<compile_context>
chip_gen: v6e
topology: v6e:2x2x1
jax: 0.10.0
libtpu: 0.0.40
codegen_flags: <defaults>
</compile_context>

<pallas_src>
import functools

import jax
import jax.numpy as jnp
from jax.experimental import pallas as pl
from jax.experimental.pallas import tpu as pltpu

NEG_SLOPE = 0.01   # nn.LeakyReLU default
GN_EPS = 1e-5      # nn.GroupNorm default
LANE = 128


def _round_up(x, m):
    return -(-x // m) * m


@functools.lru_cache(maxsize=None)
def _vmem_capacity_bytes():
    try:
        return int(pltpu.get_tpu_info().vmem_capacity_bytes)
    except Exception:
        return 64 * 1024 * 1024          # safe for every generation (v7x floor)


def _vmem_limit_bytes():
    cap = _vmem_capacity_bytes()
    # ~96 MiB on v5e/v6e (128 MiB physical), ~48 MiB on v7x (64 MiB physical)
    return min(cap, max(32 * 1024 * 1024, (cap * 3) // 4))


def _pick_rows(total, per_row_bytes, fixed_bytes, cap=4096):
    """Largest row tile that divides `total`, is a multiple of 8 (clean sublane
    tiling / unmasked stores) and fits the VMEM budget; falls back to the full
    extent (always a legal block shape)."""
    budget = int(_vmem_limit_bytes() * 0.8)
    best = None
    t = 8
    hi = min(total, cap)
    while t <= hi:
        if total % t == 0 and fixed_bytes + t * per_row_bytes <= budget:
            best = t
        t += 8
    return best if best is not None else total


# ----------------------------------------------------------------------------
# Direct (im2col-free) tap-convolution kernel, kw folded into the K dimension.
# ----------------------------------------------------------------------------
def _tapconv_kernel(*refs, n_slabs, taps_per_slab, row_stride, tm):
    """refs = (slab_0..slab_{n_slabs-1}, w_ref, b_ref, o_ref).

    Each slab is a (R, CK) bf16 view of one padded depth slice (CK = taps*C
    after the width fold); w_ref is (n_slabs*taps_per_slab, CK, Cout) bf16;
    b_ref is (1, Cout) f32; o_ref is the (tm, Cout) bf16 output tile.  The full
    tap reduction happens here in an f32 accumulator, so every output element
    is written to HBM exactly once (no K grid axis, no fat/padded writes)."""
    slabs = refs[:n_slabs]
    w_ref = refs[n_slabs]
    b_ref = refs[n_slabs + 1]
    o_ref = refs[n_slabs + 2]

    base = pl.multiple_of(pl.program_id(2) * tm, tm)
    acc = jnp.zeros((tm, o_ref.shape[-1]), jnp.float32)
    t = 0
    for s in range(n_slabs):                      # unrolled: kd / od taps
        for j in range(taps_per_slab):            # unrolled: kh / oh taps
            a = slabs[s][pl.ds(base + j * row_stride, tm), :]   # (tm, CK) bf16
            acc = acc + jnp.dot(a, w_ref[t], preferred_element_type=jnp.float32)
            t += 1
    o_ref[...] = (acc + b_ref[...]).astype(o_ref.dtype)


def _row_conv(xk, w_taps, bias, *, n_slabs, taps_per_slab, row_stride, m_rows):
    """Shared driver for conv3x3 and the fused sub-pixel ConvTranspose.

    xk: (N, Dp, R, CK) bf16 — width-folded, per-depth-slab flattened input.
    Output slab d consumes input slabs d .. d+n_slabs-1 (passed as n_slabs
    views of the same array so only those slabs are VMEM-resident); inside a
    slab the taps sit at row offsets j*row_stride.  Returns
    (N, Dp-n_slabs+1, m_rows, Cout) bf16 with zero spatial junk and no channel
    padding (the old fat-output crop is gone)."""
    N, Dp, R, CK = xk.shape
    T, ck2, Cout = w_taps.shape
    assert ck2 == CK and T == n_slabs * taps_per_slab
    D_out = Dp - (n_slabs - 1)

    ckp = _round_up(CK, LANE)
    coutp = _round_up(Cout, LANE)
    fixed = n_slabs * 2 * R * ckp * 2                    # input slabs (bf16, 2 bufs)
    fixed += 2 * T * _round_up(CK, 16) * coutp * 2       # weights (bf16, 2 bufs)
    fixed += 2 * coutp * 4                               # bias
    per_row = 2 * coutp * 2 + coutp * 4                  # out tile (2 bufs) + f32 acc
    tm = _pick_rows(m_rows, per_row, fixed)

    w = w_taps.astype(jnp.bfloat16)
    b = bias.astype(jnp.float32).reshape(1, Cout)

    in_specs = [
        pl.BlockSpec((None, None, R, CK), lambda n, d, i, s=s: (n, d + s, 0, 0))
        for s in range(n_slabs)
    ]
    in_specs += [
        pl.BlockSpec((T, CK, Cout), lambda n, d, i: (0, 0, 0)),   # grid-invariant
        pl.BlockSpec((1, Cout), lambda n, d, i: (0, 0)),
    ]

    out = pl.pallas_call(
        functools.partial(_tapconv_kernel, n_slabs=n_slabs,
                          taps_per_slab=taps_per_slab,
                          row_stride=row_stride, tm=tm),
        out_shape=jax.ShapeDtypeStruct((N, D_out, m_rows, Cout), jnp.bfloat16),
        grid=(N, D_out, m_rows // tm),
        in_specs=in_specs,
        out_specs=pl.BlockSpec((None, None, tm, Cout),
                               lambda n, d, i: (n, d, i, 0)),
        compiler_params=pltpu.CompilerParams(
            dimension_semantics=("parallel", "parallel", "parallel"),
            vmem_limit_bytes=_vmem_limit_bytes()),
    )(*([xk] * n_slabs), w, b)
    return out


def conv3x3(x, w_pt, b):
    """Conv3d(k=3, s=1, p=1) on NDHWC.  w_pt: (Cout, Cin, 3, 3, 3)."""
    N, D, H, W, C = x.shape
    Cout = w_pt.shape[0]
    xp = jnp.pad(x.astype(jnp.bfloat16),
                 ((0, 0), (1, 1), (1, 1), (1, 1), (0, 0)))
    # TODO(synk): fuse this zero-pad into the producing kernel (GroupNorm /
    # transpose conv) to save one HBM round trip per conv.
    # Fold the kw taps into the K dimension: (N, Dp, Hp, W, 3C), no W junk.
    xk = jnp.concatenate([xp[:, :, :, kw:kw + W, :] for kw in range(3)], axis=-1)
    Dp, Hp = D + 2, H + 2
    xk = xk.reshape(N, Dp, Hp * W, 3 * C)

    wm = []
    for kd in range(3):
        for kh in range(3):
            wm.append(jnp.concatenate(
                [jnp.transpose(w_pt[:, :, kd, kh, kw]) for kw in range(3)],
                axis=0))                                  # (3C, Cout)
    w_taps = jnp.stack(wm, axis=0)                        # (9, 3C, Cout)

    fat = _row_conv(xk, w_taps, b, n_slabs=3, taps_per_slab=3,
                    row_stride=W, m_rows=H * W)           # (N, D, H*W, Cout)
    return fat.reshape(N, D, H, W, Cout)


def conv_transpose3x3_s2(x, w_pt, b):
    """ConvTranspose3d(k=3, s=2, p=1, output_padding=1): spatial x2.

    x NDHWC; w_pt (Cin, Cout, 3, 3, 3) (PyTorch layout).  Single fused kernel
    over all 8 output parities (sub-pixel decomposition): parity-major output
    channels 8*Cout, so the low-res input is read once instead of 8x."""
    N, D, H, W, C = x.shape
    Cout = w_pt.shape[1]
    xp = jnp.pad(x.astype(jnp.bfloat16),
                 ((0, 0), (0, 1), (0, 1), (0, 1), (0, 0)))  # trailing zero for "i+1"
    # Fold the ow in {0,1} input offsets into the K dimension: (N, D+1, H+1, W, 2C)
    xk = jnp.concatenate([xp[:, :, :, ow:ow + W, :] for ow in range(2)], axis=-1)
    xk = xk.reshape(N, D + 1, (H + 1) * W, 2 * C)

    def k_of(parity, off):
        # per-axis sub-pixel map: even output 2m uses x[m]*w[1];
        # odd output 2m+1 uses x[m]*w[2] + x[m+1]*w[0].
        if parity == 0:
            return 1 if off == 0 else None
        return 2 if off == 0 else 0

    zero = jnp.zeros((C, Cout), w_pt.dtype)
    wm = []
    for od in range(2):
        for oh in range(2):
            cols = []
            for pd in range(2):
                for ph in range(2):
                    for pw in range(2):
                        kd, kh = k_of(pd, od), k_of(ph, oh)
                        blocks = []
                        for ow in range(2):
                            kw = k_of(pw, ow)
                            if kd is None or kh is None or kw is None:
                                blocks.append(zero)
                            else:
                                blocks.append(w_pt[:, :, kd, kh, kw])  # (Cin, Cout)
                        cols.append(jnp.concatenate(blocks, axis=0))   # (2C, Cout)
            wm.append(jnp.concatenate(cols, axis=1))                   # (2C, 8*Cout)
    w_taps = jnp.stack(wm, axis=0)                                     # (4, 2C, 8*Cout)
    b8 = jnp.tile(b, 8)

    fat = _row_conv(xk, w_taps, b8, n_slabs=2, taps_per_slab=2,
                    row_stride=W, m_rows=H * W)            # (N, D, H*W, 8*Cout) bf16

    # Depth-to-space: one bf16 shuffle of the upsampled tensor (the old stack
    # of 8 padded f32 fat arrays + 8-D transpose is gone).
    # TODO(synk): writing parity blocks straight into the interleaved output
    # needs stride-2 output blocks, which a rectangular BlockSpec can't express.
    y = fat.reshape(N, D, H, W, 2, 2, 2, Cout)
    y = jnp.transpose(y, (0, 1, 4, 2, 5, 3, 6, 7))
    return y.reshape(N, 2 * D, 2 * H, 2 * W, Cout)


# ----------------------------------------------------------------------------
# Tiled two-pass NDHWC GroupNorm (+ optional fused LeakyReLU), bf16 I/O.
# ----------------------------------------------------------------------------
def _gn_stats_kernel(x_ref, o_ref):
    x = x_ref[...].astype(jnp.float32)            # (ts, CF)
    s1 = jnp.sum(x, axis=0, keepdims=True)
    s2 = jnp.sum(x * x, axis=0, keepdims=True)

    @pl.when(pl.program_id(1) == 0)
    def _():
        o_ref[...] = jnp.zeros_like(o_ref)

    o_ref[...] += jnp.concatenate([s1, s2], axis=0)   # rows: sum, sumsq


def _gn_apply_kernel(x_ref, sc_ref, sh_ref, o_ref, *, leaky):
    x = x_ref[...].astype(jnp.float32)
    y = x * sc_ref[...] + sh_ref[...]
    if leaky:
        y = jnp.where(y >= 0, y, NEG_SLOPE * y)
    o_ref[...] = y.astype(o_ref.dtype)


def group_norm(x, gamma, beta, *, num_groups=8, leaky, eps=GN_EPS):
    """Tiled two-pass GroupNorm on NDHWC (no whole-sample blocks, no HBM
    transposes); spatial rows folded into lanes so vregs stay 128-lane dense."""
    N, D, H, W, C = x.shape
    G, Cg = num_groups, C // num_groups
    S = D * H * W
    F = 1
    if C <= LANE and LANE % C == 0 and S % (LANE // C) == 0:
        F = LANE // C
    Sf, CF = S // F, C * F
    xr = x.reshape(N, Sf, CF)

    ts = _pick_rows(Sf, 8 * _round_up(CF, LANE), 1 << 20, cap=2048)
    limit = _vmem_limit_bytes()

    # Pass 1: per-(folded-)channel sum / sumsq, accumulated over row tiles.
    stats = pl.pallas_call(
        _gn_stats_kernel,
        out_shape=jax.ShapeDtypeStruct((N, 2, CF), jnp.float32),
        grid=(N, Sf // ts),
        in_specs=[pl.BlockSpec((None, ts, CF), lambda n, i: (n, i, 0))],
        out_specs=pl.BlockSpec((None, 2, CF), lambda n, i: (n, 0, 0)),
        compiler_params=pltpu.CompilerParams(
            dimension_semantics=("parallel", "arbitrary"),
            vmem_limit_bytes=limit),
    )(xr)

    # Tiny per-(n, group) statistics math (XLA, a few KB).
    st = stats.reshape(N, 2, F, C).sum(axis=2)            # (N, 2, C)
    sg = st.reshape(N, 2, G, Cg).sum(axis=3)              # (N, 2, G)
    cnt = float(S * Cg)
    mean = sg[:, 0] / cnt
    var = jnp.maximum(sg[:, 1] / cnt - mean * mean, 0.0)
    inv = jax.lax.rsqrt(var + eps)                         # (N, G)
    scale = gamma[None, :] * jnp.repeat(inv, Cg, axis=1)   # (N, C)
    shift = beta[None, :] - jnp.repeat(mean, Cg, axis=1) * scale
    scale_f = jnp.tile(scale, (1, F)).reshape(N, 1, CF)
    shift_f = jnp.tile(shift, (1, F)).reshape(N, 1, CF)

    # Pass 2: normalize (+ LeakyReLU), bf16 out.
    y = pl.pallas_call(
        functools.partial(_gn_apply_kernel, leaky=leaky),
        out_shape=jax.ShapeDtypeStruct((N, Sf, CF), jnp.bfloat16),
        grid=(N, Sf // ts),
        in_specs=[pl.BlockSpec((None, ts, CF), lambda n, i: (n, i, 0)),
                  pl.BlockSpec((None, 1, CF), lambda n, i: (n, 0, 0)),
                  pl.BlockSpec((None, 1, CF), lambda n, i: (n, 0, 0))],
        out_specs=pl.BlockSpec((None, ts, CF), lambda n, i: (n, i, 0)),
        compiler_params=pltpu.CompilerParams(
            dimension_semantics=("parallel", "parallel"),
            vmem_limit_bytes=limit),
    )(xr, scale_f, shift_f)
    return y.reshape(N, D, H, W, C)


# ----------------------------------------------------------------------------
# Parameter init (deterministic, PyTorch weight layouts)
# ----------------------------------------------------------------------------
def _init_conv(key, cin, cout, k=3, transpose=False):
    kw, kb = jax.random.split(key)
    fan_in = cin * k ** 3
    shape = (cin, cout, k, k, k) if transpose else (cout, cin, k, k, k)
    w = jax.random.normal(kw, shape, jnp.float32) / jnp.sqrt(fan_in)
    b = 0.01 * jax.random.normal(kb, (cout,), jnp.float32)
    return {"w": w, "b": b}


def _init_gn(key, c):
    kg, kb = jax.random.split(key)
    return {
        "g": 1.0 + 0.1 * jax.random.normal(kg, (c,), jnp.float32),
        "b": 0.1 * jax.random.normal(kb, (c,), jnp.float32),
    }


def init_params(key, in_channels, out_channels):
    ks = jax.random.split(key, 7)
    return {
        "up": _init_conv(ks[0], in_channels, in_channels // 2, transpose=True),
        "conv": {
            "gn1": _init_gn(ks[1], in_channels),
            "conv1": _init_conv(ks[2], in_channels, out_channels),
            "gn2": _init_gn(ks[3], out_channels),
            "conv2": _init_conv(ks[4], out_channels, out_channels),
            "skip_conv": _init_conv(ks[5], in_channels, out_channels),
            "skip_gn": _init_gn(ks[6], out_channels),
        },
    }


# ----------------------------------------------------------------------------
# ResUp forward (mirrors the PyTorch module, trilinear=False branch)
# ----------------------------------------------------------------------------
def res_double_conv(p, x):
    y = group_norm(x, p["gn1"]["g"], p["gn1"]["b"], leaky=True)
    y = conv3x3(y, p["conv1"]["w"], p["conv1"]["b"])
    y = group_norm(y, p["gn2"]["g"], p["gn2"]["b"], leaky=True)
    y = conv3x3(y, p["conv2"]["w"], p["conv2"]["b"])
    s = conv3x3(x, p["skip_conv"]["w"], p["skip_conv"]["b"])
    s = group_norm(s, p["skip_gn"]["g"], p["skip_gn"]["b"], leaky=False)
    return y.astype(jnp.float32) + s.astype(jnp.float32)


def res_up_forward(params, x1_ncdhw, x2_ncdhw):
    # TODO(synk): trilinear=True (nn.Upsample) branch not implemented; the
    # module default (ConvTranspose3d path) is what is implemented here.
    x1 = jnp.transpose(x1_ncdhw, (0, 2, 3, 4, 1))    # NCDHW -> NDHWC
    x2 = jnp.transpose(x2_ncdhw, (0, 2, 3, 4, 1))
    x1u = conv_transpose3x3_s2(x1, params["up"]["w"], params["up"]["b"])
    # F.pad order [X, Y, Z] -> channels-last dims (W, H, D); diffs are 0 here
    dZ = x2.shape[1] - x1u.shape[1]
    dY = x2.shape[2] - x1u.shape[2]
    dX = x2.shape[3] - x1u.shape[3]
    x1u = jnp.pad(
        x1u,
        ((0, 0),
         (dZ // 2, dZ - dZ // 2),
         (dY // 2, dY - dY // 2),
         (dX // 2, dX - dX // 2),
         (0, 0)),
    )
    x = jnp.concatenate([x2.astype(jnp.bfloat16), x1u], axis=-1)  # cat(dim=1)
    out = res_double_conv(params["conv"], x)
    return jnp.transpose(out, (0, 4, 1, 2, 3)).astype(jnp.float32)


# ----------------------------------------------------------------------------
if __name__ == "__main__":
    key = jax.random.PRNGKey(0)
    k1, k2, kp = jax.random.split(key, 3)

    in_channels, out_channels = 16, 8               # channels % 8 == 0 for GN
    N = 2
    x1 = jax.random.normal(k1, (N, in_channels, 8, 8, 8), jnp.float32)
    x2 = jax.random.normal(k2, (N, in_channels // 2, 16, 16, 16), jnp.float32)
    params = init_params(kp, in_channels, out_channels)

    fwd = jax.jit(res_up_forward)
    y = fwd(params, x1, x2)
    jax.block_until_ready(y)
    assert y.shape == (N, out_channels, 16, 16, 16), y.shape
    assert bool(jnp.all(jnp.isfinite(y)))
    print("KERNEL_OK")
</pallas_src>

<mosaic_0001>
module attributes {stable_mosaic.version = 11 : i64} {
  func.func @_tapconv_kernel(%arg0: i32, %arg1: i32, %arg2: i32, %arg3: memref<1x1x72x32xbf16, #tpu.memory_space<vmem>>, %arg4: memref<1x1x72x32xbf16, #tpu.memory_space<vmem>>, %arg5: memref<4x32x64xbf16, #tpu.memory_space<vmem>>, %arg6: memref<1x64xf32, #tpu.memory_space<vmem>>, %arg7: memref<1x1x64x64xbf16, #tpu.memory_space<vmem>>) attributes {dimension_semantics = [#tpu.dimension_semantics<parallel>, #tpu.dimension_semantics<parallel>, #tpu.dimension_semantics<parallel>], iteration_bounds = array<i64: 2, 8, 1>, scalar_prefetch = 0 : i64, scratch_operands = 0 : i64, tpu.core_type = #tpu.core_type<tc>, window_params = [{transform_indices = @transform_0, window_bounds = array<i64: 1, 1, 72, 32>}, {transform_indices = @transform_1, window_bounds = array<i64: 1, 1, 72, 32>}, {pipeline_mode = #tpu.pipeline_mode<synchronous>, transform_indices = @transform_2, window_bounds = array<i64: 4, 32, 64>}, {pipeline_mode = #tpu.pipeline_mode<synchronous>, transform_indices = @transform_3, window_bounds = array<i64: 1, 64>}, {transform_indices = @transform_4, window_bounds = array<i64: 1, 1, 64, 64>}]} {
    %c64_i32 = arith.constant 64 : i32
    %0 = arith.muli %arg2, %c64_i32 : i32
    %1 = tpu.assume_multiple %0, 64 : i32
    %cst = arith.constant 0.000000e+00 : f32
    %2 = vector.broadcast %cst : f32 to vector<64x64xf32>
    %c0_i32 = arith.constant 0 : i32
    %3 = arith.addi %1, %c0_i32 : i32
    %c0 = arith.constant 0 : index
    %c0_0 = arith.constant 0 : index
    %4 = arith.index_cast %3 : i32 to index
    %c0_1 = arith.constant 0 : index
    %5 = vector.load %arg3[%c0, %c0_0, %4, %c0_1] : memref<1x1x72x32xbf16, #tpu.memory_space<vmem>>, vector<1x1x64x32xbf16>
    %6 = vector.shape_cast %5 : vector<1x1x64x32xbf16> to vector<64x32xbf16>
    %c0_2 = arith.constant 0 : index
    %c0_3 = arith.constant 0 : index
    %c0_4 = arith.constant 0 : index
    %7 = vector.load %arg5[%c0_2, %c0_3, %c0_4] : memref<4x32x64xbf16, #tpu.memory_space<vmem>>, vector<1x32x64xbf16>
    %8 = vector.shape_cast %7 : vector<1x32x64xbf16> to vector<32x64xbf16>
    %cst_5 = arith.constant dense<0.000000e+00> : vector<64x64xf32>
    %9 = tpu.matmul %6, %8, %cst_5 {dimension_numbers = #tpu.dot_dimension_numbers<[1], [0], [0], [1], [0, 0, 1, 1], [], []>} : vector<64x32xbf16>, vector<32x64xbf16>, vector<64x64xf32> -> vector<64x64xf32>
    %10 = arith.addf %2, %9 : vector<64x64xf32>
    %c8_i32 = arith.constant 8 : i32
    %11 = arith.addi %1, %c8_i32 : i32
    %c0_6 = arith.constant 0 : index
    %c0_7 = arith.constant 0 : index
    %12 = arith.index_cast %11 : i32 to index
    %c0_8 = arith.constant 0 : index
    %13 = vector.load %arg3[%c0_6, %c0_7, %12, %c0_8] : memref<1x1x72x32xbf16, #tpu.memory_space<vmem>>, vector<1x1x64x32xbf16>
    %14 = vector.shape_cast %13 : vector<1x1x64x32xbf16> to vector<64x32xbf16>
    %c1 = arith.constant 1 : index
    %c0_9 = arith.constant 0 : index
    %c0_10 = arith.constant 0 : index
    %15 = vector.load %arg5[%c1, %c0_9, %c0_10] : memref<4x32x64xbf16, #tpu.memory_space<vmem>>, vector<1x32x64xbf16>
    %16 = vector.shape_cast %15 : vector<1x32x64xbf16> to vector<32x64xbf16>
    %cst_11 = arith.constant dense<0.000000e+00> : vector<64x64xf32>
    %17 = tpu.matmul %14, %16, %cst_11 {dimension_numbers = #tpu.dot_dimension_numbers<[1], [0], [0], [1], [0, 0, 1, 1], [], []>} : vector<64x32xbf16>, vector<32x64xbf16>, vector<64x64xf32> -> vector<64x64xf32>
    %18 = arith.addf %10, %17 : vector<64x64xf32>
    %c0_i32_12 = arith.constant 0 : i32
    %19 = arith.addi %1, %c0_i32_12 : i32
    %c0_13 = arith.constant 0 : index
    %c0_14 = arith.constant 0 : index
    %20 = arith.index_cast %19 : i32 to index
    %c0_15 = arith.constant 0 : index
    %21 = vector.load %arg4[%c0_13, %c0_14, %20, %c0_15] : memref<1x1x72x32xbf16, #tpu.memory_space<vmem>>, vector<1x1x64x32xbf16>
    %22 = vector.shape_cast %21 : vector<1x1x64x32xbf16> to vector<64x32xbf16>
    %c2 = arith.constant 2 : index
    %c0_16 = arith.constant 0 : index
    %c0_17 = arith.constant 0 : index
    %23 = vector.load %arg5[%c2, %c0_16, %c0_17] : memref<4x32x64xbf16, #tpu.memory_space<vmem>>, vector<1x32x64xbf16>
    %24 = vector.shape_cast %23 : vector<1x32x64xbf16> to vector<32x64xbf16>
    %cst_18 = arith.constant dense<0.000000e+00> : vector<64x64xf32>
    %25 = tpu.matmul %22, %24, %cst_18 {dimension_numbers = #tpu.dot_dimension_numbers<[1], [0], [0], [1], [0, 0, 1, 1], [], []>} : vector<64x32xbf16>, vector<32x64xbf16>, vector<64x64xf32> -> vector<64x64xf32>
    %26 = arith.addf %18, %25 : vector<64x64xf32>
    %c8_i32_19 = arith.constant 8 : i32
    %27 = arith.addi %1, %c8_i32_19 : i32
    %c0_20 = arith.constant 0 : index
    %c0_21 = arith.constant 0 : index
    %28 = arith.index_cast %27 : i32 to index
    %c0_22 = arith.constant 0 : index
    %29 = vector.load %arg4[%c0_20, %c0_21, %28, %c0_22] : memref<1x1x72x32xbf16, #tpu.memory_space<vmem>>, vector<1x1x64x32xbf16>
    %30 = vector.shape_cast %29 : vector<1x1x64x32xbf16> to vector<64x32xbf16>
    %c3 = arith.constant 3 : index
    %c0_23 = arith.constant 0 : index
    %c0_24 = arith.constant 0 : index
    %31 = vector.load %arg5[%c3, %c0_23, %c0_24] : memref<4x32x64xbf16, #tpu.memory_space<vmem>>, vector<1x32x64xbf16>
    %32 = vector.shape_cast %31 : vector<1x32x64xbf16> to vector<32x64xbf16>
    %cst_25 = arith.constant dense<0.000000e+00> : vector<64x64xf32>
    %33 = tpu.matmul %30, %32, %cst_25 {dimension_numbers = #tpu.dot_dimension_numbers<[1], [0], [0], [1], [0, 0, 1, 1], [], []>} : vector<64x32xbf16>, vector<32x64xbf16>, vector<64x64xf32> -> vector<64x64xf32>
    %34 = arith.addf %26, %33 : vector<64x64xf32>
    %c0_26 = arith.constant 0 : index
    %c0_27 = arith.constant 0 : index
    %35 = vector.load %arg6[%c0_26, %c0_27] : memref<1x64xf32, #tpu.memory_space<vmem>>, vector<1x64xf32>
    %36 = vector.broadcast %35 : vector<1x64xf32> to vector<64x64xf32>
    %37 = arith.addf %34, %36 : vector<64x64xf32>
    %38 = arith.truncf %37 : vector<64x64xf32> to vector<64x64xbf16>
    %c0_28 = arith.constant 0 : index
    %c0_29 = arith.constant 0 : index
    %c0_30 = arith.constant 0 : index
    %c0_31 = arith.constant 0 : index
    %39 = vector.load %arg7[%c0_28, %c0_29, %c0_30, %c0_31] : memref<1x1x64x64xbf16, #tpu.memory_space<vmem>>, vector<1x1x64x64xbf16>
    %40 = vector.shape_cast %39 : vector<1x1x64x64xbf16> to vector<64x64xbf16>
    %41 = vector.shape_cast %38 : vector<64x64xbf16> to vector<1x1x64x64xbf16>
    tpu.vector_store %arg7[%c0_28, %c0_29, %c0_30, %c0_31], %41 {strides = array<i32>} : memref<1x1x64x64xbf16, #tpu.memory_space<vmem>>, vector<1x1x64x64xbf16>,
    return
  }
  func.func @transform_0(%arg0: i32, %arg1: i32, %arg2: i32) -> (i32, i32, i32, i32) {
    %c0_i32 = arith.constant 0 : i32
    %0 = arith.addi %arg1, %c0_i32 : i32
    %c0_i32_0 = arith.constant 0 : i32
    %c0_i32_1 = arith.constant 0 : i32
    %c0_i32_2 = arith.constant 0 : i32
    return %arg0, %0, %c0_i32_0, %c0_i32_1 : i32, i32, i32, i32
  }
  func.func @transform_1(%arg0: i32, %arg1: i32, %arg2: i32) -> (i32, i32, i32, i32) {
    %c1_i32 = arith.constant 1 : i32
    %0 = arith.addi %arg1, %c1_i32 : i32
    %c0_i32 = arith.constant 0 : i32
    %c0_i32_0 = arith.constant 0 : i32
    %c0_i32_1 = arith.constant 0 : i32
    return %arg0, %0, %c0_i32, %c0_i32_0 : i32, i32, i32, i32
  }
  func.func @transform_2(%arg0: i32, %arg1: i32, %arg2: i32) -> (i32, i32, i32) {
    %c0_i32 = arith.constant 0 : i32
    %c0_i32_0 = arith.constant 0 : i32
    %c0_i32_1 = arith.constant 0 : i32
    %c0_i32_2 = arith.constant 0 : i32
    return %c0_i32, %c0_i32_0, %c0_i32_1 : i32, i32, i32
  }
  func.func @transform_3(%arg0: i32, %arg1: i32, %arg2: i32) -> (i32, i32) {
    %c0_i32 = arith.constant 0 : i32
    %c0_i32_0 = arith.constant 0 : i32
    %c0_i32_1 = arith.constant 0 : i32
    return %c0_i32, %c0_i32_0 : i32, i32
  }
  func.func @transform_4(%arg0: i32, %arg1: i32, %arg2: i32) -> (i32, i32, i32, i32) {
    %c0_i32 = arith.constant 0 : i32
    %c0_i32_0 = arith.constant 0 : i32
    return %arg0, %arg1, %arg2, %c0_i32 : i32, i32, i32, i32
  }
}

module attributes {stable_mosaic.version = 11 : i64} {
  func.func @_tapconv_kernel(%arg0: i32, %arg1: i32, %arg2: i32, %arg3: memref<1x1x288x48xbf16, #tpu.memory_space<vmem>>, %arg4: memref<1x1x288x48xbf16, #tpu.memory_space<vmem>>, %arg5: memref<1x1x288x48xbf16, #tpu.memory_space<vmem>>, %arg6: memref<9x48x8xbf16, #tpu.memory_space<vmem>>, %arg7: memref<1x8xf32, #tpu.memory_space<vmem>>, %arg8: memref<1x1x256x8xbf16, #tpu.memory_space<vmem>>) attributes {dimension_semantics = [#tpu.dimension_semantics<parallel>, #tpu.dimension_semantics<parallel>, #tpu.dimension_semantics<parallel>], iteration_bounds = array<i64: 2, 16, 1>, scalar_prefetch = 0 : i64, scratch_operands = 0 : i64, tpu.core_type = #tpu.core_type<tc>, window_params = [{transform_indices = @transform_0, window_bounds = array<i64: 1, 1, 288, 48>}, {transform_indices = @transform_1, window_bounds = array<i64: 1, 1, 288, 48>}, {transform_indices = @transform_2, window_bounds = array<i64: 1, 1, 288, 48>}, {pipeline_mode = #tpu.pipeline_mode<synchronous>, transform_indices = @transform_3, window_bounds = array<i64: 9, 48, 8>}, {pipeline_mode = #tpu.pipeline_mode<synchronous>, transform_indices = @transform_4, window_bounds = array<i64: 1, 8>}, {transform_indices = @transform_5, window_bounds = array<i64: 1, 1, 256, 8>}]} {
    %c256_i32 = arith.constant 256 : i32
    %0 = arith.muli %arg2, %c256_i32 : i32
    %1 = tpu.assume_multiple %0, 256 : i32
    %cst = arith.constant 0.000000e+00 : f32
    %2 = vector.broadcast %cst : f32 to vector<256x8xf32>
    %c0_i32 = arith.constant 0 : i32
    %3 = arith.addi %1, %c0_i32 : i32
    %c0 = arith.constant 0 : index
    %c0_0 = arith.constant 0 : index
    %4 = arith.index_cast %3 : i32 to index
    %c0_1 = arith.constant 0 : index
    %5 = vector.load %arg3[%c0, %c0_0, %4, %c0_1] : memref<1x1x288x48xbf16, #tpu.memory_space<vmem>>, vector<1x1x256x48xbf16>
    %6 = vector.shape_cast %5 : vector<1x1x256x48xbf16> to vector<256x48xbf16>
    %c0_2 = arith.constant 0 : index
    %c0_3 = arith.constant 0 : index
    %c0_4 = arith.constant 0 : index
    %7 = vector.load %arg6[%c0_2, %c0_3, %c0_4] : memref<9x48x8xbf16, #tpu.memory_space<vmem>>, vector<1x48x8xbf16>
    %8 = vector.shape_cast %7 : vector<1x48x8xbf16> to vector<48x8xbf16>
    %cst_5 = arith.constant dense<0.000000e+00> : vector<256x8xf32>
    %9 = tpu.matmul %6, %8, %cst_5 {dimension_numbers = #tpu.dot_dimension_numbers<[1], [0], [0], [1], [0, 0, 1, 1], [], []>} : vector<256x48xbf16>, vector<48x8xbf16>, vector<256x8xf32> -> vector<256x8xf32>
    %10 = arith.addf %2, %9 : vector<256x8xf32>
    %c16_i32 = arith.constant 16 : i32
    %11 = arith.addi %1, %c16_i32 : i32
    %c0_6 = arith.constant 0 : index
    %c0_7 = arith.constant 0 : index
    %12 = arith.index_cast %11 : i32 to index
    %c0_8 = arith.constant 0 : index
    %13 = vector.load %arg3[%c0_6, %c0_7, %12, %c0_8] : memref<1x1x288x48xbf16, #tpu.memory_space<vmem>>, vector<1x1x256x48xbf16>
    %14 = vector.shape_cast %13 : vector<1x1x256x48xbf16> to vector<256x48xbf16>
    %c1 = arith.constant 1 : index
    %c0_9 = arith.constant 0 : index
    %c0_10 = arith.constant 0 : index
    %15 = vector.load %arg6[%c1, %c0_9, %c0_10] : memref<9x48x8xbf16, #tpu.memory_space<vmem>>, vector<1x48x8xbf16>
    %16 = vector.shape_cast %15 : vector<1x48x8xbf16> to vector<48x8xbf16>
    %cst_11 = arith.constant dense<0.000000e+00> : vector<256x8xf32>
    %17 = tpu.matmul %14, %16, %cst_11 {dimension_numbers = #tpu.dot_dimension_numbers<[1], [0], [0], [1], [0, 0, 1, 1], [], []>} : vector<256x48xbf16>, vector<48x8xbf16>, vector<256x8xf32> -> vector<256x8xf32>
    %18 = arith.addf %10, %17 : vector<256x8xf32>
    %c32_i32 = arith.constant 32 : i32
    %19 = arith.addi %1, %c32_i32 : i32
    %c0_12 = arith.constant 0 : index
    %c0_13 = arith.constant 0 : index
    %20 = arith.index_cast %19 : i32 to index
    %c0_14 = arith.constant 0 : index
    %21 = vector.load %arg3[%c0_12, %c0_13, %20, %c0_14] : memref<1x1x288x48xbf16, #tpu.memory_space<vmem>>, vector<1x1x256x48xbf16>
    %22 = vector.shape_cast %21 : vector<1x1x256x48xbf16> to vector<256x48xbf16>
    %c2 = arith.constant 2 : index
    %c0_15 = arith.constant 0 : index
    %c0_16 = arith.constant 0 : index
    %23 = vector.load %arg6[%c2, %c0_15, %c0_16] : memref<9x48x8xbf16, #tpu.memory_space<vmem>>, vector<1x48x8xbf16>
    %24 = vector.shape_cast %23 : vector<1x48x8xbf16> to vector<48x8xbf16>
    %cst_17 = arith.constant dense<0.000000e+00> : vector<256x8xf32>
    %25 = tpu.matmul %22, %24, %cst_17 {dimension_numbers = #tpu.dot_dimension_numbers<[1], [0], [0], [1], [0, 0, 1, 1], [], []>} : vector<256x48xbf16>, vector<48x8xbf16>, vector<256x8xf32> -> vector<256x8xf32>
    %26 = arith.addf %18, %25 : vector<256x8xf32>
    %c0_i32_18 = arith.constant 0 : i32
    %27 = arith.addi %1, %c0_i32_18 : i32
    %c0_19 = arith.constant 0 : index
    %c0_20 = arith.constant 0 : index
    %28 = arith.index_cast %27 : i32 to index
    %c0_21 = arith.constant 0 : index
    %29 = vector.load %arg4[%c0_19, %c0_20, %28, %c0_21] : memref<1x1x288x48xbf16, #tpu.memory_space<vmem>>, vector<1x1x256x48xbf16>
    %30 = vector.shape_cast %29 : vector<1x1x256x48xbf16> to vector<256x48xbf16>
    %c3 = arith.constant 3 : index
    %c0_22 = arith.constant 0 : index
    %c0_23 = arith.constant 0 : index
    %31 = vector.load %arg6[%c3, %c0_22, %c0_23] : memref<9x48x8xbf16, #tpu.memory_space<vmem>>, vector<1x48x8xbf16>
    %32 = vector.shape_cast %31 : vector<1x48x8xbf16> to vector<48x8xbf16>
    %cst_24 = arith.constant dense<0.000000e+00> : vector<256x8xf32>
    %33 = tpu.matmul %30, %32, %cst_24 {dimension_numbers = #tpu.dot_dimension_numbers<[1], [0], [0], [1], [0, 0, 1, 1], [], []>} : vector<256x48xbf16>, vector<48x8xbf16>, vector<256x8xf32> -> vector<256x8xf32>
    %34 = arith.addf %26, %33 : vector<256x8xf32>
    %c16_i32_25 = arith.constant 16 : i32
    %35 = arith.addi %1, %c16_i32_25 : i32
    %c0_26 = arith.constant 0 : index
    %c0_27 = arith.constant 0 : index
    %36 = arith.index_cast %35 : i32 to index
    %c0_28 = arith.constant 0 : index
    %37 = vector.load %arg4[%c0_26, %c0_27, %36, %c0_28] : memref<1x1x288x48xbf16, #tpu.memory_space<vmem>>, vector<1x1x256x48xbf16>
    %38 = vector.shape_cast %37 : vector<1x1x256x48xbf16> to vector<256x48xbf16>
    %c4 = arith.constant 4 : index
    %c0_29 = arith.constant 0 : index
    %c0_30 = arith.constant 0 : index
    %39 = vector.load %arg6[%c4, %c0_29, %c0_30] : memref<9x48x8xbf16, #tpu.memory_space<vmem>>, vector<1x48x8xbf16>
    %40 = vector.shape_cast %39 : vector<1x48x8xbf16> to vector<48x8xbf16>
    %cst_31 = arith.constant dense<0.000000e+00> : vector<256x8xf32>
    %41 = tpu.matmul %38, %40, %cst_31 {dimension_numbers = #tpu.dot_dimension_numbers<[1], [0], [0], [1], [0, 0, 1, 1], [], []>} : vector<256x48xbf16>, vector<48x8xbf16>, vector<256x8xf32> -> vector<256x8xf32>
    %42 = arith.addf %34, %41 : vector<256x8xf32>
    %c32_i32_32 = arith.constant 32 : i32
    %43 = arith.addi %1, %c32_i32_32 : i32
    %c0_33 = arith.constant 0 : index
    %c0_34 = arith.constant 0 : index
    %44 = arith.index_cast %43 : i32 to index
    %c0_35 = arith.constant 0 : index
    %45 = vector.load %arg4[%c0_33, %c0_34, %44, %c0_35] : memref<1x1x288x48xbf16, #tpu.memory_space<vmem>>, vector<1x1x256x48xbf16>
    %46 = vector.shape_cast %45 : vector<1x1x256x48xbf16> to vector<256x48xbf16>
    %c5 = arith.constant 5 : index
    %c0_36 = arith.constant 0 : index
    %c0_37 = arith.constant 0 : index
    %47 = vector.load %arg6[%c5, %c0_36, %c0_37] : memref<9x48x8xbf16, #tpu.memory_space<vmem>>, vector<1x48x8xbf16>
    %48 = vector.shape_cast %47 : vector<1x48x8xbf16> to vector<48x8xbf16>
    %cst_38 = arith.constant dense<0.000000e+00> : vector<256x8xf32>
    %49 = tpu.matmul %46, %48, %cst_38 {dimension_numbers = #tpu.dot_dimension_numbers<[1], [0], [0], [1], [0, 0, 1, 1], [], []>} : vector<256x48xbf16>, vector<48x8xbf16>, vector<256x8xf32> -> vector<256x8xf32>
    %50 = arith.addf %42, %49 : vector<256x8xf32>
    %c0_i32_39 = arith.constant 0 : i32
    %51 = arith.addi %1, %c0_i32_39 : i32
    %c0_40 = arith.constant 0 : index
    %c0_41 = arith.constant 0 : index
    %52 = arith.index_cast %51 : i32 to index
    %c0_42 = arith.constant 0 : index
    %53 = vector.load %arg5[%c0_40, %c0_41, %52, %c0_42] : memref<1x1x288x48xbf16, #tpu.memory_space<vmem>>, vector<1x1x256x48xbf16>
    %54 = vector.shape_cast %53 : vector<1x1x256x48xbf16> to vector<256x48xbf16>
    %c6 = arith.constant 6 : index
    %c0_43 = arith.constant 0 : index
    %c0_44 = arith.constant 0 : index
    %55 = vector.load %arg6[%c6, %c0_43, %c0_44] : memref<9x48x8xbf16, #tpu.memory_space<vmem>>, vector<1x48x8xbf16>
    %56 = vector.shape_cast %55 : vector<1x48x8xbf16> to vector<48x8xbf16>
    %cst_45 = arith.constant dense<0.000000e+00> : vector<256x8xf32>
    %57 = tpu.matmul %54, %56, %cst_45 {dimension_numbers = #tpu.dot_dimension_numbers<[1], [0], [0], [1], [0, 0, 1, 1], [], []>} : vector<256x48xbf16>, vector<48x8xbf16>, vector<256x8xf32> -> vector<256x8xf32>
    %58 = arith.addf %50, %57 : vector<256x8xf32>
    %c16_i32_46 = arith.constant 16 : i32
    %59 = arith.addi %1, %c16_i32_46 : i32
    %c0_47 = arith.constant 0 : index
    %c0_48 = arith.constant 0 : index
    %60 = arith.index_cast %59 : i32 to index
    %c0_49 = arith.constant 0 : index
    %61 = vector.load %arg5[%c0_47, %c0_48, %60, %c0_49] : memref<1x1x288x48xbf16, #tpu.memory_space<vmem>>, vector<1x1x256x48xbf16>
    %62 = vector.shape_cast %61 : vector<1x1x256x48xbf16> to vector<256x48xbf16>
    %c7 = arith.constant 7 : index
    %c0_50 = arith.constant 0 : index
    %c0_51 = arith.constant 0 : index
    %63 = vector.load %arg6[%c7, %c0_50, %c0_51] : memref<9x48x8xbf16, #tpu.memory_space<vmem>>, vector<1x48x8xbf16>
    %64 = vector.shape_cast %63 : vector<1x48x8xbf16> to vector<48x8xbf16>
    %cst_52 = arith.constant dense<0.000000e+00> : vector<256x8xf32>
    %65 = tpu.matmul %62, %64, %cst_52 {dimension_numbers = #tpu.dot_dimension_numbers<[1], [0], [0], [1], [0, 0, 1, 1], [], []>} : vector<256x48xbf16>, vector<48x8xbf16>, vector<256x8xf32> -> vector<256x8xf32>
    %66 = arith.addf %58, %65 : vector<256x8xf32>
    %c32_i32_53 = arith.constant 32 : i32
    %67 = arith.addi %1, %c32_i32_53 : i32
    %c0_54 = arith.constant 0 : index
    %c0_55 = arith.constant 0 : index
    %68 = arith.index_cast %67 : i32 to index
    %c0_56 = arith.constant 0 : index
    %69 = vector.load %arg5[%c0_54, %c0_55, %68, %c0_56] : memref<1x1x288x48xbf16, #tpu.memory_space<vmem>>, vector<1x1x256x48xbf16>
    %70 = vector.shape_cast %69 : vector<1x1x256x48xbf16> to vector<256x48xbf16>
    %c8 = arith.constant 8 : index
    %c0_57 = arith.constant 0 : index
    %c0_58 = arith.constant 0 : index
    %71 = vector.load %arg6[%c8, %c0_57, %c0_58] : memref<9x48x8xbf16, #tpu.memory_space<vmem>>, vector<1x48x8xbf16>
    %72 = vector.shape_cast %71 : vector<1x48x8xbf16> to vector<48x8xbf16>
    %cst_59 = arith.constant dense<0.000000e+00> : vector<256x8xf32>
    %73 = tpu.matmul %70, %72, %cst_59 {dimension_numbers = #tpu.dot_dimension_numbers<[1], [0], [0], [1], [0, 0, 1, 1], [], []>} : vector<256x48xbf16>, vector<48x8xbf16>, vector<256x8xf32> -> vector<256x8xf32>
    %74 = arith.addf %66, %73 : vector<256x8xf32>
    %c0_60 = arith.constant 0 : index
    %c0_61 = arith.constant 0 : index
    %75 = vector.load %arg7[%c0_60, %c0_61] : memref<1x8xf32, #tpu.memory_space<vmem>>, vector<1x8xf32>
    %76 = vector.broadcast %75 : vector<1x8xf32> to vector<256x8xf32>
    %77 = arith.addf %74, %76 : vector<256x8xf32>
    %78 = arith.truncf %77 : vector<256x8xf32> to vector<256x8xbf16>
    %c0_62 = arith.constant 0 : index
    %c0_63 = arith.constant 0 : index
    %c0_64 = arith.constant 0 : index
    %c0_65 = arith.constant 0 : index
    %79 = vector.load %arg8[%c0_62, %c0_63, %c0_64, %c0_65] : memref<1x1x256x8xbf16, #tpu.memory_space<vmem>>, vector<1x1x256x8xbf16>
    %80 = vector.shape_cast %79 : vector<1x1x256x8xbf16> to vector<256x8xbf16>
    %81 = vector.shape_cast %78 : vector<256x8xbf16> to vector<1x1x256x8xbf16>
    tpu.vector_store %arg8[%c0_62, %c0_63, %c0_64, %c0_65], %81 {strides = array<i32>} : memref<1x1x256x8xbf16, #tpu.memory_space<vmem>>, vector<1x1x256x8xbf16>,
    return
  }
  func.func @transform_0(%arg0: i32, %arg1: i32, %arg2: i32) -> (i32, i32, i32, i32) {
    %c0_i32 = arith.constant 0 : i32
    %0 = arith.addi %arg1, %c0_i32 : i32
    %c0_i32_0 = arith.constant 0 : i32
    %c0_i32_1 = arith.constant 0 : i32
    %c0_i32_2 = arith.constant 0 : i32
    return %arg0, %0, %c0_i32_0, %c0_i32_1 : i32, i32, i32, i32
  }
  func.func @transform_1(%arg0: i32, %arg1: i32, %arg2: i32) -> (i32, i32, i32, i32) {
    %c1_i32 = arith.constant 1 : i32
    %0 = arith.addi %arg1, %c1_i32 : i32
    %c0_i32 = arith.constant 0 : i32
    %c0_i32_0 = arith.constant 0 : i32
    %c0_i32_1 = arith.constant 0 : i32
    return %arg0, %0, %c0_i32, %c0_i32_0 : i32, i32, i32, i32
  }
  func.func @transform_2(%arg0: i32, %arg1: i32, %arg2: i32) -> (i32, i32, i32, i32) {
    %c2_i32 = arith.constant 2 : i32
    %0 = arith.addi %arg1, %c2_i32 : i32
    %c0_i32 = arith.constant 0 : i32
    %c0_i32_0 = arith.constant 0 : i32
    %c0_i32_1 = arith.constant 0 : i32
    return %arg0, %0, %c0_i32, %c0_i32_0 : i32, i32, i32, i32
  }
  func.func @transform_3(%arg0: i32, %arg1: i32, %arg2: i32) -> (i32, i32, i32) {
    %c0_i32 = arith.constant 0 : i32
    %c0_i32_0 = arith.constant 0 : i32
    %c0_i32_1 = arith.constant 0 : i32
    %c0_i32_2 = arith.constant 0 : i32
    return %c0_i32, %c0_i32_0, %c0_i32_1 : i32, i32, i32
  }
  func.func @transform_4(%arg0: i32, %arg1: i32, %arg2: i32) -> (i32, i32) {
    %c0_i32 = arith.constant 0 : i32
    %c0_i32_0 = arith.constant 0 : i32
    %c0_i32_1 = arith.constant 0 : i32
    return %c0_i32, %c0_i32_0 : i32, i32
  }
  func.func @transform_5(%arg0: i32, %arg1: i32, %arg2: i32) -> (i32, i32, i32, i32) {
    %c0_i32 = arith.constant 0 : i32
    %c0_i32_0 = arith.constant 0 : i32
    return %arg0, %arg1, %arg2, %c0_i32 : i32, i32, i32, i32
  }
}

module attributes {stable_mosaic.version = 11 : i64} {
  func.func @_gn_stats_kernel(%arg0: i32, %arg1: i32, %arg2: memref<1x256x128xbf16, #tpu.memory_space<vmem>>, %arg3: memref<1x2x128xf32, #tpu.memory_space<vmem>>) attributes {dimension_semantics = [#tpu.dimension_semantics<parallel>, #tpu.dimension_semantics<arbitrary>], iteration_bounds = array<i64: 2, 1>, scalar_prefetch = 0 : i64, scratch_operands = 0 : i64, tpu.core_type = #tpu.core_type<tc>, window_params = [{transform_indices = @transform_0, window_bounds = array<i64: 1, 256, 128>}, {transform_indices = @transform_1, window_bounds = array<i64: 1, 2, 128>}]} {
    %c0 = arith.constant 0 : index
    %c0_0 = arith.constant 0 : index
    %c0_1 = arith.constant 0 : index
    %0 = vector.load %arg2[%c0, %c0_0, %c0_1] : memref<1x256x128xbf16, #tpu.memory_space<vmem>>, vector<1x256x128xbf16>
    %1 = vector.shape_cast %0 : vector<1x256x128xbf16> to vector<256x128xbf16>
    %2 = arith.extf %1 : vector<256x128xbf16> to vector<256x128xf32>
    %cst = arith.constant dense<0.000000e+00> : vector<128xf32>
    %3 = vector.multi_reduction <add>, %2, %cst [0] : vector<256x128xf32> to vector<128xf32>
    %4 = vector.shape_cast %3 : vector<128xf32> to vector<1x128xf32>
    %5 = arith.mulf %2, %2 : vector<256x128xf32>
    %cst_2 = arith.constant dense<0.000000e+00> : vector<128xf32>
    %6 = vector.multi_reduction <add>, %5, %cst_2 [0] : vector<256x128xf32> to vector<128xf32>
    %7 = vector.shape_cast %6 : vector<128xf32> to vector<1x128xf32>
    %c0_i32 = arith.constant 0 : i32
    %8 = arith.cmpi eq, %arg1, %c0_i32 : i32
    %9 = arith.extui %8 : i1 to i32
    %c0_i32_3 = arith.constant 0 : i32
    %10 = arith.cmpi ne, %9, %c0_i32_3 : i32
    scf.if %10 {
      %cst_10 = arith.constant 0.000000e+00 : f32
      %18 = vector.broadcast %cst_10 : f32 to vector<2x128xf32>
      %c0_11 = arith.constant 0 : index
      %c0_12 = arith.constant 0 : index
      %c0_13 = arith.constant 0 : index
      %19 = vector.load %arg3[%c0_11, %c0_12, %c0_13] : memref<1x2x128xf32, #tpu.memory_space<vmem>>, vector<1x2x128xf32>
      %20 = vector.shape_cast %19 : vector<1x2x128xf32> to vector<2x128xf32>
      %21 = vector.shape_cast %18 : vector<2x128xf32> to vector<1x2x128xf32>
      tpu.vector_store %arg3[%c0_11, %c0_12, %c0_13], %21 {strides = array<i32>} : memref<1x2x128xf32, #tpu.memory_space<vmem>>, vector<1x2x128xf32>,
    } else {
    }
    %c0_4 = arith.constant 0 : index
    %c0_5 = arith.constant 0 : index
    %c0_6 = arith.constant 0 : index
    %11 = vector.load %arg3[%c0_4, %c0_5, %c0_6] : memref<1x2x128xf32, #tpu.memory_space<vmem>>, vector<1x2x128xf32>
    %12 = vector.shape_cast %11 : vector<1x2x128xf32> to vector<2x128xf32>
    %13 = tpu.concatenate %4, %7 in 0 : vector<1x128xf32>, vector<1x128xf32> -> vector<2x128xf32>
    %14 = arith.addf %12, %13 : vector<2x128xf32>
    %c0_7 = arith.constant 0 : index
    %c0_8 = arith.constant 0 : index
    %c0_9 = arith.constant 0 : index
    %15 = vector.load %arg3[%c0_7, %c0_8, %c0_9] : memref<1x2x128xf32, #tpu.memory_space<vmem>>, vector<1x2x128xf32>
    %16 = vector.shape_cast %15 : vector<1x2x128xf32> to vector<2x128xf32>
    %17 = vector.shape_cast %14 : vector<2x128xf32> to vector<1x2x128xf32>
    tpu.vector_store %arg3[%c0_7, %c0_8, %c0_9], %17 {strides = array<i32>} : memref<1x2x128xf32, #tpu.memory_space<vmem>>, vector<1x2x128xf32>,
    return
  }
  func.func @transform_0(%arg0: i32, %arg1: i32) -> (i32, i32, i32) {
    %c0_i32 = arith.constant 0 : i32
    %c0_i32_0 = arith.constant 0 : i32
    return %arg0, %arg1, %c0_i32 : i32, i32, i32
  }
  func.func @transform_1(%arg0: i32, %arg1: i32) -> (i32, i32, i32) {
    %c0_i32 = arith.constant 0 : i32
    %c0_i32_0 = arith.constant 0 : i32
    %c0_i32_1 = arith.constant 0 : i32
    return %arg0, %c0_i32, %c0_i32_0 : i32, i32, i32
  }
}

module attributes {stable_mosaic.version = 11 : i64} {
  func.func @_gn_apply_kernel(%arg0: i32, %arg1: i32, %arg2: memref<1x256x128xbf16, #tpu.memory_space<vmem>>, %arg3: memref<1x1x128xf32, #tpu.memory_space<vmem>>, %arg4: memref<1x1x128xf32, #tpu.memory_space<vmem>>, %arg5: memref<1x256x128xbf16, #tpu.memory_space<vmem>>) attributes {dimension_semantics = [#tpu.dimension_semantics<parallel>, #tpu.dimension_semantics<parallel>], iteration_bounds = array<i64: 2, 1>, scalar_prefetch = 0 : i64, scratch_operands = 0 : i64, tpu.core_type = #tpu.core_type<tc>, window_params = [{transform_indices = @transform_0, window_bounds = array<i64: 1, 256, 128>}, {transform_indices = @transform_1, window_bounds = array<i64: 1, 1, 128>}, {transform_indices = @transform_2, window_bounds = array<i64: 1, 1, 128>}, {transform_indices = @transform_3, window_bounds = array<i64: 1, 256, 128>}]} {
    %c0 = arith.constant 0 : index
    %c0_0 = arith.constant 0 : index
    %c0_1 = arith.constant 0 : index
    %0 = vector.load %arg2[%c0, %c0_0, %c0_1] : memref<1x256x128xbf16, #tpu.memory_space<vmem>>, vector<1x256x128xbf16>
    %1 = vector.shape_cast %0 : vector<1x256x128xbf16> to vector<256x128xbf16>
    %2 = arith.extf %1 : vector<256x128xbf16> to vector<256x128xf32>
    %c0_2 = arith.constant 0 : index
    %c0_3 = arith.constant 0 : index
    %c0_4 = arith.constant 0 : index
    %3 = vector.load %arg3[%c0_2, %c0_3, %c0_4] : memref<1x1x128xf32, #tpu.memory_space<vmem>>, vector<1x1x128xf32>
    %4 = vector.shape_cast %3 : vector<1x1x128xf32> to vector<1x128xf32>
    %5 = vector.broadcast %4 : vector<1x128xf32> to vector<256x128xf32>
    %6 = arith.mulf %2, %5 : vector<256x128xf32>
    %c0_5 = arith.constant 0 : index
    %c0_6 = arith.constant 0 : index
    %c0_7 = arith.constant 0 : index
    %7 = vector.load %arg4[%c0_5, %c0_6, %c0_7] : memref<1x1x128xf32, #tpu.memory_space<vmem>>, vector<1x1x128xf32>
    %8 = vector.shape_cast %7 : vector<1x1x128xf32> to vector<1x128xf32>
    %9 = vector.broadcast %8 : vector<1x128xf32> to vector<256x128xf32>
    %10 = arith.addf %6, %9 : vector<256x128xf32>
    %11 = arith.truncf %10 : vector<256x128xf32> to vector<256x128xbf16>
    %c0_8 = arith.constant 0 : index
    %c0_9 = arith.constant 0 : index
    %c0_10 = arith.constant 0 : index
    %12 = vector.load %arg5[%c0_8, %c0_9, %c0_10] : memref<1x256x128xbf16, #tpu.memory_space<vmem>>, vector<1x256x128xbf16>
    %13 = vector.shape_cast %12 : vector<1x256x128xbf16> to vector<256x128xbf16>
    %14 = vector.shape_cast %11 : vector<256x128xbf16> to vector<1x256x128xbf16>
    tpu.vector_store %arg5[%c0_8, %c0_9, %c0_10], %14 {strides = array<i32>} : memref<1x256x128xbf16, #tpu.memory_space<vmem>>, vector<1x256x128xbf16>,
    return
  }
  func.func @transform_0(%arg0: i32, %arg1: i32) -> (i32, i32, i32) {
    %c0_i32 = arith.constant 0 : i32
    %c0_i32_0 = arith.constant 0 : i32
    return %arg0, %arg1, %c0_i32 : i32, i32, i32
  }
  func.func @transform_1(%arg0: i32, %arg1: i32) -> (i32, i32, i32) {
    %c0_i32 = arith.constant 0 : i32
    %c0_i32_0 = arith.constant 0 : i32
    %c0_i32_1 = arith.constant 0 : i32
    return %arg0, %c0_i32, %c0_i32_0 : i32, i32, i32
  }
  func.func @transform_2(%arg0: i32, %arg1: i32) -> (i32, i32, i32) {
    %c0_i32 = arith.constant 0 : i32
    %c0_i32_0 = arith.constant 0 : i32
    %c0_i32_1 = arith.constant 0 : i32
    return %arg0, %c0_i32, %c0_i32_0 : i32, i32, i32
  }
  func.func @transform_3(%arg0: i32, %arg1: i32) -> (i32, i32, i32) {
    %c0_i32 = arith.constant 0 : i32
    %c0_i32_0 = arith.constant 0 : i32
    return %arg0, %arg1, %c0_i32 : i32, i32, i32
  }
}

module attributes {stable_mosaic.version = 11 : i64} {
  func.func @_gn_stats_kernel(%arg0: i32, %arg1: i32, %arg2: memref<1x512x128xbf16, #tpu.memory_space<vmem>>, %arg3: memref<1x2x128xf32, #tpu.memory_space<vmem>>) attributes {dimension_semantics = [#tpu.dimension_semantics<parallel>, #tpu.dimension_semantics<arbitrary>], iteration_bounds = array<i64: 2, 1>, scalar_prefetch = 0 : i64, scratch_operands = 0 : i64, tpu.core_type = #tpu.core_type<tc>, window_params = [{transform_indices = @transform_0, window_bounds = array<i64: 1, 512, 128>}, {transform_indices = @transform_1, window_bounds = array<i64: 1, 2, 128>}]} {
    %c0 = arith.constant 0 : index
    %c0_0 = arith.constant 0 : index
    %c0_1 = arith.constant 0 : index
    %0 = vector.load %arg2[%c0, %c0_0, %c0_1] : memref<1x512x128xbf16, #tpu.memory_space<vmem>>, vector<1x512x128xbf16>
    %1 = vector.shape_cast %0 : vector<1x512x128xbf16> to vector<512x128xbf16>
    %2 = arith.extf %1 : vector<512x128xbf16> to vector<512x128xf32>
    %cst = arith.constant dense<0.000000e+00> : vector<128xf32>
    %3 = vector.multi_reduction <add>, %2, %cst [0] : vector<512x128xf32> to vector<128xf32>
    %4 = vector.shape_cast %3 : vector<128xf32> to vector<1x128xf32>
    %5 = arith.mulf %2, %2 : vector<512x128xf32>
    %cst_2 = arith.constant dense<0.000000e+00> : vector<128xf32>
    %6 = vector.multi_reduction <add>, %5, %cst_2 [0] : vector<512x128xf32> to vector<128xf32>
    %7 = vector.shape_cast %6 : vector<128xf32> to vector<1x128xf32>
    %c0_i32 = arith.constant 0 : i32
    %8 = arith.cmpi eq, %arg1, %c0_i32 : i32
    %9 = arith.extui %8 : i1 to i32
    %c0_i32_3 = arith.constant 0 : i32
    %10 = arith.cmpi ne, %9, %c0_i32_3 : i32
    scf.if %10 {
      %cst_10 = arith.constant 0.000000e+00 : f32
      %18 = vector.broadcast %cst_10 : f32 to vector<2x128xf32>
      %c0_11 = arith.constant 0 : index
      %c0_12 = arith.constant 0 : index
      %c0_13 = arith.constant 0 : index
      %19 = vector.load %arg3[%c0_11, %c0_12, %c0_13] : memref<1x2x128xf32, #tpu.memory_space<vmem>>, vector<1x2x128xf32>
      %20 = vector.shape_cast %19 : vector<1x2x128xf32> to vector<2x128xf32>
      %21 = vector.shape_cast %18 : vector<2x128xf32> to vector<1x2x128xf32>
      tpu.vector_store %arg3[%c0_11, %c0_12, %c0_13], %21 {strides = array<i32>} : memref<1x2x128xf32, #tpu.memory_space<vmem>>, vector<1x2x128xf32>,
    } else {
    }
    %c0_4 = arith.constant 0 : index
    %c0_5 = arith.constant 0 : index
    %c0_6 = arith.constant 0 : index
    %11 = vector.load %arg3[%c0_4, %c0_5, %c0_6] : memref<1x2x128xf32, #tpu.memory_space<vmem>>, vector<1x2x128xf32>
    %12 = vector.shape_cast %11 : vector<1x2x128xf32> to vector<2x128xf32>
    %13 = tpu.concatenate %4, %7 in 0 : vector<1x128xf32>, vector<1x128xf32> -> vector<2x128xf32>
    %14 = arith.addf %12, %13 : vector<2x128xf32>
    %c0_7 = arith.constant 0 : index
    %c0_8 = arith.constant 0 : index
    %c0_9 = arith.constant 0 : index
    %15 = vector.load %arg3[%c0_7, %c0_8, %c0_9] : memref<1x2x128xf32, #tpu.memory_space<vmem>>, vector<1x2x128xf32>
    %16 = vector.shape_cast %15 : vector<1x2x128xf32> to vector<2x128xf32>
    %17 = vector.shape_cast %14 : vector<2x128xf32> to vector<1x2x128xf32>
    tpu.vector_store %arg3[%c0_7, %c0_8, %c0_9], %17 {strides = array<i32>} : memref<1x2x128xf32, #tpu.memory_space<vmem>>, vector<1x2x128xf32>,
    return
  }
  func.func @transform_0(%arg0: i32, %arg1: i32) -> (i32, i32, i32) {
    %c0_i32 = arith.constant 0 : i32
    %c0_i32_0 = arith.constant 0 : i32
    return %arg0, %arg1, %c0_i32 : i32, i32, i32
  }
  func.func @transform_1(%arg0: i32, %arg1: i32) -> (i32, i32, i32) {
    %c0_i32 = arith.constant 0 : i32
    %c0_i32_0 = arith.constant 0 : i32
    %c0_i32_1 = arith.constant 0 : i32
    return %arg0, %c0_i32, %c0_i32_0 : i32, i32, i32
  }
}

module attributes {stable_mosaic.version = 11 : i64} {
  func.func @_gn_apply_kernel(%arg0: i32, %arg1: i32, %arg2: memref<1x512x128xbf16, #tpu.memory_space<vmem>>, %arg3: memref<1x1x128xf32, #tpu.memory_space<vmem>>, %arg4: memref<1x1x128xf32, #tpu.memory_space<vmem>>, %arg5: memref<1x512x128xbf16, #tpu.memory_space<vmem>>) attributes {dimension_semantics = [#tpu.dimension_semantics<parallel>, #tpu.dimension_semantics<parallel>], iteration_bounds = array<i64: 2, 1>, scalar_prefetch = 0 : i64, scratch_operands = 0 : i64, tpu.core_type = #tpu.core_type<tc>, window_params = [{transform_indices = @transform_0, window_bounds = array<i64: 1, 512, 128>}, {transform_indices = @transform_1, window_bounds = array<i64: 1, 1, 128>}, {transform_indices = @transform_2, window_bounds = array<i64: 1, 1, 128>}, {transform_indices = @transform_3, window_bounds = array<i64: 1, 512, 128>}]} {
    %c0 = arith.constant 0 : index
    %c0_0 = arith.constant 0 : index
    %c0_1 = arith.constant 0 : index
    %0 = vector.load %arg2[%c0, %c0_0, %c0_1] : memref<1x512x128xbf16, #tpu.memory_space<vmem>>, vector<1x512x128xbf16>
    %1 = vector.shape_cast %0 : vector<1x512x128xbf16> to vector<512x128xbf16>
    %2 = arith.extf %1 : vector<512x128xbf16> to vector<512x128xf32>
    %c0_2 = arith.constant 0 : index
    %c0_3 = arith.constant 0 : index
    %c0_4 = arith.constant 0 : index
    %3 = vector.load %arg3[%c0_2, %c0_3, %c0_4] : memref<1x1x128xf32, #tpu.memory_space<vmem>>, vector<1x1x128xf32>
    %4 = vector.shape_cast %3 : vector<1x1x128xf32> to vector<1x128xf32>
    %5 = vector.broadcast %4 : vector<1x128xf32> to vector<512x128xf32>
    %6 = arith.mulf %2, %5 : vector<512x128xf32>
    %c0_5 = arith.constant 0 : index
    %c0_6 = arith.constant 0 : index
    %c0_7 = arith.constant 0 : index
    %7 = vector.load %arg4[%c0_5, %c0_6, %c0_7] : memref<1x1x128xf32, #tpu.memory_space<vmem>>, vector<1x1x128xf32>
    %8 = vector.shape_cast %7 : vector<1x1x128xf32> to vector<1x128xf32>
    %9 = vector.broadcast %8 : vector<1x128xf32> to vector<512x128xf32>
    %10 = arith.addf %6, %9 : vector<512x128xf32>
    %cst = arith.constant 0.000000e+00 : f32
    %11 = vector.broadcast %cst : f32 to vector<512x128xf32>
    %12 = arith.cmpf oge, %10, %11 : vector<512x128xf32>
    %cst_8 = arith.constant 0.00999999977 : f32
    %13 = vector.broadcast %cst_8 : f32 to vector<512x128xf32>
    %14 = arith.mulf %13, %10 : vector<512x128xf32>
    %15 = arith.select %12, %10, %14 : vector<512x128xi1>, vector<512x128xf32>
    %16 = arith.truncf %15 : vector<512x128xf32> to vector<512x128xbf16>
    %c0_9 = arith.constant 0 : index
    %c0_10 = arith.constant 0 : index
    %c0_11 = arith.constant 0 : index
    %17 = vector.load %arg5[%c0_9, %c0_10, %c0_11] : memref<1x512x128xbf16, #tpu.memory_space<vmem>>, vector<1x512x128xbf16>
    %18 = vector.shape_cast %17 : vector<1x512x128xbf16> to vector<512x128xbf16>
    %19 = vector.shape_cast %16 : vector<512x128xbf16> to vector<1x512x128xbf16>
    tpu.vector_store %arg5[%c0_9, %c0_10, %c0_11], %19 {strides = array<i32>} : memref<1x512x128xbf16, #tpu.memory_space<vmem>>, vector<1x512x128xbf16>,
    return
  }
  func.func @transform_0(%arg0: i32, %arg1: i32) -> (i32, i32, i32) {
    %c0_i32 = arith.constant 0 : i32
    %c0_i32_0 = arith.constant 0 : i32
    return %arg0, %arg1, %c0_i32 : i32, i32, i32
  }
  func.func @transform_1(%arg0: i32, %arg1: i32) -> (i32, i32, i32) {
    %c0_i32 = arith.constant 0 : i32
    %c0_i32_0 = arith.constant 0 : i32
    %c0_i32_1 = arith.constant 0 : i32
    return %arg0, %c0_i32, %c0_i32_0 : i32, i32, i32
  }
  func.func @transform_2(%arg0: i32, %arg1: i32) -> (i32, i32, i32) {
    %c0_i32 = arith.constant 0 : i32
    %c0_i32_0 = arith.constant 0 : i32
    %c0_i32_1 = arith.constant 0 : i32
    return %arg0, %c0_i32, %c0_i32_0 : i32, i32, i32
  }
  func.func @transform_3(%arg0: i32, %arg1: i32) -> (i32, i32, i32) {
    %c0_i32 = arith.constant 0 : i32
    %c0_i32_0 = arith.constant 0 : i32
    return %arg0, %arg1, %c0_i32 : i32, i32, i32
  }
}

module attributes {stable_mosaic.version = 11 : i64} {
  func.func @_gn_apply_kernel(%arg0: i32, %arg1: i32, %arg2: memref<1x256x128xbf16, #tpu.memory_space<vmem>>, %arg3: memref<1x1x128xf32, #tpu.memory_space<vmem>>, %arg4: memref<1x1x128xf32, #tpu.memory_space<vmem>>, %arg5: memref<1x256x128xbf16, #tpu.memory_space<vmem>>) attributes {dimension_semantics = [#tpu.dimension_semantics<parallel>, #tpu.dimension_semantics<parallel>], iteration_bounds = array<i64: 2, 1>, scalar_prefetch = 0 : i64, scratch_operands = 0 : i64, tpu.core_type = #tpu.core_type<tc>, window_params = [{transform_indices = @transform_0, window_bounds = array<i64: 1, 256, 128>}, {transform_indices = @transform_1, window_bounds = array<i64: 1, 1, 128>}, {transform_indices = @transform_2, window_bounds = array<i64: 1, 1, 128>}, {transform_indices = @transform_3, window_bounds = array<i64: 1, 256, 128>}]} {
    %c0 = arith.constant 0 : index
    %c0_0 = arith.constant 0 : index
    %c0_1 = arith.constant 0 : index
    %0 = vector.load %arg2[%c0, %c0_0, %c0_1] : memref<1x256x128xbf16, #tpu.memory_space<vmem>>, vector<1x256x128xbf16>
    %1 = vector.shape_cast %0 : vector<1x256x128xbf16> to vector<256x128xbf16>
    %2 = arith.extf %1 : vector<256x128xbf16> to vector<256x128xf32>
    %c0_2 = arith.constant 0 : index
    %c0_3 = arith.constant 0 : index
    %c0_4 = arith.constant 0 : index
    %3 = vector.load %arg3[%c0_2, %c0_3, %c0_4] : memref<1x1x128xf32, #tpu.memory_space<vmem>>, vector<1x1x128xf32>
    %4 = vector.shape_cast %3 : vector<1x1x128xf32> to vector<1x128xf32>
    %5 = vector.broadcast %4 : vector<1x128xf32> to vector<256x128xf32>
    %6 = arith.mulf %2, %5 : vector<256x128xf32>
    %c0_5 = arith.constant 0 : index
    %c0_6 = arith.constant 0 : index
    %c0_7 = arith.constant 0 : index
    %7 = vector.load %arg4[%c0_5, %c0_6, %c0_7] : memref<1x1x128xf32, #tpu.memory_space<vmem>>, vector<1x1x128xf32>
    %8 = vector.shape_cast %7 : vector<1x1x128xf32> to vector<1x128xf32>
    %9 = vector.broadcast %8 : vector<1x128xf32> to vector<256x128xf32>
    %10 = arith.addf %6, %9 : vector<256x128xf32>
    %cst = arith.constant 0.000000e+00 : f32
    %11 = vector.broadcast %cst : f32 to vector<256x128xf32>
    %12 = arith.cmpf oge, %10, %11 : vector<256x128xf32>
    %cst_8 = arith.constant 0.00999999977 : f32
    %13 = vector.broadcast %cst_8 : f32 to vector<256x128xf32>
    %14 = arith.mulf %13, %10 : vector<256x128xf32>
    %15 = arith.select %12, %10, %14 : vector<256x128xi1>, vector<256x128xf32>
    %16 = arith.truncf %15 : vector<256x128xf32> to vector<256x128xbf16>
    %c0_9 = arith.constant 0 : index
    %c0_10 = arith.constant 0 : index
    %c0_11 = arith.constant 0 : index
    %17 = vector.load %arg5[%c0_9, %c0_10, %c0_11] : memref<1x256x128xbf16, #tpu.memory_space<vmem>>, vector<1x256x128xbf16>
    %18 = vector.shape_cast %17 : vector<1x256x128xbf16> to vector<256x128xbf16>
    %19 = vector.shape_cast %16 : vector<256x128xbf16> to vector<1x256x128xbf16>
    tpu.vector_store %arg5[%c0_9, %c0_10, %c0_11], %19 {strides = array<i32>} : memref<1x256x128xbf16, #tpu.memory_space<vmem>>, vector<1x256x128xbf16>,
    return
  }
  func.func @transform_0(%arg0: i32, %arg1: i32) -> (i32, i32, i32) {
    %c0_i32 = arith.constant 0 : i32
    %c0_i32_0 = arith.constant 0 : i32
    return %arg0, %arg1, %c0_i32 : i32, i32, i32
  }
  func.func @transform_1(%arg0: i32, %arg1: i32) -> (i32, i32, i32) {
    %c0_i32 = arith.constant 0 : i32
    %c0_i32_0 = arith.constant 0 : i32
    %c0_i32_1 = arith.constant 0 : i32
    return %arg0, %c0_i32, %c0_i32_0 : i32, i32, i32
  }
  func.func @transform_2(%arg0: i32, %arg1: i32) -> (i32, i32, i32) {
    %c0_i32 = arith.constant 0 : i32
    %c0_i32_0 = arith.constant 0 : i32
    %c0_i32_1 = arith.constant 0 : i32
    return %arg0, %c0_i32, %c0_i32_0 : i32, i32, i32
  }
  func.func @transform_3(%arg0: i32, %arg1: i32) -> (i32, i32, i32) {
    %c0_i32 = arith.constant 0 : i32
    %c0_i32_0 = arith.constant 0 : i32
    return %arg0, %arg1, %c0_i32 : i32, i32, i32
  }
}

module attributes {stable_mosaic.version = 11 : i64} {
  func.func @_tapconv_kernel(%arg0: i32, %arg1: i32, %arg2: i32, %arg3: memref<1x1x288x24xbf16, #tpu.memory_space<vmem>>, %arg4: memref<1x1x288x24xbf16, #tpu.memory_space<vmem>>, %arg5: memref<1x1x288x24xbf16, #tpu.memory_space<vmem>>, %arg6: memref<9x24x8xbf16, #tpu.memory_space<vmem>>, %arg7: memref<1x8xf32, #tpu.memory_space<vmem>>, %arg8: memref<1x1x256x8xbf16, #tpu.memory_space<vmem>>) attributes {dimension_semantics = [#tpu.dimension_semantics<parallel>, #tpu.dimension_semantics<parallel>, #tpu.dimension_semantics<parallel>], iteration_bounds = array<i64: 2, 16, 1>, scalar_prefetch = 0 : i64, scratch_operands = 0 : i64, tpu.core_type = #tpu.core_type<tc>, window_params = [{transform_indices = @transform_0, window_bounds = array<i64: 1, 1, 288, 24>}, {transform_indices = @transform_1, window_bounds = array<i64: 1, 1, 288, 24>}, {transform_indices = @transform_2, window_bounds = array<i64: 1, 1, 288, 24>}, {pipeline_mode = #tpu.pipeline_mode<synchronous>, transform_indices = @transform_3, window_bounds = array<i64: 9, 24, 8>}, {pipeline_mode = #tpu.pipeline_mode<synchronous>, transform_indices = @transform_4, window_bounds = array<i64: 1, 8>}, {transform_indices = @transform_5, window_bounds = array<i64: 1, 1, 256, 8>}]} {
    %c256_i32 = arith.constant 256 : i32
    %0 = arith.muli %arg2, %c256_i32 : i32
    %1 = tpu.assume_multiple %0, 256 : i32
    %cst = arith.constant 0.000000e+00 : f32
    %2 = vector.broadcast %cst : f32 to vector<256x8xf32>
    %c0_i32 = arith.constant 0 : i32
    %3 = arith.addi %1, %c0_i32 : i32
    %c0 = arith.constant 0 : index
    %c0_0 = arith.constant 0 : index
    %4 = arith.index_cast %3 : i32 to index
    %c0_1 = arith.constant 0 : index
    %5 = vector.load %arg3[%c0, %c0_0, %4, %c0_1] : memref<1x1x288x24xbf16, #tpu.memory_space<vmem>>, vector<1x1x256x24xbf16>
    %6 = vector.shape_cast %5 : vector<1x1x256x24xbf16> to vector<256x24xbf16>
    %c0_2 = arith.constant 0 : index
    %c0_3 = arith.constant 0 : index
    %c0_4 = arith.constant 0 : index
    %7 = vector.load %arg6[%c0_2, %c0_3, %c0_4] : memref<9x24x8xbf16, #tpu.memory_space<vmem>>, vector<1x24x8xbf16>
    %8 = vector.shape_cast %7 : vector<1x24x8xbf16> to vector<24x8xbf16>
    %cst_5 = arith.constant dense<0.000000e+00> : vector<256x8xf32>
    %9 = tpu.matmul %6, %8, %cst_5 {dimension_numbers = #tpu.dot_dimension_numbers<[1], [0], [0], [1], [0, 0, 1, 1], [], []>} : vector<256x24xbf16>, vector<24x8xbf16>, vector<256x8xf32> -> vector<256x8xf32>
    %10 = arith.addf %2, %9 : vector<256x8xf32>
    %c16_i32 = arith.constant 16 : i32
    %11 = arith.addi %1, %c16_i32 : i32
    %c0_6 = arith.constant 0 : index
    %c0_7 = arith.constant 0 : index
    %12 = arith.index_cast %11 : i32 to index
    %c0_8 = arith.constant 0 : index
    %13 = vector.load %arg3[%c0_6, %c0_7, %12, %c0_8] : memref<1x1x288x24xbf16, #tpu.memory_space<vmem>>, vector<1x1x256x24xbf16>
    %14 = vector.shape_cast %13 : vector<1x1x256x24xbf16> to vector<256x24xbf16>
    %c1 = arith.constant 1 : index
    %c0_9 = arith.constant 0 : index
    %c0_10 = arith.constant 0 : index
    %15 = vector.load %arg6[%c1, %c0_9, %c0_10] : memref<9x24x8xbf16, #tpu.memory_space<vmem>>, vector<1x24x8xbf16>
    %16 = vector.shape_cast %15 : vector<1x24x8xbf16> to vector<24x8xbf16>
    %cst_11 = arith.constant dense<0.000000e+00> : vector<256x8xf32>
    %17 = tpu.matmul %14, %16, %cst_11 {dimension_numbers = #tpu.dot_dimension_numbers<[1], [0], [0], [1], [0, 0, 1, 1], [], []>} : vector<256x24xbf16>, vector<24x8xbf16>, vector<256x8xf32> -> vector<256x8xf32>
    %18 = arith.addf %10, %17 : vector<256x8xf32>
    %c32_i32 = arith.constant 32 : i32
    %19 = arith.addi %1, %c32_i32 : i32
    %c0_12 = arith.constant 0 : index
    %c0_13 = arith.constant 0 : index
    %20 = arith.index_cast %19 : i32 to index
    %c0_14 = arith.constant 0 : index
    %21 = vector.load %arg3[%c0_12, %c0_13, %20, %c0_14] : memref<1x1x288x24xbf16, #tpu.memory_space<vmem>>, vector<1x1x256x24xbf16>
    %22 = vector.shape_cast %21 : vector<1x1x256x24xbf16> to vector<256x24xbf16>
    %c2 = arith.constant 2 : index
    %c0_15 = arith.constant 0 : index
    %c0_16 = arith.constant 0 : index
    %23 = vector.load %arg6[%c2, %c0_15, %c0_16] : memref<9x24x8xbf16, #tpu.memory_space<vmem>>, vector<1x24x8xbf16>
    %24 = vector.shape_cast %23 : vector<1x24x8xbf16> to vector<24x8xbf16>
    %cst_17 = arith.constant dense<0.000000e+00> : vector<256x8xf32>
    %25 = tpu.matmul %22, %24, %cst_17 {dimension_numbers = #tpu.dot_dimension_numbers<[1], [0], [0], [1], [0, 0, 1, 1], [], []>} : vector<256x24xbf16>, vector<24x8xbf16>, vector<256x8xf32> -> vector<256x8xf32>
    %26 = arith.addf %18, %25 : vector<256x8xf32>
    %c0_i32_18 = arith.constant 0 : i32
    %27 = arith.addi %1, %c0_i32_18 : i32
    %c0_19 = arith.constant 0 : index
    %c0_20 = arith.constant 0 : index
    %28 = arith.index_cast %27 : i32 to index
    %c0_21 = arith.constant 0 : index
    %29 = vector.load %arg4[%c0_19, %c0_20, %28, %c0_21] : memref<1x1x288x24xbf16, #tpu.memory_space<vmem>>, vector<1x1x256x24xbf16>
    %30 = vector.shape_cast %29 : vector<1x1x256x24xbf16> to vector<256x24xbf16>
    %c3 = arith.constant 3 : index
    %c0_22 = arith.constant 0 : index
    %c0_23 = arith.constant 0 : index
    %31 = vector.load %arg6[%c3, %c0_22, %c0_23] : memref<9x24x8xbf16, #tpu.memory_space<vmem>>, vector<1x24x8xbf16>
    %32 = vector.shape_cast %31 : vector<1x24x8xbf16> to vector<24x8xbf16>
    %cst_24 = arith.constant dense<0.000000e+00> : vector<256x8xf32>
    %33 = tpu.matmul %30, %32, %cst_24 {dimension_numbers = #tpu.dot_dimension_numbers<[1], [0], [0], [1], [0, 0, 1, 1], [], []>} : vector<256x24xbf16>, vector<24x8xbf16>, vector<256x8xf32> -> vector<256x8xf32>
    %34 = arith.addf %26, %33 : vector<256x8xf32>
    %c16_i32_25 = arith.constant 16 : i32
    %35 = arith.addi %1, %c16_i32_25 : i32
    %c0_26 = arith.constant 0 : index
    %c0_27 = arith.constant 0 : index
    %36 = arith.index_cast %35 : i32 to index
    %c0_28 = arith.constant 0 : index
    %37 = vector.load %arg4[%c0_26, %c0_27, %36, %c0_28] : memref<1x1x288x24xbf16, #tpu.memory_space<vmem>>, vector<1x1x256x24xbf16>
    %38 = vector.shape_cast %37 : vector<1x1x256x24xbf16> to vector<256x24xbf16>
    %c4 = arith.constant 4 : index
    %c0_29 = arith.constant 0 : index
    %c0_30 = arith.constant 0 : index
    %39 = vector.load %arg6[%c4, %c0_29, %c0_30] : memref<9x24x8xbf16, #tpu.memory_space<vmem>>, vector<1x24x8xbf16>
    %40 = vector.shape_cast %39 : vector<1x24x8xbf16> to vector<24x8xbf16>
    %cst_31 = arith.constant dense<0.000000e+00> : vector<256x8xf32>
    %41 = tpu.matmul %38, %40, %cst_31 {dimension_numbers = #tpu.dot_dimension_numbers<[1], [0], [0], [1], [0, 0, 1, 1], [], []>} : vector<256x24xbf16>, vector<24x8xbf16>, vector<256x8xf32> -> vector<256x8xf32>
    %42 = arith.addf %34, %41 : vector<256x8xf32>
    %c32_i32_32 = arith.constant 32 : i32
    %43 = arith.addi %1, %c32_i32_32 : i32
    %c0_33 = arith.constant 0 : index
    %c0_34 = arith.constant 0 : index
    %44 = arith.index_cast %43 : i32 to index
    %c0_35 = arith.constant 0 : index
    %45 = vector.load %arg4[%c0_33, %c0_34, %44, %c0_35] : memref<1x1x288x24xbf16, #tpu.memory_space<vmem>>, vector<1x1x256x24xbf16>
    %46 = vector.shape_cast %45 : vector<1x1x256x24xbf16> to vector<256x24xbf16>
    %c5 = arith.constant 5 : index
    %c0_36 = arith.constant 0 : index
    %c0_37 = arith.constant 0 : index
    %47 = vector.load %arg6[%c5, %c0_36, %c0_37] : memref<9x24x8xbf16, #tpu.memory_space<vmem>>, vector<1x24x8xbf16>
    %48 = vector.shape_cast %47 : vector<1x24x8xbf16> to vector<24x8xbf16>
    %cst_38 = arith.constant dense<0.000000e+00> : vector<256x8xf32>
    %49 = tpu.matmul %46, %48, %cst_38 {dimension_numbers = #tpu.dot_dimension_numbers<[1], [0], [0], [1], [0, 0, 1, 1], [], []>} : vector<256x24xbf16>, vector<24x8xbf16>, vector<256x8xf32> -> vector<256x8xf32>
    %50 = arith.addf %42, %49 : vector<256x8xf32>
    %c0_i32_39 = arith.constant 0 : i32
    %51 = arith.addi %1, %c0_i32_39 : i32
    %c0_40 = arith.constant 0 : index
    %c0_41 = arith.constant 0 : index
    %52 = arith.index_cast %51 : i32 to index
    %c0_42 = arith.constant 0 : index
    %53 = vector.load %arg5[%c0_40, %c0_41, %52, %c0_42] : memref<1x1x288x24xbf16, #tpu.memory_space<vmem>>, vector<1x1x256x24xbf16>
    %54 = vector.shape_cast %53 : vector<1x1x256x24xbf16> to vector<256x24xbf16>
    %c6 = arith.constant 6 : index
    %c0_43 = arith.constant 0 : index
    %c0_44 = arith.constant 0 : index
    %55 = vector.load %arg6[%c6, %c0_43, %c0_44] : memref<9x24x8xbf16, #tpu.memory_space<vmem>>, vector<1x24x8xbf16>
    %56 = vector.shape_cast %55 : vector<1x24x8xbf16> to vector<24x8xbf16>
    %cst_45 = arith.constant dense<0.000000e+00> : vector<256x8xf32>
    %57 = tpu.matmul %54, %56, %cst_45 {dimension_numbers = #tpu.dot_dimension_numbers<[1], [0], [0], [1], [0, 0, 1, 1], [], []>} : vector<256x24xbf16>, vector<24x8xbf16>, vector<256x8xf32> -> vector<256x8xf32>
    %58 = arith.addf %50, %57 : vector<256x8xf32>
    %c16_i32_46 = arith.constant 16 : i32
    %59 = arith.addi %1, %c16_i32_46 : i32
    %c0_47 = arith.constant 0 : index
    %c0_48 = arith.constant 0 : index
    %60 = arith.index_cast %59 : i32 to index
    %c0_49 = arith.constant 0 : index
    %61 = vector.load %arg5[%c0_47, %c0_48, %60, %c0_49] : memref<1x1x288x24xbf16, #tpu.memory_space<vmem>>, vector<1x1x256x24xbf16>
    %62 = vector.shape_cast %61 : vector<1x1x256x24xbf16> to vector<256x24xbf16>
    %c7 = arith.constant 7 : index
    %c0_50 = arith.constant 0 : index
    %c0_51 = arith.constant 0 : index
    %63 = vector.load %arg6[%c7, %c0_50, %c0_51] : memref<9x24x8xbf16, #tpu.memory_space<vmem>>, vector<1x24x8xbf16>
    %64 = vector.shape_cast %63 : vector<1x24x8xbf16> to vector<24x8xbf16>
    %cst_52 = arith.constant dense<0.000000e+00> : vector<256x8xf32>
    %65 = tpu.matmul %62, %64, %cst_52 {dimension_numbers = #tpu.dot_dimension_numbers<[1], [0], [0], [1], [0, 0, 1, 1], [], []>} : vector<256x24xbf16>, vector<24x8xbf16>, vector<256x8xf32> -> vector<256x8xf32>
    %66 = arith.addf %58, %65 : vector<256x8xf32>
    %c32_i32_53 = arith.constant 32 : i32
    %67 = arith.addi %1, %c32_i32_53 : i32
    %c0_54 = arith.constant 0 : index
    %c0_55 = arith.constant 0 : index
    %68 = arith.index_cast %67 : i32 to index
    %c0_56 = arith.constant 0 : index
    %69 = vector.load %arg5[%c0_54, %c0_55, %68, %c0_56] : memref<1x1x288x24xbf16, #tpu.memory_space<vmem>>, vector<1x1x256x24xbf16>
    %70 = vector.shape_cast %69 : vector<1x1x256x24xbf16> to vector<256x24xbf16>
    %c8 = arith.constant 8 : index
    %c0_57 = arith.constant 0 : index
    %c0_58 = arith.constant 0 : index
    %71 = vector.load %arg6[%c8, %c0_57, %c0_58] : memref<9x24x8xbf16, #tpu.memory_space<vmem>>, vector<1x24x8xbf16>
    %72 = vector.shape_cast %71 : vector<1x24x8xbf16> to vector<24x8xbf16>
    %cst_59 = arith.constant dense<0.000000e+00> : vector<256x8xf32>
    %73 = tpu.matmul %70, %72, %cst_59 {dimension_numbers = #tpu.dot_dimension_numbers<[1], [0], [0], [1], [0, 0, 1, 1], [], []>} : vector<256x24xbf16>, vector<24x8xbf16>, vector<256x8xf32> -> vector<256x8xf32>
    %74 = arith.addf %66, %73 : vector<256x8xf32>
    %c0_60 = arith.constant 0 : index
    %c0_61 = arith.constant 0 : index
    %75 = vector.load %arg7[%c0_60, %c0_61] : memref<1x8xf32, #tpu.memory_space<vmem>>, vector<1x8xf32>
    %76 = vector.broadcast %75 : vector<1x8xf32> to vector<256x8xf32>
    %77 = arith.addf %74, %76 : vector<256x8xf32>
    %78 = arith.truncf %77 : vector<256x8xf32> to vector<256x8xbf16>
    %c0_62 = arith.constant 0 : index
    %c0_63 = arith.constant 0 : index
    %c0_64 = arith.constant 0 : index
    %c0_65 = arith.constant 0 : index
    %79 = vector.load %arg8[%c0_62, %c0_63, %c0_64, %c0_65] : memref<1x1x256x8xbf16, #tpu.memory_space<vmem>>, vector<1x1x256x8xbf16>
    %80 = vector.shape_cast %79 : vector<1x1x256x8xbf16> to vector<256x8xbf16>
    %81 = vector.shape_cast %78 : vector<256x8xbf16> to vector<1x1x256x8xbf16>
    tpu.vector_store %arg8[%c0_62, %c0_63, %c0_64, %c0_65], %81 {strides = array<i32>} : memref<1x1x256x8xbf16, #tpu.memory_space<vmem>>, vector<1x1x256x8xbf16>,
    return
  }
  func.func @transform_0(%arg0: i32, %arg1: i32, %arg2: i32) -> (i32, i32, i32, i32) {
    %c0_i32 = arith.constant 0 : i32
    %0 = arith.addi %arg1, %c0_i32 : i32
    %c0_i32_0 = arith.constant 0 : i32
    %c0_i32_1 = arith.constant 0 : i32
    %c0_i32_2 = arith.constant 0 : i32
    return %arg0, %0, %c0_i32_0, %c0_i32_1 : i32, i32, i32, i32
  }
  func.func @transform_1(%arg0: i32, %arg1: i32, %arg2: i32) -> (i32, i32, i32, i32) {
    %c1_i32 = arith.constant 1 : i32
    %0 = arith.addi %arg1, %c1_i32 : i32
    %c0_i32 = arith.constant 0 : i32
    %c0_i32_0 = arith.constant 0 : i32
    %c0_i32_1 = arith.constant 0 : i32
    return %arg0, %0, %c0_i32, %c0_i32_0 : i32, i32, i32, i32
  }
  func.func @transform_2(%arg0: i32, %arg1: i32, %arg2: i32) -> (i32, i32, i32, i32) {
    %c2_i32 = arith.constant 2 : i32
    %0 = arith.addi %arg1, %c2_i32 : i32
    %c0_i32 = arith.constant 0 : i32
    %c0_i32_0 = arith.constant 0 : i32
    %c0_i32_1 = arith.constant 0 : i32
    return %arg0, %0, %c0_i32, %c0_i32_0 : i32, i32, i32, i32
  }
  func.func @transform_3(%arg0: i32, %arg1: i32, %arg2: i32) -> (i32, i32, i32) {
    %c0_i32 = arith.constant 0 : i32
    %c0_i32_0 = arith.constant 0 : i32
    %c0_i32_1 = arith.constant 0 : i32
    %c0_i32_2 = arith.constant 0 : i32
    return %c0_i32, %c0_i32_0, %c0_i32_1 : i32, i32, i32
  }
  func.func @transform_4(%arg0: i32, %arg1: i32, %arg2: i32) -> (i32, i32) {
    %c0_i32 = arith.constant 0 : i32
    %c0_i32_0 = arith.constant 0 : i32
    %c0_i32_1 = arith.constant 0 : i32
    return %c0_i32, %c0_i32_0 : i32, i32
  }
  func.func @transform_5(%arg0: i32, %arg1: i32, %arg2: i32) -> (i32, i32, i32, i32) {
    %c0_i32 = arith.constant 0 : i32
    %c0_i32_0 = arith.constant 0 : i32
    return %arg0, %arg1, %arg2, %c0_i32 : i32, i32, i32, i32
  }
}

</mosaic_0001>

<bundles_post_ra>
// kernel: tile.38
= control target key start
LH: loop header
LB: loop body
LE: loop exit
PB: predicated region body
PF: predicated region fallthrough
CT: control target
= control target key end

     0   :  { %s22_s0 = inlined_call_operand.vmem [shape: f32[8], index: 0, kind: input, shape index: {}]   ;;  %s23_s1 = inlined_call_operand.vmem [shape: f32[8,8], index: 1, kind: output, shape index: {}]  }
   0x1   :  { %v4_v0 = vld [vmem:[%s22_s0] ss:$0 sm:$0xff] }
   0x2   :  { %5 = vst [vmem:[%s23_s1] sm:$0xff] %v4_v0 }

// kernel: tile.39
= control target key start
LH: loop header
LB: loop body
LE: loop exit
PB: predicated region body
PF: predicated region fallthrough
CT: control target
= control target key end

     0   :  { %s69_s10 = smov 56   ;;  %s70_s11 = smov 40   ;;  %vm3_vm0 = vcmask 64512   ;;  %vm9_vm1 = vcmask 523712   ;;  %vm15_vm2 = vcmask 458112   ;;  %vm21_vm3 = vcmask 392512   ;;  %s113_s0 = inlined_call_operand.vmem [shape: f32[8,8], index: 0, kind: input, shape index: {}]   ;;  %s114_s1 = inlined_call_operand.vmem [shape: f32[1,64], index: 1, kind: output, shape index: {}]  }
   0x1   :  { %v55_v0 = vld [vmem:[%s113_s0 + $0x7] sm:$0x1]   ;;  %v57_v1 = vld [vmem:[%s113_s0 + $0x5] sm:$0x1]   ;;  %v56_v2 = vld [vmem:[%s113_s0 + $0x6] sm:$0x1]  }
   0x2   :  { %7 = vrot.lane.b32.xlu0 %v55_v0, %s69_s10  ;;  %19 = vrot.lane.b32.xlu1 %v57_v1, %s70_s11  ;;  %v58_v3 = vld [vmem:[%s113_s0 + $0x4] sm:$0x1]   ;;  %v2_v4 = vld [vmem:[%s113_s0] sm:$0x1]   ;;  %s71_s18 = smov 48   ;;  %s72_s19 = smov 32  }
   0x3   :  { %4 = vst.msk [vmem:[#allocation0] sm:$0x1] %vm3_vm0, %v2_v4   ;;  %v59_v5 = vld [vmem:[%s113_s0 + $0x3] sm:$0x1]   ;;  %v60_v6 = vld [vmem:[%s113_s0 + $0x2] sm:$0x1]  }
   0x4   :  { %s73_s24 = smov 24   ;;  %s74_s25 = smov 16   ;;  %v61_v7 = vld [vmem:[%s113_s0 + $0x1] sm:$0x1]   ;;  %vm27_vm4 = vcmask 326912   ;;  %vm33_vm5 = vcmask 261312  }
   0x5   :  { %s75_s0 = smov 8   ;;  %vm39_vm6 = vcmask 195712   ;;  %vm45_vm7 = vcmask 130112  }
   0x6   :  { %13 = vrot.lane.b32.xlu0 %v56_v2, %s71_s18  ;;  %25 = vrot.lane.b32.xlu1 %v58_v3, %s72_s19 }
   0xa   :  { %31 = vrot.lane.b32.xlu0 %v59_v5, %s73_s24  ;;  %37 = vrot.lane.b32.xlu1 %v60_v6, %s74_s25 }
   0xe   :  { %43 = vrot.lane.b32.xlu0 %v61_v7, %s75_s0 }
  0x74   :  { %v8_v8 = vpop.permute.xlu0 %7   ;;  %v20_v9 = vpop.permute.xlu1 %19  }
  0x75   :  { %10 = vst.msk [vmem:[#allocation0] sm:$0x1] %vm9_vm1, %v8_v8  }
  0x78   :  { %v14_v10 = vpop.permute.xlu0 %13   ;;  %v26_v11 = vpop.permute.xlu1 %25  }
  0x79   :  { %16 = vst.msk [vmem:[#allocation0] sm:$0x1] %vm15_vm2, %v14_v10  }
  0x7a   :  { %22 = vst.msk [vmem:[#allocation0] sm:$0x1] %vm21_vm3, %v20_v9  }
  0x7b   :  { %28 = vst.msk [vmem:[#allocation0] sm:$0x1] %vm27_vm4, %v26_v11  }
  0x7c   :  { %v32_v12 = vpop.permute.xlu0 %31   ;;  %v38_v13 = vpop.permute.xlu1 %37  }
  0x7d   :  { %34 = vst.msk [vmem:[#allocation0] sm:$0x1] %vm33_vm5, %v32_v12  }
  0x7e   :  { %40 = vst.msk [vmem:[#allocation0] sm:$0x1] %vm39_vm6, %v38_v13  }
  0x80   :  { %v44_v14 = vpop.permute.xlu0 %43  }
  0x81   :  { %46 = vst.msk [vmem:[#allocation0] sm:$0x1] %vm45_vm7, %v44_v14  }
  0x88   :  { %v51_v15 = vld [vmem:[#allocation0] sm:$0x1] }
  0x89   :  { %54 = vst [vmem:[%s114_s1] sm:$0x1] %v51_v15 }

// kernel: res_up_forward.10
= control target key start
LH: loop header
LB: loop body
LE: loop exit
PB: predicated region body
PF: predicated region fallthrough
CT: control target
= control target key end

     0   :  { %s1310_s15 = smov 0   ;;  %s1312_s16 = smov 0   ;;  %s1436_s0 = inlined_call_operand.vmem [shape: bf16[2,9,72,32], index: 0, kind: input, shape index: {}, may-alias: {0,1}]   ;;  %s1437_s1 = inlined_call_operand.vmem [shape: bf16[2,9,72,32], index: 1, kind: input, shape index: {}, may-alias: {0,1}]   ;;  %s1438_s2 = inlined_call_operand.vmem [shape: bf16[4,32,64], index: 2, kind: input, shape index: {}]   ;;  %s1439_s3 = inlined_call_operand.vmem [shape: f32[1,64], index: 3, kind: input, shape index: {}]   ;;  %s1440_s4 = inlined_call_operand.vmem [shape: bf16[2,8,64,64], index: 4, kind: output, shape index: {}]  }
   0x1   :  { %s1314_s17 = smov 0   ;;  %s1316_s18 = smov 0  }
   0x2   :  { %s1318_s19 = smov 0  }
   0x3 LB: > { %s29_s20 = sadd.s32 1, %s1275_s17  ;;  %s33_s21 = sadd.s32 1, %s1279_s18  ;;  %s1283_s19 = sphi %s1318_s19, %s14_s19   ;;  %s1279_s18 = sphi %s1316_s18, %s1444_s18   ;;  %s1275_s17 = sphi %s1314_s17, %s1443_s17   ;;  %s1271_s16 = sphi %s1312_s16, %s1442_s16   ;;  %s1267_s15 = sphi %s1310_s15, %s1441_s15  }
   0x4   : > { %p31_p0 = scmp.ge.s32.totalorder %s29_s20, 8  ;;  %p1013_p1 = scmp.ge.s32.totalorder %s1283_s19, 1 }
   0x5   : > { %p211_p2 = scmp.lt.s32.totalorder %s1283_s19, 17 }
   0x6   : > { %s1446_s20 = smov (%p31_p0, %s29_s20), 0  ;;  %s1448_s21 = smov (!%p31_p0, %s33_s21), %s1279_s18 }
   0x7   : > { %p212_p3 = pnand %p1013_p1, %p211_p2  ;;  %p35_p4 = scmp.ge.s32.totalorder %s1448_s21, 2 }
   0x8   : > { %p259_p5 = scmp.lt.s32.totalorder (!%p212_p3), %s1271_s16, 1  ;;  %p261_p6 = scmp.lt.s32.totalorder (!%p212_p3), %s1267_s15, 8 }
   0x9   : > { %s1450_s21 = smov (%p35_p4, %s1448_s21), 0  ;;  %215 = sbr.rel (%p212_p3) target bundleno = 256 (0x100), region = 36 }
   0xa   : > { %s268_s6 = sadd.s32 (!%p212_p3), 1, %s1267_s15  ;;  %p282_p8 = scmp.lt.s32.totalorder (!%p212_p3), %s1267_s15, 7 }
   0xb   : > { %p271_p7 = scmp.lt.s32.totalorder (!%p212_p3), %s268_s6, 8 }
   0xe   : > { %v1221_v0 = vld [vmem:[%s1438_s2 + $0x18] sm:$0xff]   ;;  %v1222_v1 = vld [vmem:[%s1438_s2 + $0x8] sm:$0xff]   ;;  %v1223_v2 = vld [vmem:[%s1438_s2 + $0x10] sm:$0xff]   ;;  %s1452_s16 = smov (!%p259_p5, %s1271_s16), 1  ;;  %vm361_vm0 = vcmask 261120   ;;  %s1454_s6 = smov (!%p271_p7, %s268_s6), 8 }
   0xf   : > { %1130 = vmatprep.subr.bf16.mxu0 %v1221_v0  ;;  %1142 = vmatprep.subr.bf16.mxu1 %v1222_v1  ;;  %v1224_v3 = vld [vmem:[%s1438_s2] sm:$0xff]   ;;  %s262_s30 = scalar_select %p261_p6, %s1267_s15, 8  ;;  %v1227_v4 = vld [vmem:[%s1438_s2 + $0x28] sm:$0xff]   ;;  %v1230_v5 = vld [vmem:[%s1438_s2 + $0x38] sm:$0xff]   ;;  %vm859_vm1 = vcmask 519168  }
  0x10   : > { %1131 = vmatpush3.bf16.msra.mxu0 %v1221_v0  ;;  %1143 = vmatpush3.bf16.msra.mxu1 %v1222_v1  ;;  %s1179_s5 = smul.u32 81, %s1452_s16  ;;  %v1233_v8 = vld [vmem:[%s1438_s2 + $0x20] sm:$0xff]   ;;  %v1236_v10 = vld [vmem:[%s1438_s2 + $0x30] sm:$0xff]   ;;  %s1456_s15 = smov (!%p282_p8, %s1267_s15), 7 }
  0x11   : > { %1132 = vmatprep.subr.bf16.mxu0 %v1223_v2  ;;  %1144 = vmatprep.subr.bf16.mxu1 %v1224_v3  ;;  %s1178_s9 = smul.u32 9, %s262_s30  ;;  %v1087_v45 = vld [vmem:[%s1439_s3] ss:$0 sm:$0xff] }
  0x12   : > { %s1180_s26 = smul.u32 9, %s1454_s6 }
  0x13   : > { %s265_s12 = sadd.s32 %s1179_s5, %s1178_s9  ;;  %s1017_s9 = sshll.u32 %s1452_s16, 6 }
  0x14   : > { %1133 = vmatpush3.bf16.msra.mxu0 %v1223_v2  ;;  %1145 = vmatpush3.bf16.msra.mxu1 %v1224_v3  ;;  %s1014_s13 = sshll.u32 %s265_s12, 2  ;;  %s275_s29 = sadd.s32 %s1180_s26, %s1179_s5 }
  0x15   : > { %1154 = vmatprep.subr.bf16.mxu0 %v1227_v4  ;;  %s267_s23 = scalar_lea.vmem %s1436_s0, %s1014_s13  ;;  %1166 = vmatprep.subr.bf16.mxu1 %v1230_v5  ;;  %s1015_s30 = sshll.u32 %s275_s29, 2 }
  0x16   : > { %v1225_v6 = vld [vmem:[%s267_s23 + $0x4] sm:$0xff]   ;;  %v1228_v9 = vld [vmem:[%s267_s23 + $0xc] sm:$0xff]   ;;  %v1231_v12 = vld [vmem:[%s267_s23 + $0x14] sm:$0xff]   ;;  %s277_s8 = scalar_lea.vmem %s1437_s1, %s1015_s30  ;;  %s1016_s5 = sshll.u32 %s1456_s15, 3 }
  0x17   : > { %v1226_v7 = vld [vmem:[%s267_s23] sm:$0xff]   ;;  %1134 = vmatprep.mubr.msk.bf16.mxu0 %vm361_vm0, %v1225_v6  ;;  %v1229_v11 = vld [vmem:[%s267_s23 + $0x8] sm:$0xff]   ;;  %v1232_v13 = vld [vmem:[%s267_s23 + $0x10] sm:$0xff]   ;;  %s289_s10 = sadd.s32 %s1017_s9, %s1016_s5 }
  0x18   : > { %1146 = vmatprep.mubr.msk.bf16.mxu1 %vm361_vm0, %v1226_v7  ;;  %1135 = vmatmul.mubr.msk.bf16.vlgmr.msra.gmra.mxu0 %vm361_vm0, %v1228_v9  ;;  %v1234_v14 = vld [vmem:[%s267_s23 + $0x1c] sm:$0xff]   ;;  %v1238_v17 = vld [vmem:[%s277_s8 + $0x4] sm:$0xff]   ;;  %v1240_v19 = vld [vmem:[%s277_s8 + $0xc] sm:$0xff]   ;;  %s1018_s13 = sshll.u32 %s289_s10, 2 }
  0x19   : > { %1147 = vmatmul.mubr.msk.bf16.vlgmr.msra.gmra.mxu1 %vm361_vm0, %v1229_v11  ;;  %1155 = vmatpush3.bf16.msra.mxu0 %v1227_v4  ;;  %v1235_v15 = vld [vmem:[%s267_s23 + $0x18] sm:$0xff]   ;;  %v1237_v16 = vld [vmem:[%s277_s8] sm:$0xff]   ;;  %v1239_v18 = vld [vmem:[%s277_s8 + $0x8] sm:$0xff]   ;;  %s1403_s14 = scalar_lea.vmem %s1440_s4, %s1018_s13 }
  0x1a   : > { %1167 = vmatpush3.bf16.msra.mxu1 %v1230_v5  ;;  %1138 = vmatprep.mubr.msk.bf16.mxu0 %vm361_vm0, %v1231_v12  ;;  %v1241_v20 = vld [vmem:[%s277_s8 + $0x10] sm:$0xff]   ;;  %v1243_v22 = vld [vmem:[%s277_s8 + $0x18] sm:$0xff]  }
  0x1b   : > { %1150 = vmatprep.mubr.msk.bf16.mxu1 %vm361_vm0, %v1232_v13  ;;  %1156 = vmatprep.subr.bf16.mxu0 %v1233_v8  ;;  %v1242_v21 = vld [vmem:[%s277_s8 + $0x14] sm:$0xff]   ;;  %v1244_v23 = vld [vmem:[%s277_s8 + $0x1c] sm:$0xff]  }
  0x1c   : > { %1168 = vmatprep.subr.bf16.mxu1 %v1236_v10 }
  0x1d   : > { %1157 = vmatpush3.bf16.msra.mxu0 %v1233_v8 }
  0x1e   : > { %1169 = vmatpush3.bf16.msra.mxu1 %v1236_v10 }
  0x20   : > { %1139 = vmatmul.mubr.msk.bf16.gmra.mxu0 %vm361_vm0, %v1234_v14 }
  0x21   : > { %1151 = vmatmul.mubr.msk.bf16.gmra.mxu1 %vm361_vm0, %v1235_v15  ;;  %1158 = vmatprep.mubr.msk.bf16.mxu0 %vm361_vm0, %v1237_v16 }
  0x22   : > { %1170 = vmatprep.mubr.msk.bf16.mxu1 %vm361_vm0, %v1238_v17 }
  0x28   : > { %1159 = vmatmul.mubr.msk.bf16.vlgmr.msra.gmra.mxu0 %vm361_vm0, %v1239_v18 }
  0x29   : > { %1171 = vmatmul.mubr.msk.bf16.vlgmr.msra.gmra.mxu1 %vm361_vm0, %v1240_v19  ;;  %1162 = vmatprep.mubr.msk.bf16.mxu0 %vm361_vm0, %v1241_v20 }
  0x2a   : > { %1174 = vmatprep.mubr.msk.bf16.mxu1 %vm361_vm0, %v1242_v21 }
  0x30   : > { %1163 = vmatmul.mubr.msk.bf16.gmra.mxu0 %vm361_vm0, %v1243_v22 }
  0x31   : > { %1175 = vmatmul.mubr.msk.bf16.gmra.mxu1 %vm361_vm0, %v1244_v23 }
  0xd8   : > { %v1136_v24 = vpop.f32.mrf.mxu0 }
  0xd9   : > { %v1148_v25 = vpop.f32.mrf.mxu1 }
  0xda   : > { %v408_v26 = vpop.f32.mrf.mxu0  ;;  %v526_v39 = vadd.f32 %v1148_v25, %v1136_v24 }
  0xdb   : > { %v517_v27 = vpop.f32.mrf.mxu1 }
  0xdc   : > { %v1137_v28 = vpop.f32.mrf.mxu0  ;;  %v518_v42 = vadd.f32 %v517_v27, %v408_v26 }
  0xdd   : > { %v1149_v29 = vpop.f32.mrf.mxu1 }
  0xde   : > { %v411_v30 = vpop.f32.mrf.mxu0  ;;  %v529_v47 = vadd.f32 %v1149_v29, %v1137_v28 }
  0xdf   : > { %v520_v31 = vpop.f32.mrf.mxu1 }
  0xe0   : > { %v1140_v32 = vpop.f32.mrf.mxu0  ;;  %v521_v52 = vadd.f32 %v520_v31, %v411_v30 }
  0xe1   : > { %v1152_v33 = vpop.f32.mrf.mxu1 }
  0xe2   : > { %v424_v34 = vpop.f32.mrf.mxu0  ;;  %v542_v57 = vadd.f32 %v1152_v33, %v1140_v32 }
  0xe3   : > { %v533_v35 = vpop.f32.mrf.mxu1 }
  0xe4   : > { %v1141_v36 = vpop.f32.mrf.mxu0  ;;  %v534_v0 = vadd.f32 %v533_v35, %v424_v34 }
  0xe5   : > { %v1153_v37 = vpop.f32.mrf.mxu1 }
  0xe6   : > { %v427_v38 = vpop.f32.mrf.mxu0  ;;  %v545_v7 = vadd.f32 %v1153_v37, %v1141_v36 }
  0xe7   : > { %v536_v40 = vpop.f32.mrf.mxu1 }
  0xe8   : > { %v1160_v41 = vpop.f32.mrf.mxu0  ;;  %v537_v14 = vadd.f32 %v536_v40, %v427_v38 }
  0xe9   : > { %v674_v43 = vadd.f32 %v1160_v41, %v526_v39  ;;  %v1172_v44 = vpop.f32.mrf.mxu1 }
  0xea   : > { %v641_v46 = vpop.f32.mrf.mxu0 }
  0xeb   : > { %v806_v48 = vadd.f32 %v1172_v44, %v674_v43  ;;  %v672_v49 = vadd.f32 %v641_v46, %v518_v42  ;;  %v773_v50 = vpop.f32.mrf.mxu1 }
  0xec   : > { %v1161_v51 = vpop.f32.mrf.mxu0 }
  0xed   : > { %v821_v53 = vadd.f32 %v1087_v45, %v806_v48  ;;  %v804_v54 = vadd.f32 %v773_v50, %v672_v49  ;;  %v675_v55 = vadd.f32 %v1161_v51, %v529_v47  ;;  %v1173_v56 = vpop.f32.mrf.mxu1 }
  0xee   : > { %v644_v58 = vpop.f32.mrf.mxu0 }
  0xef   : > { %v1100_v59 = vpack.c.bf16 %v821_v53, %v821_v53  ;;  %v819_v60 = vadd.f32 %v1087_v45, %v804_v54  ;;  %v807_v61 = vadd.f32 %v1173_v56, %v675_v55  ;;  %v673_v62 = vadd.f32 %v644_v58, %v521_v52  ;;  %v776_v63 = vpop.f32.mrf.mxu1 }
  0xf0   : > { %v1164_v1 = vpop.f32.mrf.mxu0 }
  0xf1   : > { %862 = vst.msk [vmem:[%s1403_s14 + $0x8] sm:$0xf] %vm859_vm1, %v1100_v59  ;;  %v1098_v2 = vpack.c.bf16 %v819_v60, %v819_v60  ;;  %v822_v3 = vadd.f32 %v1087_v45, %v807_v61  ;;  %v805_v4 = vadd.f32 %v776_v63, %v673_v62  ;;  %v678_v5 = vadd.f32 %v1164_v1, %v542_v57  ;;  %v1176_v6 = vpop.f32.mrf.mxu1 }
  0xf2   : > { %v657_v8 = vpop.f32.mrf.mxu0 }
  0xf3   : > { %860 = vst.msk [vmem:[%s1403_s14] sm:$0xf] %vm859_vm1, %v1098_v2  ;;  %v1101_v9 = vpack.c.bf16 %v822_v3, %v822_v3  ;;  %v820_v10 = vadd.f32 %v1087_v45, %v805_v4  ;;  %v810_v11 = vadd.f32 %v1176_v6, %v678_v5  ;;  %v676_v12 = vadd.f32 %v657_v8, %v534_v0  ;;  %v789_v13 = vpop.f32.mrf.mxu1 }
  0xf4   : > { %v1165_v15 = vpop.f32.mrf.mxu0 }
  0xf5   : > { %863 = vst.msk [vmem:[%s1403_s14 + $0xc] sm:$0xf] %vm859_vm1, %v1101_v9  ;;  %v1099_v16 = vpack.c.bf16 %v820_v10, %v820_v10  ;;  %v825_v17 = vadd.f32 %v1087_v45, %v810_v11  ;;  %v808_v18 = vadd.f32 %v789_v13, %v676_v12  ;;  %v679_v19 = vadd.f32 %v1165_v15, %v545_v7  ;;  %v1177_v20 = vpop.f32.mrf.mxu1 }
  0xf6   : > { %v660_v21 = vpop.f32.mrf.mxu0 }
  0xf7   : > { %861 = vst.msk [vmem:[%s1403_s14 + $0x4] sm:$0xf] %vm859_vm1, %v1099_v16  ;;  %v1104_v22 = vpack.c.bf16 %v825_v17, %v825_v17  ;;  %v823_v23 = vadd.f32 %v1087_v45, %v808_v18  ;;  %v811_v24 = vadd.f32 %v1177_v20, %v679_v19  ;;  %v677_v25 = vadd.f32 %v660_v21, %v537_v14  ;;  %v792_v26 = vpop.f32.mrf.mxu1 }
  0xf9   : > { %866 = vst.msk [vmem:[%s1403_s14 + $0x18] sm:$0xf] %vm859_vm1, %v1104_v22  ;;  %v1102_v27 = vpack.c.bf16 %v823_v23, %v823_v23  ;;  %v826_v28 = vadd.f32 %v1087_v45, %v811_v24  ;;  %v809_v29 = vadd.f32 %v792_v26, %v677_v25 }
  0xfb   : > { %864 = vst.msk [vmem:[%s1403_s14 + $0x10] sm:$0xf] %vm859_vm1, %v1102_v27  ;;  %v1105_v30 = vpack.c.bf16 %v826_v28, %v826_v28  ;;  %v824_v31 = vadd.f32 %v1087_v45, %v809_v29 }
  0xfd   : > { %867 = vst.msk [vmem:[%s1403_s14 + $0x1c] sm:$0xf] %vm859_vm1, %v1105_v30  ;;  %v1103_v32 = vpack.c.bf16 %v824_v31, %v824_v31 }
  0xff   : > { %865 = vst.msk [vmem:[%s1403_s14 + $0x14] sm:$0xf] %vm859_vm1, %v1103_v32 }
 0x100 PF: > { %s14_s19 = sadd.s32 1, %s1283_s19   ;;  %s1441_s15 = smov %s1275_s17 }
 0x101   : > { %p11_p9 = scmp.ge.s32.totalorder %s14_s19, 18   ;;  %s1442_s16 = smov %s1279_s18 }
 0x102   : > { %s1443_s17 = smov %s1446_s20  ;;  %s1444_s18 = smov %s1450_s21 }
 0x103   :  { %13 = sbr.rel (!%p11_p9) target bundleno = 3 (0x3), region = 76 }

// kernel: res_up_forward.17
= control target key start
LH: loop header
LB: loop body
LE: loop exit
PB: predicated region body
PF: predicated region fallthrough
CT: control target
= control target key end

     0   :  { %s5536_s18 = smov 0   ;;  %s5538_s19 = smov 0   ;;  %s6570_s0 = inlined_call_operand.vmem [shape: bf16[2,18,288,48], index: 0, kind: input, shape index: {}, may-alias: {0,1,2}]   ;;  %s6571_s1 = inlined_call_operand.vmem [shape: bf16[2,18,288,48], index: 1, kind: input, shape index: {}, may-alias: {0,1,2}]   ;;  %s6572_s2 = inlined_call_operand.vmem [shape: bf16[2,18,288,48], index: 2, kind: input, shape index: {}, may-alias: {0,1,2}]   ;;  %s6573_s3 = inlined_call_operand.vmem [shape: bf16[9,48,8], index: 3, kind: input, shape index: {}]   ;;  %s6574_s4 = inlined_call_operand.vmem [shape: f32[1,8], index: 4, kind: input, shape index: {}]   ;;  %s6575_s5 = inlined_call_operand.vmem [shape: bf16[2,16,256,8], index: 5, kind: output, shape index: {}]  }
   0x1   :  { %s5540_s20 = smov 0   ;;  %s5542_s21 = smov 0  }
   0x2   :  { %s5544_s22 = smov 0  }
   0x3 LB: > { %s30_s23 = sadd.s32 1, %s5496_s20  ;;  %s34_s24 = sadd.s32 1, %s5500_s21  ;;  %s5504_s22 = sphi %s5544_s22, %s15_s22   ;;  %s5500_s21 = sphi %s5542_s21, %s6661_s21   ;;  %s5496_s20 = sphi %s5540_s20, %s6660_s20   ;;  %s5492_s19 = sphi %s5538_s19, %s6659_s19   ;;  %s5488_s18 = sphi %s5536_s18, %s6658_s18  }
   0x4   : > { %p32_p0 = scmp.ge.s32.totalorder %s30_s23, 16  ;;  %p4103_p1 = scmp.ge.s32.totalorder %s5504_s22, 1 }
   0x5   : > { %p256_p2 = scmp.lt.s32.totalorder %s5504_s22, 33 }
   0x6   : > { %s6663_s23 = smov (%p32_p0, %s30_s23), 0  ;;  %s6665_s24 = smov (!%p32_p0, %s34_s24), %s5500_s21 }
   0x7   : > { %p257_p3 = pnand %p4103_p1, %p256_p2  ;;  %p36_p4 = scmp.ge.s32.totalorder %s6665_s24, 2 }
   0x9   : > { %s6667_s24 = smov (%p36_p4, %s6665_s24), 0  ;;  %260 = sbr.rel (%p257_p3) target bundleno = 515 (0x203), region = 40 }
   0xe   : > { %v5295_v0 = vld [vmem:[%s6573_s3 + $0x28] sm:$0xff]   ;;  %p316_p5 = scmp.lt.s32.totalorder %s5492_s19, 1  ;;  %v5296_v1 = vld [vmem:[%s6573_s3 + $0x20] sm:$0xff]   ;;  %p318_p6 = scmp.lt.s32.totalorder %s5488_s18, 17  ;;  %v5297_v2 = vld [vmem:[%s6573_s3 + $0x18] sm:$0xff]   ;;  %vm547_vm0 = vcmask 392192  }
   0xf   : > { %4903 = vmatprep.subr.bf16.mxu0 %v5295_v0  ;;  %5245 = vmatprep.subr.bf16.mxu1 %v5295_v0  ;;  %v5302_v3 = vld [vmem:[%s6573_s3 + $0x10] sm:$0xff]   ;;  %v5303_v4 = vld [vmem:[%s6573_s3 + $0x40] sm:$0xff]   ;;  %v5308_v7 = vld [vmem:[%s6573_s3 + $0x8] sm:$0xff]   ;;  %s325_s13 = sadd.s32 1, %s5488_s18  ;;  %s336_s17 = sadd.s32 2, %s5488_s18  ;;  %vm3894_vm1 = vcmask 60416  }
  0x10   : > { %s6669_s19 = smov (!%p316_p5, %s5492_s19), 1  ;;  %4904 = vmatpush3.bf16.msra.mxu0 %v5295_v0  ;;  %5248 = vmatpush3.bf16.msra.mxu1 %v5295_v0  ;;  %v5309_v9 = vld [vmem:[%s6573_s3 + $0x38] sm:$0xff]   ;;  %v5314_v13 = vld [vmem:[%s6573_s3] sm:$0xff]   ;;  %v5319_v14 = vld [vmem:[%s6573_s3 + $0x30] sm:$0xff]   ;;  %p328_p7 = scmp.lt.s32.totalorder %s325_s13, 17 }
  0x11   : > { %s319_s29 = scalar_select %p318_p6, %s5488_s18, 17  ;;  %4905 = vmatprep.subr.bf16.mxu0 %v5296_v1  ;;  %5246 = vmatprep.subr.bf16.mxu1 %v5296_v1  ;;  %v5324_v23 = vld [vmem:[%s6573_s3 + $0x58] sm:$0xff]   ;;  %v5325_v24 = vld [vmem:[%s6573_s3 + $0x70] sm:$0xff]   ;;  %v5339_v34 = vld [vmem:[%s6573_s3 + $0x68] sm:$0xff]  }
  0x12   : > { %s5582_s7 = smul.u32 648, %s6669_s19  ;;  %v5334_v33 = vld [vmem:[%s6573_s3 + $0x50] sm:$0xff]   ;;  %s6671_s13 = smov (!%p328_p7, %s325_s13), 17  ;;  %v5348_v39 = vld [vmem:[%s6573_s3 + $0x48] sm:$0xff]   ;;  %v5349_v40 = vld [vmem:[%s6573_s3 + $0x60] sm:$0xff]  }
  0x13   : > { %s5251_s8 = smul.u32 36, %s319_s29  ;;  %v5362_v49 = vld [vmem:[%s6573_s3 + $0x88] sm:$0xff]   ;;  %v5363_v50 = vld [vmem:[%s6573_s3 + $0xa0] sm:$0xff]   ;;  %p339_p8 = scmp.lt.s32.totalorder %s336_s17, 17 }
  0x14   : > { %4906 = vmatpush3.bf16.msra.mxu0 %v5296_v1  ;;  %5249 = vmatpush3.bf16.msra.mxu1 %v5296_v1  ;;  %s5253_s26 = smul.u32 36, %s6671_s13  ;;  %p350_p9 = scmp.lt.s32.totalorder %s5488_s18, 15 }
  0x15   : > { %s322_s9 = sadd.s32 %s5582_s7, %s5251_s8  ;;  %4907 = vmatprep.subr.bf16.mxu0 %v5297_v2  ;;  %5247 = vmatprep.subr.bf16.mxu1 %v5297_v2  ;;  %s6673_s17 = smov (!%p339_p8, %s336_s17), 17 }
  0x16   : > { %s4104_s10 = sshll.u32 %s322_s9, 2  ;;  %s332_s6 = sadd.s32 %s5253_s26, %s5582_s7 }
  0x17   : > { %s5591_s15 = scalar_lea.vmem %s6570_s0, %s4104_s10  ;;  %s4105_s8 = sshll.u32 %s332_s6, 2 }
  0x18   : > { %v5298_v5 = vld [vmem:[%s5591_s15 + $0x8] sm:$0xff]   ;;  %4908 = vmatpush3.bf16.msra.mxu0 %v5297_v2  ;;  %5250 = vmatpush3.bf16.msra.mxu1 %v5297_v2  ;;  %v5300_v8 = vld [vmem:[%s5591_s15 + $0x10] sm:$0xff]   ;;  %v5304_v11 = vld [vmem:[%s5591_s15 + $0x18] sm:$0xff]   ;;  %s5688_s11 = scalar_lea.vmem %s6571_s1, %s4105_s8  ;;  %s5254_s25 = smul.u32 36, %s6673_s17 }
  0x19   : > { %v5299_v6 = vld [vmem:[%s5591_s15 + $0x48] sm:$0xff]   ;;  %4909 = vmatprep.mubr.msk.bf16.mxu0 %vm547_vm0, %v5298_v5  ;;  %4941 = vmatprep.subr.bf16.mxu1 %v5302_v3  ;;  %v5301_v10 = vld [vmem:[%s5591_s15 + $0x50] sm:$0xff]   ;;  %v5305_v12 = vld [vmem:[%s5591_s15 + $0x58] sm:$0xff]   ;;  %s6675_s18 = smov (!%p350_p9, %s5488_s18), 15 }
  0x1a   : > { %4925 = vmatprep.mubr.msk.bf16.mxu1 %vm547_vm0, %v5299_v6  ;;  %4979 = vmatprep.subr.bf16.mxu0 %v5303_v4  ;;  %v5306_v15 = vld [vmem:[%s5591_s15 + $0x20] sm:$0xff]   ;;  %v5310_v17 = vld [vmem:[%s5591_s15 + $0x28] sm:$0xff]   ;;  %v5312_v19 = vld [vmem:[%s5591_s15 + $0x30] sm:$0xff]   ;;  %s343_s26 = sadd.s32 %s5254_s25, %s5582_s7 }
  0x1b   : > { %4910 = vmatmul.mubr.msk.bf16.vlgmr.msra.gmra.mxu0 %vm547_vm0, %v5300_v8  ;;  %4926 = vmatmul.mubr.msk.bf16.vlgmr.msra.gmra.mxu1 %vm547_vm0, %v5301_v10  ;;  %v5307_v16 = vld [vmem:[%s5591_s15 + $0x60] sm:$0xff]   ;;  %v5311_v18 = vld [vmem:[%s5591_s15 + $0x68] sm:$0xff]   ;;  %v5313_v20 = vld [vmem:[%s5591_s15 + $0x70] sm:$0xff]   ;;  %s4106_s27 = sshll.u32 %s343_s26, 2 }
  0x1c   : > { %4980 = vmatpush3.bf16.msra.mxu0 %v5303_v4  ;;  %4942 = vmatpush3.bf16.msra.mxu1 %v5302_v3  ;;  %v5315_v21 = vld [vmem:[%s5591_s15 + $0x38] sm:$0xff]   ;;  %v5317_v25 = vld [vmem:[%s5591_s15 + $0x40] sm:$0xff]   ;;  %v5321_v27 = vld [vmem:[%s5591_s15 + $0x10] sm:$0xff]   ;;  %s5740_s30 = scalar_lea.vmem %s6572_s2, %s4106_s27 }
  0x1d   : > { %4913 = vmatprep.mubr.msk.bf16.mxu0 %vm547_vm0, %v5304_v11  ;;  %4929 = vmatprep.mubr.msk.bf16.mxu1 %vm547_vm0, %v5305_v12  ;;  %v5316_v22 = vld [vmem:[%s5591_s15 + $0x78] sm:$0xff]   ;;  %v5318_v26 = vld [vmem:[%s5591_s15 + $0x80] sm:$0xff]   ;;  %v5322_v29 = vld [vmem:[%s5591_s15 + $0x8] sm:$0xff]  }
  0x1e   : > { %4943 = vmatprep.subr.bf16.mxu1 %v5308_v7  ;;  %4981 = vmatprep.subr.bf16.mxu0 %v5309_v9  ;;  %v5320_v28 = vld [vmem:[%s5591_s15] sm:$0xff]   ;;  %v5323_v30 = vld [vmem:[%s5591_s15 + $0x18] sm:$0xff]   ;;  %v5326_v31 = vld [vmem:[%s5591_s15 + $0x10] sm:$0xff]  }
  0x1f   : > { %v5327_v32 = vld [vmem:[%s5591_s15 + $0x20] sm:$0xff]   ;;  %v5328_v35 = vld [vmem:[%s5591_s15 + $0x18] sm:$0xff]   ;;  %v5329_v36 = vld [vmem:[%s5591_s15 + $0x28] sm:$0xff]  }
  0x20   : > { %4982 = vmatpush3.bf16.msra.mxu0 %v5309_v9  ;;  %4944 = vmatpush3.bf16.msra.mxu1 %v5308_v7  ;;  %v5331_v37 = vld [vmem:[%s5591_s15 + $0x30] sm:$0xff]   ;;  %v5330_v38 = vld [vmem:[%s5591_s15 + $0x20] sm:$0xff]   ;;  %v5332_v41 = vld [vmem:[%s5591_s15 + $0x28] sm:$0xff]  }
  0x21   : > { %4983 = vmatprep.subr.bf16.mxu0 %v5319_v14  ;;  %4945 = vmatprep.subr.bf16.mxu1 %v5314_v13  ;;  %v5333_v42 = vld [vmem:[%s5591_s15 + $0x38] sm:$0xff]   ;;  %v5336_v43 = vld [vmem:[%s5591_s15 + $0x40] sm:$0xff]   ;;  %v5335_v44 = vld [vmem:[%s5591_s15 + $0x30] sm:$0xff]  }
  0x22   : > { %v5337_v45 = vld [vmem:[%s5591_s15 + $0x38] sm:$0xff]   ;;  %v5338_v46 = vld [vmem:[%s5591_s15 + $0x48] sm:$0xff]   ;;  %v5340_v47 = vld [vmem:[%s5591_s15 + $0x40] sm:$0xff]  }
  0x23   : > { %4914 = vmatmul.mubr.msk.bf16.gmra.mxu0 %vm547_vm0, %v5306_v15  ;;  %4930 = vmatmul.mubr.msk.bf16.gmra.mxu1 %vm547_vm0, %v5307_v16  ;;  %v5341_v48 = vld [vmem:[%s5591_s15 + $0x50] sm:$0xff]   ;;  %v5342_v51 = vld [vmem:[%s5591_s15 + $0x48] sm:$0xff]   ;;  %v5343_v52 = vld [vmem:[%s5591_s15 + $0x58] sm:$0xff]  }
  0x24   : > { %4917 = vmatprep.mubr.msk.bf16.mxu0 %vm547_vm0, %v5310_v17  ;;  %4933 = vmatprep.mubr.msk.bf16.mxu1 %vm547_vm0, %v5311_v18  ;;  %v5345_v53 = vld [vmem:[%s5591_s15 + $0x60] sm:$0xff]   ;;  %v5344_v54 = vld [vmem:[%s5591_s15 + $0x50] sm:$0xff]   ;;  %v5346_v55 = vld [vmem:[%s5591_s15 + $0x58] sm:$0xff]  }
  0x25   : > { %4946 = vmatpush3.bf16.msra.mxu1 %v5314_v13  ;;  %4984 = vmatpush3.bf16.msra.mxu0 %v5319_v14  ;;  %v5347_v56 = vld [vmem:[%s5591_s15 + $0x68] sm:$0xff]   ;;  %v5351_v57 = vld [vmem:[%s5591_s15 + $0x70] sm:$0xff]   ;;  %v5350_v58 = vld [vmem:[%s5591_s15 + $0x60] sm:$0xff]  }
  0x26   : > { %5017 = vmatprep.subr.bf16.mxu1 %v5324_v23  ;;  %5055 = vmatprep.subr.bf16.mxu0 %v5325_v24  ;;  %v5352_v59 = vld [vmem:[%s5591_s15 + $0x68] sm:$0xff]   ;;  %v5353_v60 = vld [vmem:[%s5591_s15 + $0x78] sm:$0xff]   ;;  %v5355_v61 = vld [vmem:[%s5591_s15 + $0x80] sm:$0xff]  }
  0x27   : > { %v5354_v62 = vld [vmem:[%s5591_s15 + $0x70] sm:$0xff]   ;;  %v5356_v63 = vld [vmem:[%s5591_s15 + $0x78] sm:$0xff]   ;;  %v5357_v0 = vld [vmem:[%s5591_s15 + $0x88] sm:$0xff]  }
  0x28   : > { %v5359_v1 = vld [vmem:[%s5688_s11 + $0x8] sm:$0xff]   ;;  %v5358_v2 = vld [vmem:[%s5688_s11] sm:$0xff]   ;;  %v5361_v4 = vld [vmem:[%s5688_s11 + $0x10] sm:$0xff]  }
  0x29   : > { %v5360_v3 = vld [vmem:[%s5688_s11 + $0x8] sm:$0xff]   ;;  %v5364_v5 = vld [vmem:[%s5688_s11 + $0x10] sm:$0xff]   ;;  %v5365_v6 = vld [vmem:[%s5688_s11 + $0x18] sm:$0xff]  }
  0x2a   : > { %v5372_v7 = vld [vmem:[%s6573_s3 + $0x80] sm:$0xff]   ;;  %v5377_v8 = vld [vmem:[%s6573_s3 + $0x98] sm:$0xff]   ;;  %v5387_v9 = vld [vmem:[%s6573_s3 + $0x90] sm:$0xff]  }
  0x2b   : > { %4918 = vmatmul.mubr.msk.bf16.gmra.mxu0 %vm547_vm0, %v5312_v19  ;;  %4934 = vmatmul.mubr.msk.bf16.gmra.mxu1 %vm547_vm0, %v5313_v20  ;;  %v5366_v10 = vld [vmem:[%s5688_s11 + $0x18] sm:$0xff]   ;;  %v5367_v12 = vld [vmem:[%s5688_s11 + $0x20] sm:$0xff]   ;;  %v5369_v13 = vld [vmem:[%s5688_s11 + $0x28] sm:$0xff]  }
  0x2c   : > { %4921 = vmatprep.mubr.msk.bf16.mxu0 %vm547_vm0, %v5315_v21  ;;  %4937 = vmatprep.mubr.msk.bf16.mxu1 %vm547_vm0, %v5316_v22  ;;  %v5386_v11 = vld [vmem:[%s6573_s3 + $0x78] sm:$0xff]   ;;  %v5368_v14 = vld [vmem:[%s5688_s11 + $0x20] sm:$0xff]   ;;  %v5779_v16 = vld [vmem:[%s6573_s3 + $0xd0] sm:$0xff]  }
  0x2d   : > { %v5773_v15 = vld [vmem:[%s6573_s3 + $0xb8] sm:$0xff]   ;;  %v5370_v17 = vld [vmem:[%s5688_s11 + $0x28] sm:$0xff]   ;;  %v5371_v18 = vld [vmem:[%s5688_s11 + $0x30] sm:$0xff]  }
  0x2e   : > { %v5374_v19 = vld [vmem:[%s5688_s11 + $0x38] sm:$0xff]   ;;  %v5373_v20 = vld [vmem:[%s5688_s11 + $0x30] sm:$0xff]   ;;  %v5376_v22 = vld [vmem:[%s5688_s11 + $0x40] sm:$0xff]  }
  0x2f   : > { %v5375_v21 = vld [vmem:[%s5688_s11 + $0x38] sm:$0xff]  }
  0x33   : > { %4922 = vmatmul.mubr.msk.bf16.gmra.mxu0 %vm547_vm0, %v5317_v25  ;;  %4938 = vmatmul.mubr.msk.bf16.gmra.mxu1 %vm547_vm0, %v5318_v26  ;;  %v5380_v25 = vld [vmem:[%s5688_s11 + $0x48] sm:$0xff]   ;;  %v5381_v26 = vld [vmem:[%s5688_s11 + $0x50] sm:$0xff]  }
  0x34   : > { %4985 = vmatprep.mubr.msk.bf16.mxu0 %vm547_vm0, %v5321_v27  ;;  %4947 = vmatprep.mubr.msk.bf16.mxu1 %vm547_vm0, %v5320_v28  ;;  %v5383_v27 = vld [vmem:[%s5688_s11 + $0x58] sm:$0xff]   ;;  %v5382_v28 = vld [vmem:[%s5688_s11 + $0x50] sm:$0xff]  }
  0x3b   : > { %4986 = vmatmul.mubr.msk.bf16.vlgmr.msra.gmra.mxu0 %vm547_vm0, %v5323_v30  ;;  %4948 = vmatmul.mubr.msk.bf16.vlgmr.msra.gmra.mxu1 %vm547_vm0, %v5322_v29  ;;  %v5384_v29 = vld [vmem:[%s5688_s11 + $0x58] sm:$0xff]   ;;  %v5385_v30 = vld [vmem:[%s5688_s11 + $0x60] sm:$0xff]  }
  0x3c   : > { %5056 = vmatpush3.bf16.msra.mxu0 %v5325_v24  ;;  %5018 = vmatpush3.bf16.msra.mxu1 %v5324_v23  ;;  %v5379_v23 = vld [vmem:[%s5688_s11 + $0x48] sm:$0xff]   ;;  %v5378_v24 = vld [vmem:[%s5688_s11 + $0x40] sm:$0xff]  }
  0x3d   : > { %4951 = vmatprep.mubr.msk.bf16.mxu1 %vm547_vm0, %v5326_v31  ;;  %4989 = vmatprep.mubr.msk.bf16.mxu0 %vm547_vm0, %v5327_v32  ;;  %v5389_v31 = vld [vmem:[%s5688_s11 + $0x68] sm:$0xff]   ;;  %v5388_v32 = vld [vmem:[%s5688_s11 + $0x60] sm:$0xff]  }
  0x3e   : > { %5019 = vmatprep.subr.bf16.mxu1 %v5334_v33  ;;  %5057 = vmatprep.subr.bf16.mxu0 %v5339_v34 }
  0x40   : > { %5058 = vmatpush3.bf16.msra.mxu0 %v5339_v34  ;;  %5020 = vmatpush3.bf16.msra.mxu1 %v5334_v33  ;;  %v5390_v33 = vld [vmem:[%s5688_s11 + $0x68] sm:$0xff]   ;;  %v5391_v34 = vld [vmem:[%s5688_s11 + $0x70] sm:$0xff]  }
  0x41   : > { %5021 = vmatprep.subr.bf16.mxu1 %v5348_v39  ;;  %5059 = vmatprep.subr.bf16.mxu0 %v5349_v40 }
  0x43   : > { %4990 = vmatmul.mubr.msk.bf16.gmra.mxu0 %vm547_vm0, %v5329_v36  ;;  %4952 = vmatmul.mubr.msk.bf16.gmra.mxu1 %vm547_vm0, %v5328_v35  ;;  %v5393_v35 = vld [vmem:[%s5688_s11 + $0x78] sm:$0xff]   ;;  %v5392_v36 = vld [vmem:[%s5688_s11 + $0x70] sm:$0xff]  }
  0x44   : > { %4993 = vmatprep.mubr.msk.bf16.mxu0 %vm547_vm0, %v5331_v37  ;;  %4955 = vmatprep.mubr.msk.bf16.mxu1 %vm547_vm0, %v5330_v38  ;;  %v5394_v37 = vld [vmem:[%s5688_s11 + $0x78] sm:$0xff]   ;;  %v5395_v38 = vld [vmem:[%s5688_s11 + $0x80] sm:$0xff]  }
  0x45   : > { %5022 = vmatpush3.bf16.msra.mxu1 %v5348_v39  ;;  %5060 = vmatpush3.bf16.msra.mxu0 %v5349_v40  ;;  %v5397_v39 = vld [vmem:[%s5740_s30] sm:$0xff]   ;;  %v5396_v40 = vld [vmem:[%s5688_s11 + $0x10] sm:$0xff]  }
  0x46   : > { %5093 = vmatprep.subr.bf16.mxu1 %v5362_v49  ;;  %5131 = vmatprep.subr.bf16.mxu0 %v5363_v50 }
  0x4b   : > { %4994 = vmatmul.mubr.msk.bf16.gmra.mxu0 %vm547_vm0, %v5333_v42  ;;  %4956 = vmatmul.mubr.msk.bf16.gmra.mxu1 %vm547_vm0, %v5332_v41  ;;  %v5399_v41 = vld [vmem:[%s5740_s30 + $0x8] sm:$0xff]   ;;  %v5398_v42 = vld [vmem:[%s5688_s11 + $0x18] sm:$0xff]  }
  0x4c   : > { %4997 = vmatprep.mubr.msk.bf16.mxu0 %vm547_vm0, %v5336_v43  ;;  %4959 = vmatprep.mubr.msk.bf16.mxu1 %vm547_vm0, %v5335_v44  ;;  %v5402_v43 = vld [vmem:[%s5688_s11 + $0x20] sm:$0xff]   ;;  %v5403_v44 = vld [vmem:[%s5740_s30 + $0x10] sm:$0xff]  }
  0x53   : > { %4998 = vmatmul.mubr.msk.bf16.gmra.mxu0 %vm547_vm0, %v5338_v46  ;;  %4960 = vmatmul.mubr.msk.bf16.gmra.mxu1 %vm547_vm0, %v5337_v45  ;;  %v5410_v45 = vld [vmem:[%s6573_s3 + $0xb0] sm:$0xff]   ;;  %v5415_v46 = vld [vmem:[%s6573_s3 + $0xc8] sm:$0xff]  }
  0x54   : > { %5001 = vmatprep.mubr.msk.bf16.mxu0 %vm547_vm0, %v5341_v48  ;;  %4963 = vmatprep.mubr.msk.bf16.mxu1 %vm547_vm0, %v5340_v47  ;;  %v5425_v47 = vld [vmem:[%s6573_s3 + $0xc0] sm:$0xff]   ;;  %v5424_v48 = vld [vmem:[%s6573_s3 + $0xa8] sm:$0xff]  }
  0x5b   : > { %5002 = vmatmul.mubr.msk.bf16.gmra.mxu0 %vm547_vm0, %v5343_v52  ;;  %4964 = vmatmul.mubr.msk.bf16.gmra.mxu1 %vm547_vm0, %v5342_v51  ;;  %v5407_v51 = vld [vmem:[%s5740_s30 + $0x20] sm:$0xff]   ;;  %v5406_v52 = vld [vmem:[%s5688_s11 + $0x30] sm:$0xff]  }
  0x5c   : > { %5005 = vmatprep.mubr.msk.bf16.mxu0 %vm547_vm0, %v5345_v53  ;;  %4967 = vmatprep.mubr.msk.bf16.mxu1 %vm547_vm0, %v5344_v54  ;;  %v5409_v53 = vld [vmem:[%s5740_s30 + $0x28] sm:$0xff]   ;;  %v5408_v54 = vld [vmem:[%s5688_s11 + $0x38] sm:$0xff]  }
  0x63   : > { %5006 = vmatmul.mubr.msk.bf16.gmra.mxu0 %vm547_vm0, %v5347_v56  ;;  %4968 = vmatmul.mubr.msk.bf16.gmra.mxu1 %vm547_vm0, %v5346_v55  ;;  %v5412_v55 = vld [vmem:[%s5740_s30 + $0x30] sm:$0xff]   ;;  %v5411_v56 = vld [vmem:[%s5688_s11 + $0x40] sm:$0xff]  }
  0x64   : > { %5009 = vmatprep.mubr.msk.bf16.mxu0 %vm547_vm0, %v5351_v57  ;;  %4971 = vmatprep.mubr.msk.bf16.mxu1 %vm547_vm0, %v5350_v58  ;;  %v5414_v57 = vld [vmem:[%s5740_s30 + $0x38] sm:$0xff]   ;;  %v5413_v58 = vld [vmem:[%s5688_s11 + $0x48] sm:$0xff]  }
  0x6b   : > { %5010 = vmatmul.mubr.msk.bf16.gmra.mxu0 %vm547_vm0, %v5353_v60  ;;  %4972 = vmatmul.mubr.msk.bf16.gmra.mxu1 %vm547_vm0, %v5352_v59  ;;  %v5417_v59 = vld [vmem:[%s5740_s30 + $0x40] sm:$0xff]   ;;  %v5416_v60 = vld [vmem:[%s5688_s11 + $0x50] sm:$0xff]  }
  0x6c   : > { %5013 = vmatprep.mubr.msk.bf16.mxu0 %vm547_vm0, %v5355_v61  ;;  %4975 = vmatprep.mubr.msk.bf16.mxu1 %vm547_vm0, %v5354_v62  ;;  %v5419_v61 = vld [vmem:[%s5740_s30 + $0x48] sm:$0xff]   ;;  %v5418_v62 = vld [vmem:[%s5688_s11 + $0x58] sm:$0xff]  }
  0x73   : > { %5014 = vmatmul.mubr.msk.bf16.gmra.mxu0 %vm547_vm0, %v5357_v0  ;;  %4976 = vmatmul.mubr.msk.bf16.gmra.mxu1 %vm547_vm0, %v5356_v63  ;;  %v5421_v63 = vld [vmem:[%s5740_s30 + $0x50] sm:$0xff]   ;;  %v5420_v0 = vld [vmem:[%s5688_s11 + $0x60] sm:$0xff]  }
  0x74   : > { %5061 = vmatprep.mubr.msk.bf16.mxu0 %vm547_vm0, %v5359_v1  ;;  %5023 = vmatprep.mubr.msk.bf16.mxu1 %vm547_vm0, %v5358_v2 }
  0x7b   : > { %5062 = vmatmul.mubr.msk.bf16.vlgmr.msra.gmra.mxu0 %vm547_vm0, %v5361_v4  ;;  %5024 = vmatmul.mubr.msk.bf16.vlgmr.msra.gmra.mxu1 %vm547_vm0, %v5360_v3 }
  0x7c   : > { %5132 = vmatpush3.bf16.msra.mxu0 %v5363_v50  ;;  %5094 = vmatpush3.bf16.msra.mxu1 %v5362_v49  ;;  %v5405_v49 = vld [vmem:[%s5740_s30 + $0x18] sm:$0xff]   ;;  %v5404_v50 = vld [vmem:[%s5688_s11 + $0x28] sm:$0xff]  }
  0x7d   : > { %5027 = vmatprep.mubr.msk.bf16.mxu1 %vm547_vm0, %v5364_v5  ;;  %5065 = vmatprep.mubr.msk.bf16.mxu0 %vm547_vm0, %v5365_v6  ;;  %v5423_v6 = vld [vmem:[%s5740_s30 + $0x58] sm:$0xff]  }
  0x7e   : > { %5095 = vmatprep.subr.bf16.mxu1 %v5372_v7  ;;  %5133 = vmatprep.subr.bf16.mxu0 %v5377_v8 }
  0x80   : > { %5134 = vmatpush3.bf16.msra.mxu0 %v5377_v8  ;;  %5096 = vmatpush3.bf16.msra.mxu1 %v5372_v7  ;;  %v5422_v8 = vld [vmem:[%s5688_s11 + $0x68] sm:$0xff]  }
  0x81   : > { %5135 = vmatprep.subr.bf16.mxu0 %v5387_v9  ;;  %5097 = vmatprep.subr.bf16.mxu1 %v5386_v11 }
  0x83   : > { %5066 = vmatmul.mubr.msk.bf16.gmra.mxu0 %vm547_vm0, %v5367_v12  ;;  %5028 = vmatmul.mubr.msk.bf16.gmra.mxu1 %vm547_vm0, %v5366_v10 }
  0x84   : > { %5069 = vmatprep.mubr.msk.bf16.mxu0 %vm547_vm0, %v5369_v13  ;;  %5031 = vmatprep.mubr.msk.bf16.mxu1 %vm547_vm0, %v5368_v14 }
  0x85   : > { %5098 = vmatpush3.bf16.msra.mxu1 %v5386_v11  ;;  %5136 = vmatpush3.bf16.msra.mxu0 %v5387_v9  ;;  %v5427_v9 = vld [vmem:[%s5740_s30 + $0x60] sm:$0xff]   ;;  %v5426_v11 = vld [vmem:[%s5688_s11 + $0x70] sm:$0xff]  }
  0x86   : > { %5169 = vmatprep.subr.bf16.mxu1 %v5773_v15  ;;  %5207 = vmatprep.subr.bf16.mxu0 %v5779_v16 }
  0x8b   : > { %5070 = vmatmul.mubr.msk.bf16.gmra.mxu0 %vm547_vm0, %v5371_v18  ;;  %5032 = vmatmul.mubr.msk.bf16.gmra.mxu1 %vm547_vm0, %v5370_v17  ;;  %v5429_v18 = vld [vmem:[%s5740_s30 + $0x68] sm:$0xff]  }
  0x8c   : > { %5073 = vmatprep.mubr.msk.bf16.mxu0 %vm547_vm0, %v5374_v19  ;;  %5035 = vmatprep.mubr.msk.bf16.mxu1 %vm547_vm0, %v5373_v20  ;;  %v5428_v20 = vld [vmem:[%s5688_s11 + $0x78] sm:$0xff]  }
  0x93   : > { %5074 = vmatmul.mubr.msk.bf16.gmra.mxu0 %vm547_vm0, %v5376_v22  ;;  %5036 = vmatmul.mubr.msk.bf16.gmra.mxu1 %vm547_vm0, %v5375_v21  ;;  %v5431_v21 = vld [vmem:[%s5740_s30 + $0x70] sm:$0xff]  }
  0x94   : > { %5077 = vmatprep.mubr.msk.bf16.mxu0 %vm547_vm0, %v5379_v23  ;;  %5039 = vmatprep.mubr.msk.bf16.mxu1 %vm547_vm0, %v5378_v24  ;;  %v5430_v23 = vld [vmem:[%s5688_s11 + $0x80] sm:$0xff]  }
  0x9b   : > { %5078 = vmatmul.mubr.msk.bf16.gmra.mxu0 %vm547_vm0, %v5381_v26  ;;  %5040 = vmatmul.mubr.msk.bf16.gmra.mxu1 %vm547_vm0, %v5380_v25 }
  0x9c   : > { %5081 = vmatprep.mubr.msk.bf16.mxu0 %vm547_vm0, %v5383_v27  ;;  %5043 = vmatprep.mubr.msk.bf16.mxu1 %vm547_vm0, %v5382_v28 }
  0xa3   : > { %5082 = vmatmul.mubr.msk.bf16.gmra.mxu0 %vm547_vm0, %v5385_v30  ;;  %5044 = vmatmul.mubr.msk.bf16.gmra.mxu1 %vm547_vm0, %v5384_v29  ;;  %v5433_v30 = vld [vmem:[%s5740_s30 + $0x78] sm:$0xff]  }
  0xa4   : > { %5085 = vmatprep.mubr.msk.bf16.mxu0 %vm547_vm0, %v5389_v31  ;;  %5047 = vmatprep.mubr.msk.bf16.mxu1 %vm547_vm0, %v5388_v32  ;;  %v5432_v32 = vld [vmem:[%s5688_s11 + $0x88] sm:$0xff]   ;;  %s4107_s11 = sshll.u32 %s6675_s18, 5 }
  0xab   : > { %5086 = vmatmul.mubr.msk.bf16.gmra.mxu0 %vm547_vm0, %v5391_v34  ;;  %5048 = vmatmul.mubr.msk.bf16.gmra.mxu1 %vm547_vm0, %v5390_v33  ;;  %v5435_v33 = vld [vmem:[%s5740_s30 + $0x10] sm:$0xff]  }
  0xac   : > { %5089 = vmatprep.mubr.msk.bf16.mxu0 %vm547_vm0, %v5393_v35  ;;  %5051 = vmatprep.mubr.msk.bf16.mxu1 %vm547_vm0, %v5392_v36  ;;  %v5434_v35 = vld [vmem:[%s5740_s30 + $0x8] sm:$0xff]  }
  0xb3   : > { %5090 = vmatmul.mubr.msk.bf16.gmra.mxu0 %vm547_vm0, %v5395_v38  ;;  %5052 = vmatmul.mubr.msk.bf16.gmra.mxu1 %vm547_vm0, %v5394_v37 }
  0xb4   : > { %5137 = vmatprep.mubr.msk.bf16.mxu0 %vm547_vm0, %v5397_v39  ;;  %5099 = vmatprep.mubr.msk.bf16.mxu1 %vm547_vm0, %v5396_v40 }
  0xbb   : > { %5138 = vmatmul.mubr.msk.bf16.vlgmr.msra.gmra.mxu0 %vm547_vm0, %v5399_v41  ;;  %5100 = vmatmul.mubr.msk.bf16.vlgmr.msra.gmra.mxu1 %vm547_vm0, %v5398_v42  ;;  %v5437_v42 = vld [vmem:[%s5740_s30 + $0x18] sm:$0xff]  }
  0xbc   : > { %5208 = vmatpush3.bf16.msra.mxu0 %v5779_v16  ;;  %5170 = vmatpush3.bf16.msra.mxu1 %v5773_v15 }
  0xbd   : > { %5103 = vmatprep.mubr.msk.bf16.mxu1 %vm547_vm0, %v5402_v43  ;;  %5141 = vmatprep.mubr.msk.bf16.mxu0 %vm547_vm0, %v5403_v44  ;;  %v5436_v44 = vld [vmem:[%s5740_s30 + $0x10] sm:$0xff]  }
  0xbe   : > { %5171 = vmatprep.subr.bf16.mxu1 %v5410_v45  ;;  %5209 = vmatprep.subr.bf16.mxu0 %v5415_v46 }
  0xc0   : > { %5210 = vmatpush3.bf16.msra.mxu0 %v5415_v46  ;;  %5172 = vmatpush3.bf16.msra.mxu1 %v5410_v45  ;;  %v5439_v45 = vld [vmem:[%s5740_s30 + $0x20] sm:$0xff]  }
  0xc1   : > { %5211 = vmatprep.subr.bf16.mxu0 %v5425_v47  ;;  %5173 = vmatprep.subr.bf16.mxu1 %v5424_v48 }
  0xc3   : > { %5142 = vmatmul.mubr.msk.bf16.gmra.mxu0 %vm547_vm0, %v5405_v49  ;;  %5104 = vmatmul.mubr.msk.bf16.gmra.mxu1 %vm547_vm0, %v5404_v50 }
  0xc4   : > { %5145 = vmatprep.mubr.msk.bf16.mxu0 %vm547_vm0, %v5407_v51  ;;  %5107 = vmatprep.mubr.msk.bf16.mxu1 %vm547_vm0, %v5406_v52 }
  0xc5   : > { %5174 = vmatpush3.bf16.msra.mxu1 %v5424_v48  ;;  %5212 = vmatpush3.bf16.msra.mxu0 %v5425_v47  ;;  %v5438_v47 = vld [vmem:[%s5740_s30 + $0x18] sm:$0xff]  }
  0xcb   : > { %5146 = vmatmul.mubr.msk.bf16.gmra.mxu0 %vm547_vm0, %v5409_v53  ;;  %5108 = vmatmul.mubr.msk.bf16.gmra.mxu1 %vm547_vm0, %v5408_v54 }
  0xcc   : > { %5149 = vmatprep.mubr.msk.bf16.mxu0 %vm547_vm0, %v5412_v55  ;;  %5111 = vmatprep.mubr.msk.bf16.mxu1 %vm547_vm0, %v5411_v56 }
  0xd3   : > { %5150 = vmatmul.mubr.msk.bf16.gmra.mxu0 %vm547_vm0, %v5414_v57  ;;  %5112 = vmatmul.mubr.msk.bf16.gmra.mxu1 %vm547_vm0, %v5413_v58  ;;  %v5441_v57 = vld [vmem:[%s5740_s30 + $0x28] sm:$0xff]  }
  0xd4   : > { %5153 = vmatprep.mubr.msk.bf16.mxu0 %vm547_vm0, %v5417_v59  ;;  %5115 = vmatprep.mubr.msk.bf16.mxu1 %vm547_vm0, %v5416_v60  ;;  %v5440_v59 = vld [vmem:[%s5740_s30 + $0x20] sm:$0xff]   ;;  %v5443_v60 = vld [vmem:[%s5740_s30 + $0x30] sm:$0xff]  }
  0xdb   : > { %v5884_v1 = vpop.f32.mrf.mxu0  ;;  %5154 = vmatmul.mubr.msk.bf16.gmra.mxu0 %vm547_vm0, %v5419_v61  ;;  %v5887_v2 = vpop.f32.mrf.mxu1  ;;  %5116 = vmatmul.mubr.msk.bf16.gmra.mxu1 %vm547_vm0, %v5418_v62 }
  0xdc   : > { %5157 = vmatprep.mubr.msk.bf16.mxu0 %vm547_vm0, %v5421_v63  ;;  %5119 = vmatprep.mubr.msk.bf16.mxu1 %vm547_vm0, %v5420_v0  ;;  %v5442_v0 = vld [vmem:[%s5740_s30 + $0x28] sm:$0xff]  }
  0xdd   : > { %v5891_v3 = vpop.f32.mrf.mxu0  ;;  %v5894_v4 = vpop.f32.mrf.mxu1 }
  0xdf   : > { %v5896_v5 = vpop.f32.mrf.mxu0  ;;  %v5899_v7 = vpop.f32.mrf.mxu1 }
  0xe1   : > { %v5903_v10 = vpop.f32.mrf.mxu0  ;;  %v5906_v12 = vpop.f32.mrf.mxu1 }
  0xe3   : > { %v5908_v13 = vpop.f32.mrf.mxu0  ;;  %5158 = vmatmul.mubr.msk.bf16.gmra.mxu0 %vm547_vm0, %v5423_v6  ;;  %v5911_v14 = vpop.f32.mrf.mxu1  ;;  %5120 = vmatmul.mubr.msk.bf16.gmra.mxu1 %vm547_vm0, %v5422_v8 }
  0xe4   : > { %5161 = vmatprep.mubr.msk.bf16.mxu0 %vm547_vm0, %v5427_v9  ;;  %5123 = vmatprep.mubr.msk.bf16.mxu1 %vm547_vm0, %v5426_v11 }
  0xe5   : > { %v5915_v15 = vpop.f32.mrf.mxu0  ;;  %v5918_v16 = vpop.f32.mrf.mxu1 }
  0xe7   : > { %v5920_v17 = vpop.f32.mrf.mxu0  ;;  %v5923_v19 = vpop.f32.mrf.mxu1 }
  0xe9   : > { %v5927_v22 = vpop.f32.mrf.mxu0  ;;  %v5930_v24 = vpop.f32.mrf.mxu1 }
  0xeb   : > { %v5932_v25 = vpop.f32.mrf.mxu0  ;;  %5162 = vmatmul.mubr.msk.bf16.gmra.mxu0 %vm547_vm0, %v5429_v18  ;;  %v5935_v26 = vpop.f32.mrf.mxu1  ;;  %5124 = vmatmul.mubr.msk.bf16.gmra.mxu1 %vm547_vm0, %v5428_v20 }
  0xec   : > { %5165 = vmatprep.mubr.msk.bf16.mxu0 %vm547_vm0, %v5431_v21  ;;  %5127 = vmatprep.mubr.msk.bf16.mxu1 %vm547_vm0, %v5430_v23 }
  0xed   : > { %v5939_v27 = vpop.f32.mrf.mxu0  ;;  %v5942_v28 = vpop.f32.mrf.mxu1 }
  0xef   : > { %v5944_v29 = vpop.f32.mrf.mxu0  ;;  %v5947_v31 = vpop.f32.mrf.mxu1 }
  0xf1   : > { %v5951_v34 = vpop.f32.mrf.mxu0  ;;  %v5954_v36 = vpop.f32.mrf.mxu1 }
  0xf3   : > { %v5956_v37 = vpop.f32.mrf.mxu0  ;;  %5166 = vmatmul.mubr.msk.bf16.gmra.mxu0 %vm547_vm0, %v5433_v30  ;;  %v5959_v38 = vpop.f32.mrf.mxu1  ;;  %5128 = vmatmul.mubr.msk.bf16.gmra.mxu1 %vm547_vm0, %v5432_v32  ;;  %v5445_v30 = vld [vmem:[%s5740_s30 + $0x38] sm:$0xff]  }
  0xf4   : > { %5213 = vmatprep.mubr.msk.bf16.mxu0 %vm547_vm0, %v5435_v33  ;;  %5175 = vmatprep.mubr.msk.bf16.mxu1 %vm547_vm0, %v5434_v35  ;;  %v5444_v33 = vld [vmem:[%s5740_s30 + $0x30] sm:$0xff]   ;;  %v5447_v35 = vld [vmem:[%s5740_s30 + $0x40] sm:$0xff]  }
  0xf5   : > { %v5963_v39 = vpop.f32.mrf.mxu0  ;;  %v5966_v40 = vpop.f32.mrf.mxu1 }
  0xf7   : > { %v5968_v41 = vpop.f32.mrf.mxu0  ;;  %v5971_v43 = vpop.f32.mrf.mxu1 }
  0xf9   : > { %v5975_v46 = vpop.f32.mrf.mxu0  ;;  %v5978_v48 = vpop.f32.mrf.mxu1 }
  0xfb   : > { %v4987_v49 = vpop.f32.mrf.mxu0  ;;  %5214 = vmatmul.mubr.msk.bf16.vlgmr.msra.gmra.mxu0 %vm547_vm0, %v5437_v42  ;;  %v4949_v50 = vpop.f32.mrf.mxu1  ;;  %5176 = vmatmul.mubr.msk.bf16.vlgmr.msra.gmra.mxu1 %vm547_vm0, %v5436_v44 }
  0xfc   : > { %5217 = vmatprep.mubr.msk.bf16.mxu0 %vm547_vm0, %v5439_v45  ;;  %v946_v51 = vadd.f32 %v4949_v50, %v5884_v1  ;;  %5179 = vmatprep.mubr.msk.bf16.mxu1 %vm547_vm0, %v5438_v47  ;;  %v5446_v47 = vld [vmem:[%s5740_s30 + $0x38] sm:$0xff]  }
  0xfd   : > { %v1288_v52 = vpop.f32.mrf.mxu0  ;;  %v937_v53 = vpop.f32.mrf.mxu1 }
  0xfe   : > { %v5985_v54 = vadd.f32 %v4987_v49, %v946_v51  ;;  %v938_v55 = vadd.f32 %v937_v53, %v5891_v3 }
  0xff   : > { %v4988_v56 = vpop.f32.mrf.mxu0  ;;  %v4950_v58 = vpop.f32.mrf.mxu1 }
 0x100   : > { %v5991_v61 = vadd.f32 %v1288_v52, %v938_v55  ;;  %v949_v62 = vadd.f32 %v4950_v58, %v5896_v5  ;;  %v5449_v58 = vld [vmem:[%s5740_s30 + $0x48] sm:$0xff]  }
 0x101   : > { %v1291_v63 = vpop.f32.mrf.mxu0  ;;  %v940_v1 = vpop.f32.mrf.mxu1 }
 0x102   : > { %v5995_v6 = vadd.f32 %v4988_v56, %v949_v62  ;;  %v941_v8 = vadd.f32 %v940_v1, %v5903_v10  ;;  %v5451_v62 = vld [vmem:[%s5740_s30 + $0x50] sm:$0xff]  }
 0x103   : > { %v4991_v9 = vpop.f32.mrf.mxu0  ;;  %5218 = vmatmul.mubr.msk.bf16.gmra.mxu0 %vm547_vm0, %v5441_v57  ;;  %v4953_v3 = vpop.f32.mrf.mxu1  ;;  %5180 = vmatmul.mubr.msk.bf16.gmra.mxu1 %vm547_vm0, %v5440_v59 }
 0x104   : > { %5221 = vmatprep.mubr.msk.bf16.mxu0 %vm547_vm0, %v5443_v60  ;;  %v6001_v5 = vadd.f32 %v1291_v63, %v941_v8  ;;  %v962_v11 = vadd.f32 %v4953_v3, %v5908_v13  ;;  %5183 = vmatprep.mubr.msk.bf16.mxu1 %vm547_vm0, %v5442_v0  ;;  %v5448_v60 = vld [vmem:[%s5740_s30 + $0x40] sm:$0xff]   ;;  %v5450_v8 = vld [vmem:[%s5740_s30 + $0x48] sm:$0xff]  }
 0x105   : > { %v1304_v18 = vpop.f32.mrf.mxu0  ;;  %v953_v20 = vpop.f32.mrf.mxu1 }
 0x106   : > { %v6005_v10 = vadd.f32 %v4991_v9, %v962_v11  ;;  %v954_v21 = vadd.f32 %v953_v20, %v5915_v15 }
 0x107   : > { %v4992_v23 = vpop.f32.mrf.mxu0  ;;  %v4954_v32 = vpop.f32.mrf.mxu1 }
 0x108   : > { %v6011_v42 = vadd.f32 %v1304_v18, %v954_v21  ;;  %v965_v44 = vadd.f32 %v4954_v32, %v5920_v17  ;;  %v5453_v32 = vld [vmem:[%s5740_s30 + $0x58] sm:$0xff]  }
 0x109   : > { %v1307_v45 = vpop.f32.mrf.mxu0  ;;  %v956_v13 = vpop.f32.mrf.mxu1 }
 0x10a   : > { %v6015_v49 = vadd.f32 %v4992_v23, %v965_v44  ;;  %v957_v50 = vadd.f32 %v956_v13, %v5927_v22  ;;  %v5455_v44 = vld [vmem:[%s5740_s30 + $0x60] sm:$0xff]  }
 0x10b   : > { %v4995_v51 = vpop.f32.mrf.mxu0  ;;  %5222 = vmatmul.mubr.msk.bf16.gmra.mxu0 %vm547_vm0, %v5445_v30  ;;  %v4957_v15 = vpop.f32.mrf.mxu1  ;;  %5184 = vmatmul.mubr.msk.bf16.gmra.mxu1 %vm547_vm0, %v5444_v33 }
 0x10c   : > { %5225 = vmatprep.mubr.msk.bf16.mxu0 %vm547_vm0, %v5447_v35  ;;  %v6021_v17 = vadd.f32 %v1307_v45, %v957_v50  ;;  %v978_v52 = vadd.f32 %v4957_v15, %v5932_v25  ;;  %5187 = vmatprep.mubr.msk.bf16.mxu1 %vm547_vm0, %v5446_v47  ;;  %v5452_v35 = vld [vmem:[%s5740_s30 + $0x50] sm:$0xff]   ;;  %v5454_v50 = vld [vmem:[%s5740_s30 + $0x58] sm:$0xff]  }
 0x10d   : > { %v1320_v53 = vpop.f32.mrf.mxu0  ;;  %v969_v55 = vpop.f32.mrf.mxu1 }
 0x10e   : > { %v6025_v22 = vadd.f32 %v4995_v51, %v978_v52  ;;  %v970_v56 = vadd.f32 %v969_v55, %v5939_v27 }
 0x10f   : > { %v4996_v57 = vpop.f32.mrf.mxu0  ;;  %v4958_v59 = vpop.f32.mrf.mxu1 }
 0x110   : > { %v6031_v63 = vadd.f32 %v1320_v53, %v970_v56  ;;  %v981_v0 = vadd.f32 %v4958_v59, %v5944_v29  ;;  %v5457_v59 = vld [vmem:[%s5740_s30 + $0x68] sm:$0xff]  }
 0x111   : > { %v1323_v1 = vpop.f32.mrf.mxu0  ;;  %v972_v25 = vpop.f32.mrf.mxu1 }
 0x112   : > { %v6035_v9 = vadd.f32 %v4996_v57, %v981_v0  ;;  %v973_v3 = vadd.f32 %v972_v25, %v5951_v34  ;;  %v5459_v0 = vld [vmem:[%s5740_s30 + $0x70] sm:$0xff]  }
 0x113   : > { %v4999_v11 = vpop.f32.mrf.mxu0  ;;  %5226 = vmatmul.mubr.msk.bf16.gmra.mxu0 %vm547_vm0, %v5449_v58  ;;  %v4961_v27 = vpop.f32.mrf.mxu1  ;;  %5188 = vmatmul.mubr.msk.bf16.gmra.mxu1 %vm547_vm0, %v5448_v60 }
 0x114   : > { %5229 = vmatprep.mubr.msk.bf16.mxu0 %vm547_vm0, %v5451_v62  ;;  %v6041_v29 = vadd.f32 %v1323_v1, %v973_v3  ;;  %v994_v18 = vadd.f32 %v4961_v27, %v5956_v37  ;;  %5191 = vmatprep.mubr.msk.bf16.mxu1 %vm547_vm0, %v5450_v8  ;;  %v5456_v62 = vld [vmem:[%s5740_s30 + $0x60] sm:$0xff]   ;;  %v5458_v3 = vld [vmem:[%s5740_s30 + $0x68] sm:$0xff]  }
 0x115   : > { %v1336_v20 = vpop.f32.mrf.mxu0  ;;  %v985_v21 = vpop.f32.mrf.mxu1 }
 0x116   : > { %v6045_v34 = vadd.f32 %v4999_v11, %v994_v18  ;;  %v986_v23 = vadd.f32 %v985_v21, %v5963_v39 }
 0x117   : > { %v5000_v30 = vpop.f32.mrf.mxu0  ;;  %v4962_v33 = vpop.f32.mrf.mxu1 }
 0x118   : > { %v6051_v45 = vadd.f32 %v1336_v20, %v986_v23  ;;  %v997_v47 = vadd.f32 %v4962_v33, %v5968_v41  ;;  %v5461_v33 = vld [vmem:[%s5740_s30 + $0x78] sm:$0xff]  }
 0x119   : > { %v1339_v13 = vpop.f32.mrf.mxu0  ;;  %v988_v37 = vpop.f32.mrf.mxu1 }
 0x11a   : > { %v6055_v51 = vadd.f32 %v5000_v30, %v997_v47  ;;  %v989_v15 = vadd.f32 %v988_v37, %v5975_v46  ;;  %v5463_v47 = vld [vmem:[%s5740_s30 + $0x80] sm:$0xff]  }
 0x11b   : > { %v5003_v52 = vpop.f32.mrf.mxu0  ;;  %5230 = vmatmul.mubr.msk.bf16.gmra.mxu0 %vm547_vm0, %v5453_v32  ;;  %v4965_v39 = vpop.f32.mrf.mxu1  ;;  %5192 = vmatmul.mubr.msk.bf16.gmra.mxu1 %vm547_vm0, %v5452_v35 }
 0x11c   : > { %5233 = vmatprep.mubr.msk.bf16.mxu0 %vm547_vm0, %v5455_v44  ;;  %v6061_v41 = vadd.f32 %v1339_v13, %v989_v15  ;;  %v1010_v53 = vadd.f32 %v4965_v39, %v5887_v2  ;;  %5195 = vmatprep.mubr.msk.bf16.mxu1 %vm547_vm0, %v5454_v50  ;;  %v5460_v44 = vld [vmem:[%s5740_s30 + $0x70] sm:$0xff]   ;;  %v5462_v15 = vld [vmem:[%s5740_s30 + $0x78] sm:$0xff]  }
 0x11d   : > { %v1352_v55 = vpop.f32.mrf.mxu0  ;;  %v1001_v56 = vpop.f32.mrf.mxu1 }
 0x11e   : > { %v6065_v46 = vadd.f32 %v5003_v52, %v1010_v53  ;;  %v1002_v57 = vadd.f32 %v1001_v56, %v5894_v4 }
 0x11f   : > { %v5004_v58 = vpop.f32.mrf.mxu0  ;;  %v4966_v60 = vpop.f32.mrf.mxu1 }
 0x120   : > { %v6071_v1 = vadd.f32 %v1352_v55, %v1002_v57  ;;  %v1013_v8 = vadd.f32 %v4966_v60, %v5899_v7  ;;  %v5465_v60 = vld [vmem:[%s5740_s30 + $0x88] sm:$0xff]  }
 0x121   : > { %v1355_v25 = vpop.f32.mrf.mxu0  ;;  %v1004_v2 = vpop.f32.mrf.mxu1 }
 0x122   : > { %v6075_v11 = vadd.f32 %v5004_v58, %v1013_v8  ;;  %v1005_v27 = vadd.f32 %v1004_v2, %v5906_v12 }
 0x123   : > { %v5007_v18 = vpop.f32.mrf.mxu0  ;;  %5234 = vmatmul.mubr.msk.bf16.gmra.mxu0 %vm547_vm0, %v5457_v59  ;;  %v4969_v4 = vpop.f32.mrf.mxu1  ;;  %5196 = vmatmul.mubr.msk.bf16.gmra.mxu1 %vm547_vm0, %v5456_v62 }
 0x124   : > { %5237 = vmatprep.mubr.msk.bf16.mxu0 %vm547_vm0, %v5459_v0  ;;  %v6081_v7 = vadd.f32 %v1355_v25, %v1005_v27  ;;  %v1026_v20 = vadd.f32 %v4969_v4, %v5911_v14  ;;  %5199 = vmatprep.mubr.msk.bf16.mxu1 %vm547_vm0, %v5458_v3  ;;  %v5464_v0 = vld [vmem:[%s5740_s30 + $0x80] sm:$0xff]   ;;  %s4108_s30 = sshll.u32 %s6669_s19, 9 }
 0x125   : > { %v1368_v21 = vpop.f32.mrf.mxu0  ;;  %v1017_v23 = vpop.f32.mrf.mxu1  ;;  %s357_s9 = sadd.s32 %s4108_s30, %s4107_s11 }
 0x126   : > { %v6085_v12 = vadd.f32 %v5007_v18, %v1026_v20  ;;  %v1018_v30 = vadd.f32 %v1017_v23, %v5918_v16  ;;  %s4109_s10 = sshll.u32 %s357_s9, 2 }
 0x127   : > { %v5008_v32 = vpop.f32.mrf.mxu0  ;;  %v4970_v35 = vpop.f32.mrf.mxu1  ;;  %s6381_s14 = scalar_lea.vmem %s6575_s5, %s4109_s10 }
 0x128   : > { %v6091_v13 = vadd.f32 %v1368_v21, %v1018_v30  ;;  %v1029_v50 = vadd.f32 %v4970_v35, %v5923_v19 }
 0x129   : > { %v1371_v37 = vpop.f32.mrf.mxu0  ;;  %v1020_v14 = vpop.f32.mrf.mxu1 }
 0x12a   : > { %v6095_v52 = vadd.f32 %v5008_v32, %v1029_v50  ;;  %v1021_v39 = vadd.f32 %v1020_v14, %v5930_v24 }
 0x12b   : > { %v5011_v53 = vpop.f32.mrf.mxu0  ;;  %5238 = vmatmul.mubr.msk.bf16.gmra.mxu0 %vm547_vm0, %v5461_v33  ;;  %v4973_v16 = vpop.f32.mrf.mxu1  ;;  %5200 = vmatmul.mubr.msk.bf16.gmra.mxu1 %vm547_vm0, %v5460_v44 }
 0x12c   : > { %5241 = vmatprep.mubr.msk.bf16.mxu0 %vm547_vm0, %v5463_v47  ;;  %v6101_v55 = vadd.f32 %v1371_v37, %v1021_v39  ;;  %v1042_v19 = vadd.f32 %v4973_v16, %v5935_v26  ;;  %5203 = vmatprep.mubr.msk.bf16.mxu1 %vm547_vm0, %v5462_v15 }
 0x12d   : > { %v1384_v56 = vpop.f32.mrf.mxu0  ;;  %v1033_v57 = vpop.f32.mrf.mxu1 }
 0x12e   : > { %v6105_v58 = vadd.f32 %v5011_v53, %v1042_v19  ;;  %v1034_v24 = vadd.f32 %v1033_v57, %v5942_v28 }
 0x12f   : > { %v5012_v59 = vpop.f32.mrf.mxu0  ;;  %v4974_v62 = vpop.f32.mrf.mxu1 }
 0x130   : > { %v6110_v8 = vadd.f32 %v1384_v56, %v1034_v24  ;;  %v1045_v25 = vadd.f32 %v4974_v62, %v5947_v31 }
 0x131   : > { %v1387_v3 = vpop.f32.mrf.mxu0  ;;  %v1036_v2 = vpop.f32.mrf.mxu1 }
 0x132   : > { %v6113_v27 = vadd.f32 %v5012_v59, %v1045_v25  ;;  %v1037_v26 = vadd.f32 %v1036_v2, %v5954_v36 }
 0x133   : > { %v5015_v18 = vpop.f32.mrf.mxu0  ;;  %5242 = vmatmul.mubr.msk.bf16.gmra.mxu0 %vm547_vm0, %v5465_v60  ;;  %v4977_v4 = vpop.f32.mrf.mxu1  ;;  %5204 = vmatmul.mubr.msk.bf16.gmra.mxu1 %vm547_vm0, %v5464_v0 }
 0x134   : > { %v6118_v28 = vadd.f32 %v1387_v3, %v1037_v26  ;;  %v1058_v20 = vadd.f32 %v4977_v4, %v5959_v38 }
 0x135   : > { %v1400_v21 = vpop.f32.mrf.mxu0  ;;  %v1049_v23 = vpop.f32.mrf.mxu1 }
 0x136   : > { %v6121_v30 = vadd.f32 %v5015_v18, %v1058_v20  ;;  %v1050_v31 = vadd.f32 %v1049_v23, %v5966_v40 }
 0x137   : > { %v5016_v32 = vpop.f32.mrf.mxu0  ;;  %v4978_v33 = vpop.f32.mrf.mxu1 }
 0x138   : > { %v6124_v35 = vadd.f32 %v1400_v21, %v1050_v31  ;;  %v1061_v36 = vadd.f32 %v4978_v33, %v5971_v43 }
 0x139   : > { %v1403_v44 = vpop.f32.mrf.mxu0  ;;  %v1052_v47 = vpop.f32.mrf.mxu1 }
 0x13a   : > { %v6127_v50 = vadd.f32 %v5016_v32, %v1061_v36  ;;  %v1053_v37 = vadd.f32 %v1052_v47, %v5978_v48 }
 0x13b   : > { %v5063_v15 = vpop.f32.mrf.mxu0  ;;  %v5025_v38 = vpop.f32.mrf.mxu1 }
 0x13c   : > { %v6130_v14 = vadd.f32 %v1403_v44, %v1053_v37  ;;  %v1797_v39 = vadd.f32 %v5025_v38, %v5985_v54 }
 0x13d   : > { %v2048_v53 = vpop.f32.mrf.mxu0  ;;  %v1668_v40 = vpop.f32.mrf.mxu1 }
 0x13e   : > { %v6133_v16 = vadd.f32 %v5063_v15, %v1797_v39  ;;  %v1795_v19 = vadd.f32 %v1668_v40, %v5991_v61 }
 0x13f   : > { %v5064_v56 = vpop.f32.mrf.mxu0  ;;  %v5026_v43 = vpop.f32.mrf.mxu1 }
 0x140   : > { %v6136_v57 = vadd.f32 %v2048_v53, %v1795_v19  ;;  %v1798_v24 = vadd.f32 %v5026_v43, %v5995_v6 }
 0x141   : > { %v2051_v59 = vpop.f32.mrf.mxu0  ;;  %v1671_v48 = vpop.f32.mrf.mxu1 }
 0x142   : > { %v6139_v60 = vadd.f32 %v5064_v56, %v1798_v24  ;;  %v1796_v62 = vadd.f32 %v1671_v48, %v6001_v5 }
 0x143   : > { %v5067_v0 = vpop.f32.mrf.mxu0  ;;  %v5029_v54 = vpop.f32.mrf.mxu1 }
 0x144   : > { %v6142_v25 = vadd.f32 %v2051_v59, %v1796_v62  ;;  %v1801_v3 = vadd.f32 %v5029_v54, %v6005_v10 }
 0x145   : > { %v2064_v2 = vpop.f32.mrf.mxu0  ;;  %v1684_v61 = vpop.f32.mrf.mxu1 }
 0x146   : > { %v6145_v26 = vadd.f32 %v5067_v0, %v1801_v3  ;;  %v1799_v18 = vadd.f32 %v1684_v61, %v6011_v42 }
 0x147   : > { %v5068_v4 = vpop.f32.mrf.mxu0  ;;  %v5030_v6 = vpop.f32.mrf.mxu1 }
 0x148   : > { %v6148_v20 = vadd.f32 %v2064_v2, %v1799_v18  ;;  %v1802_v21 = vadd.f32 %v5030_v6, %v6015_v49 }
 0x149   : > { %v2067_v23 = vpop.f32.mrf.mxu0  ;;  %v1687_v5 = vpop.f32.mrf.mxu1 }
 0x14a   : > { %v6151_v31 = vadd.f32 %v5068_v4, %v1802_v21  ;;  %v1800_v32 = vadd.f32 %v1687_v5, %v6021_v17 }
 0x14b   : > { %v5071_v33 = vpop.f32.mrf.mxu0  ;;  %v5033_v10 = vpop.f32.mrf.mxu1 }
 0x14c   : > { %v6154_v36 = vadd.f32 %v2067_v23, %v1800_v32  ;;  %v1805_v44 = vadd.f32 %v5033_v10, %v6025_v22 }
 0x14d   : > { %v2080_v47 = vpop.f32.mrf.mxu0  ;;  %v1700_v42 = vpop.f32.mrf.mxu1 }
 0x14e   : > { %v6157_v37 = vadd.f32 %v5071_v33, %v1805_v44  ;;  %v1803_v15 = vadd.f32 %v1700_v42, %v6031_v63 }
 0x14f   : > { %v5072_v38 = vpop.f32.mrf.mxu0  ;;  %v5034_v49 = vpop.f32.mrf.mxu1 }
 0x150   : > { %v6160_v39 = vadd.f32 %v2080_v47, %v1803_v15  ;;  %v1806_v53 = vadd.f32 %v5034_v49, %v6035_v9 }
 0x151   : > { %v2083_v40 = vpop.f32.mrf.mxu0  ;;  %v1703_v17 = vpop.f32.mrf.mxu1 }
 0x152   : > { %v6163_v19 = vadd.f32 %v5072_v38, %v1806_v53  ;;  %v1804_v56 = vadd.f32 %v1703_v17, %v6041_v29 }
 0x153   : > { %v5075_v43 = vpop.f32.mrf.mxu0  ;;  %v5037_v22 = vpop.f32.mrf.mxu1 }
 0x154   : > { %v6166_v24 = vadd.f32 %v2083_v40, %v1804_v56  ;;  %v1809_v59 = vadd.f32 %v5037_v22, %v6045_v34 }
 0x155   : > { %v2096_v48 = vpop.f32.mrf.mxu0  ;;  %v1716_v63 = vpop.f32.mrf.mxu1 }
 0x156   : > { %v6169_v62 = vadd.f32 %v5075_v43, %v1809_v59  ;;  %v1807_v0 = vadd.f32 %v1716_v63, %v6051_v45 }
 0x157   : > { %v5076_v54 = vpop.f32.mrf.mxu0  ;;  %v5038_v9 = vpop.f32.mrf.mxu1 }
 0x158   : > { %v6172_v3 = vadd.f32 %v2096_v48, %v1807_v0  ;;  %v1810_v2 = vadd.f32 %v5038_v9, %v6055_v51 }
 0x159   : > { %v2099_v61 = vpop.f32.mrf.mxu0  ;;  %v1719_v29 = vpop.f32.mrf.mxu1 }
 0x15a   : > { %v6175_v18 = vadd.f32 %v5076_v54, %v1810_v2  ;;  %v1808_v4 = vadd.f32 %v1719_v29, %v6061_v41 }
 0x15b   : > { %v5079_v6 = vpop.f32.mrf.mxu0  ;;  %v5041_v34 = vpop.f32.mrf.mxu1 }
 0x15c   : > { %v6178_v21 = vadd.f32 %v2099_v61, %v1808_v4  ;;  %v1813_v23 = vadd.f32 %v5041_v34, %v6065_v46 }
 0x15d   : > { %v2112_v5 = vpop.f32.mrf.mxu0  ;;  %v1732_v45 = vpop.f32.mrf.mxu1 }
 0x15e   : > { %v6181_v32 = vadd.f32 %v5079_v6, %v1813_v23  ;;  %v1811_v33 = vadd.f32 %v1732_v45, %v6071_v1 }
 0x15f   : > { %v5080_v10 = vpop.f32.mrf.mxu0  ;;  %v5042_v51 = vpop.f32.mrf.mxu1 }
 0x160   : > { %v6184_v44 = vadd.f32 %v2112_v5, %v1811_v33  ;;  %v1814_v47 = vadd.f32 %v5042_v51, %v6075_v11 }
 0x161   : > { %v2115_v42 = vpop.f32.mrf.mxu0  ;;  %v1735_v41 = vpop.f32.mrf.mxu1 }
 0x162   : > { %v6187_v15 = vadd.f32 %v5080_v10, %v1814_v47  ;;  %v1812_v38 = vadd.f32 %v1735_v41, %v6081_v7 }
 0x163   : > { %v5083_v49 = vpop.f32.mrf.mxu0  ;;  %v5045_v46 = vpop.f32.mrf.mxu1 }
 0x164   : > { %v6190_v53 = vadd.f32 %v2115_v42, %v1812_v38  ;;  %v1817_v40 = vadd.f32 %v5045_v46, %v6085_v12 }
 0x165   : > { %v2128_v17 = vpop.f32.mrf.mxu0  ;;  %v1748_v1 = vpop.f32.mrf.mxu1 }
 0x166   : > { %6576 = vst [vmem:[#allocation2_spill] sm:$0xff] %v6190_v53  ;;  %v6193_v56 = vadd.f32 %v5083_v49, %v1817_v40  ;;  %v1815_v43 = vadd.f32 %v1748_v1, %v6091_v13 }
 0x167   : > { %v5084_v22 = vpop.f32.mrf.mxu0  ;;  %v5046_v11 = vpop.f32.mrf.mxu1 }
 0x168   : > { %6577 = vst [vmem:[#allocation3_spill] sm:$0xff] %v6193_v56  ;;  %v6196_v59 = vadd.f32 %v2128_v17, %v1815_v43  ;;  %v1818_v48 = vadd.f32 %v5046_v11, %v6095_v52 }
 0x169   : > { %v2131_v63 = vpop.f32.mrf.mxu0  ;;  %v1751_v7 = vpop.f32.mrf.mxu1 }
 0x16a   : > { %6578 = vst [vmem:[#allocation4_spill] sm:$0xff] %v6196_v59  ;;  %v6199_v0 = vadd.f32 %v5084_v22, %v1818_v48  ;;  %v1816_v54 = vadd.f32 %v1751_v7, %v6101_v55 }
 0x16b   : > { %v5087_v9 = vpop.f32.mrf.mxu0  ;;  %v5049_v12 = vpop.f32.mrf.mxu1 }
 0x16c   : > { %6579 = vst [vmem:[#allocation5_spill] sm:$0xff] %v6199_v0  ;;  %v6202_v2 = vadd.f32 %v2131_v63, %v1816_v54  ;;  %v1821_v61 = vadd.f32 %v5049_v12, %v6105_v58 }
 0x16d   : > { %v2144_v29 = vpop.f32.mrf.mxu0  ;;  %v1764_v13 = vpop.f32.mrf.mxu1 }
 0x16e   : > { %6580 = vst [vmem:[#allocation6_spill] sm:$0xff] %v6202_v2  ;;  %v6205_v4 = vadd.f32 %v5087_v9, %v1821_v61  ;;  %v1819_v6 = vadd.f32 %v1764_v13, %v6110_v8 }
 0x16f   : > { %v5088_v34 = vpop.f32.mrf.mxu0  ;;  %v5050_v52 = vpop.f32.mrf.mxu1 }
 0x170   : > { %6581 = vst [vmem:[#allocation7_spill] sm:$0xff] %v6205_v4  ;;  %v6208_v23 = vadd.f32 %v2144_v29, %v1819_v6  ;;  %v1822_v5 = vadd.f32 %v5050_v52, %v6113_v27 }
 0x171   : > { %v2147_v45 = vpop.f32.mrf.mxu0  ;;  %v1767_v55 = vpop.f32.mrf.mxu1 }
 0x172   : > { %6582 = vst [vmem:[#allocation8_spill] sm:$0xff] %v6208_v23  ;;  %v6211_v33 = vadd.f32 %v5088_v34, %v1822_v5  ;;  %v1820_v10 = vadd.f32 %v1767_v55, %v6118_v28 }
 0x173   : > { %v5091_v51 = vpop.f32.mrf.mxu0  ;;  %v5053_v58 = vpop.f32.mrf.mxu1 }
 0x174   : > { %6583 = vst [vmem:[#allocation9_spill] sm:$0xff] %v6211_v33  ;;  %v6214_v47 = vadd.f32 %v2147_v45, %v1820_v10  ;;  %v1825_v42 = vadd.f32 %v5053_v58, %v6121_v30 }
 0x175   : > { %v2160_v41 = vpop.f32.mrf.mxu0  ;;  %v1780_v8 = vpop.f32.mrf.mxu1 }
 0x176   : > { %6584 = vst [vmem:[#allocation10_spill] sm:$0xff] %v6214_v47  ;;  %v6217_v38 = vadd.f32 %v5091_v51, %v1825_v42  ;;  %v1823_v49 = vadd.f32 %v1780_v8, %v6124_v35 }
 0x177   : > { %v5092_v46 = vpop.f32.mrf.mxu0  ;;  %v5054_v27 = vpop.f32.mrf.mxu1 }
 0x178   : > { %6585 = vst [vmem:[#allocation11_spill] sm:$0xff] %v6217_v38  ;;  %v6220_v40 = vadd.f32 %v2160_v41, %v1823_v49  ;;  %v1826_v17 = vadd.f32 %v5054_v27, %v6127_v50 }
 0x179   : > { %v2163_v1 = vpop.f32.mrf.mxu0  ;;  %v1783_v28 = vpop.f32.mrf.mxu1 }
 0x17a   : > { %6586 = vst [vmem:[#allocation12_spill] sm:$0xff] %v6220_v40  ;;  %v6223_v43 = vadd.f32 %v5092_v46, %v1826_v17  ;;  %v1824_v22 = vadd.f32 %v1783_v28, %v6130_v14 }
 0x17b   : > { %v6226_v11 = vpop.f32.mrf.mxu0  ;;  %v5101_v30 = vpop.f32.mrf.mxu1 }
 0x17c   : > { %6587 = vst [vmem:[#allocation13_spill] sm:$0xff] %v6223_v43  ;;  %v6228_v48 = vadd.f32 %v2163_v1, %v1824_v22 }
 0x17d   : > { %v6230_v63 = vpop.f32.mrf.mxu0  ;;  %v2428_v35 = vpop.f32.mrf.mxu1 }
 0x17e   : > { %6588 = vst [vmem:[#allocation14_spill] sm:$0xff] %v6228_v48 }
 0x17f   : > { %v6232_v7 = vpop.f32.mrf.mxu0  ;;  %v6234_v54 = vpop.f32.mrf.mxu1 }
 0x181   : > { %v6236_v9 = vpop.f32.mrf.mxu0  ;;  %v6238_v50 = vpop.f32.mrf.mxu1 }
 0x183   : > { %v6240_v12 = vpop.f32.mrf.mxu0  ;;  %v6242_v61 = vpop.f32.mrf.mxu1 }
 0x185   : > { %v6244_v14 = vpop.f32.mrf.mxu0  ;;  %v6246_v29 = vpop.f32.mrf.mxu1 }
 0x187   : > { %v6248_v13 = vpop.f32.mrf.mxu0  ;;  %v6250_v6 = vpop.f32.mrf.mxu1 }
 0x189   : > { %v6252_v34 = vpop.f32.mrf.mxu0  ;;  %v6254_v52 = vpop.f32.mrf.mxu1 }
 0x18b   : > { %v6256_v5 = vpop.f32.mrf.mxu0  ;;  %v6258_v45 = vpop.f32.mrf.mxu1 }
 0x18d   : > { %v6260_v55 = vpop.f32.mrf.mxu0  ;;  %v6262_v10 = vpop.f32.mrf.mxu1 }
 0x18f   : > { %v6264_v51 = vpop.f32.mrf.mxu0  ;;  %v6266_v58 = vpop.f32.mrf.mxu1 }
 0x191   : > { %v6268_v42 = vpop.f32.mrf.mxu0  ;;  %v6270_v41 = vpop.f32.mrf.mxu1 }
 0x193   : > { %v6272_v8 = vpop.f32.mrf.mxu0  ;;  %v6274_v49 = vpop.f32.mrf.mxu1 }
 0x195   : > { %v6276_v46 = vpop.f32.mrf.mxu0  ;;  %v6278_v27 = vpop.f32.mrf.mxu1 }
 0x197   : > { %v6280_v17 = vpop.f32.mrf.mxu0  ;;  %v6282_v1 = vpop.f32.mrf.mxu1 }
 0x199   : > { %v6284_v28 = vpop.f32.mrf.mxu0  ;;  %v6286_v22 = vpop.f32.mrf.mxu1 }
 0x19b   : > { %v6288_v48 = vpop.f32.mrf.mxu0  ;;  %v6290_v43 = vpop.f32.mrf.mxu1 }
 0x19d   : > { %v6292_v40 = vpop.f32.mrf.mxu0  ;;  %v6294_v38 = vpop.f32.mrf.mxu1 }
 0x19e   : > { %6589 = vst [vmem:[#allocation15_spill] sm:$0xff] %v6292_v40 }
 0x19f   : > { %v6296_v47 = vpop.f32.mrf.mxu0  ;;  %v6298_v33 = vpop.f32.mrf.mxu1 }
 0x1a0   : > { %6590 = vst [vmem:[#allocation16_spill] sm:$0xff] %v6296_v47  ;;  %6591 = vst [vmem:[#allocation17_spill] sm:$0xff] %v6298_v33 }
 0x1a1   : > { %v6300_v23 = vpop.f32.mrf.mxu0  ;;  %v6302_v4 = vpop.f32.mrf.mxu1 }
 0x1a2   : > { %6592 = vst [vmem:[#allocation18_spill] sm:$0xff] %v6300_v23  ;;  %6593 = vst [vmem:[#allocation19_spill] sm:$0xff] %v6302_v4 }
 0x1a3   : > { %v6304_v2 = vpop.f32.mrf.mxu0  ;;  %v6306_v0 = vpop.f32.mrf.mxu1 }
 0x1a4   : > { %6594 = vst [vmem:[#allocation20_spill] sm:$0xff] %v6304_v2  ;;  %6595 = vst [vmem:[#allocation21_spill] sm:$0xff] %v6306_v0 }
 0x1a5   : > { %v6308_v59 = vpop.f32.mrf.mxu0  ;;  %v6310_v56 = vpop.f32.mrf.mxu1 }
 0x1a6   : > { %6596 = vst [vmem:[#allocation22_spill] sm:$0xff] %v6308_v59  ;;  %6597 = vst [vmem:[#allocation23_spill] sm:$0xff] %v6310_v56 }
 0x1a7   : > { %v6312_v53 = vpop.f32.mrf.mxu0  ;;  %v6314_v40 = vpop.f32.mrf.mxu1 }
 0x1a8   : > { %6598 = vst [vmem:[#allocation24_spill] sm:$0xff] %v6312_v53  ;;  %6599 = vst [vmem:[#allocation25_spill] sm:$0xff] %v6314_v40 }
 0x1a9   : > { %v6316_v47 = vpop.f32.mrf.mxu0  ;;  %v6318_v33 = vpop.f32.mrf.mxu1 }
 0x1aa   : > { %6600 = vst [vmem:[#allocation26_spill] sm:$0xff] %v6316_v47  ;;  %6601 = vst [vmem:[#allocation27_spill] sm:$0xff] %v6318_v33 }
 0x1ab   : > { %v6320_v23 = vpop.f32.mrf.mxu0  ;;  %v6322_v4 = vpop.f32.mrf.mxu1 }
 0x1ac   : > { %6602 = vst [vmem:[#allocation28_spill] sm:$0xff] %v6320_v23  ;;  %6603 = vst [vmem:[#allocation29_spill] sm:$0xff] %v6322_v4 }
 0x1ad   : > { %v6324_v2 = vpop.f32.mrf.mxu0  ;;  %v6326_v0 = vpop.f32.mrf.mxu1 }
 0x1ae   : > { %6604 = vst [vmem:[#allocation30_spill] sm:$0xff] %v6324_v2  ;;  %6605 = vst [vmem:[#allocation31_spill] sm:$0xff] %v6326_v0  ;;  %v2557_v0 = vadd.f32 %v5101_v30, %v6133_v16  ;;  %v2556_v30 = vadd.f32 %v6238_v50, %v6142_v25  ;;  %v2559_v25 = vadd.f32 %v6246_v29, %v6148_v20 }
 0x1af   : > { %v6328_v59 = vpop.f32.mrf.mxu0  ;;  %v6330_v56 = vpop.f32.mrf.mxu1 }
 0x1b0   : > { %6606 = vst [vmem:[#allocation32_spill] sm:$0xff] %v6328_v59  ;;  %6607 = vst [vmem:[#allocation33_spill] sm:$0xff] %v6330_v56 }
 0x1b1   : > { %v6332_v53 = vpop.f32.mrf.mxu0  ;;  %v6335_v40 = vpop.f32.mrf.mxu1 }
 0x1b2   : > { %6608 = vst [vmem:[#allocation34_spill] sm:$0xff] %v6332_v53  ;;  %6609 = vst [vmem:[#allocation35_spill] sm:$0xff] %v6335_v40  ;;  %v2555_v53 = vadd.f32 %v2428_v35, %v6136_v57 }
 0x1b3   : > { %v6337_v47 = vpop.f32.mrf.mxu0  ;;  %v6339_v33 = vpop.f32.mrf.mxu1 }
 0x1b4   : > { %6610 = vst [vmem:[#allocation36_spill] sm:$0xff] %v6337_v47  ;;  %6611 = vst [vmem:[#allocation37_spill] sm:$0xff] %v6339_v33  ;;  %v2937_v33 = vadd.f32 %v6226_v11, %v2557_v0  ;;  %v2935_v16 = vadd.f32 %v6230_v63, %v2555_v53  ;;  %v6368_v0 = vld [vmem:[%s6574_s4] ss:$0 sm:$0xff] }
 0x1b5   : > { %v6341_v23 = vpop.f32.mrf.mxu0  ;;  %v6344_v2 = vpop.f32.mrf.mxu1 }
 0x1b6   : > { %6612 = vst [vmem:[#allocation38_spill] sm:$0xff] %v6341_v23  ;;  %6613 = vst [vmem:[#allocation39_spill] sm:$0xff] %v6344_v2  ;;  %v2558_v23 = vadd.f32 %v6234_v54, %v6139_v60 }
 0x1b7   : > { %v6347_v59 = vpop.f32.mrf.mxu0  ;;  %v6349_v4 = vpop.f32.mrf.mxu1 }
 0x1b8   : > { %6614 = vst [vmem:[#allocation40_spill] sm:$0xff] %v6347_v59  ;;  %v2938_v60 = vadd.f32 %v6232_v7, %v2558_v23  ;;  %v2562_v23 = vadd.f32 %v6250_v6, %v6151_v31  ;;  %v2560_v31 = vadd.f32 %v6254_v52, %v6154_v36 }
 0x1b9   : > { %v6352_v56 = vpop.f32.mrf.mxu0  ;;  %v6355_v47 = vpop.f32.mrf.mxu1 }
 0x1ba   : > { %6615 = vst [vmem:[#allocation41_spill] sm:$0xff] %v6352_v56  ;;  %6616 = vst [vmem:[#allocation42_spill] sm:$0xff] %v6355_v47  ;;  %v2561_v56 = vadd.f32 %v6242_v61, %v6145_v26 }
 0x1bb   : > { %v5215_v2 = vpop.f32.mrf.mxu0  ;;  %v5177_v40 = vpop.f32.mrf.mxu1 }
 0x1bc   : > { %v3317_v57 = vadd.f32 %v5177_v40, %v2937_v33  ;;  %v2936_v40 = vadd.f32 %v6236_v9, %v2556_v30  ;;  %v2941_v47 = vadd.f32 %v6240_v12, %v2561_v56  ;;  %v2939_v56 = vadd.f32 %v6244_v14, %v2559_v25 }
 0x1bd   : > { %v3568_v35 = vpop.f32.mrf.mxu0  ;;  %v3188_v11 = vpop.f32.mrf.mxu1 }
 0x1be   : > { %v3697_v54 = vadd.f32 %v5215_v2, %v3317_v57  ;;  %v3315_v59 = vadd.f32 %v3188_v11, %v2935_v16  ;;  %v2942_v11 = vadd.f32 %v6248_v13, %v2562_v23 }
 0x1bf   : > { %v5216_v53 = vpop.f32.mrf.mxu0  ;;  %v5178_v33 = vpop.f32.mrf.mxu1 }
 0x1c0   : > { %v3736_v26 = vadd.f32 %v6368_v0, %v3697_v54  ;;  %v3695_v63 = vadd.f32 %v3568_v35, %v3315_v59  ;;  %v3318_v50 = vadd.f32 %v5178_v33, %v2938_v60  ;;  %v2565_v60 = vadd.f32 %v6258_v45, %v6157_v37 }
 0x1c1   : > { %v3571_v61 = vpop.f32.mrf.mxu0  ;;  %v3191_v20 = vpop.f32.mrf.mxu1  ;;  %v2940_v33 = vadd.f32 %v6252_v34, %v2560_v31 }
 0x1c2   : > { %v4702_v2 = vpack.c.bf16 %v3736_v26, %v3736_v26  ;;  %v3734_v7 = vadd.f32 %v6368_v0, %v3695_v63  ;;  %v3698_v59 = vadd.f32 %v5216_v53, %v3318_v50  ;;  %v3316_v9 = vadd.f32 %v3191_v20, %v2936_v40 }
 0x1c3   : > { %v5219_v29 = vpop.f32.mrf.mxu0  ;;  %v5181_v12 = vpop.f32.mrf.mxu1  ;;  %v2945_v50 = vadd.f32 %v6256_v5, %v2565_v60 }
 0x1c4   : > { %3897 = vst.msk [vmem:[%s6381_s14 + $0x8] sm:$0xf] %vm3894_vm1, %v4702_v2  ;;  %v4700_v6 = vpack.c.bf16 %v3734_v7, %v3734_v7  ;;  %v3737_v16 = vadd.f32 %v6368_v0, %v3698_v59  ;;  %v3696_v30 = vadd.f32 %v3571_v61, %v3316_v9  ;;  %v3321_v57 = vadd.f32 %v5181_v12, %v2941_v47 }
 0x1c5   : > { %v3584_v35 = vpop.f32.mrf.mxu0  ;;  %v3204_v54 = vpop.f32.mrf.mxu1  ;;  %v2563_v47 = vadd.f32 %v6262_v10, %v6160_v39  ;;  %v2566_v61 = vadd.f32 %v6266_v58, %v6163_v19  ;;  %v2564_v59 = vadd.f32 %v6270_v41, %v6166_v24  ;;  %v2569_v12 = vadd.f32 %v6274_v49, %v6169_v62 }
 0x1c6   : > { %3895 = vst.msk [vmem:[%s6381_s14] sm:$0xf] %vm3894_vm1, %v4700_v6  ;;  %v4703_v14 = vpack.c.bf16 %v3737_v16, %v3737_v16  ;;  %v3735_v36 = vadd.f32 %v6368_v0, %v3696_v30  ;;  %v3701_v52 = vadd.f32 %v5219_v29, %v3321_v57  ;;  %v3319_v53 = vadd.f32 %v3204_v54, %v2939_v56 }
 0x1c7   : > { %v5220_v25 = vpop.f32.mrf.mxu0  ;;  %v5182_v40 = vpop.f32.mrf.mxu1  ;;  %v2943_v7 = vadd.f32 %v6260_v55, %v2563_v47  ;;  %v2946_v31 = vadd.f32 %v6264_v51, %v2566_v61  ;;  %v2944_v57 = vadd.f32 %v6268_v42, %v2564_v59  ;;  %v2568_v47 = vadd.f32 %v6286_v22, %v6178_v21 }
 0x1c8   : > { %3898 = vst.msk [vmem:[%s6381_s14 + $0xc] sm:$0xf] %vm3894_vm1, %v4703_v14  ;;  %v4701_v13 = vpack.c.bf16 %v3735_v36, %v3735_v36  ;;  %v3740_v37 = vadd.f32 %v6368_v0, %v3701_v52  ;;  %v3699_v45 = vadd.f32 %v3584_v35, %v3319_v53  ;;  %v3322_v26 = vadd.f32 %v5182_v40, %v2942_v11 }
 0x1c9   : > { %v3587_v63 = vpop.f32.mrf.mxu0  ;;  %v3207_v23 = vpop.f32.mrf.mxu1  ;;  %v2567_v35 = vadd.f32 %v6278_v27, %v6172_v3  ;;  %v2949_v14 = vadd.f32 %v6272_v8, %v2569_v12  ;;  %v2570_v36 = vadd.f32 %v6282_v1, %v6175_v18 }
 0x1ca   : > { %3896 = vst.msk [vmem:[%s6381_s14 + $0x4] sm:$0xf] %vm3894_vm1, %v4701_v13  ;;  %v4706_v34 = vpack.c.bf16 %v3740_v37, %v3740_v37  ;;  %v3738_v39 = vadd.f32 %v6368_v0, %v3699_v45  ;;  %v3702_v10 = vadd.f32 %v5220_v25, %v3322_v26  ;;  %v3320_v20 = vadd.f32 %v3207_v23, %v2940_v33 }
 0x1cb   : > { %v5223_v2 = vpop.f32.mrf.mxu0  ;;  %v5185_v9 = vpop.f32.mrf.mxu1  ;;  %v2947_v33 = vadd.f32 %v6276_v46, %v2567_v35  ;;  %v2950_v45 = vadd.f32 %v6280_v17, %v2570_v36  ;;  %v2573_v26 = vadd.f32 %v6290_v43, %v6181_v32  ;;  %v2948_v23 = vadd.f32 %v6284_v28, %v2568_v47  ;;  %v6623_v35 = vld [vmem:[#allocation21_spill] sm:$0xff]  ;;  %v6624_v36 = vld [vmem:[#allocation18_spill] sm:$0xff] }
 0x1cc   : > { %3901 = vst.msk [vmem:[%s6381_s14 + $0x18] sm:$0xf] %vm3894_vm1, %v4706_v34  ;;  %v4704_v5 = vpack.c.bf16 %v3738_v39, %v3738_v39  ;;  %v3741_v19 = vadd.f32 %v6368_v0, %v3702_v10  ;;  %v3700_v58 = vadd.f32 %v3587_v63, %v3320_v20  ;;  %v3325_v29 = vadd.f32 %v5185_v9, %v2945_v50 }
 0x1cd   : > { %v3600_v56 = vpop.f32.mrf.mxu0  ;;  %v3220_v6 = vpop.f32.mrf.mxu1  ;;  %v2571_v34 = vadd.f32 %v6294_v38, %v6184_v44 }
 0x1ce   : > { %3899 = vst.msk [vmem:[%s6381_s14 + $0x10] sm:$0xf] %vm3894_vm1, %v4704_v5  ;;  %v4707_v55 = vpack.c.bf16 %v3741_v19, %v3741_v19  ;;  %v3739_v24 = vadd.f32 %v6368_v0, %v3700_v58  ;;  %v3705_v41 = vadd.f32 %v5223_v2, %v3325_v29  ;;  %v3323_v16 = vadd.f32 %v3220_v6, %v2943_v7  ;;  %v6617_v7 = vld [vmem:[#allocation17_spill] sm:$0xff]  ;;  %v6618_v58 = vld [vmem:[#allocation15_spill] sm:$0xff] }
 0x1cf   : > { %v5224_v30 = vpop.f32.mrf.mxu0  ;;  %v5186_v11 = vpop.f32.mrf.mxu1  ;;  %v2953_v2 = vadd.f32 %v6288_v48, %v2573_v26  ;;  %v2574_v59 = vadd.f32 %v6617_v7, %v6187_v15  ;;  %v2951_v29 = vadd.f32 %v6618_v58, %v2571_v34  ;;  %v6631_v34 = vld [vmem:[#allocation6_spill] sm:$0xff] }
 0x1d0   : > { %3902 = vst.msk [vmem:[%s6381_s14 + $0x1c] sm:$0xf] %vm3894_vm1, %v4707_v55  ;;  %v4705_v51 = vpack.c.bf16 %v3739_v24, %v3739_v24  ;;  %v3744_v62 = vadd.f32 %v6368_v0, %v3705_v41  ;;  %v3703_v49 = vadd.f32 %v3600_v56, %v3323_v16  ;;  %v3326_v60 = vadd.f32 %v5186_v11, %v2946_v31  ;;  %v6619_v56 = vld [vmem:[#allocation2_spill] sm:$0xff]  ;;  %v6620_v31 = vld [vmem:[#allocation19_spill] sm:$0xff]  ;;  %v6621_v16 = vld [vmem:[#allocation16_spill] sm:$0xff] }
 0x1d1   : > { %v3603_v54 = vpop.f32.mrf.mxu0  ;;  %v3223_v52 = vpop.f32.mrf.mxu1  ;;  %v2572_v12 = vadd.f32 %v6620_v31, %v6619_v56 }
 0x1d2   : > { %3900 = vst.msk [vmem:[%s6381_s14 + $0x14] sm:$0xf] %vm3894_vm1, %v4705_v51  ;;  %v4710_v42 = vpack.c.bf16 %v3744_v62, %v3744_v62  ;;  %v3742_v3 = vadd.f32 %v6368_v0, %v3703_v49  ;;  %v3706_v27 = vadd.f32 %v5224_v30, %v3326_v60  ;;  %v3324_v53 = vadd.f32 %v3223_v52, %v2944_v57  ;;  %v6622_v57 = vld [vmem:[#allocation3_spill] sm:$0xff] }
 0x1d3   : > { %v5227_v25 = vpop.f32.mrf.mxu0  ;;  %v5189_v40 = vpop.f32.mrf.mxu1  ;;  %v2954_v30 = vadd.f32 %v6621_v16, %v2574_v59  ;;  %v2577_v11 = vadd.f32 %v6623_v35, %v6622_v57  ;;  %v2952_v52 = vadd.f32 %v6624_v36, %v2572_v12  ;;  %v6633_v59 = vld [vmem:[#allocation24_spill] sm:$0xff]  ;;  %v6636_v12 = vld [vmem:[#allocation26_spill] sm:$0xff] }
 0x1d4   : > { %3905 = vst.msk [vmem:[%s6381_s14 + $0x28] sm:$0xf] %vm3894_vm1, %v4710_v42  ;;  %v4708_v8 = vpack.c.bf16 %v3742_v3, %v3742_v3  ;;  %v3745_v18 = vadd.f32 %v6368_v0, %v3706_v27  ;;  %v3704_v1 = vadd.f32 %v3603_v54, %v3324_v53  ;;  %v3329_v13 = vadd.f32 %v5189_v40, %v2949_v14  ;;  %v6625_v42 = vld [vmem:[#allocation4_spill] sm:$0xff]  ;;  %v6626_v3 = vld [vmem:[#allocation23_spill] sm:$0xff] }
 0x1d5   : > { %v3616_v37 = vpop.f32.mrf.mxu0  ;;  %v3236_v63 = vpop.f32.mrf.mxu1  ;;  %v2575_v27 = vadd.f32 %v6626_v3, %v6625_v42 }
 0x1d6   : > { %3903 = vst.msk [vmem:[%s6381_s14 + $0x20] sm:$0xf] %vm3894_vm1, %v4708_v8  ;;  %v4711_v46 = vpack.c.bf16 %v3745_v18, %v3745_v18  ;;  %v3743_v21 = vadd.f32 %v6368_v0, %v3704_v1  ;;  %v3709_v22 = vadd.f32 %v5227_v25, %v3329_v13  ;;  %v3327_v50 = vadd.f32 %v3236_v63, %v2947_v33  ;;  %v6627_v18 = vld [vmem:[#allocation20_spill] sm:$0xff]  ;;  %v6628_v13 = vld [vmem:[#allocation5_spill] sm:$0xff] }
 0x1d7   : > { %v5228_v61 = vpop.f32.mrf.mxu0  ;;  %v5190_v39 = vpop.f32.mrf.mxu1  ;;  %v2957_v1 = vadd.f32 %v6627_v18, %v2577_v11  ;;  %v6639_v11 = vld [vmem:[#allocation28_spill] sm:$0xff] }
 0x1d8   : > { %3906 = vst.msk [vmem:[%s6381_s14 + $0x2c] sm:$0xf] %vm3894_vm1, %v4711_v46  ;;  %v4709_v17 = vpack.c.bf16 %v3743_v21, %v3743_v21  ;;  %v3748_v32 = vadd.f32 %v6368_v0, %v3709_v22  ;;  %v3707_v43 = vadd.f32 %v3616_v37, %v3327_v50  ;;  %v3330_v10 = vadd.f32 %v5190_v39, %v2950_v45  ;;  %v6629_v37 = vld [vmem:[#allocation25_spill] sm:$0xff]  ;;  %v6632_v39 = vld [vmem:[#allocation27_spill] sm:$0xff] }
 0x1d9   : > { %v3619_v20 = vpop.f32.mrf.mxu0  ;;  %v3239_v9 = vpop.f32.mrf.mxu1  ;;  %v2578_v45 = vadd.f32 %v6629_v37, %v6628_v13 }
 0x1da   : > { %3904 = vst.msk [vmem:[%s6381_s14 + $0x24] sm:$0xf] %vm3894_vm1, %v4709_v17  ;;  %v4714_v28 = vpack.c.bf16 %v3748_v32, %v3748_v32  ;;  %v3746_v44 = vadd.f32 %v6368_v0, %v3707_v43  ;;  %v3710_v38 = vadd.f32 %v5228_v61, %v3330_v10  ;;  %v3328_v5 = vadd.f32 %v3239_v9, %v2948_v23  ;;  %v6630_v61 = vld [vmem:[#allocation22_spill] sm:$0xff] }
 0x1db   : > { %v5231_v19 = vpop.f32.mrf.mxu0  ;;  %v5193_v6 = vpop.f32.mrf.mxu1  ;;  %v2955_v23 = vadd.f32 %v6630_v61, %v2575_v27  ;;  %v2576_v17 = vadd.f32 %v6632_v39, %v6631_v34  ;;  %v2958_v9 = vadd.f32 %v6633_v59, %v2578_v45  ;;  %v6642_v27 = vld [vmem:[#allocation30_spill] sm:$0xff]  ;;  %v6645_v45 = vld [vmem:[#allocation32_spill] sm:$0xff] }
 0x1dc   : > { %3909 = vst.msk [vmem:[%s6381_s14 + $0x38] sm:$0xf] %vm3894_vm1, %v4714_v28  ;;  %v4712_v48 = vpack.c.bf16 %v3746_v44, %v3746_v44  ;;  %v3749_v15 = vadd.f32 %v6368_v0, %v3710_v38  ;;  %v3708_v55 = vadd.f32 %v3619_v20, %v3328_v5  ;;  %v3333_v24 = vadd.f32 %v5193_v6, %v2953_v2  ;;  %v6634_v28 = vld [vmem:[#allocation7_spill] sm:$0xff]  ;;  %v6635_v44 = vld [vmem:[#allocation29_spill] sm:$0xff] }
 0x1dd   : > { %v3632_v41 = vpop.f32.mrf.mxu0  ;;  %v3252_v51 = vpop.f32.mrf.mxu1  ;;  %v2581_v38 = vadd.f32 %v6635_v44, %v6634_v28  ;;  %v2956_v6 = vadd.f32 %v6636_v12, %v2576_v17  ;;  %v6648_v17 = vld [vmem:[#allocation34_spill] sm:$0xff] }
 0x1de   : > { %3907 = vst.msk [vmem:[%s6381_s14 + $0x30] sm:$0xf] %vm3894_vm1, %v4712_v48  ;;  %v4715_v62 = vpack.c.bf16 %v3749_v15, %v3749_v15  ;;  %v3747_v49 = vadd.f32 %v6368_v0, %v3708_v55  ;;  %v3713_v60 = vadd.f32 %v5231_v19, %v3333_v24  ;;  %v3331_v54 = vadd.f32 %v3252_v51, %v2951_v29  ;;  %v6637_v48 = vld [vmem:[#allocation8_spill] sm:$0xff]  ;;  %v6638_v15 = vld [vmem:[#allocation31_spill] sm:$0xff] }
 0x1df   : > { %v5232_v14 = vpop.f32.mrf.mxu0  ;;  %v5194_v53 = vpop.f32.mrf.mxu1  ;;  %v2579_v55 = vadd.f32 %v6638_v15, %v6637_v48  ;;  %v2961_v51 = vadd.f32 %v6639_v11, %v2581_v38  ;;  %v6651_v38 = vld [vmem:[#allocation36_spill] sm:$0xff]  ;;  %v6653_v15 = vld [vmem:[#allocation38_spill] sm:$0xff] }
 0x1e0   : > { %3910 = vst.msk [vmem:[%s6381_s14 + $0x3c] sm:$0xf] %vm3894_vm1, %v4715_v62  ;;  %v4713_v25 = vpack.c.bf16 %v3747_v49, %v3747_v49  ;;  %v3752_v33 = vadd.f32 %v6368_v0, %v3713_v60  ;;  %v3711_v47 = vadd.f32 %v3632_v41, %v3331_v54  ;;  %v3334_v40 = vadd.f32 %v5194_v53, %v2954_v30  ;;  %v6640_v62 = vld [vmem:[#allocation9_spill] sm:$0xff] }
 0x1e1   : > { %v3635_v8 = vpop.f32.mrf.mxu0  ;;  %v3255_v26 = vpop.f32.mrf.mxu1  ;;  %v6641_v49 = vld [vmem:[#allocation33_spill] sm:$0xff]  ;;  %v2959_v53 = vadd.f32 %v6642_v27, %v2579_v55 }
 0x1e2   : > { %3908 = vst.msk [vmem:[%s6381_s14 + $0x34] sm:$0xf] %vm3894_vm1, %v4713_v25  ;;  %v4718_v63 = vpack.c.bf16 %v3752_v33, %v3752_v33  ;;  %v3750_v46 = vadd.f32 %v6368_v0, %v3711_v47  ;;  %v3714_v21 = vadd.f32 %v5232_v14, %v3334_v40  ;;  %v3332_v22 = vadd.f32 %v3255_v26, %v2952_v52  ;;  %v6643_v25 = vld [vmem:[#allocation10_spill] sm:$0xff]  ;;  %v6644_v33 = vld [vmem:[#allocation35_spill] sm:$0xff] }
 0x1e3   : > { %v5235_v50 = vpop.f32.mrf.mxu0  ;;  %v5197_v32 = vpop.f32.mrf.mxu1  ;;  %v2582_v60 = vadd.f32 %v6641_v49, %v6640_v62  ;;  %v2580_v47 = vadd.f32 %v6644_v33, %v6643_v25  ;;  %v6656_v62 = vld [vmem:[#allocation40_spill] sm:$0xff] }
 0x1e4   : > { %3913 = vst.msk [vmem:[%s6381_s14 + $0x48] sm:$0xf] %vm3894_vm1, %v4718_v63  ;;  %v4716_v43 = vpack.c.bf16 %v3750_v46, %v3750_v46  ;;  %v3753_v10 = vadd.f32 %v6368_v0, %v3714_v21  ;;  %v3712_v20 = vadd.f32 %v3635_v8, %v3332_v22  ;;  %v3337_v2 = vadd.f32 %v5197_v32, %v2957_v1  ;;  %v6646_v63 = vld [vmem:[#allocation11_spill] sm:$0xff]  ;;  %v6647_v46 = vld [vmem:[#allocation37_spill] sm:$0xff] }
 0x1e5   : > { %v3648_v7 = vpop.f32.mrf.mxu0  ;;  %v3268_v5 = vpop.f32.mrf.mxu1  ;;  %v2962_v26 = vadd.f32 %v6645_v45, %v2582_v60  ;;  %v2585_v21 = vadd.f32 %v6647_v46, %v6646_v63  ;;  %v2960_v32 = vadd.f32 %v6648_v17, %v2580_v47 }
 0x1e6   : > { %3911 = vst.msk [vmem:[%s6381_s14 + $0x40] sm:$0xf] %vm3894_vm1, %v4716_v43  ;;  %v4719_v19 = vpack.c.bf16 %v3753_v10, %v3753_v10  ;;  %v3751_v58 = vadd.f32 %v6368_v0, %v3712_v20  ;;  %v3717_v29 = vadd.f32 %v5235_v50, %v3337_v2  ;;  %v3335_v56 = vadd.f32 %v3268_v5, %v2955_v23  ;;  %v6649_v43 = vld [vmem:[#allocation12_spill] sm:$0xff]  ;;  %v6650_v10 = vld [vmem:[#allocation39_spill] sm:$0xff] }
 0x1e7   : > { %v5236_v31 = vpop.f32.mrf.mxu0  ;;  %v5198_v24 = vpop.f32.mrf.mxu1  ;;  %v2583_v20 = vadd.f32 %v6650_v10, %v6649_v43  ;;  %v2965_v5 = vadd.f32 %v6651_v38, %v2585_v21 }
 0x1e8   : > { %3914 = vst.msk [vmem:[%s6381_s14 + $0x4c] sm:$0xf] %vm3894_vm1, %v4719_v19  ;;  %v4717_v41 = vpack.c.bf16 %v3751_v58, %v3751_v58  ;;  %v3756_v16 = vadd.f32 %v6368_v0, %v3717_v29  ;;  %v3715_v30 = vadd.f32 %v3648_v7, %v3335_v56  ;;  %v3338_v57 = vadd.f32 %v5198_v24, %v2958_v9  ;;  %v6652_v19 = vld [vmem:[#allocation13_spill] sm:$0xff]  ;;  %v6654_v24 = vld [vmem:[#allocation14_spill] sm:$0xff] }
 0x1e9   : > { %v3651_v35 = vpop.f32.mrf.mxu0  ;;  %v3271_v54 = vpop.f32.mrf.mxu1  ;;  %v2586_v58 = vadd.f32 %v6349_v4, %v6652_v19  ;;  %v2963_v55 = vadd.f32 %v6653_v15, %v2583_v20 }
 0x1ea   : > { %3912 = vst.msk [vmem:[%s6381_s14 + $0x44] sm:$0xf] %vm3894_vm1, %v4717_v41  ;;  %v4722_v14 = vpack.c.bf16 %v3756_v16, %v3756_v16  ;;  %v3754_v36 = vadd.f32 %v6368_v0, %v3715_v30  ;;  %v3718_v52 = vadd.f32 %v5236_v31, %v3338_v57  ;;  %v3336_v42 = vadd.f32 %v3271_v54, %v2956_v6  ;;  %v6655_v41 = vld [vmem:[#allocation42_spill] sm:$0xff] }
 0x1eb   : > { %v5239_v3 = vpop.f32.mrf.mxu0  ;;  %v5201_v40 = vpop.f32.mrf.mxu1  ;;  %v2584_v16 = vadd.f32 %v6655_v41, %v6654_v24  ;;  %v2966_v49 = vadd.f32 %v6656_v62, %v2586_v58 }
 0x1ec   : > { %3917 = vst.msk [vmem:[%s6381_s14 + $0x58] sm:$0xf] %vm3894_vm1, %v4722_v14  ;;  %v4720_v8 = vpack.c.bf16 %v3754_v36, %v3754_v36  ;;  %v3757_v18 = vadd.f32 %v6368_v0, %v3718_v52  ;;  %v3716_v1 = vadd.f32 %v3651_v35, %v3336_v42  ;;  %v3341_v13 = vadd.f32 %v5201_v40, %v2961_v51  ;;  %v6657_v42 = vld [vmem:[#allocation41_spill] sm:$0xff] }
 0x1ed   : > { %v3664_v37 = vpop.f32.mrf.mxu0  ;;  %v3284_v22 = vpop.f32.mrf.mxu1 }
 0x1ee   : > { %3915 = vst.msk [vmem:[%s6381_s14 + $0x50] sm:$0xf] %vm3894_vm1, %v4720_v8  ;;  %v4723_v50 = vpack.c.bf16 %v3757_v18, %v3757_v18  ;;  %v3755_v61 = vadd.f32 %v6368_v0, %v3716_v1  ;;  %v3721_v23 = vadd.f32 %v5239_v3, %v3341_v13  ;;  %v3339_v34 = vadd.f32 %v3284_v22, %v2959_v53 }
 0x1ef   : > { %v5240_v39 = vpop.f32.mrf.mxu0  ;;  %v5202_v2 = vpop.f32.mrf.mxu1  ;;  %v2964_v3 = vadd.f32 %v6657_v42, %v2584_v16 }
 0x1f0   : > { %3918 = vst.msk [vmem:[%s6381_s14 + $0x5c] sm:$0xf] %vm3894_vm1, %v4723_v50  ;;  %v4721_v7 = vpack.c.bf16 %v3755_v61, %v3755_v61  ;;  %v3760_v59 = vadd.f32 %v6368_v0, %v3721_v23  ;;  %v3719_v9 = vadd.f32 %v3664_v37, %v3339_v34  ;;  %v3342_v28 = vadd.f32 %v5202_v2, %v2962_v26 }
 0x1f1   : > { %v3667_v44 = vpop.f32.mrf.mxu0  ;;  %v3287_v29 = vpop.f32.mrf.mxu1 }
 0x1f2   : > { %3916 = vst.msk [vmem:[%s6381_s14 + $0x54] sm:$0xf] %vm3894_vm1, %v4721_v7  ;;  %v4726_v56 = vpack.c.bf16 %v3760_v59, %v3760_v59  ;;  %v3758_v31 = vadd.f32 %v6368_v0, %v3719_v9  ;;  %v3722_v12 = vadd.f32 %v5240_v39, %v3342_v28  ;;  %v3340_v6 = vadd.f32 %v3287_v29, %v2960_v32 }
 0x1f3   : > { %v5243_v48 = vpop.f32.mrf.mxu0  ;;  %v5205_v30 = vpop.f32.mrf.mxu1 }
 0x1f4   : > { %3921 = vst.msk [vmem:[%s6381_s14 + $0x68] sm:$0xf] %vm3894_vm1, %v4726_v56  ;;  %v4724_v4 = vpack.c.bf16 %v3758_v31, %v3758_v31  ;;  %v3761_v57 = vadd.f32 %v6368_v0, %v3722_v12  ;;  %v3720_v35 = vadd.f32 %v3667_v44, %v3340_v6  ;;  %v3345_v11 = vadd.f32 %v5205_v30, %v2965_v5 }
 0x1f5   : > { %v3680_v51 = vpop.f32.mrf.mxu0  ;;  %v3300_v60 = vpop.f32.mrf.mxu1 }
 0x1f6   : > { %3919 = vst.msk [vmem:[%s6381_s14 + $0x60] sm:$0xf] %vm3894_vm1, %v4724_v4  ;;  %v4727_v54 = vpack.c.bf16 %v3761_v57, %v3761_v57  ;;  %v3759_v14 = vadd.f32 %v6368_v0, %v3720_v35  ;;  %v3725_v36 = vadd.f32 %v5243_v48, %v3345_v11  ;;  %v3343_v52 = vadd.f32 %v3300_v60, %v2963_v55 }
 0x1f7   : > { %v5206_v27 = vpop.f32.mrf.mxu1  ;;  %v5244_v53 = vpop.f32.mrf.mxu0 }
 0x1f8   : > { %3922 = vst.msk [vmem:[%s6381_s14 + $0x6c] sm:$0xf] %vm3894_vm1, %v4727_v54  ;;  %v4725_v25 = vpack.c.bf16 %v3759_v14, %v3759_v14  ;;  %v3764_v33 = vadd.f32 %v6368_v0, %v3725_v36  ;;  %v3723_v47 = vadd.f32 %v3680_v51, %v3343_v52  ;;  %v3346_v40 = vadd.f32 %v5206_v27, %v2966_v49 }
 0x1f9   : > { %v3303_v8 = vpop.f32.mrf.mxu1  ;;  %v3683_v45 = vpop.f32.mrf.mxu0 }
 0x1fa   : > { %3920 = vst.msk [vmem:[%s6381_s14 + $0x64] sm:$0xf] %vm3894_vm1, %v4725_v25  ;;  %v4730_v18 = vpack.c.bf16 %v3764_v33, %v3764_v33  ;;  %v3762_v1 = vadd.f32 %v6368_v0, %v3723_v47  ;;  %v3726_v13 = vadd.f32 %v5244_v53, %v3346_v40  ;;  %v3344_v37 = vadd.f32 %v3303_v8, %v2964_v3 }
 0x1fc   : > { %3925 = vst.msk [vmem:[%s6381_s14 + $0x78] sm:$0xf] %vm3894_vm1, %v4730_v18  ;;  %v4728_v26 = vpack.c.bf16 %v3762_v1, %v3762_v1  ;;  %v3765_v63 = vadd.f32 %v6368_v0, %v3726_v13  ;;  %v3724_v46 = vadd.f32 %v3683_v45, %v3344_v37 }
 0x1fe   : > { %3923 = vst.msk [vmem:[%s6381_s14 + $0x70] sm:$0xf] %vm3894_vm1, %v4728_v26  ;;  %v4731_v21 = vpack.c.bf16 %v3765_v63, %v3765_v63  ;;  %v3763_v22 = vadd.f32 %v6368_v0, %v3724_v46 }
 0x200   : > { %3926 = vst.msk [vmem:[%s6381_s14 + $0x7c] sm:$0xf] %vm3894_vm1, %v4731_v21  ;;  %v4729_v50 = vpack.c.bf16 %v3763_v22, %v3763_v22 }
 0x202   : > { %3924 = vst.msk [vmem:[%s6381_s14 + $0x74] sm:$0xf] %vm3894_vm1, %v4729_v50 }
 0x203 PF: > { %s15_s22 = sadd.s32 1, %s5504_s22   ;;  %s6658_s18 = smov %s5496_s20 }
 0x204   : > { %p12_p10 = scmp.ge.s32.totalorder %s15_s22, 34   ;;  %s6659_s19 = smov %s5500_s21 }
 0x205   : > { %s6660_s20 = smov %s6663_s23  ;;  %s6661_s21 = smov %s6667_s24 }
 0x206   :  { %14 = sbr.rel (!%p12_p10) target bundleno = 3 (0x3), region = 93 }

// kernel: res_up_forward.18
= control target key start
LH: loop header
LB: loop body
LE: loop exit
PB: predicated region body
PF: predicated region fallthrough
CT: control target
= control target key end

     0   :  { %s540_s6 = smov 0   ;;  %s542_s7 = smov 0   ;;  %s596_s0 = inlined_call_operand.vmem [shape: bf16[2,256,128], index: 0, kind: input, shape index: {}]   ;;  %s597_s1 = inlined_call_operand.vmem [shape: f32[2,2,128], index: 1, kind: output, shape index: {}]  }
   0x1   :  { %s544_s8 = smov 0  }
   0x2 LB: > { %s23_s9 = sadd.s32 1, %s523_s7  ;;  %p394_p0 = scmp.ge.s32.totalorder %s527_s8, 1  ;;  %s527_s8 = sphi %s544_s8, %s11_s8   ;;  %s523_s7 = sphi %s542_s7, %s599_s7   ;;  %s519_s6 = sphi %s540_s6, %s598_s6  }
   0x3   : > { %p25_p1 = scmp.ge.s32.totalorder %s23_s9, 2  ;;  %p106_p2 = scmp.lt.s32.totalorder %s527_s8, 3 }
   0x5   : > { %s601_s9 = smov (%p25_p1, %s23_s9), 0  ;;  %p107_p3 = pnand %p394_p0, %p106_p2 }
   0x6   : > { %p130_p4 = scmp.lt.s32.totalorder (!%p107_p3), %s519_s6, 1 }
   0x7   : > { %110 = sbr.rel (%p107_p3) target bundleno = 98 (0x62), region = 24 }
   0xc   : > { %s603_s6 = smov (!%p130_p4, %s519_s6), 1  ;;  %v529_v0 = vmov 0.0   ;;  %vm319_vm0 = vcmask 1040384  }
   0xd   : > { %s400_s10 = sshll.u32 %s603_s6, 7  ;;  %s397_s11 = sshll.u32 %s603_s6, 1 }
   0xe   : > { %s561_s14 = scalar_lea.vmem %s597_s1, %s397_s11  ;;  %s567_s17 = scalar_lea.vmem %s596_s0, %s400_s10 }
   0xf   : > { %317 = vst [vmem:[%s561_s14] sm:$0x3] %v529_v0  ;;  %v402_v1 = vld [vmem:[%s567_s17] sm:$0xff]   ;;  %v465_v2 = vld [vmem:[%s567_s17 + $0x8] sm:$0xff]   ;;  %v466_v7 = vld [vmem:[%s567_s17 + $0x10] sm:$0xff]  }
  0x10   : > { %v403_v3 = vunpack.c.l.bf16 %v402_v1  ;;  %v404_v4 = vunpack.c.h.bf16 %v402_v1  ;;  %v407_v5 = vunpack.c.l.bf16 %v465_v2  ;;  %v408_v8 = vunpack.c.h.bf16 %v465_v2  ;;  %v467_v12 = vld [vmem:[%s567_s17 + $0x18] sm:$0xff]   ;;  %v468_v20 = vld [vmem:[%s567_s17 + $0x20] sm:$0xff]   ;;  %v469_v29 = vld [vmem:[%s567_s17 + $0x28] sm:$0xff]  }
  0x11   : > { %v411_v10 = vunpack.c.l.bf16 %v466_v7  ;;  %v412_v15 = vunpack.c.h.bf16 %v466_v7  ;;  %v415_v18 = vunpack.c.l.bf16 %v467_v12  ;;  %v416_v23 = vunpack.c.h.bf16 %v467_v12  ;;  %v470_v38 = vld [vmem:[%s567_s17 + $0x30] sm:$0xff]   ;;  %v471_v47 = vld [vmem:[%s567_s17 + $0x38] sm:$0xff]   ;;  %v472_v56 = vld [vmem:[%s567_s17 + $0x40] sm:$0xff]  }
  0x12   : > { %v207_v6 = vadd.f32 %v404_v4, %v403_v3  ;;  %v244_v13 = vmul.f32 %v403_v3, %v403_v3  ;;  %v245_v14 = vmul.f32 %v404_v4, %v404_v4  ;;  %v246_v17 = vmul.f32 %v407_v5, %v407_v5  ;;  %v473_v1 = vld [vmem:[%s567_s17 + $0x48] sm:$0xff]  }
  0x13   : > { %v247_v21 = vmul.f32 %v408_v8, %v408_v8  ;;  %v248_v25 = vmul.f32 %v411_v10, %v411_v10  ;;  %v419_v27 = vunpack.c.l.bf16 %v468_v20  ;;  %v249_v30 = vmul.f32 %v412_v15, %v412_v15 }
  0x14   : > { %v208_v9 = vadd.f32 %v407_v5, %v207_v6  ;;  %v276_v22 = vadd.f32 %v245_v14, %v244_v13  ;;  %v420_v32 = vunpack.c.h.bf16 %v468_v20  ;;  %v250_v34 = vmul.f32 %v415_v18, %v415_v18 }
  0x15   : > { %v423_v36 = vunpack.c.l.bf16 %v469_v29  ;;  %v251_v39 = vmul.f32 %v416_v23, %v416_v23  ;;  %v424_v41 = vunpack.c.h.bf16 %v469_v29  ;;  %v252_v43 = vmul.f32 %v419_v27, %v419_v27 }
  0x16   : > { %v209_v11 = vadd.f32 %v408_v8, %v208_v9  ;;  %v277_v26 = vadd.f32 %v276_v22, %v246_v17  ;;  %v427_v45 = vunpack.c.l.bf16 %v470_v38  ;;  %v253_v48 = vmul.f32 %v420_v32, %v420_v32 }
  0x17   : > { %v428_v50 = vunpack.c.h.bf16 %v470_v38  ;;  %v254_v52 = vmul.f32 %v423_v36, %v423_v36  ;;  %v431_v54 = vunpack.c.l.bf16 %v471_v47  ;;  %v255_v57 = vmul.f32 %v424_v41, %v424_v41 }
  0x18   : > { %v210_v16 = vadd.f32 %v411_v10, %v209_v11  ;;  %v278_v31 = vadd.f32 %v277_v26, %v247_v21  ;;  %v432_v59 = vunpack.c.h.bf16 %v471_v47  ;;  %v256_v61 = vmul.f32 %v427_v45, %v427_v45  ;;  %v474_v10 = vld [vmem:[%s567_s17 + $0x50] sm:$0xff]  }
  0x19   : > { %v435_v63 = vunpack.c.l.bf16 %v472_v56  ;;  %v257_v2 = vmul.f32 %v428_v50, %v428_v50  ;;  %v436_v4 = vunpack.c.h.bf16 %v472_v56  ;;  %v258_v6 = vmul.f32 %v431_v54, %v431_v54 }
  0x1a   : > { %v211_v19 = vadd.f32 %v412_v15, %v210_v16  ;;  %v279_v35 = vadd.f32 %v278_v31, %v248_v25  ;;  %v439_v8 = vunpack.c.l.bf16 %v473_v1  ;;  %v259_v11 = vmul.f32 %v432_v59, %v432_v59 }
  0x1b   : > { %v440_v13 = vunpack.c.h.bf16 %v473_v1  ;;  %v260_v15 = vmul.f32 %v435_v63, %v435_v63  ;;  %v443_v17 = vunpack.c.l.bf16 %v474_v10  ;;  %v261_v20 = vmul.f32 %v436_v4, %v436_v4 }
  0x1c   : > { %v212_v24 = vadd.f32 %v415_v18, %v211_v19  ;;  %v280_v40 = vadd.f32 %v279_v35, %v249_v30  ;;  %v475_v19 = vld [vmem:[%s567_s17 + $0x58] sm:$0xff]   ;;  %v444_v22 = vunpack.c.h.bf16 %v474_v10 }
  0x1d   : > { %v447_v26 = vunpack.c.l.bf16 %v475_v19  ;;  %v263_v29 = vmul.f32 %v440_v13, %v440_v13  ;;  %v448_v31 = vunpack.c.h.bf16 %v475_v19 }
  0x1e   : > { %v213_v28 = vadd.f32 %v416_v23, %v212_v24  ;;  %v281_v44 = vadd.f32 %v280_v40, %v250_v34  ;;  %v262_v24 = vmul.f32 %v439_v8, %v439_v8  ;;  %v265_v38 = vmul.f32 %v444_v22, %v444_v22 }
  0x1f   : > { %v267_v47 = vmul.f32 %v448_v31, %v448_v31 }
  0x20   : > { %v214_v33 = vadd.f32 %v419_v27, %v213_v28  ;;  %v282_v49 = vadd.f32 %v281_v44, %v251_v39  ;;  %v476_v28 = vld [vmem:[%s567_s17 + $0x60] sm:$0xff]  }
  0x21   : > { %v451_v35 = vunpack.c.l.bf16 %v476_v28  ;;  %v452_v40 = vunpack.c.h.bf16 %v476_v28 }
  0x22   : > { %v215_v37 = vadd.f32 %v420_v32, %v214_v33  ;;  %v283_v53 = vadd.f32 %v282_v49, %v252_v43  ;;  %v264_v33 = vmul.f32 %v443_v17, %v443_v17 }
  0x23   : > { %v269_v56 = vmul.f32 %v452_v40, %v452_v40 }
  0x24   : > { %v216_v42 = vadd.f32 %v423_v36, %v215_v37  ;;  %v284_v58 = vadd.f32 %v283_v53, %v253_v48  ;;  %v477_v37 = vld [vmem:[%s567_s17 + $0x68] sm:$0xff]  }
  0x25   : > { %v455_v44 = vunpack.c.l.bf16 %v477_v37  ;;  %v456_v49 = vunpack.c.h.bf16 %v477_v37 }
  0x26   : > { %v217_v46 = vadd.f32 %v424_v41, %v216_v42  ;;  %v285_v62 = vadd.f32 %v284_v58, %v254_v52  ;;  %v266_v42 = vmul.f32 %v447_v26, %v447_v26 }
  0x28   : > { %v218_v51 = vadd.f32 %v427_v45, %v217_v46  ;;  %v286_v3 = vadd.f32 %v285_v62, %v255_v57  ;;  %v478_v46 = vld [vmem:[%s567_s17 + $0x70] sm:$0xff]  }
  0x29   : > { %v459_v53 = vunpack.c.l.bf16 %v478_v46  ;;  %v460_v58 = vunpack.c.h.bf16 %v478_v46 }
  0x2a   : > { %v219_v55 = vadd.f32 %v428_v50, %v218_v51  ;;  %v287_v7 = vadd.f32 %v286_v3, %v256_v61  ;;  %v268_v51 = vmul.f32 %v451_v35, %v451_v35 }
  0x2c   : > { %v220_v60 = vadd.f32 %v431_v54, %v219_v55  ;;  %v288_v12 = vadd.f32 %v287_v7, %v257_v2  ;;  %v479_v55 = vld [vmem:[%s567_s17 + $0x78] sm:$0xff]   ;;  %v273_v7 = vmul.f32 %v460_v58, %v460_v58 }
  0x2d   : > { %v463_v62 = vunpack.c.l.bf16 %v479_v55  ;;  %v464_v2 = vunpack.c.h.bf16 %v479_v55 }
  0x2e   : > { %v221_v0 = vadd.f32 %v432_v59, %v220_v60  ;;  %v289_v16 = vadd.f32 %v288_v12, %v258_v6  ;;  %v270_v60 = vmul.f32 %v455_v44, %v455_v44 }
  0x2f   : > { %v274_v10 = vmul.f32 %v463_v62, %v463_v62 }
  0x30   : > { %v222_v5 = vadd.f32 %v435_v63, %v221_v0  ;;  %v290_v21 = vadd.f32 %v289_v16, %v259_v11  ;;  %v271_v0 = vmul.f32 %v456_v49, %v456_v49 }
  0x32   : > { %v223_v9 = vadd.f32 %v436_v4, %v222_v5  ;;  %v291_v25 = vadd.f32 %v290_v21, %v260_v15  ;;  %v272_v4 = vmul.f32 %v459_v53, %v459_v53 }
  0x34   : > { %v224_v14 = vadd.f32 %v439_v8, %v223_v9  ;;  %v292_v30 = vadd.f32 %v291_v25, %v261_v20 }
  0x36   : > { %v225_v18 = vadd.f32 %v440_v13, %v224_v14  ;;  %v293_v34 = vadd.f32 %v292_v30, %v262_v24  ;;  %v275_v13 = vmul.f32 %v464_v2, %v464_v2 }
  0x38   : > { %v226_v23 = vadd.f32 %v443_v17, %v225_v18  ;;  %v294_v39 = vadd.f32 %v293_v34, %v263_v29 }
  0x3a   : > { %v227_v27 = vadd.f32 %v444_v22, %v226_v23  ;;  %v295_v43 = vadd.f32 %v294_v39, %v264_v33 }
  0x3c   : > { %v228_v32 = vadd.f32 %v447_v26, %v227_v27  ;;  %v296_v48 = vadd.f32 %v295_v43, %v265_v38  ;;  %v318_v27 = vld [vmem:[%s561_s14] sm:$0x3] }
  0x3e   : > { %v229_v36 = vadd.f32 %v448_v31, %v228_v32  ;;  %v297_v52 = vadd.f32 %v296_v48, %v266_v42 }
  0x40   : > { %v230_v41 = vadd.f32 %v451_v35, %v229_v36  ;;  %v298_v57 = vadd.f32 %v297_v52, %v267_v47 }
  0x42   : > { %v231_v45 = vadd.f32 %v452_v40, %v230_v41  ;;  %v299_v61 = vadd.f32 %v298_v57, %v268_v51 }
  0x44   : > { %v232_v50 = vadd.f32 %v455_v44, %v231_v45  ;;  %v300_v1 = vadd.f32 %v299_v61, %v269_v56 }
  0x46   : > { %v233_v54 = vadd.f32 %v456_v49, %v232_v50  ;;  %v301_v5 = vadd.f32 %v300_v1, %v270_v60 }
  0x48   : > { %v234_v59 = vadd.f32 %v459_v53, %v233_v54  ;;  %v302_v8 = vadd.f32 %v301_v5, %v271_v0 }
  0x4a   : > { %v235_v63 = vadd.f32 %v460_v58, %v234_v59  ;;  %v303_v11 = vadd.f32 %v302_v8, %v272_v4 }
  0x4c   : > { %v236_v3 = vadd.f32 %v463_v62, %v235_v63  ;;  %v304_v14 = vadd.f32 %v303_v11, %v273_v7 }
  0x4e   : > { %v237_v6 = vadd.f32 %v464_v2, %v236_v3  ;;  %v305_v16 = vadd.f32 %v304_v14, %v274_v10 }
  0x50   : > { %v238_v9 = vrot.slane %v237_v6, 4  ;;  %v306_v17 = vadd.f32 %v305_v16, %v275_v13 }
  0x52   : > { %v239_v12 = vadd.f32 %v238_v9, %v237_v6  ;;  %v307_v19 = vrot.slane %v306_v17, 4 }
  0x54   : > { %v240_v15 = vrot.slane %v239_v12, 2  ;;  %v308_v20 = vadd.f32 %v307_v19, %v306_v17 }
  0x56   : > { %v241_v18 = vadd.f32 %v240_v15, %v239_v12  ;;  %v309_v22 = vrot.slane %v308_v20, 2 }
  0x58   : > { %v242_v21 = vrot.slane %v241_v18, 1  ;;  %v310_v23 = vadd.f32 %v309_v22, %v308_v20 }
  0x5a   : > { %v243_v24 = vadd.f32 %v242_v21, %v241_v18  ;;  %v311_v25 = vrot.slane %v310_v23, 1 }
  0x5c   : > { %v312_v26 = vadd.f32 %v311_v25, %v310_v23 }
  0x5e   : > { %v320_v28 = vsel %vm319_vm0, %v243_v24, %v312_v26 }
  0x5f   : > { %v321_v29 = vadd.f32 %v320_v28, %v318_v27 }
  0x61   : > { %322 = vst [vmem:[%s561_s14] sm:$0x3] %v321_v29 }
  0x62 PF: > { %s11_s8 = sadd.s32 1, %s527_s8   ;;  %s598_s6 = smov %s523_s7 }
  0x63   : > { %p8_p5 = scmp.ge.s32.totalorder %s11_s8, 4   ;;  %s599_s7 = smov %s601_s9 }
  0x65   :  { %10 = sbr.rel (!%p8_p5) target bundleno = 2 (0x2), region = 58 }

// kernel: res_up_forward.19
= control target key start
LH: loop header
LB: loop body
LE: loop exit
PB: predicated region body
PF: predicated region fallthrough
CT: control target
= control target key end

     0   :  { %s966_s12 = smov 0   ;;  %s968_s13 = smov 0   ;;  %s1118_s0 = inlined_call_operand.vmem [shape: bf16[2,256,128], index: 0, kind: input, shape index: {}]   ;;  %s1119_s1 = inlined_call_operand.vmem [shape: f32[2,1,128], index: 1, kind: input, shape index: {}]   ;;  %s1120_s2 = inlined_call_operand.vmem [shape: f32[2,1,128], index: 2, kind: input, shape index: {}]   ;;  %s1121_s3 = inlined_call_operand.vmem [shape: bf16[2,256,128], index: 3, kind: output, shape index: {}]  }
   0x1   :  { %s970_s14 = smov 0  }
   0x2 LB: > { %s25_s15 = sadd.s32 1, %s940_s13  ;;  %p649_p0 = scmp.ge.s32.totalorder %s944_s14, 1  ;;  %s944_s14 = sphi %s970_s14, %s13_s14   ;;  %s940_s13 = sphi %s968_s13, %s1123_s13   ;;  %s936_s12 = sphi %s966_s12, %s1122_s12  }
   0x3   : > { %p27_p1 = scmp.ge.s32.totalorder %s25_s15, 2  ;;  %p174_p2 = scmp.lt.s32.totalorder %s944_s14, 3 }
   0x5   : > { %s1125_s15 = smov (%p27_p1, %s25_s15), 0  ;;  %p175_p3 = pnand %p649_p0, %p174_p2 }
   0x6   : > { %p213_p4 = scmp.lt.s32.totalorder (!%p175_p3), %s936_s12, 1 }
   0x7   : > { %178 = sbr.rel (%p175_p3) target bundleno = 49 (0x31), region = 32 }
   0xc   : > { %s1127_s12 = smov (!%p213_p4, %s936_s12), 1 }
   0xd   : > { %s690_s16 = sshll.u32 %s1127_s12, 7  ;;  %s224_s19 = scalar_lea.vmem %s1119_s1, %s1127_s12 }
   0xe   : > { %s996_s22 = scalar_lea.vmem %s1118_s0, %s690_s16  ;;  %s227_s25 = scalar_lea.vmem %s1120_s2, %s1127_s12  ;;  %v1003_v1 = vld [vmem:[%s224_s19] ss:$0 sm:$0xff] }
   0xf   : > { %v725_v0 = vld [vmem:[%s996_s22] sm:$0xff]   ;;  %v868_v2 = vld [vmem:[%s996_s22 + $0x8] sm:$0xff]   ;;  %v869_v7 = vld [vmem:[%s996_s22 + $0x10] sm:$0xff]   ;;  %s1029_s28 = scalar_lea.vmem %s1121_s3, %s690_s16 }
  0x10   : > { %v726_v3 = vunpack.c.l.bf16 %v725_v0  ;;  %v727_v4 = vunpack.c.h.bf16 %v725_v0  ;;  %v730_v5 = vunpack.c.l.bf16 %v868_v2  ;;  %v731_v6 = vunpack.c.h.bf16 %v868_v2  ;;  %v870_v8 = vld [vmem:[%s996_s22 + $0x18] sm:$0xff]   ;;  %v1008_v9 = vld [vmem:[%s227_s25] ss:$0 sm:$0xff]  ;;  %v872_v27 = vld [vmem:[%s996_s22 + $0x28] sm:$0xff]  }
  0x11   : > { %v734_v10 = vunpack.c.l.bf16 %v869_v7  ;;  %v735_v11 = vunpack.c.h.bf16 %v869_v7  ;;  %v738_v12 = vunpack.c.l.bf16 %v870_v8  ;;  %v739_v13 = vunpack.c.h.bf16 %v870_v8  ;;  %v871_v22 = vld [vmem:[%s996_s22 + $0x20] sm:$0xff]   ;;  %v873_v32 = vld [vmem:[%s996_s22 + $0x30] sm:$0xff]   ;;  %v874_v37 = vld [vmem:[%s996_s22 + $0x38] sm:$0xff]  }
  0x12   : > { %v309_v14 = vmul.f32 %v726_v3, %v1003_v1  ;;  %v310_v15 = vmul.f32 %v727_v4, %v1003_v1  ;;  %v311_v16 = vmul.f32 %v730_v5, %v1003_v1  ;;  %v312_v17 = vmul.f32 %v731_v6, %v1003_v1  ;;  %v875_v50 = vld [vmem:[%s996_s22 + $0x40] sm:$0xff]   ;;  %v876_v59 = vld [vmem:[%s996_s22 + $0x48] sm:$0xff]   ;;  %v877_v0 = vld [vmem:[%s996_s22 + $0x50] sm:$0xff]  }
  0x13   : > { %v313_v18 = vmul.f32 %v734_v10, %v1003_v1  ;;  %v314_v19 = vmul.f32 %v735_v11, %v1003_v1  ;;  %v315_v20 = vmul.f32 %v738_v12, %v1003_v1  ;;  %v316_v21 = vmul.f32 %v739_v13, %v1003_v1  ;;  %v878_v6 = vld [vmem:[%s996_s22 + $0x58] sm:$0xff]  }
  0x14   : > { %v348_v23 = vadd.f32 %v1008_v9, %v309_v14  ;;  %v349_v24 = vadd.f32 %v1008_v9, %v310_v15  ;;  %v350_v25 = vadd.f32 %v1008_v9, %v311_v16  ;;  %v351_v26 = vadd.f32 %v1008_v9, %v312_v17  ;;  %v879_v16 = vld [vmem:[%s996_s22 + $0x60] sm:$0xff]  }
  0x15   : > { %v352_v28 = vadd.f32 %v1008_v9, %v313_v18  ;;  %v353_v29 = vadd.f32 %v1008_v9, %v314_v19  ;;  %v354_v30 = vadd.f32 %v1008_v9, %v315_v20  ;;  %v355_v31 = vadd.f32 %v1008_v9, %v316_v21 }
  0x16   : > { %v791_v33 = vpack.c.bf16 %v349_v24, %v348_v23  ;;  %v796_v34 = vpack.c.bf16 %v351_v26, %v350_v25  ;;  %v742_v35 = vunpack.c.l.bf16 %v871_v22  ;;  %v743_v36 = vunpack.c.h.bf16 %v871_v22 }
  0x17   : > { %v801_v38 = vpack.c.bf16 %v353_v29, %v352_v28  ;;  %v806_v39 = vpack.c.bf16 %v355_v31, %v354_v30  ;;  %v746_v40 = vunpack.c.l.bf16 %v872_v27  ;;  %v747_v41 = vunpack.c.h.bf16 %v872_v27  ;;  %v880_v29 = vld [vmem:[%s996_s22 + $0x68] sm:$0xff]  }
  0x18   : > { %792 = vst [vmem:[%s1029_s28] sm:$0xff] %v791_v33   ;;  %883 = vst [vmem:[%s1029_s28 + $0x8] sm:$0xff] %v796_v34   ;;  %v317_v42 = vmul.f32 %v742_v35, %v1003_v1  ;;  %v318_v43 = vmul.f32 %v743_v36, %v1003_v1  ;;  %v750_v44 = vunpack.c.l.bf16 %v873_v32  ;;  %v751_v45 = vunpack.c.h.bf16 %v873_v32  ;;  %v881_v34 = vld [vmem:[%s996_s22 + $0x70] sm:$0xff]  }
  0x19   : > { %884 = vst [vmem:[%s1029_s28 + $0x10] sm:$0xff] %v801_v38   ;;  %885 = vst [vmem:[%s1029_s28 + $0x18] sm:$0xff] %v806_v39   ;;  %v319_v46 = vmul.f32 %v746_v40, %v1003_v1  ;;  %v320_v47 = vmul.f32 %v747_v41, %v1003_v1  ;;  %v754_v48 = vunpack.c.l.bf16 %v874_v37  ;;  %v755_v49 = vunpack.c.h.bf16 %v874_v37  ;;  %v882_v39 = vld [vmem:[%s996_s22 + $0x78] sm:$0xff]  }
  0x1a   : > { %v356_v51 = vadd.f32 %v1008_v9, %v317_v42  ;;  %v357_v52 = vadd.f32 %v1008_v9, %v318_v43  ;;  %v321_v53 = vmul.f32 %v750_v44, %v1003_v1  ;;  %v322_v54 = vmul.f32 %v751_v45, %v1003_v1 }
  0x1b   : > { %v358_v55 = vadd.f32 %v1008_v9, %v319_v46  ;;  %v359_v56 = vadd.f32 %v1008_v9, %v320_v47  ;;  %v323_v57 = vmul.f32 %v754_v48, %v1003_v1  ;;  %v324_v58 = vmul.f32 %v755_v49, %v1003_v1 }
  0x1c   : > { %v811_v60 = vpack.c.bf16 %v357_v52, %v356_v51  ;;  %v360_v61 = vadd.f32 %v1008_v9, %v321_v53  ;;  %v361_v62 = vadd.f32 %v1008_v9, %v322_v54  ;;  %v758_v63 = vunpack.c.l.bf16 %v875_v50 }
  0x1d   : > { %v816_v2 = vpack.c.bf16 %v359_v56, %v358_v55  ;;  %v362_v3 = vadd.f32 %v1008_v9, %v323_v57  ;;  %v363_v4 = vadd.f32 %v1008_v9, %v324_v58  ;;  %v759_v5 = vunpack.c.h.bf16 %v875_v50 }
  0x1e   : > { %886 = vst [vmem:[%s1029_s28 + $0x20] sm:$0xff] %v811_v60   ;;  %v821_v7 = vpack.c.bf16 %v361_v62, %v360_v61  ;;  %v325_v8 = vmul.f32 %v758_v63, %v1003_v1  ;;  %v762_v10 = vunpack.c.l.bf16 %v876_v59  ;;  %v763_v11 = vunpack.c.h.bf16 %v876_v59 }
  0x1f   : > { %887 = vst [vmem:[%s1029_s28 + $0x28] sm:$0xff] %v816_v2   ;;  %v826_v12 = vpack.c.bf16 %v363_v4, %v362_v3  ;;  %v326_v13 = vmul.f32 %v759_v5, %v1003_v1  ;;  %v766_v14 = vunpack.c.l.bf16 %v877_v0  ;;  %v767_v15 = vunpack.c.h.bf16 %v877_v0 }
  0x20   : > { %888 = vst [vmem:[%s1029_s28 + $0x30] sm:$0xff] %v821_v7   ;;  %v364_v17 = vadd.f32 %v1008_v9, %v325_v8  ;;  %v327_v18 = vmul.f32 %v762_v10, %v1003_v1  ;;  %v328_v19 = vmul.f32 %v763_v11, %v1003_v1  ;;  %v770_v20 = vunpack.c.l.bf16 %v878_v6 }
  0x21   : > { %889 = vst [vmem:[%s1029_s28 + $0x38] sm:$0xff] %v826_v12   ;;  %v365_v21 = vadd.f32 %v1008_v9, %v326_v13  ;;  %v329_v22 = vmul.f32 %v766_v14, %v1003_v1  ;;  %v330_v23 = vmul.f32 %v767_v15, %v1003_v1  ;;  %v771_v24 = vunpack.c.h.bf16 %v878_v6 }
  0x22   : > { %v366_v25 = vadd.f32 %v1008_v9, %v327_v18  ;;  %v367_v26 = vadd.f32 %v1008_v9, %v328_v19  ;;  %v331_v27 = vmul.f32 %v770_v20, %v1003_v1  ;;  %v774_v28 = vunpack.c.l.bf16 %v879_v16 }
  0x23   : > { %v831_v30 = vpack.c.bf16 %v365_v21, %v364_v17  ;;  %v368_v31 = vadd.f32 %v1008_v9, %v329_v22  ;;  %v369_v32 = vadd.f32 %v1008_v9, %v330_v23  ;;  %v332_v33 = vmul.f32 %v771_v24, %v1003_v1 }
  0x24   : > { %v836_v35 = vpack.c.bf16 %v367_v26, %v366_v25  ;;  %v370_v36 = vadd.f32 %v1008_v9, %v331_v27  ;;  %v775_v37 = vunpack.c.h.bf16 %v879_v16  ;;  %v333_v38 = vmul.f32 %v774_v28, %v1003_v1 }
  0x25   : > { %890 = vst [vmem:[%s1029_s28 + $0x40] sm:$0xff] %v831_v30   ;;  %v841_v40 = vpack.c.bf16 %v369_v32, %v368_v31  ;;  %v371_v41 = vadd.f32 %v1008_v9, %v332_v33  ;;  %v778_v42 = vunpack.c.l.bf16 %v880_v29  ;;  %v779_v43 = vunpack.c.h.bf16 %v880_v29 }
  0x26   : > { %891 = vst [vmem:[%s1029_s28 + $0x48] sm:$0xff] %v836_v35   ;;  %v334_v44 = vmul.f32 %v775_v37, %v1003_v1  ;;  %v372_v45 = vadd.f32 %v1008_v9, %v333_v38  ;;  %v782_v46 = vunpack.c.l.bf16 %v881_v34  ;;  %v783_v47 = vunpack.c.h.bf16 %v881_v34 }
  0x27   : > { %892 = vst [vmem:[%s1029_s28 + $0x50] sm:$0xff] %v841_v40   ;;  %v846_v48 = vpack.c.bf16 %v371_v41, %v370_v36  ;;  %v335_v49 = vmul.f32 %v778_v42, %v1003_v1  ;;  %v336_v50 = vmul.f32 %v779_v43, %v1003_v1  ;;  %v786_v51 = vunpack.c.l.bf16 %v882_v39 }
  0x28   : > { %v373_v52 = vadd.f32 %v1008_v9, %v334_v44  ;;  %v337_v53 = vmul.f32 %v782_v46, %v1003_v1  ;;  %v338_v54 = vmul.f32 %v783_v47, %v1003_v1  ;;  %v787_v55 = vunpack.c.h.bf16 %v882_v39 }
  0x29   : > { %893 = vst [vmem:[%s1029_s28 + $0x58] sm:$0xff] %v846_v48   ;;  %v374_v56 = vadd.f32 %v1008_v9, %v335_v49  ;;  %v375_v57 = vadd.f32 %v1008_v9, %v336_v50  ;;  %v339_v58 = vmul.f32 %v786_v51, %v1003_v1 }
  0x2a   : > { %v851_v59 = vpack.c.bf16 %v373_v52, %v372_v45  ;;  %v376_v60 = vadd.f32 %v1008_v9, %v337_v53  ;;  %v377_v61 = vadd.f32 %v1008_v9, %v338_v54  ;;  %v340_v62 = vmul.f32 %v787_v55, %v1003_v1 }
  0x2b   : > { %v856_v63 = vpack.c.bf16 %v375_v57, %v374_v56  ;;  %v378_v0 = vadd.f32 %v1008_v9, %v339_v58 }
  0x2c   : > { %894 = vst [vmem:[%s1029_s28 + $0x60] sm:$0xff] %v851_v59   ;;  %v861_v2 = vpack.c.bf16 %v377_v61, %v376_v60  ;;  %v379_v3 = vadd.f32 %v1008_v9, %v340_v62 }
  0x2d   : > { %895 = vst [vmem:[%s1029_s28 + $0x68] sm:$0xff] %v856_v63  }
  0x2e   : > { %896 = vst [vmem:[%s1029_s28 + $0x70] sm:$0xff] %v861_v2   ;;  %v866_v4 = vpack.c.bf16 %v379_v3, %v378_v0 }
  0x30   : > { %897 = vst [vmem:[%s1029_s28 + $0x78] sm:$0xff] %v866_v4  }
  0x31 PF: > { %s13_s14 = sadd.s32 1, %s944_s14   ;;  %s1122_s12 = smov %s940_s13 }
  0x32   : > { %p10_p5 = scmp.ge.s32.totalorder %s13_s14, 4   ;;  %s1123_s13 = smov %s1125_s15 }
  0x34   :  { %12 = sbr.rel (!%p10_p5) target bundleno = 2 (0x2), region = 68 }

// kernel: res_up_forward.11
= control target key start
LH: loop header
LB: loop body
LE: loop exit
PB: predicated region body
PF: predicated region fallthrough
CT: control target
= control target key end

     0   :  { %s780_s6 = smov 0   ;;  %s782_s7 = smov 0   ;;  %s856_s0 = inlined_call_operand.vmem [shape: bf16[2,512,128], index: 0, kind: input, shape index: {}]   ;;  %s857_s1 = inlined_call_operand.vmem [shape: f32[2,2,128], index: 1, kind: output, shape index: {}]  }
   0x1   :  { %s784_s8 = smov 0  }
   0x2 LB: > { %s23_s9 = sadd.s32 1, %s763_s7  ;;  %p554_p0 = scmp.ge.s32.totalorder %s767_s8, 1  ;;  %s767_s8 = sphi %s784_s8, %s11_s8   ;;  %s763_s7 = sphi %s782_s7, %s859_s7   ;;  %s759_s6 = sphi %s780_s6, %s858_s6  }
   0x3   : > { %p25_p1 = scmp.ge.s32.totalorder %s23_s9, 2  ;;  %p106_p2 = scmp.lt.s32.totalorder %s767_s8, 3 }
   0x5   : > { %s861_s9 = smov (%p25_p1, %s23_s9), 0  ;;  %p107_p3 = pnand %p554_p0, %p106_p2 }
   0x6   : > { %p130_p4 = scmp.lt.s32.totalorder (!%p107_p3), %s759_s6, 1 }
   0x7   : > { %110 = sbr.rel (%p107_p3) target bundleno = 163 (0xa3), region = 24 }
   0xc   : > { %s863_s6 = smov (!%p130_p4, %s759_s6), 1  ;;  %v769_v39 = vmov 0.0   ;;  %vm479_vm0 = vcmask 1040384  }
   0xd   : > { %s560_s10 = sshll.u32 %s863_s6, 8  ;;  %s557_s14 = sshll.u32 %s863_s6, 1 }
   0xe   : > { %s804_s13 = scalar_lea.vmem %s856_s0, %s560_s10  ;;  %s817_s17 = scalar_lea.vmem %s857_s1, %s557_s14 }
   0xf   : > { %v562_v0 = vld [vmem:[%s804_s13] sm:$0xff]   ;;  %v689_v1 = vld [vmem:[%s804_s13 + $0x8] sm:$0xff]   ;;  %v690_v6 = vld [vmem:[%s804_s13 + $0x10] sm:$0xff]   ;;  %477 = vst [vmem:[%s817_s17] sm:$0x3] %v769_v39 }
  0x10   : > { %v563_v2 = vunpack.c.l.bf16 %v562_v0  ;;  %v564_v3 = vunpack.c.h.bf16 %v562_v0  ;;  %v567_v4 = vunpack.c.l.bf16 %v689_v1  ;;  %v568_v7 = vunpack.c.h.bf16 %v689_v1  ;;  %v691_v11 = vld [vmem:[%s804_s13 + $0x18] sm:$0xff]   ;;  %v692_v16 = vld [vmem:[%s804_s13 + $0x20] sm:$0xff]   ;;  %v693_v21 = vld [vmem:[%s804_s13 + $0x28] sm:$0xff]  }
  0x11   : > { %v571_v9 = vunpack.c.l.bf16 %v690_v6  ;;  %v572_v12 = vunpack.c.h.bf16 %v690_v6  ;;  %v575_v14 = vunpack.c.l.bf16 %v691_v11  ;;  %v576_v17 = vunpack.c.h.bf16 %v691_v11  ;;  %v694_v27 = vld [vmem:[%s804_s13 + $0x30] sm:$0xff]   ;;  %v695_v38 = vld [vmem:[%s804_s13 + $0x38] sm:$0xff]   ;;  %v696_v48 = vld [vmem:[%s804_s13 + $0x40] sm:$0xff]  }
  0x12   : > { %v271_v5 = vadd.f32 %v564_v3, %v563_v2  ;;  %v579_v19 = vunpack.c.l.bf16 %v692_v16  ;;  %v580_v22 = vunpack.c.h.bf16 %v692_v16  ;;  %v340_v24 = vmul.f32 %v563_v2, %v563_v2  ;;  %v697_v57 = vld [vmem:[%s804_s13 + $0x48] sm:$0xff]   ;;  %v698_v2 = vld [vmem:[%s804_s13 + $0x50] sm:$0xff]   ;;  %v699_v11 = vld [vmem:[%s804_s13 + $0x58] sm:$0xff]  }
  0x13   : > { %v341_v25 = vmul.f32 %v564_v3, %v564_v3  ;;  %v583_v26 = vunpack.c.l.bf16 %v693_v21  ;;  %v342_v29 = vmul.f32 %v567_v4, %v567_v4  ;;  %v584_v30 = vunpack.c.h.bf16 %v693_v21 }
  0x14   : > { %v272_v8 = vadd.f32 %v567_v4, %v271_v5  ;;  %v343_v32 = vmul.f32 %v568_v7, %v568_v7  ;;  %v587_v34 = vunpack.c.l.bf16 %v694_v27  ;;  %v344_v36 = vmul.f32 %v571_v9, %v571_v9 }
  0x15   : > { %v404_v33 = vadd.f32 %v341_v25, %v340_v24  ;;  %v588_v40 = vunpack.c.h.bf16 %v694_v27  ;;  %v345_v42 = vmul.f32 %v572_v12, %v572_v12  ;;  %v591_v44 = vunpack.c.l.bf16 %v695_v38 }
  0x16   : > { %v273_v10 = vadd.f32 %v568_v7, %v272_v8  ;;  %v346_v46 = vmul.f32 %v575_v14, %v575_v14  ;;  %v592_v49 = vunpack.c.h.bf16 %v695_v38  ;;  %v347_v51 = vmul.f32 %v576_v17, %v576_v17  ;;  %v702_v38 = vld [vmem:[%s804_s13 + $0x70] sm:$0xff]  }
  0x17   : > { %v405_v37 = vadd.f32 %v404_v33, %v342_v29  ;;  %v595_v53 = vunpack.c.l.bf16 %v696_v48  ;;  %v348_v55 = vmul.f32 %v579_v19, %v579_v19  ;;  %v596_v58 = vunpack.c.h.bf16 %v696_v48  ;;  %v701_v29 = vld [vmem:[%s804_s13 + $0x68] sm:$0xff]  }
  0x18   : > { %v274_v13 = vadd.f32 %v571_v9, %v273_v10  ;;  %v349_v60 = vmul.f32 %v580_v22, %v580_v22  ;;  %v599_v62 = vunpack.c.l.bf16 %v697_v57  ;;  %v350_v0 = vmul.f32 %v583_v26, %v583_v26 }
  0x19   : > { %v406_v43 = vadd.f32 %v405_v37, %v343_v32  ;;  %v600_v3 = vunpack.c.h.bf16 %v697_v57  ;;  %v351_v5 = vmul.f32 %v584_v30, %v584_v30  ;;  %v603_v7 = vunpack.c.l.bf16 %v698_v2 }
  0x1a   : > { %v275_v15 = vadd.f32 %v572_v12, %v274_v13  ;;  %v352_v9 = vmul.f32 %v587_v34, %v587_v34  ;;  %v604_v12 = vunpack.c.h.bf16 %v698_v2  ;;  %v607_v16 = vunpack.c.l.bf16 %v699_v11 }
  0x1b   : > { %v407_v47 = vadd.f32 %v406_v43, %v344_v36  ;;  %v608_v21 = vunpack.c.h.bf16 %v699_v11  ;;  %v356_v27 = vmul.f32 %v595_v53, %v595_v53  ;;  %v357_v32 = vmul.f32 %v596_v58, %v596_v58 }
  0x1c   : > { %v276_v18 = vadd.f32 %v575_v14, %v275_v15  ;;  %v353_v14 = vmul.f32 %v588_v40, %v588_v40  ;;  %v358_v36 = vmul.f32 %v599_v62, %v599_v62  ;;  %v616_v39 = vunpack.c.h.bf16 %v701_v29 }
  0x1d   : > { %v408_v52 = vadd.f32 %v407_v47, %v345_v42  ;;  %v619_v43 = vunpack.c.l.bf16 %v702_v38  ;;  %v703_v47 = vld [vmem:[%s804_s13 + $0x78] sm:$0xff]   ;;  %v620_v48 = vunpack.c.h.bf16 %v702_v38 }
  0x1e   : > { %v277_v20 = vadd.f32 %v576_v17, %v276_v18  ;;  %v354_v18 = vmul.f32 %v591_v44, %v591_v44  ;;  %v624_v57 = vunpack.c.h.bf16 %v703_v47 }
  0x1f   : > { %v409_v56 = vadd.f32 %v408_v52, %v346_v46  ;;  %v623_v52 = vunpack.c.l.bf16 %v703_v47 }
  0x20   : > { %v278_v23 = vadd.f32 %v579_v19, %v277_v20  ;;  %v700_v20 = vld [vmem:[%s804_s13 + $0x60] sm:$0xff]  }
  0x21   : > { %v410_v61 = vadd.f32 %v409_v56, %v347_v51  ;;  %v611_v25 = vunpack.c.l.bf16 %v700_v20  ;;  %v704_v56 = vld [vmem:[%s804_s13 + $0x80] sm:$0xff]  }
  0x22   : > { %v279_v28 = vadd.f32 %v580_v22, %v278_v23  ;;  %v355_v23 = vmul.f32 %v592_v49, %v592_v49  ;;  %v628_v2 = vunpack.c.h.bf16 %v704_v56 }
  0x23   : > { %v411_v1 = vadd.f32 %v410_v61, %v348_v55  ;;  %v627_v61 = vunpack.c.l.bf16 %v704_v56 }
  0x24   : > { %v280_v31 = vadd.f32 %v583_v26, %v279_v28 }
  0x25   : > { %v412_v6 = vadd.f32 %v411_v1, %v349_v60  ;;  %v705_v1 = vld [vmem:[%s804_s13 + $0x88] sm:$0xff]  }
  0x26   : > { %v281_v35 = vadd.f32 %v584_v30, %v280_v31  ;;  %v612_v30 = vunpack.c.h.bf16 %v700_v20  ;;  %v632_v11 = vunpack.c.h.bf16 %v705_v1 }
  0x27   : > { %v413_v10 = vadd.f32 %v412_v6, %v350_v0  ;;  %v631_v6 = vunpack.c.l.bf16 %v705_v1 }
  0x28   : > { %v282_v41 = vadd.f32 %v587_v34, %v281_v35  ;;  %v615_v34 = vunpack.c.l.bf16 %v701_v29 }
  0x29   : > { %v414_v15 = vadd.f32 %v413_v10, %v351_v5  ;;  %v706_v10 = vld [vmem:[%s804_s13 + $0x90] sm:$0xff]  }
  0x2a   : > { %v283_v45 = vadd.f32 %v588_v40, %v282_v41  ;;  %v359_v41 = vmul.f32 %v600_v3, %v600_v3  ;;  %v636_v20 = vunpack.c.h.bf16 %v706_v10 }
  0x2b   : > { %v415_v19 = vadd.f32 %v414_v15, %v352_v9  ;;  %v635_v15 = vunpack.c.l.bf16 %v706_v10 }
  0x2c   : > { %v284_v50 = vadd.f32 %v591_v44, %v283_v45  ;;  %v360_v45 = vmul.f32 %v603_v7, %v603_v7 }
  0x2d   : > { %v416_v24 = vadd.f32 %v415_v19, %v353_v14  ;;  %v707_v19 = vld [vmem:[%s804_s13 + $0x98] sm:$0xff]  }
  0x2e   : > { %v285_v54 = vadd.f32 %v592_v49, %v284_v50  ;;  %v361_v50 = vmul.f32 %v604_v12, %v604_v12  ;;  %v640_v29 = vunpack.c.h.bf16 %v707_v19 }
  0x2f   : > { %v417_v28 = vadd.f32 %v416_v24, %v354_v18  ;;  %v639_v24 = vunpack.c.l.bf16 %v707_v19 }
  0x30   : > { %v286_v59 = vadd.f32 %v595_v53, %v285_v54  ;;  %v362_v54 = vmul.f32 %v607_v16, %v607_v16 }
  0x31   : > { %v418_v33 = vadd.f32 %v417_v28, %v355_v23  ;;  %v708_v28 = vld [vmem:[%s804_s13 + $0xa0] sm:$0xff]  }
  0x32   : > { %v287_v63 = vadd.f32 %v596_v58, %v286_v59  ;;  %v363_v59 = vmul.f32 %v608_v21, %v608_v21  ;;  %v644_v38 = vunpack.c.h.bf16 %v708_v28 }
  0x33   : > { %v419_v37 = vadd.f32 %v418_v33, %v356_v27  ;;  %v643_v33 = vunpack.c.l.bf16 %v708_v28 }
  0x34   : > { %v288_v4 = vadd.f32 %v599_v62, %v287_v63  ;;  %v364_v63 = vmul.f32 %v611_v25, %v611_v25 }
  0x35   : > { %v420_v42 = vadd.f32 %v419_v37, %v357_v32  ;;  %v709_v37 = vld [vmem:[%s804_s13 + $0xa8] sm:$0xff]  }
  0x36   : > { %v289_v8 = vadd.f32 %v600_v3, %v288_v4  ;;  %v365_v4 = vmul.f32 %v612_v30, %v612_v30  ;;  %v648_v47 = vunpack.c.h.bf16 %v709_v37 }
  0x37   : > { %v421_v46 = vadd.f32 %v420_v42, %v358_v36  ;;  %v647_v42 = vunpack.c.l.bf16 %v709_v37 }
  0x38   : > { %v290_v13 = vadd.f32 %v603_v7, %v289_v8  ;;  %v366_v8 = vmul.f32 %v615_v34, %v615_v34 }
  0x39   : > { %v422_v51 = vadd.f32 %v421_v46, %v359_v41  ;;  %v710_v46 = vld [vmem:[%s804_s13 + $0xb0] sm:$0xff]  }
  0x3a   : > { %v291_v17 = vadd.f32 %v604_v12, %v290_v13  ;;  %v367_v13 = vmul.f32 %v616_v39, %v616_v39  ;;  %v652_v56 = vunpack.c.h.bf16 %v710_v46 }
  0x3b   : > { %v423_v55 = vadd.f32 %v422_v51, %v360_v45  ;;  %v651_v51 = vunpack.c.l.bf16 %v710_v46 }
  0x3c   : > { %v292_v22 = vadd.f32 %v607_v16, %v291_v17  ;;  %v368_v17 = vmul.f32 %v619_v43, %v619_v43 }
  0x3d   : > { %v424_v60 = vadd.f32 %v423_v55, %v361_v50  ;;  %v711_v55 = vld [vmem:[%s804_s13 + $0xb8] sm:$0xff]  }
  0x3e   : > { %v293_v26 = vadd.f32 %v608_v21, %v292_v22  ;;  %v369_v22 = vmul.f32 %v620_v48, %v620_v48  ;;  %v656_v1 = vunpack.c.h.bf16 %v711_v55 }
  0x3f   : > { %v425_v0 = vadd.f32 %v424_v60, %v362_v54  ;;  %v655_v60 = vunpack.c.l.bf16 %v711_v55 }
  0x40   : > { %v294_v31 = vadd.f32 %v611_v25, %v293_v26  ;;  %v370_v26 = vmul.f32 %v623_v52, %v623_v52 }
  0x41   : > { %v426_v5 = vadd.f32 %v425_v0, %v363_v59  ;;  %v712_v0 = vld [vmem:[%s804_s13 + $0xc0] sm:$0xff]  }
  0x42   : > { %v295_v35 = vadd.f32 %v612_v30, %v294_v31  ;;  %v371_v31 = vmul.f32 %v624_v57, %v624_v57  ;;  %v660_v10 = vunpack.c.h.bf16 %v712_v0 }
  0x43   : > { %v427_v9 = vadd.f32 %v426_v5, %v364_v63  ;;  %v659_v5 = vunpack.c.l.bf16 %v712_v0 }
  0x44   : > { %v296_v40 = vadd.f32 %v615_v34, %v295_v35  ;;  %v372_v35 = vmul.f32 %v627_v61, %v627_v61 }
  0x45   : > { %v428_v14 = vadd.f32 %v427_v9, %v365_v4  ;;  %v713_v9 = vld [vmem:[%s804_s13 + $0xc8] sm:$0xff]  }
  0x46   : > { %v297_v44 = vadd.f32 %v616_v39, %v296_v40  ;;  %v373_v40 = vmul.f32 %v628_v2, %v628_v2  ;;  %v664_v19 = vunpack.c.h.bf16 %v713_v9 }
  0x47   : > { %v429_v18 = vadd.f32 %v428_v14, %v366_v8  ;;  %v663_v14 = vunpack.c.l.bf16 %v713_v9 }
  0x48   : > { %v298_v49 = vadd.f32 %v619_v43, %v297_v44  ;;  %v374_v44 = vmul.f32 %v631_v6, %v631_v6 }
  0x49   : > { %v430_v23 = vadd.f32 %v429_v18, %v367_v13  ;;  %v714_v18 = vld [vmem:[%s804_s13 + $0xd0] sm:$0xff]  }
  0x4a   : > { %v299_v53 = vadd.f32 %v620_v48, %v298_v49  ;;  %v375_v49 = vmul.f32 %v632_v11, %v632_v11  ;;  %v668_v28 = vunpack.c.h.bf16 %v714_v18 }
  0x4b   : > { %v431_v27 = vadd.f32 %v430_v23, %v368_v17  ;;  %v667_v23 = vunpack.c.l.bf16 %v714_v18 }
  0x4c   : > { %v300_v58 = vadd.f32 %v623_v52, %v299_v53  ;;  %v376_v53 = vmul.f32 %v635_v15, %v635_v15 }
  0x4d   : > { %v432_v32 = vadd.f32 %v431_v27, %v369_v22  ;;  %v715_v27 = vld [vmem:[%s804_s13 + $0xd8] sm:$0xff]  }
  0x4e   : > { %v301_v62 = vadd.f32 %v624_v57, %v300_v58  ;;  %v377_v58 = vmul.f32 %v636_v20, %v636_v20  ;;  %v672_v37 = vunpack.c.h.bf16 %v715_v27 }
  0x4f   : > { %v433_v36 = vadd.f32 %v432_v32, %v370_v26  ;;  %v671_v32 = vunpack.c.l.bf16 %v715_v27 }
  0x50   : > { %v302_v3 = vadd.f32 %v627_v61, %v301_v62  ;;  %v378_v62 = vmul.f32 %v639_v24, %v639_v24 }
  0x51   : > { %v434_v41 = vadd.f32 %v433_v36, %v371_v31  ;;  %v716_v36 = vld [vmem:[%s804_s13 + $0xe0] sm:$0xff]  }
  0x52   : > { %v303_v7 = vadd.f32 %v628_v2, %v302_v3  ;;  %v379_v3 = vmul.f32 %v640_v29, %v640_v29  ;;  %v676_v46 = vunpack.c.h.bf16 %v716_v36 }
  0x53   : > { %v435_v45 = vadd.f32 %v434_v41, %v372_v35  ;;  %v675_v41 = vunpack.c.l.bf16 %v716_v36 }
  0x54   : > { %v304_v12 = vadd.f32 %v631_v6, %v303_v7  ;;  %v380_v7 = vmul.f32 %v643_v33, %v643_v33 }
  0x55   : > { %v436_v50 = vadd.f32 %v435_v45, %v373_v40  ;;  %v717_v45 = vld [vmem:[%s804_s13 + $0xe8] sm:$0xff]  }
  0x56   : > { %v305_v16 = vadd.f32 %v632_v11, %v304_v12  ;;  %v381_v12 = vmul.f32 %v644_v38, %v644_v38  ;;  %v680_v55 = vunpack.c.h.bf16 %v717_v45 }
  0x57   : > { %v437_v54 = vadd.f32 %v436_v50, %v374_v44  ;;  %v679_v50 = vunpack.c.l.bf16 %v717_v45 }
  0x58   : > { %v306_v21 = vadd.f32 %v635_v15, %v305_v16  ;;  %v382_v16 = vmul.f32 %v647_v42, %v647_v42 }
  0x59   : > { %v438_v59 = vadd.f32 %v437_v54, %v375_v49  ;;  %v718_v54 = vld [vmem:[%s804_s13 + $0xf0] sm:$0xff]  }
  0x5a   : > { %v307_v25 = vadd.f32 %v636_v20, %v306_v21  ;;  %v383_v21 = vmul.f32 %v648_v47, %v648_v47 }
  0x5b   : > { %v439_v63 = vadd.f32 %v438_v59, %v376_v53  ;;  %v683_v59 = vunpack.c.l.bf16 %v718_v54 }
  0x5c   : > { %v308_v30 = vadd.f32 %v639_v24, %v307_v25  ;;  %v384_v25 = vmul.f32 %v651_v51, %v651_v51 }
  0x5d   : > { %v440_v4 = vadd.f32 %v439_v63, %v377_v58  ;;  %v684_v63 = vunpack.c.h.bf16 %v718_v54 }
  0x5e   : > { %v309_v34 = vadd.f32 %v640_v29, %v308_v30  ;;  %v385_v30 = vmul.f32 %v652_v56, %v652_v56 }
  0x5f   : > { %v441_v8 = vadd.f32 %v440_v4, %v378_v62 }
  0x60   : > { %v310_v39 = vadd.f32 %v643_v33, %v309_v34  ;;  %v386_v34 = vmul.f32 %v655_v60, %v655_v60 }
  0x61   : > { %v442_v13 = vadd.f32 %v441_v8, %v379_v3  ;;  %v719_v3 = vld [vmem:[%s804_s13 + $0xf8] sm:$0xff]   ;;  %v395_v8 = vmul.f32 %v672_v37, %v672_v37 }
  0x62   : > { %v311_v43 = vadd.f32 %v644_v38, %v310_v39  ;;  %v387_v39 = vmul.f32 %v656_v1, %v656_v1 }
  0x63   : > { %v443_v17 = vadd.f32 %v442_v13, %v380_v7  ;;  %v687_v7 = vunpack.c.l.bf16 %v719_v3  ;;  %v688_v13 = vunpack.c.h.bf16 %v719_v3 }
  0x64   : > { %v312_v48 = vadd.f32 %v647_v42, %v311_v43  ;;  %v388_v43 = vmul.f32 %v659_v5, %v659_v5 }
  0x65   : > { %v444_v22 = vadd.f32 %v443_v17, %v381_v12  ;;  %v398_v17 = vmul.f32 %v679_v50, %v679_v50  ;;  %v402_v27 = vmul.f32 %v687_v7, %v687_v7 }
  0x66   : > { %v313_v52 = vadd.f32 %v648_v47, %v312_v48  ;;  %v389_v48 = vmul.f32 %v660_v10, %v660_v10 }
  0x67   : > { %v445_v26 = vadd.f32 %v444_v22, %v382_v16  ;;  %v400_v22 = vmul.f32 %v683_v59, %v683_v59 }
  0x68   : > { %v314_v57 = vadd.f32 %v651_v51, %v313_v52  ;;  %v390_v52 = vmul.f32 %v663_v14, %v663_v14 }
  0x69   : > { %v446_v31 = vadd.f32 %v445_v26, %v383_v21 }
  0x6a   : > { %v315_v61 = vadd.f32 %v652_v56, %v314_v57  ;;  %v391_v57 = vmul.f32 %v664_v19, %v664_v19 }
  0x6b   : > { %v447_v35 = vadd.f32 %v446_v31, %v384_v25 }
  0x6c   : > { %v316_v2 = vadd.f32 %v655_v60, %v315_v61  ;;  %v392_v61 = vmul.f32 %v667_v23, %v667_v23 }
  0x6d   : > { %v448_v40 = vadd.f32 %v447_v35, %v385_v30 }
  0x6e   : > { %v317_v6 = vadd.f32 %v656_v1, %v316_v2  ;;  %v393_v1 = vmul.f32 %v668_v28, %v668_v28 }
  0x6f   : > { %v449_v44 = vadd.f32 %v448_v40, %v386_v34 }
  0x70   : > { %v318_v11 = vadd.f32 %v659_v5, %v317_v6  ;;  %v394_v5 = vmul.f32 %v671_v32, %v671_v32 }
  0x71   : > { %v450_v49 = vadd.f32 %v449_v44, %v387_v39 }
  0x72   : > { %v319_v15 = vadd.f32 %v660_v10, %v318_v11  ;;  %v396_v11 = vmul.f32 %v675_v41, %v675_v41 }
  0x73   : > { %v451_v53 = vadd.f32 %v450_v49, %v388_v43  ;;  %v478_v43 = vld [vmem:[%s817_s17] sm:$0x3] }
  0x74   : > { %v320_v20 = vadd.f32 %v663_v14, %v319_v15  ;;  %v397_v14 = vmul.f32 %v676_v46, %v676_v46 }
  0x75   : > { %v452_v58 = vadd.f32 %v451_v53, %v389_v48 }
  0x76   : > { %v321_v24 = vadd.f32 %v664_v19, %v320_v20  ;;  %v399_v19 = vmul.f32 %v680_v55, %v680_v55 }
  0x77   : > { %v453_v62 = vadd.f32 %v452_v58, %v390_v52 }
  0x78   : > { %v322_v29 = vadd.f32 %v667_v23, %v321_v24  ;;  %v401_v24 = vmul.f32 %v684_v63, %v684_v63 }
  0x79   : > { %v454_v2 = vadd.f32 %v453_v62, %v391_v57 }
  0x7a   : > { %v323_v33 = vadd.f32 %v668_v28, %v322_v29  ;;  %v403_v29 = vmul.f32 %v688_v13, %v688_v13 }
  0x7b   : > { %v455_v6 = vadd.f32 %v454_v2, %v392_v61 }
  0x7c   : > { %v324_v38 = vadd.f32 %v671_v32, %v323_v33 }
  0x7d   : > { %v456_v9 = vadd.f32 %v455_v6, %v393_v1 }
  0x7e   : > { %v325_v42 = vadd.f32 %v672_v37, %v324_v38 }
  0x7f   : > { %v457_v12 = vadd.f32 %v456_v9, %v394_v5 }
  0x80   : > { %v326_v47 = vadd.f32 %v675_v41, %v325_v42 }
  0x81   : > { %v458_v15 = vadd.f32 %v457_v12, %v395_v8 }
  0x82   : > { %v327_v51 = vadd.f32 %v676_v46, %v326_v47 }
  0x83   : > { %v459_v18 = vadd.f32 %v458_v15, %v396_v11 }
  0x84   : > { %v328_v56 = vadd.f32 %v679_v50, %v327_v51 }
  0x85   : > { %v460_v20 = vadd.f32 %v459_v18, %v397_v14 }
  0x86   : > { %v329_v60 = vadd.f32 %v680_v55, %v328_v56 }
  0x87   : > { %v461_v23 = vadd.f32 %v460_v20, %v398_v17 }
  0x88   : > { %v330_v0 = vadd.f32 %v683_v59, %v329_v60 }
  0x89   : > { %v462_v25 = vadd.f32 %v461_v23, %v399_v19 }
  0x8a   : > { %v331_v4 = vadd.f32 %v684_v63, %v330_v0 }
  0x8b   : > { %v463_v28 = vadd.f32 %v462_v25, %v400_v22 }
  0x8c   : > { %v332_v10 = vadd.f32 %v687_v7, %v331_v4 }
  0x8d   : > { %v464_v30 = vadd.f32 %v463_v28, %v401_v24 }
  0x8e   : > { %v333_v16 = vadd.f32 %v688_v13, %v332_v10 }
  0x8f   : > { %v465_v32 = vadd.f32 %v464_v30, %v402_v27 }
  0x90   : > { %v334_v21 = vrot.slane %v333_v16, 4 }
  0x91   : > { %v466_v33 = vadd.f32 %v465_v32, %v403_v29 }
  0x92   : > { %v335_v26 = vadd.f32 %v334_v21, %v333_v16 }
  0x93   : > { %v467_v35 = vrot.slane %v466_v33, 4 }
  0x94   : > { %v336_v31 = vrot.slane %v335_v26, 2 }
  0x95   : > { %v468_v36 = vadd.f32 %v467_v35, %v466_v33 }
  0x96   : > { %v337_v34 = vadd.f32 %v336_v31, %v335_v26 }
  0x97   : > { %v469_v38 = vrot.slane %v468_v36, 2 }
  0x98   : > { %v338_v37 = vrot.slane %v337_v34, 1 }
  0x99   : > { %v470_v39 = vadd.f32 %v469_v38, %v468_v36 }
  0x9a   : > { %v339_v40 = vadd.f32 %v338_v37, %v337_v34 }
  0x9b   : > { %v471_v41 = vrot.slane %v470_v39, 1 }
  0x9d   : > { %v472_v42 = vadd.f32 %v471_v41, %v470_v39 }
  0x9f   : > { %v480_v44 = vsel %vm479_vm0, %v339_v40, %v472_v42 }
  0xa0   : > { %v481_v45 = vadd.f32 %v480_v44, %v478_v43 }
  0xa2   : > { %482 = vst [vmem:[%s817_s17] sm:$0x3] %v481_v45 }
  0xa3 PF: > { %s11_s8 = sadd.s32 1, %s767_s8   ;;  %s858_s6 = smov %s763_s7 }
  0xa4   : > { %p8_p5 = scmp.ge.s32.totalorder %s11_s8, 4   ;;  %s859_s7 = smov %s861_s9 }
  0xa6   :  { %10 = sbr.rel (!%p8_p5) target bundleno = 2 (0x2), region = 58 }

// kernel: res_up_forward.12
= control target key start
LH: loop header
LB: loop body
LE: loop exit
PB: predicated region body
PF: predicated region fallthrough
CT: control target
= control target key end

     0   :  { %s1686_s12 = smov 0   ;;  %s1688_s13 = smov 0   ;;  %s1935_s0 = inlined_call_operand.vmem [shape: bf16[2,512,128], index: 0, kind: input, shape index: {}]   ;;  %s1936_s1 = inlined_call_operand.vmem [shape: f32[2,1,128], index: 1, kind: input, shape index: {}]   ;;  %s1937_s2 = inlined_call_operand.vmem [shape: f32[2,1,128], index: 2, kind: input, shape index: {}]   ;;  %s1938_s3 = inlined_call_operand.vmem [shape: bf16[2,512,128], index: 3, kind: output, shape index: {}]  }
   0x1   :  { %s1690_s14 = smov 0  }
   0x2 LB: > { %s25_s15 = sadd.s32 1, %s1660_s13  ;;  %p1129_p0 = scmp.ge.s32.totalorder %s1664_s14, 1  ;;  %s1664_s14 = sphi %s1690_s14, %s13_s14   ;;  %s1660_s13 = sphi %s1688_s13, %s1940_s13   ;;  %s1656_s12 = sphi %s1686_s12, %s1939_s12  }
   0x3   : > { %p27_p1 = scmp.ge.s32.totalorder %s25_s15, 2  ;;  %p174_p2 = scmp.lt.s32.totalorder %s1664_s14, 3 }
   0x5   : > { %s1942_s15 = smov (%p27_p1, %s25_s15), 0  ;;  %p175_p3 = pnand %p1129_p0, %p174_p2 }
   0x6   : > { %p213_p4 = scmp.lt.s32.totalorder (!%p175_p3), %s1656_s12, 1 }
   0x7   : > { %178 = sbr.rel (%p175_p3) target bundleno = 128 (0x80), region = 32 }
   0xc   : > { %s1944_s12 = smov (!%p213_p4, %s1656_s12), 1 }
   0xd   : > { %s1202_s16 = sshll.u32 %s1944_s12, 8  ;;  %s224_s19 = scalar_lea.vmem %s1936_s1, %s1944_s12 }
   0xe   : > { %s1716_s22 = scalar_lea.vmem %s1935_s0, %s1202_s16  ;;  %s227_s25 = scalar_lea.vmem %s1937_s2, %s1944_s12  ;;  %v1723_v1 = vld [vmem:[%s224_s19] ss:$0 sm:$0xff] }
   0xf   : > { %v1269_v0 = vld [vmem:[%s1716_s22] sm:$0xff]   ;;  %v1556_v2 = vld [vmem:[%s1716_s22 + $0x8] sm:$0xff]   ;;  %v1557_v7 = vld [vmem:[%s1716_s22 + $0x10] sm:$0xff]   ;;  %s1751_s28 = scalar_lea.vmem %s1938_s3, %s1202_s16 }
  0x10   : > { %v1270_v3 = vunpack.c.l.bf16 %v1269_v0  ;;  %v1271_v4 = vunpack.c.h.bf16 %v1269_v0  ;;  %v1274_v5 = vunpack.c.l.bf16 %v1556_v2  ;;  %v1275_v6 = vunpack.c.h.bf16 %v1556_v2  ;;  %v1558_v8 = vld [vmem:[%s1716_s22 + $0x18] sm:$0xff]   ;;  %v1728_v9 = vld [vmem:[%s227_s25] ss:$0 sm:$0xff]  ;;  %v1560_v41 = vld [vmem:[%s1716_s22 + $0x28] sm:$0xff]  }
  0x11   : > { %v1278_v10 = vunpack.c.l.bf16 %v1557_v7  ;;  %v1279_v11 = vunpack.c.h.bf16 %v1557_v7  ;;  %v1282_v12 = vunpack.c.l.bf16 %v1558_v8  ;;  %v1283_v13 = vunpack.c.h.bf16 %v1558_v8  ;;  %v1559_v36 = vld [vmem:[%s1716_s22 + $0x20] sm:$0xff]   ;;  %v1561_v52 = vld [vmem:[%s1716_s22 + $0x30] sm:$0xff]   ;;  %v1562_v53 = vld [vmem:[%s1716_s22 + $0x38] sm:$0xff]  }
  0x12   : > { %v373_v14 = vmul.f32 %v1270_v3, %v1723_v1  ;;  %v374_v15 = vmul.f32 %v1271_v4, %v1723_v1  ;;  %v375_v16 = vmul.f32 %v1274_v5, %v1723_v1  ;;  %v376_v17 = vmul.f32 %v1275_v6, %v1723_v1 }
  0x13   : > { %v377_v18 = vmul.f32 %v1278_v10, %v1723_v1  ;;  %v378_v19 = vmul.f32 %v1279_v11, %v1723_v1  ;;  %v379_v20 = vmul.f32 %v1282_v12, %v1723_v1  ;;  %v380_v21 = vmul.f32 %v1283_v13, %v1723_v1 }
  0x14   : > { %v444_v22 = vadd.f32 %v1728_v9, %v373_v14  ;;  %v445_v23 = vadd.f32 %v1728_v9, %v374_v15  ;;  %v446_v24 = vadd.f32 %v1728_v9, %v375_v16  ;;  %v447_v25 = vadd.f32 %v1728_v9, %v376_v17 }
  0x15   : > { %v448_v26 = vadd.f32 %v1728_v9, %v377_v18  ;;  %v449_v27 = vadd.f32 %v1728_v9, %v378_v19  ;;  %v450_v28 = vadd.f32 %v1728_v9, %v379_v20  ;;  %v451_v29 = vadd.f32 %v1728_v9, %v380_v21  ;;  %v1563_v20 = vld [vmem:[%s1716_s22 + $0x40] sm:$0xff]  }
  0x16   : > { %vm508_vm0 = vcmp.ge.f32.partialorder %v444_v22, 0.0  ;;  %vm509_vm1 = vcmp.ge.f32.partialorder %v445_v23, 0.0  ;;  %v572_v30 = vmul.f32 0.01, %v444_v22  ;;  %v573_v31 = vmul.f32 0.01, %v445_v23 }
  0x17   : > { %vm510_vm2 = vcmp.ge.f32.partialorder %v446_v24, 0.0  ;;  %vm511_vm3 = vcmp.ge.f32.partialorder %v447_v25, 0.0  ;;  %v574_v32 = vmul.f32 0.01, %v446_v24  ;;  %v575_v33 = vmul.f32 0.01, %v447_v25 }
  0x18   : > { %v636_v34 = vsel %vm508_vm0, %v444_v22, %v572_v30  ;;  %v637_v35 = vsel %vm509_vm1, %v445_v23, %v573_v31  ;;  %vm512_vm4 = vcmp.ge.f32.partialorder %v448_v26, 0.0  ;;  %vm513_vm5 = vcmp.ge.f32.partialorder %v449_v27, 0.0 }
  0x19   : > { %v1399_v37 = vpack.c.bf16 %v637_v35, %v636_v34  ;;  %v638_v38 = vsel %vm510_vm2, %v446_v24, %v574_v32  ;;  %v639_v39 = vsel %vm511_vm3, %v447_v25, %v575_v33  ;;  %v576_v40 = vmul.f32 0.01, %v448_v26  ;;  %v1564_v24 = vld [vmem:[%s1716_s22 + $0x48] sm:$0xff]  }
  0x1a   : > { %v1404_v42 = vpack.c.bf16 %v639_v39, %v638_v38  ;;  %v577_v43 = vmul.f32 0.01, %v449_v27  ;;  %vm514_vm6 = vcmp.ge.f32.partialorder %v450_v28, 0.0  ;;  %vm515_vm7 = vcmp.ge.f32.partialorder %v451_v29, 0.0 }
  0x1b   : > { %1400 = vst [vmem:[%s1751_s28] sm:$0xff] %v1399_v37   ;;  %v640_v44 = vsel %vm512_vm4, %v448_v26, %v576_v40  ;;  %v578_v45 = vmul.f32 0.01, %v450_v28  ;;  %v579_v46 = vmul.f32 0.01, %v451_v29  ;;  %v1286_v47 = vunpack.c.l.bf16 %v1559_v36 }
  0x1c   : > { %1587 = vst [vmem:[%s1751_s28 + $0x8] sm:$0xff] %v1404_v42   ;;  %v641_v48 = vsel %vm513_vm5, %v449_v27, %v577_v43  ;;  %v1287_v49 = vunpack.c.h.bf16 %v1559_v36  ;;  %v1290_v50 = vunpack.c.l.bf16 %v1560_v41  ;;  %v1291_v51 = vunpack.c.h.bf16 %v1560_v41  ;;  %v1565_v36 = vld [vmem:[%s1716_s22 + $0x50] sm:$0xff]  }
  0x1d   : > { %v1409_v54 = vpack.c.bf16 %v641_v48, %v640_v44  ;;  %v642_v55 = vsel %vm514_vm6, %v450_v28, %v578_v45  ;;  %v643_v56 = vsel %vm515_vm7, %v451_v29, %v579_v46  ;;  %v381_v57 = vmul.f32 %v1286_v47, %v1723_v1 }
  0x1e   : > { %v1414_v58 = vpack.c.bf16 %v643_v56, %v642_v55  ;;  %v382_v59 = vmul.f32 %v1287_v49, %v1723_v1  ;;  %v383_v60 = vmul.f32 %v1290_v50, %v1723_v1  ;;  %v384_v61 = vmul.f32 %v1291_v51, %v1723_v1  ;;  %v1566_v55 = vld [vmem:[%s1716_s22 + $0x58] sm:$0xff]  }
  0x1f   : > { %1588 = vst [vmem:[%s1751_s28 + $0x10] sm:$0xff] %v1409_v54   ;;  %v452_v62 = vadd.f32 %v1728_v9, %v381_v57  ;;  %v1294_v63 = vunpack.c.l.bf16 %v1561_v52  ;;  %v1295_v0 = vunpack.c.h.bf16 %v1561_v52  ;;  %v1298_v2 = vunpack.c.l.bf16 %v1562_v53 }
  0x20   : > { %1589 = vst [vmem:[%s1751_s28 + $0x18] sm:$0xff] %v1414_v58   ;;  %v453_v3 = vadd.f32 %v1728_v9, %v382_v59  ;;  %v454_v4 = vadd.f32 %v1728_v9, %v383_v60  ;;  %v455_v5 = vadd.f32 %v1728_v9, %v384_v61  ;;  %v1299_v6 = vunpack.c.h.bf16 %v1562_v53 }
  0x21   : > { %vm516_vm8 = vcmp.ge.f32.partialorder %v452_v62, 0.0  ;;  %v580_v7 = vmul.f32 0.01, %v452_v62  ;;  %v385_v8 = vmul.f32 %v1294_v63, %v1723_v1  ;;  %v386_v10 = vmul.f32 %v1295_v0, %v1723_v1  ;;  %v1567_v0 = vld [vmem:[%s1716_s22 + $0x60] sm:$0xff]  }
  0x22   : > { %vm517_vm9 = vcmp.ge.f32.partialorder %v453_v3, 0.0  ;;  %v581_v11 = vmul.f32 0.01, %v453_v3  ;;  %vm518_vm10 = vcmp.ge.f32.partialorder %v454_v4, 0.0  ;;  %vm519_vm11 = vcmp.ge.f32.partialorder %v455_v5, 0.0 }
  0x23   : > { %v644_v12 = vsel %vm516_vm8, %v452_v62, %v580_v7  ;;  %v582_v13 = vmul.f32 0.01, %v454_v4  ;;  %v583_v14 = vmul.f32 0.01, %v455_v5  ;;  %v456_v15 = vadd.f32 %v1728_v9, %v385_v8 }
  0x24   : > { %v645_v16 = vsel %vm517_vm9, %v453_v3, %v581_v11  ;;  %v457_v17 = vadd.f32 %v1728_v9, %v386_v10  ;;  %v387_v18 = vmul.f32 %v1298_v2, %v1723_v1  ;;  %v388_v19 = vmul.f32 %v1299_v6, %v1723_v1  ;;  %v1568_v6 = vld [vmem:[%s1716_s22 + $0x68] sm:$0xff]  }
  0x25   : > { %v1419_v21 = vpack.c.bf16 %v645_v16, %v644_v12  ;;  %v646_v22 = vsel %vm518_vm10, %v454_v4, %v582_v13  ;;  %v647_v23 = vsel %vm519_vm11, %v455_v5, %v583_v14  ;;  %vm520_vm12 = vcmp.ge.f32.partialorder %v456_v15, 0.0 }
  0x26   : > { %v1424_v25 = vpack.c.bf16 %v647_v23, %v646_v22  ;;  %vm521_vm13 = vcmp.ge.f32.partialorder %v457_v17, 0.0  ;;  %v584_v26 = vmul.f32 0.01, %v456_v15  ;;  %v585_v27 = vmul.f32 0.01, %v457_v17  ;;  %v1569_v22 = vld [vmem:[%s1716_s22 + $0x70] sm:$0xff]  }
  0x27   : > { %1590 = vst [vmem:[%s1751_s28 + $0x20] sm:$0xff] %v1419_v21   ;;  %v458_v28 = vadd.f32 %v1728_v9, %v387_v18  ;;  %v459_v29 = vadd.f32 %v1728_v9, %v388_v19  ;;  %v1302_v30 = vunpack.c.l.bf16 %v1563_v20  ;;  %v1303_v31 = vunpack.c.h.bf16 %v1563_v20 }
  0x28   : > { %1591 = vst [vmem:[%s1751_s28 + $0x28] sm:$0xff] %v1424_v25   ;;  %v648_v32 = vsel %vm520_vm12, %v456_v15, %v584_v26  ;;  %v649_v33 = vsel %vm521_vm13, %v457_v17, %v585_v27  ;;  %v1306_v34 = vunpack.c.l.bf16 %v1564_v24  ;;  %v1307_v35 = vunpack.c.h.bf16 %v1564_v24 }
  0x29   : > { %v1429_v37 = vpack.c.bf16 %v649_v33, %v648_v32  ;;  %vm522_vm14 = vcmp.ge.f32.partialorder %v458_v28, 0.0  ;;  %vm523_vm15 = vcmp.ge.f32.partialorder %v459_v29, 0.0  ;;  %v586_v38 = vmul.f32 0.01, %v458_v28 }
  0x2a   : > { %v587_v39 = vmul.f32 0.01, %v459_v29  ;;  %v389_v40 = vmul.f32 %v1302_v30, %v1723_v1  ;;  %v390_v41 = vmul.f32 %v1303_v31, %v1723_v1  ;;  %v391_v42 = vmul.f32 %v1306_v34, %v1723_v1 }
  0x2b   : > { %1592 = vst [vmem:[%s1751_s28 + $0x30] sm:$0xff] %v1429_v37   ;;  %v650_v43 = vsel %vm522_vm14, %v458_v28, %v586_v38  ;;  %v392_v44 = vmul.f32 %v1307_v35, %v1723_v1  ;;  %v1310_v45 = vunpack.c.l.bf16 %v1565_v36  ;;  %v1311_v46 = vunpack.c.h.bf16 %v1565_v36 }
  0x2c   : > { %v651_v47 = vsel %vm523_vm15, %v459_v29, %v587_v39  ;;  %v460_v48 = vadd.f32 %v1728_v9, %v389_v40  ;;  %v461_v49 = vadd.f32 %v1728_v9, %v390_v41  ;;  %v462_v50 = vadd.f32 %v1728_v9, %v391_v42  ;;  %v1570_v41 = vld [vmem:[%s1716_s22 + $0x78] sm:$0xff]  }
  0x2d   : > { %v1434_v51 = vpack.c.bf16 %v651_v47, %v650_v43  ;;  %v463_v52 = vadd.f32 %v1728_v9, %v392_v44  ;;  %v393_v53 = vmul.f32 %v1310_v45, %v1723_v1  ;;  %v394_v54 = vmul.f32 %v1311_v46, %v1723_v1  ;;  %v1571_v46 = vld [vmem:[%s1716_s22 + $0x80] sm:$0xff]   ;;  %v1572_v47 = vld [vmem:[%s1716_s22 + $0x88] sm:$0xff]  }
  0x2e   : > { %vm524_vm0 = vcmp.ge.f32.partialorder %v460_v48, 0.0  ;;  %vm525_vm1 = vcmp.ge.f32.partialorder %v461_v49, 0.0  ;;  %v588_v56 = vmul.f32 0.01, %v460_v48  ;;  %v589_v57 = vmul.f32 0.01, %v461_v49 }
  0x2f   : > { %1593 = vst [vmem:[%s1751_s28 + $0x38] sm:$0xff] %v1434_v51   ;;  %vm526_vm2 = vcmp.ge.f32.partialorder %v462_v50, 0.0  ;;  %vm527_vm3 = vcmp.ge.f32.partialorder %v463_v52, 0.0  ;;  %v590_v58 = vmul.f32 0.01, %v462_v50  ;;  %v464_v62 = vadd.f32 %v1728_v9, %v393_v53 }
  0x30   : > { %v591_v59 = vmul.f32 0.01, %v463_v52  ;;  %v652_v60 = vsel %vm524_vm0, %v460_v48, %v588_v56  ;;  %v653_v61 = vsel %vm525_vm1, %v461_v49, %v589_v57  ;;  %v465_v63 = vadd.f32 %v1728_v9, %v394_v54 }
  0x31   : > { %v1439_v2 = vpack.c.bf16 %v653_v61, %v652_v60  ;;  %v654_v3 = vsel %vm526_vm2, %v462_v50, %v590_v58  ;;  %v1314_v5 = vunpack.c.l.bf16 %v1566_v55  ;;  %vm528_vm4 = vcmp.ge.f32.partialorder %v464_v62, 0.0 }
  0x32   : > { %v655_v4 = vsel %vm527_vm3, %v463_v52, %v591_v59  ;;  %vm529_vm5 = vcmp.ge.f32.partialorder %v465_v63, 0.0  ;;  %v592_v8 = vmul.f32 0.01, %v464_v62  ;;  %v593_v10 = vmul.f32 0.01, %v465_v63 }
  0x33   : > { %v1444_v7 = vpack.c.bf16 %v655_v4, %v654_v3  ;;  %1594 = vst [vmem:[%s1751_s28 + $0x40] sm:$0xff] %v1439_v2   ;;  %v1315_v11 = vunpack.c.h.bf16 %v1566_v55  ;;  %v395_v12 = vmul.f32 %v1314_v5, %v1723_v1  ;;  %v1318_v13 = vunpack.c.l.bf16 %v1567_v0 }
  0x34   : > { %v656_v14 = vsel %vm528_vm4, %v464_v62, %v592_v8  ;;  %v1319_v15 = vunpack.c.h.bf16 %v1567_v0  ;;  %v1322_v16 = vunpack.c.l.bf16 %v1568_v6  ;;  %v1323_v17 = vunpack.c.h.bf16 %v1568_v6 }
  0x35   : > { %1595 = vst [vmem:[%s1751_s28 + $0x48] sm:$0xff] %v1444_v7   ;;  %v657_v18 = vsel %vm529_vm5, %v465_v63, %v593_v10  ;;  %v396_v19 = vmul.f32 %v1315_v11, %v1723_v1  ;;  %v466_v20 = vadd.f32 %v1728_v9, %v395_v12  ;;  %v397_v21 = vmul.f32 %v1318_v13, %v1723_v1 }
  0x36   : > { %v1449_v23 = vpack.c.bf16 %v657_v18, %v656_v14  ;;  %v398_v24 = vmul.f32 %v1319_v15, %v1723_v1  ;;  %v399_v25 = vmul.f32 %v1322_v16, %v1723_v1  ;;  %v400_v26 = vmul.f32 %v1323_v17, %v1723_v1  ;;  %v1573_v14 = vld [vmem:[%s1716_s22 + $0x90] sm:$0xff]  }
  0x37   : > { %v467_v27 = vadd.f32 %v1728_v9, %v396_v19  ;;  %vm530_vm6 = vcmp.ge.f32.partialorder %v466_v20, 0.0  ;;  %v594_v28 = vmul.f32 0.01, %v466_v20  ;;  %v468_v29 = vadd.f32 %v1728_v9, %v397_v21 }
  0x38   : > { %1596 = vst [vmem:[%s1751_s28 + $0x50] sm:$0xff] %v1449_v23   ;;  %v469_v30 = vadd.f32 %v1728_v9, %v398_v24  ;;  %v470_v31 = vadd.f32 %v1728_v9, %v399_v25  ;;  %v471_v32 = vadd.f32 %v1728_v9, %v400_v26  ;;  %v1326_v33 = vunpack.c.l.bf16 %v1569_v22  ;;  %v1574_v25 = vld [vmem:[%s1716_s22 + $0x98] sm:$0xff]  }
  0x39   : > { %vm531_vm7 = vcmp.ge.f32.partialorder %v467_v27, 0.0  ;;  %v595_v34 = vmul.f32 0.01, %v467_v27  ;;  %v658_v35 = vsel %vm530_vm6, %v466_v20, %v594_v28  ;;  %vm532_vm8 = vcmp.ge.f32.partialorder %v468_v29, 0.0 }
  0x3a   : > { %vm533_vm9 = vcmp.ge.f32.partialorder %v469_v30, 0.0  ;;  %v596_v36 = vmul.f32 0.01, %v468_v29  ;;  %v597_v37 = vmul.f32 0.01, %v469_v30  ;;  %vm534_vm10 = vcmp.ge.f32.partialorder %v470_v31, 0.0 }
  0x3b   : > { %v659_v38 = vsel %vm531_vm7, %v467_v27, %v595_v34  ;;  %vm535_vm11 = vcmp.ge.f32.partialorder %v471_v32, 0.0  ;;  %v598_v39 = vmul.f32 0.01, %v470_v31  ;;  %v599_v40 = vmul.f32 0.01, %v471_v32 }
  0x3c   : > { %v1454_v42 = vpack.c.bf16 %v659_v38, %v658_v35  ;;  %v660_v43 = vsel %vm532_vm8, %v468_v29, %v596_v36  ;;  %v661_v44 = vsel %vm533_vm9, %v469_v30, %v597_v37  ;;  %v1327_v45 = vunpack.c.h.bf16 %v1569_v22  ;;  %v1575_v30 = vld [vmem:[%s1716_s22 + $0xa0] sm:$0xff]  }
  0x3d   : > { %v1459_v48 = vpack.c.bf16 %v661_v44, %v660_v43  ;;  %v662_v49 = vsel %vm534_vm10, %v470_v31, %v598_v39  ;;  %v663_v50 = vsel %vm535_vm11, %v471_v32, %v599_v40  ;;  %v401_v51 = vmul.f32 %v1326_v33, %v1723_v1 }
  0x3e   : > { %1597 = vst [vmem:[%s1751_s28 + $0x58] sm:$0xff] %v1454_v42   ;;  %v1464_v52 = vpack.c.bf16 %v663_v50, %v662_v49  ;;  %v402_v53 = vmul.f32 %v1327_v45, %v1723_v1  ;;  %v1330_v54 = vunpack.c.l.bf16 %v1570_v41  ;;  %v1331_v55 = vunpack.c.h.bf16 %v1570_v41  ;;  %v1576_v45 = vld [vmem:[%s1716_s22 + $0xa8] sm:$0xff]  }
  0x3f   : > { %1598 = vst [vmem:[%s1751_s28 + $0x60] sm:$0xff] %v1459_v48   ;;  %v472_v56 = vadd.f32 %v1728_v9, %v401_v51  ;;  %v1334_v57 = vunpack.c.l.bf16 %v1571_v46  ;;  %v1335_v58 = vunpack.c.h.bf16 %v1571_v46  ;;  %v1338_v59 = vunpack.c.l.bf16 %v1572_v47 }
  0x40   : > { %1599 = vst [vmem:[%s1751_s28 + $0x68] sm:$0xff] %v1464_v52   ;;  %v473_v60 = vadd.f32 %v1728_v9, %v402_v53  ;;  %v403_v61 = vmul.f32 %v1330_v54, %v1723_v1  ;;  %v404_v62 = vmul.f32 %v1331_v55, %v1723_v1  ;;  %v1339_v63 = vunpack.c.h.bf16 %v1572_v47 }
  0x41   : > { %vm536_vm12 = vcmp.ge.f32.partialorder %v472_v56, 0.0  ;;  %v600_v0 = vmul.f32 0.01, %v472_v56  ;;  %v405_v2 = vmul.f32 %v1334_v57, %v1723_v1  ;;  %v406_v3 = vmul.f32 %v1335_v58, %v1723_v1 }
  0x42   : > { %vm537_vm13 = vcmp.ge.f32.partialorder %v473_v60, 0.0  ;;  %v601_v4 = vmul.f32 0.01, %v473_v60  ;;  %v474_v5 = vadd.f32 %v1728_v9, %v403_v61  ;;  %v475_v6 = vadd.f32 %v1728_v9, %v404_v62  ;;  %v1577_v62 = vld [vmem:[%s1716_s22 + $0xb0] sm:$0xff]  }
  0x43   : > { %v664_v7 = vsel %vm536_vm12, %v472_v56, %v600_v0  ;;  %v476_v8 = vadd.f32 %v1728_v9, %v405_v2  ;;  %v477_v10 = vadd.f32 %v1728_v9, %v406_v3  ;;  %v407_v11 = vmul.f32 %v1338_v59, %v1723_v1  ;;  %v1578_v3 = vld [vmem:[%s1716_s22 + $0xb8] sm:$0xff]  }
  0x44   : > { %v665_v12 = vsel %vm537_vm13, %v473_v60, %v601_v4  ;;  %vm538_vm14 = vcmp.ge.f32.partialorder %v474_v5, 0.0  ;;  %vm539_vm15 = vcmp.ge.f32.partialorder %v475_v6, 0.0  ;;  %v602_v13 = vmul.f32 0.01, %v474_v5 }
  0x45   : > { %v1469_v15 = vpack.c.bf16 %v665_v12, %v664_v7  ;;  %v603_v16 = vmul.f32 0.01, %v475_v6  ;;  %vm540_vm0 = vcmp.ge.f32.partialorder %v476_v8, 0.0  ;;  %vm541_vm1 = vcmp.ge.f32.partialorder %v477_v10, 0.0 }
  0x46   : > { %v666_v17 = vsel %vm538_vm14, %v474_v5, %v602_v13  ;;  %v604_v18 = vmul.f32 0.01, %v476_v8  ;;  %v605_v19 = vmul.f32 0.01, %v477_v10  ;;  %v408_v20 = vmul.f32 %v1339_v63, %v1723_v1 }
  0x47   : > { %1600 = vst [vmem:[%s1751_s28 + $0x70] sm:$0xff] %v1469_v15   ;;  %v667_v21 = vsel %vm539_vm15, %v475_v6, %v603_v16  ;;  %v478_v22 = vadd.f32 %v1728_v9, %v407_v11  ;;  %v1342_v23 = vunpack.c.l.bf16 %v1573_v14  ;;  %v1343_v24 = vunpack.c.h.bf16 %v1573_v14 }
  0x48   : > { %v1474_v26 = vpack.c.bf16 %v667_v21, %v666_v17  ;;  %v668_v27 = vsel %vm540_vm0, %v476_v8, %v604_v18  ;;  %v669_v28 = vsel %vm541_vm1, %v477_v10, %v605_v19  ;;  %v479_v29 = vadd.f32 %v1728_v9, %v408_v20  ;;  %v1579_v20 = vld [vmem:[%s1716_s22 + $0xc0] sm:$0xff]  }
  0x49   : > { %v1479_v31 = vpack.c.bf16 %v669_v28, %v668_v27  ;;  %vm542_vm2 = vcmp.ge.f32.partialorder %v478_v22, 0.0  ;;  %v606_v32 = vmul.f32 0.01, %v478_v22  ;;  %v409_v33 = vmul.f32 %v1342_v23, %v1723_v1 }
  0x4a   : > { %1601 = vst [vmem:[%s1751_s28 + $0x78] sm:$0xff] %v1474_v26   ;;  %vm543_vm3 = vcmp.ge.f32.partialorder %v479_v29, 0.0  ;;  %v607_v34 = vmul.f32 0.01, %v479_v29  ;;  %v410_v35 = vmul.f32 %v1343_v24, %v1723_v1  ;;  %v1346_v36 = vunpack.c.l.bf16 %v1574_v25 }
  0x4b   : > { %1602 = vst [vmem:[%s1751_s28 + $0x80] sm:$0xff] %v1479_v31   ;;  %v670_v37 = vsel %vm542_vm2, %v478_v22, %v606_v32  ;;  %v480_v38 = vadd.f32 %v1728_v9, %v409_v33  ;;  %v1347_v39 = vunpack.c.h.bf16 %v1574_v25  ;;  %v1350_v40 = vunpack.c.l.bf16 %v1575_v30 }
  0x4c   : > { %v671_v41 = vsel %vm543_vm3, %v479_v29, %v607_v34  ;;  %v481_v42 = vadd.f32 %v1728_v9, %v410_v35  ;;  %v411_v43 = vmul.f32 %v1346_v36, %v1723_v1  ;;  %v1351_v44 = vunpack.c.h.bf16 %v1575_v30  ;;  %v1580_v34 = vld [vmem:[%s1716_s22 + $0xc8] sm:$0xff]  }
  0x4d   : > { %v1484_v46 = vpack.c.bf16 %v671_v41, %v670_v37  ;;  %vm544_vm4 = vcmp.ge.f32.partialorder %v480_v38, 0.0  ;;  %v608_v47 = vmul.f32 0.01, %v480_v38  ;;  %v412_v48 = vmul.f32 %v1347_v39, %v1723_v1 }
  0x4e   : > { %vm545_vm5 = vcmp.ge.f32.partialorder %v481_v42, 0.0  ;;  %v609_v49 = vmul.f32 0.01, %v481_v42  ;;  %v482_v50 = vadd.f32 %v1728_v9, %v411_v43  ;;  %v413_v51 = vmul.f32 %v1350_v40, %v1723_v1 }
  0x4f   : > { %1603 = vst [vmem:[%s1751_s28 + $0x88] sm:$0xff] %v1484_v46   ;;  %v672_v52 = vsel %vm544_vm4, %v480_v38, %v608_v47  ;;  %v483_v53 = vadd.f32 %v1728_v9, %v412_v48  ;;  %v414_v54 = vmul.f32 %v1351_v44, %v1723_v1  ;;  %v1354_v55 = vunpack.c.l.bf16 %v1576_v45  ;;  %v1581_v44 = vld [vmem:[%s1716_s22 + $0xd0] sm:$0xff]  }
  0x50   : > { %v673_v56 = vsel %vm545_vm5, %v481_v42, %v609_v49  ;;  %vm546_vm6 = vcmp.ge.f32.partialorder %v482_v50, 0.0  ;;  %v610_v57 = vmul.f32 0.01, %v482_v50  ;;  %v484_v58 = vadd.f32 %v1728_v9, %v413_v51 }
  0x51   : > { %v1489_v59 = vpack.c.bf16 %v673_v56, %v672_v52  ;;  %vm547_vm7 = vcmp.ge.f32.partialorder %v483_v53, 0.0  ;;  %v611_v60 = vmul.f32 0.01, %v483_v53  ;;  %v485_v61 = vadd.f32 %v1728_v9, %v414_v54 }
  0x52   : > { %v674_v63 = vsel %vm546_vm6, %v482_v50, %v610_v57  ;;  %vm548_vm8 = vcmp.ge.f32.partialorder %v484_v58, 0.0  ;;  %v612_v0 = vmul.f32 0.01, %v484_v58  ;;  %v1355_v2 = vunpack.c.h.bf16 %v1576_v45  ;;  %v1582_v45 = vld [vmem:[%s1716_s22 + $0xd8] sm:$0xff]  }
  0x53   : > { %1604 = vst [vmem:[%s1751_s28 + $0x90] sm:$0xff] %v1489_v59   ;;  %v675_v4 = vsel %vm547_vm7, %v483_v53, %v611_v60  ;;  %vm549_vm9 = vcmp.ge.f32.partialorder %v485_v61, 0.0  ;;  %v613_v5 = vmul.f32 0.01, %v485_v61  ;;  %v415_v6 = vmul.f32 %v1354_v55, %v1723_v1 }
  0x54   : > { %v1494_v7 = vpack.c.bf16 %v675_v4, %v674_v63  ;;  %v676_v8 = vsel %vm548_vm8, %v484_v58, %v612_v0  ;;  %v416_v10 = vmul.f32 %v1355_v2, %v1723_v1  ;;  %v1358_v11 = vunpack.c.l.bf16 %v1577_v62 }
  0x55   : > { %v677_v12 = vsel %vm549_vm9, %v485_v61, %v613_v5  ;;  %v486_v13 = vadd.f32 %v1728_v9, %v415_v6  ;;  %v1359_v14 = vunpack.c.h.bf16 %v1577_v62  ;;  %v1362_v15 = vunpack.c.l.bf16 %v1578_v3 }
  0x56   : > { %1605 = vst [vmem:[%s1751_s28 + $0x98] sm:$0xff] %v1494_v7   ;;  %v1499_v16 = vpack.c.bf16 %v677_v12, %v676_v8  ;;  %v487_v17 = vadd.f32 %v1728_v9, %v416_v10  ;;  %v417_v18 = vmul.f32 %v1358_v11, %v1723_v1  ;;  %v1363_v19 = vunpack.c.h.bf16 %v1578_v3  ;;  %v1583_v12 = vld [vmem:[%s1716_s22 + $0xe0] sm:$0xff]  }
  0x57   : > { %vm550_vm10 = vcmp.ge.f32.partialorder %v486_v13, 0.0  ;;  %v614_v21 = vmul.f32 0.01, %v486_v13  ;;  %v418_v22 = vmul.f32 %v1359_v14, %v1723_v1  ;;  %v419_v23 = vmul.f32 %v1362_v15, %v1723_v1 }
  0x58   : > { %1606 = vst [vmem:[%s1751_s28 + $0xa0] sm:$0xff] %v1499_v16   ;;  %vm551_vm11 = vcmp.ge.f32.partialorder %v487_v17, 0.0  ;;  %v615_v24 = vmul.f32 0.01, %v487_v17  ;;  %v488_v25 = vadd.f32 %v1728_v9, %v417_v18  ;;  %v420_v26 = vmul.f32 %v1363_v19, %v1723_v1  ;;  %v1584_v16 = vld [vmem:[%s1716_s22 + $0xe8] sm:$0xff]  }
  0x59   : > { %v678_v27 = vsel %vm550_vm10, %v486_v13, %v614_v21  ;;  %v489_v28 = vadd.f32 %v1728_v9, %v418_v22  ;;  %v490_v29 = vadd.f32 %v1728_v9, %v419_v23  ;;  %v1366_v30 = vunpack.c.l.bf16 %v1579_v20 }
  0x5a   : > { %v679_v31 = vsel %vm551_vm11, %v487_v17, %v615_v24  ;;  %vm552_vm12 = vcmp.ge.f32.partialorder %v488_v25, 0.0  ;;  %v616_v32 = vmul.f32 0.01, %v488_v25  ;;  %v491_v33 = vadd.f32 %v1728_v9, %v420_v26 }
  0x5b   : > { %v1504_v35 = vpack.c.bf16 %v679_v31, %v678_v27  ;;  %vm553_vm13 = vcmp.ge.f32.partialorder %v489_v28, 0.0  ;;  %v617_v36 = vmul.f32 0.01, %v489_v28  ;;  %vm554_vm14 = vcmp.ge.f32.partialorder %v490_v29, 0.0 }
  0x5c   : > { %v680_v37 = vsel %vm552_vm12, %v488_v25, %v616_v32  ;;  %vm555_vm15 = vcmp.ge.f32.partialorder %v491_v33, 0.0  ;;  %v618_v38 = vmul.f32 0.01, %v490_v29  ;;  %v619_v39 = vmul.f32 0.01, %v491_v33 }
  0x5d   : > { %1607 = vst [vmem:[%s1751_s28 + $0xa8] sm:$0xff] %v1504_v35   ;;  %v681_v40 = vsel %vm553_vm13, %v489_v28, %v617_v36  ;;  %v1367_v41 = vunpack.c.h.bf16 %v1579_v20  ;;  %v421_v42 = vmul.f32 %v1366_v30, %v1723_v1  ;;  %v1370_v43 = vunpack.c.l.bf16 %v1580_v34  ;;  %v1585_v28 = vld [vmem:[%s1716_s22 + $0xf0] sm:$0xff]  }
  0x5e   : > { %v1509_v46 = vpack.c.bf16 %v681_v40, %v680_v37  ;;  %v682_v47 = vsel %vm554_vm14, %v490_v29, %v618_v38  ;;  %v683_v48 = vsel %vm555_vm15, %v491_v33, %v619_v39  ;;  %v1371_v49 = vunpack.c.h.bf16 %v1580_v34 }
  0x5f   : > { %v1514_v50 = vpack.c.bf16 %v683_v48, %v682_v47  ;;  %v422_v51 = vmul.f32 %v1367_v41, %v1723_v1  ;;  %v492_v52 = vadd.f32 %v1728_v9, %v421_v42  ;;  %v423_v53 = vmul.f32 %v1370_v43, %v1723_v1  ;;  %v1586_v47 = vld [vmem:[%s1716_s22 + $0xf8] sm:$0xff]  }
  0x60   : > { %1608 = vst [vmem:[%s1751_s28 + $0xb0] sm:$0xff] %v1509_v46   ;;  %v424_v54 = vmul.f32 %v1371_v49, %v1723_v1  ;;  %v1374_v55 = vunpack.c.l.bf16 %v1581_v44  ;;  %v1375_v56 = vunpack.c.h.bf16 %v1581_v44  ;;  %v1378_v57 = vunpack.c.l.bf16 %v1582_v45 }
  0x61   : > { %1609 = vst [vmem:[%s1751_s28 + $0xb8] sm:$0xff] %v1514_v50   ;;  %v493_v58 = vadd.f32 %v1728_v9, %v422_v51  ;;  %vm556_vm0 = vcmp.ge.f32.partialorder %v492_v52, 0.0  ;;  %v620_v59 = vmul.f32 0.01, %v492_v52  ;;  %v494_v60 = vadd.f32 %v1728_v9, %v423_v53 }
  0x62   : > { %v495_v61 = vadd.f32 %v1728_v9, %v424_v54  ;;  %v425_v62 = vmul.f32 %v1374_v55, %v1723_v1  ;;  %v426_v63 = vmul.f32 %v1375_v56, %v1723_v1  ;;  %v1379_v0 = vunpack.c.h.bf16 %v1582_v45 }
  0x63   : > { %vm557_vm1 = vcmp.ge.f32.partialorder %v493_v58, 0.0  ;;  %v621_v2 = vmul.f32 0.01, %v493_v58  ;;  %v684_v3 = vsel %vm556_vm0, %v492_v52, %v620_v59  ;;  %vm558_vm2 = vcmp.ge.f32.partialorder %v494_v60, 0.0 }
  0x64   : > { %vm559_vm3 = vcmp.ge.f32.partialorder %v495_v61, 0.0  ;;  %v622_v4 = vmul.f32 0.01, %v494_v60  ;;  %v623_v5 = vmul.f32 0.01, %v495_v61  ;;  %v496_v6 = vadd.f32 %v1728_v9, %v425_v62 }
  0x65   : > { %v685_v7 = vsel %vm557_vm1, %v493_v58, %v621_v2  ;;  %v497_v8 = vadd.f32 %v1728_v9, %v426_v63  ;;  %v427_v10 = vmul.f32 %v1378_v57, %v1723_v1  ;;  %v428_v11 = vmul.f32 %v1379_v0, %v1723_v1 }
  0x66   : > { %v1519_v13 = vpack.c.bf16 %v685_v7, %v684_v3  ;;  %v686_v14 = vsel %vm558_vm2, %v494_v60, %v622_v4  ;;  %v687_v15 = vsel %vm559_vm3, %v495_v61, %v623_v5  ;;  %vm560_vm4 = vcmp.ge.f32.partialorder %v496_v6, 0.0 }
  0x67   : > { %v1524_v17 = vpack.c.bf16 %v687_v15, %v686_v14  ;;  %vm561_vm5 = vcmp.ge.f32.partialorder %v497_v8, 0.0  ;;  %v624_v18 = vmul.f32 0.01, %v496_v6  ;;  %v625_v19 = vmul.f32 0.01, %v497_v8 }
  0x68   : > { %1610 = vst [vmem:[%s1751_s28 + $0xc0] sm:$0xff] %v1519_v13   ;;  %v498_v20 = vadd.f32 %v1728_v9, %v427_v10  ;;  %v499_v21 = vadd.f32 %v1728_v9, %v428_v11  ;;  %v1382_v22 = vunpack.c.l.bf16 %v1583_v12  ;;  %v1383_v23 = vunpack.c.h.bf16 %v1583_v12 }
  0x69   : > { %1611 = vst [vmem:[%s1751_s28 + $0xc8] sm:$0xff] %v1524_v17   ;;  %v688_v24 = vsel %vm560_vm4, %v496_v6, %v624_v18  ;;  %v689_v25 = vsel %vm561_vm5, %v497_v8, %v625_v19  ;;  %v1386_v26 = vunpack.c.l.bf16 %v1584_v16  ;;  %v1387_v27 = vunpack.c.h.bf16 %v1584_v16 }
  0x6a   : > { %v1529_v29 = vpack.c.bf16 %v689_v25, %v688_v24  ;;  %vm562_vm6 = vcmp.ge.f32.partialorder %v498_v20, 0.0  ;;  %vm563_vm7 = vcmp.ge.f32.partialorder %v499_v21, 0.0  ;;  %v626_v30 = vmul.f32 0.01, %v498_v20 }
  0x6b   : > { %v627_v31 = vmul.f32 0.01, %v499_v21  ;;  %v429_v32 = vmul.f32 %v1382_v22, %v1723_v1  ;;  %v430_v33 = vmul.f32 %v1383_v23, %v1723_v1  ;;  %v431_v34 = vmul.f32 %v1386_v26, %v1723_v1 }
  0x6c   : > { %1612 = vst [vmem:[%s1751_s28 + $0xd0] sm:$0xff] %v1529_v29   ;;  %v690_v35 = vsel %vm562_vm6, %v498_v20, %v626_v30  ;;  %v432_v36 = vmul.f32 %v1387_v27, %v1723_v1  ;;  %v1390_v37 = vunpack.c.l.bf16 %v1585_v28  ;;  %v1391_v38 = vunpack.c.h.bf16 %v1585_v28 }
  0x6d   : > { %v691_v39 = vsel %vm563_vm7, %v499_v21, %v627_v31  ;;  %v500_v40 = vadd.f32 %v1728_v9, %v429_v32  ;;  %v501_v41 = vadd.f32 %v1728_v9, %v430_v33  ;;  %v502_v42 = vadd.f32 %v1728_v9, %v431_v34 }
  0x6e   : > { %v1534_v43 = vpack.c.bf16 %v691_v39, %v690_v35  ;;  %v503_v44 = vadd.f32 %v1728_v9, %v432_v36  ;;  %v433_v45 = vmul.f32 %v1390_v37, %v1723_v1  ;;  %v434_v46 = vmul.f32 %v1391_v38, %v1723_v1 }
  0x6f   : > { %vm564_vm8 = vcmp.ge.f32.partialorder %v500_v40, 0.0  ;;  %vm565_vm9 = vcmp.ge.f32.partialorder %v501_v41, 0.0  ;;  %v628_v48 = vmul.f32 0.01, %v500_v40  ;;  %v629_v49 = vmul.f32 0.01, %v501_v41 }
  0x70   : > { %1613 = vst [vmem:[%s1751_s28 + $0xd8] sm:$0xff] %v1534_v43   ;;  %vm566_vm10 = vcmp.ge.f32.partialorder %v502_v42, 0.0  ;;  %vm567_vm11 = vcmp.ge.f32.partialorder %v503_v44, 0.0  ;;  %v630_v50 = vmul.f32 0.01, %v502_v42  ;;  %v504_v54 = vadd.f32 %v1728_v9, %v433_v45 }
  0x71   : > { %v631_v51 = vmul.f32 0.01, %v503_v44  ;;  %v692_v52 = vsel %vm564_vm8, %v500_v40, %v628_v48  ;;  %v693_v53 = vsel %vm565_vm9, %v501_v41, %v629_v49  ;;  %v505_v55 = vadd.f32 %v1728_v9, %v434_v46 }
  0x72   : > { %v1539_v56 = vpack.c.bf16 %v693_v53, %v692_v52  ;;  %v694_v57 = vsel %vm566_vm10, %v502_v42, %v630_v50  ;;  %v1394_v59 = vunpack.c.l.bf16 %v1586_v47  ;;  %vm568_vm12 = vcmp.ge.f32.partialorder %v504_v54, 0.0 }
  0x73   : > { %v695_v58 = vsel %vm567_vm11, %v503_v44, %v631_v51  ;;  %vm569_vm13 = vcmp.ge.f32.partialorder %v505_v55, 0.0  ;;  %v632_v61 = vmul.f32 0.01, %v504_v54  ;;  %v633_v62 = vmul.f32 0.01, %v505_v55 }
  0x74   : > { %v1544_v60 = vpack.c.bf16 %v695_v58, %v694_v57  ;;  %1614 = vst [vmem:[%s1751_s28 + $0xe0] sm:$0xff] %v1539_v56   ;;  %v1395_v63 = vunpack.c.h.bf16 %v1586_v47  ;;  %v435_v0 = vmul.f32 %v1394_v59, %v1723_v1 }
  0x75   : > { %v696_v2 = vsel %vm568_vm12, %v504_v54, %v632_v61  ;;  %v697_v3 = vsel %vm569_vm13, %v505_v55, %v633_v62 }
  0x76   : > { %1615 = vst [vmem:[%s1751_s28 + $0xe8] sm:$0xff] %v1544_v60   ;;  %v436_v4 = vmul.f32 %v1395_v63, %v1723_v1  ;;  %v506_v5 = vadd.f32 %v1728_v9, %v435_v0  ;;  %v1549_v6 = vpack.c.bf16 %v697_v3, %v696_v2 }
  0x78   : > { %v507_v7 = vadd.f32 %v1728_v9, %v436_v4  ;;  %vm570_vm14 = vcmp.ge.f32.partialorder %v506_v5, 0.0  ;;  %v634_v8 = vmul.f32 0.01, %v506_v5  ;;  %1616 = vst [vmem:[%s1751_s28 + $0xf0] sm:$0xff] %v1549_v6  }
  0x7a   : > { %vm571_vm15 = vcmp.ge.f32.partialorder %v507_v7, 0.0  ;;  %v635_v10 = vmul.f32 0.01, %v507_v7  ;;  %v698_v11 = vsel %vm570_vm14, %v506_v5, %v634_v8 }
  0x7c   : > { %v699_v12 = vsel %vm571_vm15, %v507_v7, %v635_v10 }
  0x7d   : > { %v1554_v13 = vpack.c.bf16 %v699_v12, %v698_v11 }
  0x7f   : > { %1617 = vst [vmem:[%s1751_s28 + $0xf8] sm:$0xff] %v1554_v13  }
  0x80 PF: > { %s13_s14 = sadd.s32 1, %s1664_s14   ;;  %s1939_s12 = smov %s1660_s13 }
  0x81   : > { %p10_p5 = scmp.ge.s32.totalorder %s13_s14, 4   ;;  %s1940_s13 = smov %s1942_s15 }
  0x83   :  { %12 = sbr.rel (!%p10_p5) target bundleno = 2 (0x2), region = 68 }

// kernel: res_up_forward.15
= control target key start
LH: loop header
LB: loop body
LE: loop exit
PB: predicated region body
PF: predicated region fallthrough
CT: control target
= control target key end

     0   :  { %s1062_s12 = smov 0   ;;  %s1064_s13 = smov 0   ;;  %s1215_s0 = inlined_call_operand.vmem [shape: bf16[2,256,128], index: 0, kind: input, shape index: {}]   ;;  %s1216_s1 = inlined_call_operand.vmem [shape: f32[2,1,128], index: 1, kind: input, shape index: {}]   ;;  %s1217_s2 = inlined_call_operand.vmem [shape: f32[2,1,128], index: 2, kind: input, shape index: {}]   ;;  %s1218_s3 = inlined_call_operand.vmem [shape: bf16[2,256,128], index: 3, kind: output, shape index: {}]  }
   0x1   :  { %s1066_s14 = smov 0  }
   0x2 LB: > { %s25_s15 = sadd.s32 1, %s1036_s13  ;;  %p745_p0 = scmp.ge.s32.totalorder %s1040_s14, 1  ;;  %s1040_s14 = sphi %s1066_s14, %s13_s14   ;;  %s1036_s13 = sphi %s1064_s13, %s1220_s13   ;;  %s1032_s12 = sphi %s1062_s12, %s1219_s12  }
   0x3   : > { %p27_p1 = scmp.ge.s32.totalorder %s25_s15, 2  ;;  %p174_p2 = scmp.lt.s32.totalorder %s1040_s14, 3 }
   0x5   : > { %s1222_s15 = smov (%p27_p1, %s25_s15), 0  ;;  %p175_p3 = pnand %p745_p0, %p174_p2 }
   0x6   : > { %p213_p4 = scmp.lt.s32.totalorder (!%p175_p3), %s1032_s12, 1 }
   0x7   : > { %178 = sbr.rel (%p175_p3) target bundleno = 75 (0x4b), region = 32 }
   0xc   : > { %s1224_s12 = smov (!%p213_p4, %s1032_s12), 1 }
   0xd   : > { %s786_s16 = sshll.u32 %s1224_s12, 7  ;;  %s224_s19 = scalar_lea.vmem %s1216_s1, %s1224_s12 }
   0xe   : > { %s1092_s22 = scalar_lea.vmem %s1215_s0, %s786_s16  ;;  %s227_s25 = scalar_lea.vmem %s1217_s2, %s1224_s12  ;;  %v1099_v1 = vld [vmem:[%s224_s19] ss:$0 sm:$0xff] }
   0xf   : > { %v821_v0 = vld [vmem:[%s1092_s22] sm:$0xff]   ;;  %v964_v2 = vld [vmem:[%s1092_s22 + $0x8] sm:$0xff]   ;;  %v965_v7 = vld [vmem:[%s1092_s22 + $0x10] sm:$0xff]   ;;  %s1127_s28 = scalar_lea.vmem %s1218_s3, %s786_s16 }
  0x10   : > { %v822_v3 = vunpack.c.l.bf16 %v821_v0  ;;  %v823_v4 = vunpack.c.h.bf16 %v821_v0  ;;  %v826_v5 = vunpack.c.l.bf16 %v964_v2  ;;  %v827_v6 = vunpack.c.h.bf16 %v964_v2  ;;  %v966_v8 = vld [vmem:[%s1092_s22 + $0x18] sm:$0xff]   ;;  %v1104_v9 = vld [vmem:[%s227_s25] ss:$0 sm:$0xff]  ;;  %v968_v41 = vld [vmem:[%s1092_s22 + $0x28] sm:$0xff]  }
  0x11   : > { %v830_v10 = vunpack.c.l.bf16 %v965_v7  ;;  %v831_v11 = vunpack.c.h.bf16 %v965_v7  ;;  %v834_v12 = vunpack.c.l.bf16 %v966_v8  ;;  %v835_v13 = vunpack.c.h.bf16 %v966_v8  ;;  %v967_v36 = vld [vmem:[%s1092_s22 + $0x20] sm:$0xff]   ;;  %v969_v52 = vld [vmem:[%s1092_s22 + $0x30] sm:$0xff]   ;;  %v970_v53 = vld [vmem:[%s1092_s22 + $0x38] sm:$0xff]  }
  0x12   : > { %v309_v14 = vmul.f32 %v822_v3, %v1099_v1  ;;  %v310_v15 = vmul.f32 %v823_v4, %v1099_v1  ;;  %v311_v16 = vmul.f32 %v826_v5, %v1099_v1  ;;  %v312_v17 = vmul.f32 %v827_v6, %v1099_v1 }
  0x13   : > { %v313_v18 = vmul.f32 %v830_v10, %v1099_v1  ;;  %v314_v19 = vmul.f32 %v831_v11, %v1099_v1  ;;  %v315_v20 = vmul.f32 %v834_v12, %v1099_v1  ;;  %v316_v21 = vmul.f32 %v835_v13, %v1099_v1 }
  0x14   : > { %v348_v22 = vadd.f32 %v1104_v9, %v309_v14  ;;  %v349_v23 = vadd.f32 %v1104_v9, %v310_v15  ;;  %v350_v24 = vadd.f32 %v1104_v9, %v311_v16  ;;  %v351_v25 = vadd.f32 %v1104_v9, %v312_v17 }
  0x15   : > { %v352_v26 = vadd.f32 %v1104_v9, %v313_v18  ;;  %v353_v27 = vadd.f32 %v1104_v9, %v314_v19  ;;  %v354_v28 = vadd.f32 %v1104_v9, %v315_v20  ;;  %v355_v29 = vadd.f32 %v1104_v9, %v316_v21  ;;  %v971_v20 = vld [vmem:[%s1092_s22 + $0x40] sm:$0xff]  }
  0x16   : > { %vm380_vm0 = vcmp.ge.f32.partialorder %v348_v22, 0.0  ;;  %vm381_vm1 = vcmp.ge.f32.partialorder %v349_v23, 0.0  ;;  %v412_v30 = vmul.f32 0.01, %v348_v22  ;;  %v413_v31 = vmul.f32 0.01, %v349_v23 }
  0x17   : > { %vm382_vm2 = vcmp.ge.f32.partialorder %v350_v24, 0.0  ;;  %vm383_vm3 = vcmp.ge.f32.partialorder %v351_v25, 0.0  ;;  %v414_v32 = vmul.f32 0.01, %v350_v24  ;;  %v415_v33 = vmul.f32 0.01, %v351_v25 }
  0x18   : > { %v444_v34 = vsel %vm380_vm0, %v348_v22, %v412_v30  ;;  %v445_v35 = vsel %vm381_vm1, %v349_v23, %v413_v31  ;;  %vm384_vm4 = vcmp.ge.f32.partialorder %v352_v26, 0.0  ;;  %vm385_vm5 = vcmp.ge.f32.partialorder %v353_v27, 0.0 }
  0x19   : > { %v887_v37 = vpack.c.bf16 %v445_v35, %v444_v34  ;;  %v446_v38 = vsel %vm382_vm2, %v350_v24, %v414_v32  ;;  %v447_v39 = vsel %vm383_vm3, %v351_v25, %v415_v33  ;;  %v416_v40 = vmul.f32 0.01, %v352_v26  ;;  %v972_v24 = vld [vmem:[%s1092_s22 + $0x48] sm:$0xff]  }
  0x1a   : > { %v892_v42 = vpack.c.bf16 %v447_v39, %v446_v38  ;;  %v417_v43 = vmul.f32 0.01, %v353_v27  ;;  %vm386_vm6 = vcmp.ge.f32.partialorder %v354_v28, 0.0  ;;  %vm387_vm7 = vcmp.ge.f32.partialorder %v355_v29, 0.0 }
  0x1b   : > { %888 = vst [vmem:[%s1127_s28] sm:$0xff] %v887_v37   ;;  %v448_v44 = vsel %vm384_vm4, %v352_v26, %v416_v40  ;;  %v418_v45 = vmul.f32 0.01, %v354_v28  ;;  %v419_v46 = vmul.f32 0.01, %v355_v29  ;;  %v838_v47 = vunpack.c.l.bf16 %v967_v36 }
  0x1c   : > { %979 = vst [vmem:[%s1127_s28 + $0x8] sm:$0xff] %v892_v42   ;;  %v449_v48 = vsel %vm385_vm5, %v353_v27, %v417_v43  ;;  %v839_v49 = vunpack.c.h.bf16 %v967_v36  ;;  %v842_v50 = vunpack.c.l.bf16 %v968_v41  ;;  %v843_v51 = vunpack.c.h.bf16 %v968_v41  ;;  %v973_v36 = vld [vmem:[%s1092_s22 + $0x50] sm:$0xff]  }
  0x1d   : > { %v897_v54 = vpack.c.bf16 %v449_v48, %v448_v44  ;;  %v450_v55 = vsel %vm386_vm6, %v354_v28, %v418_v45  ;;  %v451_v56 = vsel %vm387_vm7, %v355_v29, %v419_v46  ;;  %v317_v57 = vmul.f32 %v838_v47, %v1099_v1 }
  0x1e   : > { %v902_v58 = vpack.c.bf16 %v451_v56, %v450_v55  ;;  %v318_v59 = vmul.f32 %v839_v49, %v1099_v1  ;;  %v319_v60 = vmul.f32 %v842_v50, %v1099_v1  ;;  %v320_v61 = vmul.f32 %v843_v51, %v1099_v1  ;;  %v974_v55 = vld [vmem:[%s1092_s22 + $0x58] sm:$0xff]  }
  0x1f   : > { %980 = vst [vmem:[%s1127_s28 + $0x10] sm:$0xff] %v897_v54   ;;  %v356_v62 = vadd.f32 %v1104_v9, %v317_v57  ;;  %v846_v63 = vunpack.c.l.bf16 %v969_v52  ;;  %v847_v0 = vunpack.c.h.bf16 %v969_v52  ;;  %v850_v2 = vunpack.c.l.bf16 %v970_v53 }
  0x20   : > { %981 = vst [vmem:[%s1127_s28 + $0x18] sm:$0xff] %v902_v58   ;;  %v357_v3 = vadd.f32 %v1104_v9, %v318_v59  ;;  %v358_v4 = vadd.f32 %v1104_v9, %v319_v60  ;;  %v359_v5 = vadd.f32 %v1104_v9, %v320_v61  ;;  %v851_v6 = vunpack.c.h.bf16 %v970_v53 }
  0x21   : > { %vm388_vm8 = vcmp.ge.f32.partialorder %v356_v62, 0.0  ;;  %v420_v7 = vmul.f32 0.01, %v356_v62  ;;  %v321_v8 = vmul.f32 %v846_v63, %v1099_v1  ;;  %v322_v10 = vmul.f32 %v847_v0, %v1099_v1  ;;  %v975_v0 = vld [vmem:[%s1092_s22 + $0x60] sm:$0xff]  }
  0x22   : > { %vm389_vm9 = vcmp.ge.f32.partialorder %v357_v3, 0.0  ;;  %v421_v11 = vmul.f32 0.01, %v357_v3  ;;  %vm390_vm10 = vcmp.ge.f32.partialorder %v358_v4, 0.0  ;;  %vm391_vm11 = vcmp.ge.f32.partialorder %v359_v5, 0.0 }
  0x23   : > { %v452_v12 = vsel %vm388_vm8, %v356_v62, %v420_v7  ;;  %v422_v13 = vmul.f32 0.01, %v358_v4  ;;  %v423_v14 = vmul.f32 0.01, %v359_v5  ;;  %v360_v15 = vadd.f32 %v1104_v9, %v321_v8 }
  0x24   : > { %v453_v16 = vsel %vm389_vm9, %v357_v3, %v421_v11  ;;  %v361_v17 = vadd.f32 %v1104_v9, %v322_v10  ;;  %v323_v18 = vmul.f32 %v850_v2, %v1099_v1  ;;  %v324_v19 = vmul.f32 %v851_v6, %v1099_v1  ;;  %v976_v6 = vld [vmem:[%s1092_s22 + $0x68] sm:$0xff]  }
  0x25   : > { %v907_v21 = vpack.c.bf16 %v453_v16, %v452_v12  ;;  %v454_v22 = vsel %vm390_vm10, %v358_v4, %v422_v13  ;;  %v455_v23 = vsel %vm391_vm11, %v359_v5, %v423_v14  ;;  %vm392_vm12 = vcmp.ge.f32.partialorder %v360_v15, 0.0 }
  0x26   : > { %v912_v25 = vpack.c.bf16 %v455_v23, %v454_v22  ;;  %vm393_vm13 = vcmp.ge.f32.partialorder %v361_v17, 0.0  ;;  %v424_v26 = vmul.f32 0.01, %v360_v15  ;;  %v425_v27 = vmul.f32 0.01, %v361_v17  ;;  %v977_v22 = vld [vmem:[%s1092_s22 + $0x70] sm:$0xff]  }
  0x27   : > { %982 = vst [vmem:[%s1127_s28 + $0x20] sm:$0xff] %v907_v21   ;;  %v362_v28 = vadd.f32 %v1104_v9, %v323_v18  ;;  %v363_v29 = vadd.f32 %v1104_v9, %v324_v19  ;;  %v854_v30 = vunpack.c.l.bf16 %v971_v20  ;;  %v855_v31 = vunpack.c.h.bf16 %v971_v20 }
  0x28   : > { %983 = vst [vmem:[%s1127_s28 + $0x28] sm:$0xff] %v912_v25   ;;  %v456_v32 = vsel %vm392_vm12, %v360_v15, %v424_v26  ;;  %v457_v33 = vsel %vm393_vm13, %v361_v17, %v425_v27  ;;  %v858_v34 = vunpack.c.l.bf16 %v972_v24  ;;  %v859_v35 = vunpack.c.h.bf16 %v972_v24 }
  0x29   : > { %v917_v37 = vpack.c.bf16 %v457_v33, %v456_v32  ;;  %vm394_vm14 = vcmp.ge.f32.partialorder %v362_v28, 0.0  ;;  %vm395_vm15 = vcmp.ge.f32.partialorder %v363_v29, 0.0  ;;  %v426_v38 = vmul.f32 0.01, %v362_v28 }
  0x2a   : > { %v427_v39 = vmul.f32 0.01, %v363_v29  ;;  %v325_v40 = vmul.f32 %v854_v30, %v1099_v1  ;;  %v326_v41 = vmul.f32 %v855_v31, %v1099_v1  ;;  %v327_v42 = vmul.f32 %v858_v34, %v1099_v1 }
  0x2b   : > { %984 = vst [vmem:[%s1127_s28 + $0x30] sm:$0xff] %v917_v37   ;;  %v458_v43 = vsel %vm394_vm14, %v362_v28, %v426_v38  ;;  %v328_v44 = vmul.f32 %v859_v35, %v1099_v1  ;;  %v862_v45 = vunpack.c.l.bf16 %v973_v36  ;;  %v863_v46 = vunpack.c.h.bf16 %v973_v36 }
  0x2c   : > { %v459_v47 = vsel %vm395_vm15, %v363_v29, %v427_v39  ;;  %v364_v48 = vadd.f32 %v1104_v9, %v325_v40  ;;  %v365_v49 = vadd.f32 %v1104_v9, %v326_v41  ;;  %v366_v50 = vadd.f32 %v1104_v9, %v327_v42  ;;  %v978_v41 = vld [vmem:[%s1092_s22 + $0x78] sm:$0xff]  }
  0x2d   : > { %v922_v51 = vpack.c.bf16 %v459_v47, %v458_v43  ;;  %v367_v52 = vadd.f32 %v1104_v9, %v328_v44  ;;  %v329_v53 = vmul.f32 %v862_v45, %v1099_v1  ;;  %v330_v54 = vmul.f32 %v863_v46, %v1099_v1 }
  0x2e   : > { %vm396_vm0 = vcmp.ge.f32.partialorder %v364_v48, 0.0  ;;  %vm397_vm1 = vcmp.ge.f32.partialorder %v365_v49, 0.0  ;;  %v428_v56 = vmul.f32 0.01, %v364_v48  ;;  %v429_v57 = vmul.f32 0.01, %v365_v49 }
  0x2f   : > { %985 = vst [vmem:[%s1127_s28 + $0x38] sm:$0xff] %v922_v51   ;;  %vm398_vm2 = vcmp.ge.f32.partialorder %v366_v50, 0.0  ;;  %vm399_vm3 = vcmp.ge.f32.partialorder %v367_v52, 0.0  ;;  %v430_v58 = vmul.f32 0.01, %v366_v50  ;;  %v368_v62 = vadd.f32 %v1104_v9, %v329_v53 }
  0x30   : > { %v431_v59 = vmul.f32 0.01, %v367_v52  ;;  %v460_v60 = vsel %vm396_vm0, %v364_v48, %v428_v56  ;;  %v461_v61 = vsel %vm397_vm1, %v365_v49, %v429_v57  ;;  %v369_v63 = vadd.f32 %v1104_v9, %v330_v54 }
  0x31   : > { %v927_v2 = vpack.c.bf16 %v461_v61, %v460_v60  ;;  %v462_v3 = vsel %vm398_vm2, %v366_v50, %v430_v58  ;;  %v866_v5 = vunpack.c.l.bf16 %v974_v55  ;;  %vm400_vm4 = vcmp.ge.f32.partialorder %v368_v62, 0.0 }
  0x32   : > { %v463_v4 = vsel %vm399_vm3, %v367_v52, %v431_v59  ;;  %vm401_vm5 = vcmp.ge.f32.partialorder %v369_v63, 0.0  ;;  %v432_v8 = vmul.f32 0.01, %v368_v62  ;;  %v433_v10 = vmul.f32 0.01, %v369_v63 }
  0x33   : > { %v932_v7 = vpack.c.bf16 %v463_v4, %v462_v3  ;;  %986 = vst [vmem:[%s1127_s28 + $0x40] sm:$0xff] %v927_v2   ;;  %v867_v11 = vunpack.c.h.bf16 %v974_v55  ;;  %v331_v12 = vmul.f32 %v866_v5, %v1099_v1  ;;  %v870_v13 = vunpack.c.l.bf16 %v975_v0 }
  0x34   : > { %v464_v14 = vsel %vm400_vm4, %v368_v62, %v432_v8  ;;  %v871_v15 = vunpack.c.h.bf16 %v975_v0  ;;  %v874_v16 = vunpack.c.l.bf16 %v976_v6  ;;  %v875_v17 = vunpack.c.h.bf16 %v976_v6 }
  0x35   : > { %987 = vst [vmem:[%s1127_s28 + $0x48] sm:$0xff] %v932_v7   ;;  %v465_v18 = vsel %vm401_vm5, %v369_v63, %v433_v10  ;;  %v332_v19 = vmul.f32 %v867_v11, %v1099_v1  ;;  %v370_v20 = vadd.f32 %v1104_v9, %v331_v12  ;;  %v333_v21 = vmul.f32 %v870_v13, %v1099_v1 }
  0x36   : > { %v937_v23 = vpack.c.bf16 %v465_v18, %v464_v14  ;;  %v334_v24 = vmul.f32 %v871_v15, %v1099_v1  ;;  %v335_v25 = vmul.f32 %v874_v16, %v1099_v1  ;;  %v336_v26 = vmul.f32 %v875_v17, %v1099_v1 }
  0x37   : > { %v371_v27 = vadd.f32 %v1104_v9, %v332_v19  ;;  %vm402_vm6 = vcmp.ge.f32.partialorder %v370_v20, 0.0  ;;  %v434_v28 = vmul.f32 0.01, %v370_v20  ;;  %v372_v29 = vadd.f32 %v1104_v9, %v333_v21 }
  0x38   : > { %988 = vst [vmem:[%s1127_s28 + $0x50] sm:$0xff] %v937_v23   ;;  %v373_v30 = vadd.f32 %v1104_v9, %v334_v24  ;;  %v374_v31 = vadd.f32 %v1104_v9, %v335_v25  ;;  %v375_v32 = vadd.f32 %v1104_v9, %v336_v26  ;;  %v878_v33 = vunpack.c.l.bf16 %v977_v22 }
  0x39   : > { %vm403_vm7 = vcmp.ge.f32.partialorder %v371_v27, 0.0  ;;  %v435_v34 = vmul.f32 0.01, %v371_v27  ;;  %v466_v35 = vsel %vm402_vm6, %v370_v20, %v434_v28  ;;  %vm404_vm8 = vcmp.ge.f32.partialorder %v372_v29, 0.0 }
  0x3a   : > { %vm405_vm9 = vcmp.ge.f32.partialorder %v373_v30, 0.0  ;;  %v436_v36 = vmul.f32 0.01, %v372_v29  ;;  %v437_v37 = vmul.f32 0.01, %v373_v30  ;;  %vm406_vm10 = vcmp.ge.f32.partialorder %v374_v31, 0.0 }
  0x3b   : > { %v467_v38 = vsel %vm403_vm7, %v371_v27, %v435_v34  ;;  %vm407_vm11 = vcmp.ge.f32.partialorder %v375_v32, 0.0  ;;  %v438_v39 = vmul.f32 0.01, %v374_v31  ;;  %v439_v40 = vmul.f32 0.01, %v375_v32 }
  0x3c   : > { %v942_v42 = vpack.c.bf16 %v467_v38, %v466_v35  ;;  %v468_v43 = vsel %vm404_vm8, %v372_v29, %v436_v36  ;;  %v469_v44 = vsel %vm405_vm9, %v373_v30, %v437_v37  ;;  %v879_v45 = vunpack.c.h.bf16 %v977_v22 }
  0x3d   : > { %v947_v46 = vpack.c.bf16 %v469_v44, %v468_v43  ;;  %v470_v47 = vsel %vm406_vm10, %v374_v31, %v438_v39  ;;  %v471_v48 = vsel %vm407_vm11, %v375_v32, %v439_v40  ;;  %v337_v49 = vmul.f32 %v878_v33, %v1099_v1 }
  0x3e   : > { %989 = vst [vmem:[%s1127_s28 + $0x58] sm:$0xff] %v942_v42   ;;  %v952_v50 = vpack.c.bf16 %v471_v48, %v470_v47  ;;  %v338_v51 = vmul.f32 %v879_v45, %v1099_v1  ;;  %v882_v52 = vunpack.c.l.bf16 %v978_v41  ;;  %v883_v53 = vunpack.c.h.bf16 %v978_v41 }
  0x3f   : > { %990 = vst [vmem:[%s1127_s28 + $0x60] sm:$0xff] %v947_v46   ;;  %v376_v54 = vadd.f32 %v1104_v9, %v337_v49 }
  0x40   : > { %991 = vst [vmem:[%s1127_s28 + $0x68] sm:$0xff] %v952_v50   ;;  %v377_v55 = vadd.f32 %v1104_v9, %v338_v51  ;;  %v339_v56 = vmul.f32 %v882_v52, %v1099_v1  ;;  %v340_v57 = vmul.f32 %v883_v53, %v1099_v1 }
  0x41   : > { %vm408_vm12 = vcmp.ge.f32.partialorder %v376_v54, 0.0  ;;  %v440_v58 = vmul.f32 0.01, %v376_v54 }
  0x42   : > { %vm409_vm13 = vcmp.ge.f32.partialorder %v377_v55, 0.0  ;;  %v441_v59 = vmul.f32 0.01, %v377_v55  ;;  %v378_v60 = vadd.f32 %v1104_v9, %v339_v56  ;;  %v379_v61 = vadd.f32 %v1104_v9, %v340_v57 }
  0x43   : > { %v472_v62 = vsel %vm408_vm12, %v376_v54, %v440_v58 }
  0x44   : > { %v473_v63 = vsel %vm409_vm13, %v377_v55, %v441_v59  ;;  %vm410_vm14 = vcmp.ge.f32.partialorder %v378_v60, 0.0  ;;  %vm411_vm15 = vcmp.ge.f32.partialorder %v379_v61, 0.0  ;;  %v442_v0 = vmul.f32 0.01, %v378_v60 }
  0x45   : > { %v957_v2 = vpack.c.bf16 %v473_v63, %v472_v62  ;;  %v443_v3 = vmul.f32 0.01, %v379_v61 }
  0x46   : > { %v474_v4 = vsel %vm410_vm14, %v378_v60, %v442_v0 }
  0x47   : > { %992 = vst [vmem:[%s1127_s28 + $0x70] sm:$0xff] %v957_v2   ;;  %v475_v5 = vsel %vm411_vm15, %v379_v61, %v443_v3 }
  0x48   : > { %v962_v1 = vpack.c.bf16 %v475_v5, %v474_v4 }
  0x4a   : > { %993 = vst [vmem:[%s1127_s28 + $0x78] sm:$0xff] %v962_v1  }
  0x4b PF: > { %s13_s14 = sadd.s32 1, %s1040_s14   ;;  %s1219_s12 = smov %s1036_s13 }
  0x4c   : > { %p10_p5 = scmp.ge.s32.totalorder %s13_s14, 4   ;;  %s1220_s13 = smov %s1222_s15 }
  0x4e   :  { %12 = sbr.rel (!%p10_p5) target bundleno = 2 (0x2), region = 68 }

// kernel: res_up_forward.16
= control target key start
LH: loop header
LB: loop body
LE: loop exit
PB: predicated region body
PF: predicated region fallthrough
CT: control target
= control target key end

     0   :  { %s5395_s18 = smov 0   ;;  %s5397_s19 = smov 0   ;;  %s6425_s0 = inlined_call_operand.vmem [shape: bf16[2,18,288,24], index: 0, kind: input, shape index: {}, may-alias: {0,1,2}]   ;;  %s6426_s1 = inlined_call_operand.vmem [shape: bf16[2,18,288,24], index: 1, kind: input, shape index: {}, may-alias: {0,1,2}]   ;;  %s6427_s2 = inlined_call_operand.vmem [shape: bf16[2,18,288,24], index: 2, kind: input, shape index: {}, may-alias: {0,1,2}]   ;;  %s6428_s3 = inlined_call_operand.vmem [shape: bf16[9,24,8], index: 3, kind: input, shape index: {}]   ;;  %s6429_s4 = inlined_call_operand.vmem [shape: f32[1,8], index: 4, kind: input, shape index: {}]   ;;  %s6430_s5 = inlined_call_operand.vmem [shape: bf16[2,16,256,8], index: 5, kind: output, shape index: {}]  }
   0x1   :  { %s5399_s20 = smov 0   ;;  %s5401_s21 = smov 0  }
   0x2   :  { %s5403_s22 = smov 0  }
   0x3 LB: > { %s30_s23 = sadd.s32 1, %s5355_s20  ;;  %s34_s24 = sadd.s32 1, %s5359_s21  ;;  %s5363_s22 = sphi %s5403_s22, %s15_s22   ;;  %s5359_s21 = sphi %s5401_s21, %s6516_s21   ;;  %s5355_s20 = sphi %s5399_s20, %s6515_s20   ;;  %s5351_s19 = sphi %s5397_s19, %s6514_s19   ;;  %s5347_s18 = sphi %s5395_s18, %s6513_s18  }
   0x4   : > { %p32_p0 = scmp.ge.s32.totalorder %s30_s23, 16  ;;  %p4023_p1 = scmp.ge.s32.totalorder %s5363_s22, 1 }
   0x5   : > { %p256_p2 = scmp.lt.s32.totalorder %s5363_s22, 33 }
   0x6   : > { %s6518_s23 = smov (%p32_p0, %s30_s23), 0  ;;  %s6520_s24 = smov (!%p32_p0, %s34_s24), %s5359_s21 }
   0x7   : > { %p257_p3 = pnand %p4023_p1, %p256_p2  ;;  %p36_p4 = scmp.ge.s32.totalorder %s6520_s24, 2 }
   0x9   : > { %s6522_s24 = smov (%p36_p4, %s6520_s24), 0  ;;  %260 = sbr.rel (%p257_p3) target bundleno = 515 (0x203), region = 40 }
   0xe   : > { %v5163_v0 = vld [vmem:[%s6428_s3 + $0x14] ss:$0 sps:$4 sm:$0xff]   ;;  %vm581_vm0 = vcmask 1043456   ;;  %v5164_v1 = vld [vmem:[%s6428_s3 + $0xc] sm:$0xff]   ;;  %p316_p5 = scmp.lt.s32.totalorder %s5351_s19, 1  ;;  %p318_p6 = scmp.lt.s32.totalorder %s5347_s18, 17 }
   0xf   : > { %5110 = vmatprep.subr.msk.bf16.mxu1 %vm581_vm0, %v5163_v0  ;;  %5109 = vmatprep.subr.msk.bf16.mxu0 %vm581_vm0, %v5163_v0  ;;  %v583_v2 = vsel %vm581_vm0, %v5163_v0, 0  ;;  %v5167_v3 = vld [vmem:[%s6428_s3 + $0x8] ss:$0 sps:$4 sm:$0xff]   ;;  %v5170_v4 = vld [vmem:[%s6428_s3 + $0x20] ss:$0 sps:$4 sm:$0xff]   ;;  %vm532_vm1 = vcmask 195584  }
  0x10   : > { %5107 = vmatpush3.bf16.msra.mxu1 %v583_v2  ;;  %4782 = vmatpush3.bf16.msra.mxu0 %v583_v2  ;;  %s6524_s19 = smov (!%p316_p5, %s5351_s19), 1  ;;  %v5177_v7 = vld [vmem:[%s6428_s3] sm:$0xff]   ;;  %v1226_v9 = vsel %vm581_vm0, %v5170_v4, 0  ;;  %v5180_v10 = vld [vmem:[%s6428_s3 + $0x18] sm:$0xff]   ;;  %v884_v12 = vsel %vm581_vm0, %v5167_v3, 0  ;;  %s325_s6 = sadd.s32 1, %s5347_s18 }
  0x11   : > { %5106 = vmatprep.subr.bf16.mxu1 %v5164_v1  ;;  %4783 = vmatprep.subr.bf16.mxu0 %v5164_v1  ;;  %s319_s8 = scalar_select %p318_p6, %s5347_s18, 17  ;;  %v5187_v15 = vld [vmem:[%s6428_s3 + $0x2c] ss:$0 sps:$4 sm:$0xff]   ;;  %v5190_v16 = vld [vmem:[%s6428_s3 + $0x38] ss:$0 sps:$4 sm:$0xff]   ;;  %v5205_v31 = vld [vmem:[%s6428_s3 + $0x24] sm:$0xff]  }
  0x12   : > { %s5447_s9 = smul.u32 648, %s6524_s19  ;;  %p328_p7 = scmp.lt.s32.totalorder %s325_s6, 17  ;;  %v1968_v32 = vsel %vm581_vm0, %v5190_v16, 0  ;;  %v1597_v34 = vsel %vm581_vm0, %v5187_v15, 0  ;;  %v5208_v36 = vld [vmem:[%s6428_s3 + $0x30] sm:$0xff]   ;;  %vm3814_vm2 = vcmask 60416  }
  0x13   : > { %s5119_s10 = smul.u32 36, %s319_s8  ;;  %v5528_v37 = vld [vmem:[%s6428_s3 + $0x44] ss:$0 sps:$4 sm:$0xff]   ;;  %v5226_v46 = vld [vmem:[%s6428_s3 + $0x50] ss:$0 sps:$4 sm:$0xff]   ;;  %s336_s30 = sadd.s32 2, %s5347_s18 }
  0x14   : > { %5108 = vmatpush3.bf16.msra.mxu1 %v5164_v1  ;;  %4784 = vmatpush3.bf16.msra.mxu0 %v5164_v1  ;;  %s6526_s6 = smov (!%p328_p7, %s325_s6), 17  ;;  %p339_p8 = scmp.lt.s32.totalorder %s336_s30, 17 }
  0x15   : > { %s322_s11 = sadd.s32 %s5447_s9, %s5119_s10  ;;  %5111 = vmatprep.subr.msk.bf16.mxu1 %vm581_vm0, %v5167_v3  ;;  %5112 = vmatprep.subr.msk.bf16.mxu0 %vm581_vm0, %v5170_v4  ;;  %p350_p9 = scmp.lt.s32.totalorder %s5347_s18, 15 }
  0x16   : > { %s4024_s12 = sshll.u32 %s322_s11, 2  ;;  %s6528_s30 = smov (!%p339_p8, %s336_s30), 17 }
  0x17   : > { %s5455_s15 = scalar_lea.vmem %s6425_s0, %s4024_s12  ;;  %s5121_s12 = smul.u32 36, %s6526_s6 }
  0x18   : > { %v5165_v5 = vld [vmem:[%s5455_s15 + $0x8] sm:$0xff]   ;;  %v5168_v8 = vld [vmem:[%s5455_s15 + $0x10] sm:$0xff]   ;;  %v5171_v13 = vld [vmem:[%s5455_s15 + $0x18] sm:$0xff]   ;;  %s5122_s6 = smul.u32 36, %s6528_s30  ;;  %s6530_s18 = smov (!%p350_p9, %s5347_s18), 15 }
  0x19   : > { %v5166_v6 = vld [vmem:[%s5455_s15 + $0x48] sm:$0xff]   ;;  %4785 = vmatprep.mubr.msk.bf16.mxu0 %vm532_vm1, %v5165_v5  ;;  %v5169_v11 = vld [vmem:[%s5455_s15 + $0x50] sm:$0xff]   ;;  %v5172_v14 = vld [vmem:[%s5455_s15 + $0x58] sm:$0xff]   ;;  %s332_s16 = sadd.s32 %s5121_s12, %s5447_s9 }
  0x1a   : > { %4801 = vmatprep.mubr.msk.bf16.mxu1 %vm532_vm1, %v5166_v6  ;;  %4786 = vmatmul.mubr.msk.bf16.vlgmr.msra.gmra.mxu0 %vm532_vm1, %v5168_v8  ;;  %v5173_v17 = vld [vmem:[%s5455_s15 + $0x20] sm:$0xff]   ;;  %v5175_v19 = vld [vmem:[%s5455_s15 + $0x28] sm:$0xff]   ;;  %v5178_v21 = vld [vmem:[%s5455_s15 + $0x30] sm:$0xff]   ;;  %s4025_s17 = sshll.u32 %s332_s16, 2  ;;  %s343_s7 = sadd.s32 %s5122_s6, %s5447_s9  ;;  %v2710_v6 = vsel %vm581_vm0, %v5226_v46, 0  ;;  %v2339_v8 = vsel %vm581_vm0, %v5528_v37, 0 }
  0x1b   : > { %4802 = vmatmul.mubr.msk.bf16.vlgmr.msra.gmra.mxu1 %vm532_vm1, %v5169_v11  ;;  %4854 = vmatpush3.bf16.msra.mxu0 %v1226_v9  ;;  %v5174_v18 = vld [vmem:[%s5455_s15 + $0x60] sm:$0xff]   ;;  %v5176_v20 = vld [vmem:[%s5455_s15 + $0x68] sm:$0xff]   ;;  %v5179_v22 = vld [vmem:[%s5455_s15 + $0x70] sm:$0xff]   ;;  %s5546_s27 = scalar_lea.vmem %s6426_s1, %s4025_s17  ;;  %s4026_s8 = sshll.u32 %s343_s7, 2 }
  0x1c   : > { %4818 = vmatpush3.bf16.msra.mxu1 %v884_v12  ;;  %4789 = vmatprep.mubr.msk.bf16.mxu0 %vm532_vm1, %v5171_v13  ;;  %v5181_v23 = vld [vmem:[%s5455_s15 + $0x38] sm:$0xff]   ;;  %v5183_v25 = vld [vmem:[%s5455_s15 + $0x40] sm:$0xff]   ;;  %v5186_v27 = vld [vmem:[%s5455_s15 + $0x10] sm:$0xff]   ;;  %s5592_s12 = scalar_lea.vmem %s6427_s2, %s4026_s8  ;;  %s4028_s7 = sshll.u32 %s6524_s19, 9 }
  0x1d   : > { %4805 = vmatprep.mubr.msk.bf16.mxu1 %vm532_vm1, %v5172_v14  ;;  %4819 = vmatprep.subr.bf16.mxu1 %v5177_v7  ;;  %v5182_v24 = vld [vmem:[%s5455_s15 + $0x78] sm:$0xff]   ;;  %v5184_v26 = vld [vmem:[%s5455_s15 + $0x80] sm:$0xff]   ;;  %v5188_v30 = vld [vmem:[%s5455_s15 + $0x8] sm:$0xff]  }
  0x1e   : > { %4855 = vmatprep.subr.bf16.mxu0 %v5180_v10  ;;  %v5185_v28 = vld [vmem:[%s5455_s15] sm:$0xff]   ;;  %v5189_v29 = vld [vmem:[%s5455_s15 + $0x18] sm:$0xff]   ;;  %v5191_v33 = vld [vmem:[%s5455_s15 + $0x10] sm:$0xff]  }
  0x1f   : > { %4856 = vmatpush3.bf16.msra.mxu0 %v5180_v10  ;;  %v5192_v35 = vld [vmem:[%s5455_s15 + $0x20] sm:$0xff]   ;;  %v5193_v38 = vld [vmem:[%s5455_s15 + $0x18] sm:$0xff]   ;;  %v5194_v39 = vld [vmem:[%s5455_s15 + $0x28] sm:$0xff]  }
  0x20   : > { %4820 = vmatpush3.bf16.msra.mxu1 %v5177_v7  ;;  %5114 = vmatprep.subr.msk.bf16.mxu0 %vm581_vm0, %v5190_v16  ;;  %v5196_v40 = vld [vmem:[%s5455_s15 + $0x30] sm:$0xff]   ;;  %v5195_v41 = vld [vmem:[%s5455_s15 + $0x20] sm:$0xff]   ;;  %v5197_v42 = vld [vmem:[%s5455_s15 + $0x28] sm:$0xff]  }
  0x21   : > { %5113 = vmatprep.subr.msk.bf16.mxu1 %vm581_vm0, %v5187_v15  ;;  %v5198_v43 = vld [vmem:[%s5455_s15 + $0x38] sm:$0xff]   ;;  %v5200_v44 = vld [vmem:[%s5455_s15 + $0x40] sm:$0xff]   ;;  %v5199_v45 = vld [vmem:[%s5455_s15 + $0x30] sm:$0xff]  }
  0x22   : > { %4790 = vmatmul.mubr.msk.bf16.gmra.mxu0 %vm532_vm1, %v5173_v17  ;;  %v5201_v47 = vld [vmem:[%s5455_s15 + $0x38] sm:$0xff]   ;;  %v5202_v48 = vld [vmem:[%s5455_s15 + $0x48] sm:$0xff]   ;;  %v5204_v49 = vld [vmem:[%s5455_s15 + $0x50] sm:$0xff]  }
  0x23   : > { %4806 = vmatmul.mubr.msk.bf16.gmra.mxu1 %vm532_vm1, %v5174_v18  ;;  %4793 = vmatprep.mubr.msk.bf16.mxu0 %vm532_vm1, %v5175_v19  ;;  %v5203_v50 = vld [vmem:[%s5455_s15 + $0x40] sm:$0xff]   ;;  %v5206_v51 = vld [vmem:[%s5455_s15 + $0x48] sm:$0xff]   ;;  %v5207_v52 = vld [vmem:[%s5455_s15 + $0x58] sm:$0xff]  }
  0x24   : > { %4809 = vmatprep.mubr.msk.bf16.mxu1 %vm532_vm1, %v5176_v20  ;;  %v5210_v53 = vld [vmem:[%s5455_s15 + $0x60] sm:$0xff]   ;;  %v5209_v54 = vld [vmem:[%s5455_s15 + $0x50] sm:$0xff]   ;;  %v5211_v55 = vld [vmem:[%s5455_s15 + $0x58] sm:$0xff]  }
  0x25   : > { %v5212_v56 = vld [vmem:[%s5455_s15 + $0x68] sm:$0xff]   ;;  %v5214_v57 = vld [vmem:[%s5455_s15 + $0x70] sm:$0xff]   ;;  %v5213_v58 = vld [vmem:[%s5455_s15 + $0x60] sm:$0xff]  }
  0x26   : > { %v5215_v59 = vld [vmem:[%s5455_s15 + $0x68] sm:$0xff]   ;;  %v5216_v60 = vld [vmem:[%s5455_s15 + $0x78] sm:$0xff]   ;;  %v5218_v61 = vld [vmem:[%s5455_s15 + $0x80] sm:$0xff]  }
  0x27   : > { %v5217_v62 = vld [vmem:[%s5455_s15 + $0x70] sm:$0xff]   ;;  %v5219_v63 = vld [vmem:[%s5455_s15 + $0x78] sm:$0xff]   ;;  %v5220_v0 = vld [vmem:[%s5455_s15 + $0x88] sm:$0xff]  }
  0x28   : > { %v5222_v1 = vld [vmem:[%s5546_s27 + $0x8] sm:$0xff]   ;;  %v5221_v2 = vld [vmem:[%s5546_s27] sm:$0xff]   ;;  %v5225_v3 = vld [vmem:[%s5546_s27 + $0x10] sm:$0xff]  }
  0x29   : > { %v5224_v4 = vld [vmem:[%s5546_s27 + $0x8] sm:$0xff]   ;;  %v5241_v5 = vld [vmem:[%s6428_s3 + $0x3c] sm:$0xff]   ;;  %v5227_v7 = vld [vmem:[%s5546_s27 + $0x10] sm:$0xff]  }
  0x2a   : > { %4794 = vmatmul.mubr.msk.bf16.gmra.mxu0 %vm532_vm1, %v5178_v21  ;;  %v5228_v9 = vld [vmem:[%s5546_s27 + $0x18] sm:$0xff]   ;;  %v5244_v10 = vld [vmem:[%s6428_s3 + $0x48] sm:$0xff]   ;;  %v5230_v14 = vld [vmem:[%s5546_s27 + $0x20] sm:$0xff]  }
  0x2b   : > { %4810 = vmatmul.mubr.msk.bf16.gmra.mxu1 %vm532_vm1, %v5179_v22  ;;  %4797 = vmatprep.mubr.msk.bf16.mxu0 %vm532_vm1, %v5181_v23  ;;  %v5625_v11 = vld [vmem:[%s6428_s3 + $0x68] ss:$0 sps:$4 sm:$0xff]   ;;  %v5229_v12 = vld [vmem:[%s5546_s27 + $0x18] sm:$0xff]   ;;  %v5231_v16 = vld [vmem:[%s5546_s27 + $0x20] sm:$0xff]  }
  0x2c   : > { %4813 = vmatprep.mubr.msk.bf16.mxu1 %vm532_vm1, %v5182_v24  ;;  %v5632_v13 = vld [vmem:[%s6428_s3 + $0x5c] ss:$0 sps:$4 sm:$0xff]   ;;  %v5232_v15 = vld [vmem:[%s5546_s27 + $0x28] sm:$0xff]   ;;  %v5234_v18 = vld [vmem:[%s5546_s27 + $0x30] sm:$0xff]  }
  0x2d   : > { %v5233_v17 = vld [vmem:[%s5546_s27 + $0x28] sm:$0xff]   ;;  %v5236_v19 = vld [vmem:[%s5546_s27 + $0x38] sm:$0xff]   ;;  %v5235_v20 = vld [vmem:[%s5546_s27 + $0x30] sm:$0xff]  }
  0x2e   : > { %v5237_v21 = vld [vmem:[%s5546_s27 + $0x38] sm:$0xff]   ;;  %v5238_v22 = vld [vmem:[%s5546_s27 + $0x40] sm:$0xff]   ;;  %v5240_v23 = vld [vmem:[%s5546_s27 + $0x48] sm:$0xff]  }
  0x2f   : > { %v5239_v24 = vld [vmem:[%s5546_s27 + $0x40] sm:$0xff]  }
  0x32   : > { %4798 = vmatmul.mubr.msk.bf16.gmra.mxu0 %vm532_vm1, %v5183_v25  ;;  %v5242_v25 = vld [vmem:[%s5546_s27 + $0x48] sm:$0xff]  }
  0x33   : > { %4814 = vmatmul.mubr.msk.bf16.gmra.mxu1 %vm532_vm1, %v5184_v26  ;;  %4857 = vmatprep.mubr.msk.bf16.mxu0 %vm532_vm1, %v5186_v27  ;;  %v5243_v26 = vld [vmem:[%s5546_s27 + $0x50] sm:$0xff]   ;;  %v5246_v27 = vld [vmem:[%s5546_s27 + $0x58] sm:$0xff]  }
  0x34   : > { %4821 = vmatprep.mubr.msk.bf16.mxu1 %vm532_vm1, %v5185_v28  ;;  %v5245_v28 = vld [vmem:[%s5546_s27 + $0x50] sm:$0xff]  }
  0x3a   : > { %4858 = vmatmul.mubr.msk.bf16.vlgmr.msra.gmra.mxu0 %vm532_vm1, %v5189_v29  ;;  %v5247_v29 = vld [vmem:[%s5546_s27 + $0x58] sm:$0xff]  }
  0x3b   : > { %4822 = vmatmul.mubr.msk.bf16.vlgmr.msra.gmra.mxu1 %vm532_vm1, %v5188_v30  ;;  %4926 = vmatpush3.bf16.msra.mxu0 %v1968_v32  ;;  %v5248_v30 = vld [vmem:[%s5546_s27 + $0x60] sm:$0xff]  }
  0x3c   : > { %4890 = vmatpush3.bf16.msra.mxu1 %v1597_v34  ;;  %4825 = vmatprep.mubr.msk.bf16.mxu1 %vm532_vm1, %v5191_v33  ;;  %v5249_v32 = vld [vmem:[%s5546_s27 + $0x60] sm:$0xff]   ;;  %v5252_v33 = vld [vmem:[%s5546_s27 + $0x70] sm:$0xff]   ;;  %v5251_v34 = vld [vmem:[%s5546_s27 + $0x68] sm:$0xff]  }
  0x3d   : > { %4861 = vmatprep.mubr.msk.bf16.mxu0 %vm532_vm1, %v5192_v35  ;;  %4891 = vmatprep.subr.bf16.mxu1 %v5205_v31  ;;  %v5254_v35 = vld [vmem:[%s5546_s27 + $0x78] sm:$0xff]  }
  0x3e   : > { %4927 = vmatprep.subr.bf16.mxu0 %v5208_v36 }
  0x3f   : > { %4928 = vmatpush3.bf16.msra.mxu0 %v5208_v36  ;;  %v5253_v36 = vld [vmem:[%s5546_s27 + $0x70] sm:$0xff]  }
  0x40   : > { %4892 = vmatpush3.bf16.msra.mxu1 %v5205_v31  ;;  %5116 = vmatprep.subr.msk.bf16.mxu0 %vm581_vm0, %v5226_v46  ;;  %v5250_v31 = vld [vmem:[%s5546_s27 + $0x68] sm:$0xff]   ;;  %v5264_v46 = vld [vmem:[%s5592_s12 + $0x10] sm:$0xff]  }
  0x41   : > { %5115 = vmatprep.subr.msk.bf16.mxu1 %vm581_vm0, %v5528_v37  ;;  %v5256_v37 = vld [vmem:[%s5546_s27 + $0x80] sm:$0xff]  }
  0x42   : > { %4862 = vmatmul.mubr.msk.bf16.gmra.mxu0 %vm532_vm1, %v5194_v39  ;;  %v5258_v39 = vld [vmem:[%s5592_s12] sm:$0xff]  }
  0x43   : > { %4826 = vmatmul.mubr.msk.bf16.gmra.mxu1 %vm532_vm1, %v5193_v38  ;;  %4865 = vmatprep.mubr.msk.bf16.mxu0 %vm532_vm1, %v5196_v40  ;;  %v5255_v38 = vld [vmem:[%s5546_s27 + $0x78] sm:$0xff]   ;;  %v5257_v40 = vld [vmem:[%s5546_s27 + $0x10] sm:$0xff]  }
  0x44   : > { %4829 = vmatprep.mubr.msk.bf16.mxu1 %vm532_vm1, %v5195_v41  ;;  %v5261_v41 = vld [vmem:[%s5592_s12 + $0x8] sm:$0xff]  }
  0x4a   : > { %4866 = vmatmul.mubr.msk.bf16.gmra.mxu0 %vm532_vm1, %v5198_v43  ;;  %v3452_v43 = vsel %vm581_vm0, %v5625_v11, 0 }
  0x4b   : > { %4830 = vmatmul.mubr.msk.bf16.gmra.mxu1 %vm532_vm1, %v5197_v42  ;;  %4869 = vmatprep.mubr.msk.bf16.mxu0 %vm532_vm1, %v5200_v44  ;;  %v5260_v42 = vld [vmem:[%s5546_s27 + $0x18] sm:$0xff]   ;;  %v5263_v44 = vld [vmem:[%s5546_s27 + $0x20] sm:$0xff]  }
  0x4c   : > { %4833 = vmatprep.mubr.msk.bf16.mxu1 %vm532_vm1, %v5199_v45  ;;  %v3081_v45 = vsel %vm581_vm0, %v5632_v13, 0 }
  0x52   : > { %4870 = vmatmul.mubr.msk.bf16.gmra.mxu0 %vm532_vm1, %v5202_v48  ;;  %v5280_v48 = vld [vmem:[%s6428_s3 + $0x60] sm:$0xff]  }
  0x53   : > { %4834 = vmatmul.mubr.msk.bf16.gmra.mxu1 %vm532_vm1, %v5201_v47  ;;  %4873 = vmatprep.mubr.msk.bf16.mxu0 %vm532_vm1, %v5204_v49  ;;  %v5277_v47 = vld [vmem:[%s6428_s3 + $0x54] sm:$0xff]  }
  0x54   : > { %4837 = vmatprep.mubr.msk.bf16.mxu1 %vm532_vm1, %v5203_v50  ;;  %v5266_v49 = vld [vmem:[%s5592_s12 + $0x18] sm:$0xff]   ;;  %v5265_v50 = vld [vmem:[%s5546_s27 + $0x28] sm:$0xff]  }
  0x5a   : > { %4874 = vmatmul.mubr.msk.bf16.gmra.mxu0 %vm532_vm1, %v5207_v52  ;;  %v5267_v52 = vld [vmem:[%s5546_s27 + $0x30] sm:$0xff]  }
  0x5b   : > { %4838 = vmatmul.mubr.msk.bf16.gmra.mxu1 %vm532_vm1, %v5206_v51  ;;  %4877 = vmatprep.mubr.msk.bf16.mxu0 %vm532_vm1, %v5210_v53  ;;  %v5268_v51 = vld [vmem:[%s5592_s12 + $0x20] sm:$0xff]   ;;  %v5270_v53 = vld [vmem:[%s5592_s12 + $0x28] sm:$0xff]  }
  0x5c   : > { %4841 = vmatprep.mubr.msk.bf16.mxu1 %vm532_vm1, %v5209_v54  ;;  %v5269_v54 = vld [vmem:[%s5546_s27 + $0x38] sm:$0xff]  }
  0x62   : > { %4878 = vmatmul.mubr.msk.bf16.gmra.mxu0 %vm532_vm1, %v5212_v56  ;;  %v5271_v56 = vld [vmem:[%s5546_s27 + $0x40] sm:$0xff]  }
  0x63   : > { %4842 = vmatmul.mubr.msk.bf16.gmra.mxu1 %vm532_vm1, %v5211_v55  ;;  %4881 = vmatprep.mubr.msk.bf16.mxu0 %vm532_vm1, %v5214_v57  ;;  %v5272_v55 = vld [vmem:[%s5592_s12 + $0x30] sm:$0xff]   ;;  %v5274_v57 = vld [vmem:[%s5592_s12 + $0x38] sm:$0xff]  }
  0x64   : > { %4845 = vmatprep.mubr.msk.bf16.mxu1 %vm532_vm1, %v5213_v58  ;;  %v5273_v58 = vld [vmem:[%s5546_s27 + $0x48] sm:$0xff]  }
  0x6a   : > { %4882 = vmatmul.mubr.msk.bf16.gmra.mxu0 %vm532_vm1, %v5216_v60  ;;  %v5275_v60 = vld [vmem:[%s5546_s27 + $0x50] sm:$0xff]  }
  0x6b   : > { %4846 = vmatmul.mubr.msk.bf16.gmra.mxu1 %vm532_vm1, %v5215_v59  ;;  %4885 = vmatprep.mubr.msk.bf16.mxu0 %vm532_vm1, %v5218_v61  ;;  %v5276_v59 = vld [vmem:[%s5592_s12 + $0x40] sm:$0xff]   ;;  %v5279_v61 = vld [vmem:[%s5592_s12 + $0x48] sm:$0xff]  }
  0x6c   : > { %4849 = vmatprep.mubr.msk.bf16.mxu1 %vm532_vm1, %v5217_v62  ;;  %v5278_v62 = vld [vmem:[%s5546_s27 + $0x58] sm:$0xff]  }
  0x72   : > { %4886 = vmatmul.mubr.msk.bf16.gmra.mxu0 %vm532_vm1, %v5220_v0  ;;  %v5281_v0 = vld [vmem:[%s5546_s27 + $0x60] sm:$0xff]  }
  0x73   : > { %4850 = vmatmul.mubr.msk.bf16.gmra.mxu1 %vm532_vm1, %v5219_v63  ;;  %4929 = vmatprep.mubr.msk.bf16.mxu0 %vm532_vm1, %v5222_v1  ;;  %v5282_v63 = vld [vmem:[%s5592_s12 + $0x50] sm:$0xff]  }
  0x74   : > { %4893 = vmatprep.mubr.msk.bf16.mxu1 %vm532_vm1, %v5221_v2 }
  0x7a   : > { %4930 = vmatmul.mubr.msk.bf16.vlgmr.msra.gmra.mxu0 %vm532_vm1, %v5225_v3 }
  0x7b   : > { %4894 = vmatmul.mubr.msk.bf16.vlgmr.msra.gmra.mxu1 %vm532_vm1, %v5224_v4  ;;  %4998 = vmatpush3.bf16.msra.mxu0 %v2710_v6  ;;  %v5284_v6 = vld [vmem:[%s5592_s12 + $0x58] sm:$0xff]  }
  0x7c   : > { %4962 = vmatpush3.bf16.msra.mxu1 %v2339_v8  ;;  %4897 = vmatprep.mubr.msk.bf16.mxu1 %vm532_vm1, %v5227_v7  ;;  %v5283_v8 = vld [vmem:[%s5546_s27 + $0x68] sm:$0xff]  }
  0x7d   : > { %4933 = vmatprep.mubr.msk.bf16.mxu0 %vm532_vm1, %v5228_v9  ;;  %4963 = vmatprep.subr.bf16.mxu1 %v5241_v5  ;;  %v5286_v9 = vld [vmem:[%s5592_s12 + $0x60] sm:$0xff]  }
  0x7e   : > { %4999 = vmatprep.subr.bf16.mxu0 %v5244_v10 }
  0x7f   : > { %5000 = vmatpush3.bf16.msra.mxu0 %v5244_v10 }
  0x80   : > { %4964 = vmatpush3.bf16.msra.mxu1 %v5241_v5  ;;  %5118 = vmatprep.subr.msk.bf16.mxu0 %vm581_vm0, %v5625_v11  ;;  %v5285_v11 = vld [vmem:[%s5546_s27 + $0x70] sm:$0xff]  }
  0x81   : > { %5117 = vmatprep.subr.msk.bf16.mxu1 %vm581_vm0, %v5632_v13 }
  0x82   : > { %4934 = vmatmul.mubr.msk.bf16.gmra.mxu0 %vm532_vm1, %v5230_v14 }
  0x83   : > { %4898 = vmatmul.mubr.msk.bf16.gmra.mxu1 %vm532_vm1, %v5229_v12  ;;  %4937 = vmatprep.mubr.msk.bf16.mxu0 %vm532_vm1, %v5232_v15 }
  0x84   : > { %4901 = vmatprep.mubr.msk.bf16.mxu1 %vm532_vm1, %v5231_v16 }
  0x8a   : > { %4938 = vmatmul.mubr.msk.bf16.gmra.mxu0 %vm532_vm1, %v5234_v18  ;;  %v5288_v18 = vld [vmem:[%s5592_s12 + $0x68] sm:$0xff]  }
  0x8b   : > { %4902 = vmatmul.mubr.msk.bf16.gmra.mxu1 %vm532_vm1, %v5233_v17  ;;  %4941 = vmatprep.mubr.msk.bf16.mxu0 %vm532_vm1, %v5236_v19 }
  0x8c   : > { %4905 = vmatprep.mubr.msk.bf16.mxu1 %vm532_vm1, %v5235_v20  ;;  %v5287_v20 = vld [vmem:[%s5546_s27 + $0x78] sm:$0xff]  }
  0x92   : > { %4942 = vmatmul.mubr.msk.bf16.gmra.mxu0 %vm532_vm1, %v5238_v22 }
  0x93   : > { %4906 = vmatmul.mubr.msk.bf16.gmra.mxu1 %vm532_vm1, %v5237_v21  ;;  %4945 = vmatprep.mubr.msk.bf16.mxu0 %vm532_vm1, %v5240_v23  ;;  %v5290_v21 = vld [vmem:[%s5592_s12 + $0x70] sm:$0xff]   ;;  %v5289_v23 = vld [vmem:[%s5546_s27 + $0x80] sm:$0xff]  }
  0x94   : > { %4909 = vmatprep.mubr.msk.bf16.mxu1 %vm532_vm1, %v5239_v24 }
  0x9a   : > { %4946 = vmatmul.mubr.msk.bf16.gmra.mxu0 %vm532_vm1, %v5243_v26 }
  0x9b   : > { %4910 = vmatmul.mubr.msk.bf16.gmra.mxu1 %vm532_vm1, %v5242_v25  ;;  %4949 = vmatprep.mubr.msk.bf16.mxu0 %vm532_vm1, %v5246_v27 }
  0x9c   : > { %4913 = vmatprep.mubr.msk.bf16.mxu1 %vm532_vm1, %v5245_v28 }
  0xa2   : > { %4950 = vmatmul.mubr.msk.bf16.gmra.mxu0 %vm532_vm1, %v5248_v30  ;;  %v5292_v30 = vld [vmem:[%s5592_s12 + $0x78] sm:$0xff]  }
  0xa3   : > { %4914 = vmatmul.mubr.msk.bf16.gmra.mxu1 %vm532_vm1, %v5247_v29  ;;  %4953 = vmatprep.mubr.msk.bf16.mxu0 %vm532_vm1, %v5250_v31 }
  0xa4   : > { %4917 = vmatprep.mubr.msk.bf16.mxu1 %vm532_vm1, %v5249_v32  ;;  %v5291_v32 = vld [vmem:[%s5546_s27 + $0x88] sm:$0xff]   ;;  %s4027_s27 = sshll.u32 %s6530_s18, 5 }
  0xa5   : > { %s357_s8 = sadd.s32 %s4028_s7, %s4027_s27 }
  0xa6   : > { %s4029_s10 = sshll.u32 %s357_s8, 2 }
  0xa7   : > { %s6236_s9 = scalar_lea.vmem %s6430_s5, %s4029_s10 }
  0xaa   : > { %4954 = vmatmul.mubr.msk.bf16.gmra.mxu0 %vm532_vm1, %v5252_v33  ;;  %v5294_v33 = vld [vmem:[%s5592_s12 + $0x10] sm:$0xff]  }
  0xab   : > { %4918 = vmatmul.mubr.msk.bf16.gmra.mxu1 %vm532_vm1, %v5251_v34  ;;  %4957 = vmatprep.mubr.msk.bf16.mxu0 %vm532_vm1, %v5254_v35  ;;  %v5293_v35 = vld [vmem:[%s5592_s12 + $0x8] sm:$0xff]  }
  0xac   : > { %4921 = vmatprep.mubr.msk.bf16.mxu1 %vm532_vm1, %v5253_v36 }
  0xb2   : > { %4958 = vmatmul.mubr.msk.bf16.gmra.mxu0 %vm532_vm1, %v5256_v37 }
  0xb3   : > { %4922 = vmatmul.mubr.msk.bf16.gmra.mxu1 %vm532_vm1, %v5255_v38  ;;  %5001 = vmatprep.mubr.msk.bf16.mxu0 %vm532_vm1, %v5258_v39 }
  0xb4   : > { %4965 = vmatprep.mubr.msk.bf16.mxu1 %vm532_vm1, %v5257_v40 }
  0xba   : > { %5002 = vmatmul.mubr.msk.bf16.vlgmr.msra.gmra.mxu0 %vm532_vm1, %v5261_v41 }
  0xbb   : > { %4966 = vmatmul.mubr.msk.bf16.vlgmr.msra.gmra.mxu1 %vm532_vm1, %v5260_v42  ;;  %5070 = vmatpush3.bf16.msra.mxu0 %v3452_v43  ;;  %v5296_v42 = vld [vmem:[%s5592_s12 + $0x18] sm:$0xff]  }
  0xbc   : > { %5034 = vmatpush3.bf16.msra.mxu1 %v3081_v45  ;;  %4969 = vmatprep.mubr.msk.bf16.mxu1 %vm532_vm1, %v5263_v44  ;;  %v5295_v44 = vld [vmem:[%s5592_s12 + $0x10] sm:$0xff]   ;;  %v5298_v45 = vld [vmem:[%s5592_s12 + $0x20] sm:$0xff]  }
  0xbd   : > { %5005 = vmatprep.mubr.msk.bf16.mxu0 %vm532_vm1, %v5264_v46  ;;  %5035 = vmatprep.subr.bf16.mxu1 %v5277_v47 }
  0xbe   : > { %5071 = vmatprep.subr.bf16.mxu0 %v5280_v48 }
  0xbf   : > { %5072 = vmatpush3.bf16.msra.mxu0 %v5280_v48 }
  0xc0   : > { %5036 = vmatpush3.bf16.msra.mxu1 %v5277_v47  ;;  %v5297_v47 = vld [vmem:[%s5592_s12 + $0x18] sm:$0xff]  }
  0xc2   : > { %5006 = vmatmul.mubr.msk.bf16.gmra.mxu0 %vm532_vm1, %v5266_v49 }
  0xc3   : > { %4970 = vmatmul.mubr.msk.bf16.gmra.mxu1 %vm532_vm1, %v5265_v50  ;;  %5009 = vmatprep.mubr.msk.bf16.mxu0 %vm532_vm1, %v5268_v51 }
  0xc4   : > { %4973 = vmatprep.mubr.msk.bf16.mxu1 %vm532_vm1, %v5267_v52 }
  0xca   : > { %5010 = vmatmul.mubr.msk.bf16.gmra.mxu0 %vm532_vm1, %v5270_v53 }
  0xcb   : > { %4974 = vmatmul.mubr.msk.bf16.gmra.mxu1 %vm532_vm1, %v5269_v54  ;;  %5013 = vmatprep.mubr.msk.bf16.mxu0 %vm532_vm1, %v5272_v55 }
  0xcc   : > { %4977 = vmatprep.mubr.msk.bf16.mxu1 %vm532_vm1, %v5271_v56 }
  0xd2   : > { %5014 = vmatmul.mubr.msk.bf16.gmra.mxu0 %vm532_vm1, %v5274_v57  ;;  %v5300_v57 = vld [vmem:[%s5592_s12 + $0x28] sm:$0xff]  }
  0xd3   : > { %4978 = vmatmul.mubr.msk.bf16.gmra.mxu1 %vm532_vm1, %v5273_v58  ;;  %5017 = vmatprep.mubr.msk.bf16.mxu0 %vm532_vm1, %v5276_v59  ;;  %v5299_v59 = vld [vmem:[%s5592_s12 + $0x20] sm:$0xff]  }
  0xd4   : > { %4981 = vmatprep.mubr.msk.bf16.mxu1 %vm532_vm1, %v5275_v60  ;;  %v5302_v60 = vld [vmem:[%s5592_s12 + $0x30] sm:$0xff]  }
  0xda   : > { %v5739_v1 = vpop.f32.mrf.mxu0  ;;  %5018 = vmatmul.mubr.msk.bf16.gmra.mxu0 %vm532_vm1, %v5279_v61 }
  0xdb   : > { %v5742_v2 = vpop.f32.mrf.mxu1  ;;  %4982 = vmatmul.mubr.msk.bf16.gmra.mxu1 %vm532_vm1, %v5278_v62  ;;  %5021 = vmatprep.mubr.msk.bf16.mxu0 %vm532_vm1, %v5282_v63 }
  0xdc   : > { %v5746_v3 = vpop.f32.mrf.mxu0  ;;  %4985 = vmatprep.mubr.msk.bf16.mxu1 %vm532_vm1, %v5281_v0  ;;  %v5301_v0 = vld [vmem:[%s5592_s12 + $0x28] sm:$0xff]  }
  0xdd   : > { %v5749_v4 = vpop.f32.mrf.mxu1 }
  0xde   : > { %v5751_v5 = vpop.f32.mrf.mxu0 }
  0xdf   : > { %v5754_v7 = vpop.f32.mrf.mxu1 }
  0xe0   : > { %v5758_v10 = vpop.f32.mrf.mxu0 }
  0xe1   : > { %v5761_v12 = vpop.f32.mrf.mxu1 }
  0xe2   : > { %v5763_v13 = vpop.f32.mrf.mxu0  ;;  %5022 = vmatmul.mubr.msk.bf16.gmra.mxu0 %vm532_vm1, %v5284_v6 }
  0xe3   : > { %v5766_v14 = vpop.f32.mrf.mxu1  ;;  %4986 = vmatmul.mubr.msk.bf16.gmra.mxu1 %vm532_vm1, %v5283_v8  ;;  %5025 = vmatprep.mubr.msk.bf16.mxu0 %vm532_vm1, %v5286_v9 }
  0xe4   : > { %v5770_v15 = vpop.f32.mrf.mxu0  ;;  %4989 = vmatprep.mubr.msk.bf16.mxu1 %vm532_vm1, %v5285_v11 }
  0xe5   : > { %v5773_v16 = vpop.f32.mrf.mxu1 }
  0xe6   : > { %v5775_v17 = vpop.f32.mrf.mxu0 }
  0xe7   : > { %v5778_v19 = vpop.f32.mrf.mxu1 }
  0xe8   : > { %v5782_v22 = vpop.f32.mrf.mxu0 }
  0xe9   : > { %v5785_v24 = vpop.f32.mrf.mxu1 }
  0xea   : > { %v5787_v25 = vpop.f32.mrf.mxu0  ;;  %5026 = vmatmul.mubr.msk.bf16.gmra.mxu0 %vm532_vm1, %v5288_v18 }
  0xeb   : > { %v5790_v26 = vpop.f32.mrf.mxu1  ;;  %4990 = vmatmul.mubr.msk.bf16.gmra.mxu1 %vm532_vm1, %v5287_v20  ;;  %5029 = vmatprep.mubr.msk.bf16.mxu0 %vm532_vm1, %v5290_v21 }
  0xec   : > { %v5794_v27 = vpop.f32.mrf.mxu0  ;;  %4993 = vmatprep.mubr.msk.bf16.mxu1 %vm532_vm1, %v5289_v23 }
  0xed   : > { %v5797_v28 = vpop.f32.mrf.mxu1 }
  0xee   : > { %v5799_v29 = vpop.f32.mrf.mxu0 }
  0xef   : > { %v5802_v31 = vpop.f32.mrf.mxu1 }
  0xf0   : > { %v5806_v34 = vpop.f32.mrf.mxu0 }
  0xf1   : > { %v5809_v36 = vpop.f32.mrf.mxu1 }
  0xf2   : > { %v5811_v37 = vpop.f32.mrf.mxu0  ;;  %5030 = vmatmul.mubr.msk.bf16.gmra.mxu0 %vm532_vm1, %v5292_v30  ;;  %v5304_v30 = vld [vmem:[%s5592_s12 + $0x38] sm:$0xff]  }
  0xf3   : > { %v5814_v38 = vpop.f32.mrf.mxu1  ;;  %4994 = vmatmul.mubr.msk.bf16.gmra.mxu1 %vm532_vm1, %v5291_v32  ;;  %5073 = vmatprep.mubr.msk.bf16.mxu0 %vm532_vm1, %v5294_v33  ;;  %v5303_v33 = vld [vmem:[%s5592_s12 + $0x30] sm:$0xff]  }
  0xf4   : > { %v5818_v39 = vpop.f32.mrf.mxu0  ;;  %5037 = vmatprep.mubr.msk.bf16.mxu1 %vm532_vm1, %v5293_v35  ;;  %v5306_v35 = vld [vmem:[%s5592_s12 + $0x40] sm:$0xff]  }
  0xf5   : > { %v5821_v40 = vpop.f32.mrf.mxu1 }
  0xf6   : > { %v5823_v41 = vpop.f32.mrf.mxu0 }
  0xf7   : > { %v5826_v43 = vpop.f32.mrf.mxu1 }
  0xf8   : > { %v5830_v46 = vpop.f32.mrf.mxu0 }
  0xf9   : > { %v5833_v48 = vpop.f32.mrf.mxu1 }
  0xfa   : > { %v4859_v49 = vpop.f32.mrf.mxu0  ;;  %5074 = vmatmul.mubr.msk.bf16.vlgmr.msra.gmra.mxu0 %vm532_vm1, %v5296_v42 }
  0xfb   : > { %v4823_v50 = vpop.f32.mrf.mxu1  ;;  %5038 = vmatmul.mubr.msk.bf16.vlgmr.msra.gmra.mxu1 %vm532_vm1, %v5295_v44  ;;  %5077 = vmatprep.mubr.msk.bf16.mxu0 %vm532_vm1, %v5298_v45 }
  0xfc   : > { %v929_v51 = vadd.f32 %v4823_v50, %v5739_v1  ;;  %v1262_v52 = vpop.f32.mrf.mxu0  ;;  %5041 = vmatprep.mubr.msk.bf16.mxu1 %vm532_vm1, %v5297_v47  ;;  %v5305_v47 = vld [vmem:[%s5592_s12 + $0x38] sm:$0xff]  }
  0xfd   : > { %v920_v53 = vpop.f32.mrf.mxu1 }
  0xfe   : > { %v5840_v54 = vadd.f32 %v4859_v49, %v929_v51  ;;  %v921_v55 = vadd.f32 %v920_v53, %v5746_v3  ;;  %v4860_v56 = vpop.f32.mrf.mxu0 }
  0xff   : > { %v4824_v58 = vpop.f32.mrf.mxu1 }
 0x100   : > { %v5846_v61 = vadd.f32 %v1262_v52, %v921_v55  ;;  %v932_v62 = vadd.f32 %v4824_v58, %v5751_v5  ;;  %v1265_v63 = vpop.f32.mrf.mxu0  ;;  %v5308_v58 = vld [vmem:[%s5592_s12 + $0x48] sm:$0xff]  }
 0x101   : > { %v923_v1 = vpop.f32.mrf.mxu1 }
 0x102   : > { %v5850_v6 = vadd.f32 %v4860_v56, %v932_v62  ;;  %v924_v8 = vadd.f32 %v923_v1, %v5758_v10  ;;  %v4863_v9 = vpop.f32.mrf.mxu0  ;;  %5078 = vmatmul.mubr.msk.bf16.gmra.mxu0 %vm532_vm1, %v5300_v57  ;;  %v5310_v62 = vld [vmem:[%s5592_s12 + $0x50] sm:$0xff]  }
 0x103   : > { %v4827_v3 = vpop.f32.mrf.mxu1  ;;  %5042 = vmatmul.mubr.msk.bf16.gmra.mxu1 %vm532_vm1, %v5299_v59  ;;  %5081 = vmatprep.mubr.msk.bf16.mxu0 %vm532_vm1, %v5302_v60  ;;  %v5307_v60 = vld [vmem:[%s5592_s12 + $0x40] sm:$0xff]  }
 0x104   : > { %v5856_v5 = vadd.f32 %v1265_v63, %v924_v8  ;;  %v945_v11 = vadd.f32 %v4827_v3, %v5763_v13  ;;  %v1278_v18 = vpop.f32.mrf.mxu0  ;;  %5045 = vmatprep.mubr.msk.bf16.mxu1 %vm532_vm1, %v5301_v0  ;;  %v5309_v8 = vld [vmem:[%s5592_s12 + $0x48] sm:$0xff]  }
 0x105   : > { %v936_v20 = vpop.f32.mrf.mxu1 }
 0x106   : > { %v5860_v10 = vadd.f32 %v4863_v9, %v945_v11  ;;  %v937_v21 = vadd.f32 %v936_v20, %v5770_v15  ;;  %v4864_v23 = vpop.f32.mrf.mxu0 }
 0x107   : > { %v4828_v32 = vpop.f32.mrf.mxu1 }
 0x108   : > { %v5866_v42 = vadd.f32 %v1278_v18, %v937_v21  ;;  %v948_v44 = vadd.f32 %v4828_v32, %v5775_v17  ;;  %v1281_v45 = vpop.f32.mrf.mxu0  ;;  %v5312_v32 = vld [vmem:[%s5592_s12 + $0x58] sm:$0xff]  }
 0x109   : > { %v939_v13 = vpop.f32.mrf.mxu1 }
 0x10a   : > { %v5870_v49 = vadd.f32 %v4864_v23, %v948_v44  ;;  %v940_v50 = vadd.f32 %v939_v13, %v5782_v22  ;;  %v4867_v51 = vpop.f32.mrf.mxu0  ;;  %5082 = vmatmul.mubr.msk.bf16.gmra.mxu0 %vm532_vm1, %v5304_v30  ;;  %v5314_v44 = vld [vmem:[%s5592_s12 + $0x60] sm:$0xff]  }
 0x10b   : > { %v4831_v15 = vpop.f32.mrf.mxu1  ;;  %5046 = vmatmul.mubr.msk.bf16.gmra.mxu1 %vm532_vm1, %v5303_v33  ;;  %5085 = vmatprep.mubr.msk.bf16.mxu0 %vm532_vm1, %v5306_v35  ;;  %v5311_v35 = vld [vmem:[%s5592_s12 + $0x50] sm:$0xff]  }
 0x10c   : > { %v5876_v17 = vadd.f32 %v1281_v45, %v940_v50  ;;  %v961_v52 = vadd.f32 %v4831_v15, %v5787_v25  ;;  %v1294_v53 = vpop.f32.mrf.mxu0  ;;  %5049 = vmatprep.mubr.msk.bf16.mxu1 %vm532_vm1, %v5305_v47  ;;  %v5313_v50 = vld [vmem:[%s5592_s12 + $0x58] sm:$0xff]  }
 0x10d   : > { %v952_v55 = vpop.f32.mrf.mxu1 }
 0x10e   : > { %v5880_v22 = vadd.f32 %v4867_v51, %v961_v52  ;;  %v953_v56 = vadd.f32 %v952_v55, %v5794_v27  ;;  %v4868_v57 = vpop.f32.mrf.mxu0 }
 0x10f   : > { %v4832_v59 = vpop.f32.mrf.mxu1 }
 0x110   : > { %v5886_v63 = vadd.f32 %v1294_v53, %v953_v56  ;;  %v964_v0 = vadd.f32 %v4832_v59, %v5799_v29  ;;  %v1297_v1 = vpop.f32.mrf.mxu0  ;;  %v5316_v59 = vld [vmem:[%s5592_s12 + $0x68] sm:$0xff]  }
 0x111   : > { %v955_v25 = vpop.f32.mrf.mxu1 }
 0x112   : > { %v5890_v9 = vadd.f32 %v4868_v57, %v964_v0  ;;  %v956_v3 = vadd.f32 %v955_v25, %v5806_v34  ;;  %v4871_v11 = vpop.f32.mrf.mxu0  ;;  %5086 = vmatmul.mubr.msk.bf16.gmra.mxu0 %vm532_vm1, %v5308_v58  ;;  %v5318_v0 = vld [vmem:[%s5592_s12 + $0x70] sm:$0xff]  }
 0x113   : > { %v4835_v27 = vpop.f32.mrf.mxu1  ;;  %5050 = vmatmul.mubr.msk.bf16.gmra.mxu1 %vm532_vm1, %v5307_v60  ;;  %5089 = vmatprep.mubr.msk.bf16.mxu0 %vm532_vm1, %v5310_v62  ;;  %v5315_v62 = vld [vmem:[%s5592_s12 + $0x60] sm:$0xff]  }
 0x114   : > { %v5896_v29 = vadd.f32 %v1297_v1, %v956_v3  ;;  %v977_v18 = vadd.f32 %v4835_v27, %v5811_v37  ;;  %v1310_v20 = vpop.f32.mrf.mxu0  ;;  %5053 = vmatprep.mubr.msk.bf16.mxu1 %vm532_vm1, %v5309_v8  ;;  %v5317_v3 = vld [vmem:[%s5592_s12 + $0x68] sm:$0xff]  }
 0x115   : > { %v968_v21 = vpop.f32.mrf.mxu1 }
 0x116   : > { %v5900_v34 = vadd.f32 %v4871_v11, %v977_v18  ;;  %v969_v23 = vadd.f32 %v968_v21, %v5818_v39  ;;  %v4872_v30 = vpop.f32.mrf.mxu0 }
 0x117   : > { %v4836_v33 = vpop.f32.mrf.mxu1 }
 0x118   : > { %v5906_v45 = vadd.f32 %v1310_v20, %v969_v23  ;;  %v980_v47 = vadd.f32 %v4836_v33, %v5823_v41  ;;  %v1313_v13 = vpop.f32.mrf.mxu0  ;;  %v5320_v33 = vld [vmem:[%s5592_s12 + $0x78] sm:$0xff]  }
 0x119   : > { %v971_v37 = vpop.f32.mrf.mxu1 }
 0x11a   : > { %v5910_v51 = vadd.f32 %v4872_v30, %v980_v47  ;;  %v972_v15 = vadd.f32 %v971_v37, %v5830_v46  ;;  %v4875_v52 = vpop.f32.mrf.mxu0  ;;  %5090 = vmatmul.mubr.msk.bf16.gmra.mxu0 %vm532_vm1, %v5312_v32  ;;  %v5322_v47 = vld [vmem:[%s5592_s12 + $0x80] sm:$0xff]  }
 0x11b   : > { %v4839_v39 = vpop.f32.mrf.mxu1  ;;  %5054 = vmatmul.mubr.msk.bf16.gmra.mxu1 %vm532_vm1, %v5311_v35  ;;  %5093 = vmatprep.mubr.msk.bf16.mxu0 %vm532_vm1, %v5314_v44  ;;  %v5319_v44 = vld [vmem:[%s5592_s12 + $0x70] sm:$0xff]  }
 0x11c   : > { %v5916_v41 = vadd.f32 %v1313_v13, %v972_v15  ;;  %v993_v53 = vadd.f32 %v4839_v39, %v5742_v2  ;;  %v1326_v55 = vpop.f32.mrf.mxu0  ;;  %5057 = vmatprep.mubr.msk.bf16.mxu1 %vm532_vm1, %v5313_v50  ;;  %v5321_v15 = vld [vmem:[%s5592_s12 + $0x78] sm:$0xff]  }
 0x11d   : > { %v984_v56 = vpop.f32.mrf.mxu1 }
 0x11e   : > { %v5920_v46 = vadd.f32 %v4875_v52, %v993_v53  ;;  %v985_v57 = vadd.f32 %v984_v56, %v5749_v4  ;;  %v4876_v58 = vpop.f32.mrf.mxu0 }
 0x11f   : > { %v4840_v60 = vpop.f32.mrf.mxu1 }
 0x120   : > { %v5926_v1 = vadd.f32 %v1326_v55, %v985_v57  ;;  %v996_v8 = vadd.f32 %v4840_v60, %v5754_v7  ;;  %v1329_v25 = vpop.f32.mrf.mxu0  ;;  %v5324_v60 = vld [vmem:[%s5592_s12 + $0x88] sm:$0xff]  }
 0x121   : > { %v987_v2 = vpop.f32.mrf.mxu1 }
 0x122   : > { %v5930_v11 = vadd.f32 %v4876_v58, %v996_v8  ;;  %v988_v27 = vadd.f32 %v987_v2, %v5761_v12  ;;  %v4879_v18 = vpop.f32.mrf.mxu0  ;;  %5094 = vmatmul.mubr.msk.bf16.gmra.mxu0 %vm532_vm1, %v5316_v59 }
 0x123   : > { %v4843_v4 = vpop.f32.mrf.mxu1  ;;  %5058 = vmatmul.mubr.msk.bf16.gmra.mxu1 %vm532_vm1, %v5315_v62  ;;  %5097 = vmatprep.mubr.msk.bf16.mxu0 %vm532_vm1, %v5318_v0  ;;  %v5323_v0 = vld [vmem:[%s5592_s12 + $0x80] sm:$0xff]  }
 0x124   : > { %v5936_v7 = vadd.f32 %v1329_v25, %v988_v27  ;;  %v1009_v20 = vadd.f32 %v4843_v4, %v5766_v14  ;;  %v1342_v21 = vpop.f32.mrf.mxu0  ;;  %5061 = vmatprep.mubr.msk.bf16.mxu1 %vm532_vm1, %v5317_v3 }
 0x125   : > { %v1000_v23 = vpop.f32.mrf.mxu1 }
 0x126   : > { %v5940_v12 = vadd.f32 %v4879_v18, %v1009_v20  ;;  %v1001_v30 = vadd.f32 %v1000_v23, %v5773_v16  ;;  %v4880_v32 = vpop.f32.mrf.mxu0 }
 0x127   : > { %v4844_v35 = vpop.f32.mrf.mxu1 }
 0x128   : > { %v5946_v13 = vadd.f32 %v1342_v21, %v1001_v30  ;;  %v1012_v50 = vadd.f32 %v4844_v35, %v5778_v19  ;;  %v1345_v37 = vpop.f32.mrf.mxu0 }
 0x129   : > { %v1003_v14 = vpop.f32.mrf.mxu1 }
 0x12a   : > { %v5950_v52 = vadd.f32 %v4880_v32, %v1012_v50  ;;  %v1004_v39 = vadd.f32 %v1003_v14, %v5785_v24  ;;  %v4883_v53 = vpop.f32.mrf.mxu0  ;;  %5098 = vmatmul.mubr.msk.bf16.gmra.mxu0 %vm532_vm1, %v5320_v33 }
 0x12b   : > { %v4847_v16 = vpop.f32.mrf.mxu1  ;;  %5062 = vmatmul.mubr.msk.bf16.gmra.mxu1 %vm532_vm1, %v5319_v44  ;;  %5101 = vmatprep.mubr.msk.bf16.mxu0 %vm532_vm1, %v5322_v47 }
 0x12c   : > { %v5956_v55 = vadd.f32 %v1345_v37, %v1004_v39  ;;  %v1025_v19 = vadd.f32 %v4847_v16, %v5790_v26  ;;  %v1358_v56 = vpop.f32.mrf.mxu0  ;;  %5065 = vmatprep.mubr.msk.bf16.mxu1 %vm532_vm1, %v5321_v15 }
 0x12d   : > { %v1016_v57 = vpop.f32.mrf.mxu1 }
 0x12e   : > { %v5960_v58 = vadd.f32 %v4883_v53, %v1025_v19  ;;  %v1017_v24 = vadd.f32 %v1016_v57, %v5797_v28  ;;  %v4884_v59 = vpop.f32.mrf.mxu0 }
 0x12f   : > { %v4848_v62 = vpop.f32.mrf.mxu1 }
 0x130   : > { %v5965_v8 = vadd.f32 %v1358_v56, %v1017_v24  ;;  %v1028_v25 = vadd.f32 %v4848_v62, %v5802_v31  ;;  %v1361_v3 = vpop.f32.mrf.mxu0 }
 0x131   : > { %v1019_v2 = vpop.f32.mrf.mxu1 }
 0x132   : > { %v5968_v27 = vadd.f32 %v4884_v59, %v1028_v25  ;;  %v1020_v26 = vadd.f32 %v1019_v2, %v5809_v36  ;;  %v4887_v18 = vpop.f32.mrf.mxu0  ;;  %5102 = vmatmul.mubr.msk.bf16.gmra.mxu0 %vm532_vm1, %v5324_v60 }
 0x133   : > { %v4851_v4 = vpop.f32.mrf.mxu1  ;;  %5066 = vmatmul.mubr.msk.bf16.gmra.mxu1 %vm532_vm1, %v5323_v0 }
 0x134   : > { %v5973_v28 = vadd.f32 %v1361_v3, %v1020_v26  ;;  %v1041_v20 = vadd.f32 %v4851_v4, %v5814_v38  ;;  %v1374_v21 = vpop.f32.mrf.mxu0 }
 0x135   : > { %v1032_v23 = vpop.f32.mrf.mxu1 }
 0x136   : > { %v5976_v30 = vadd.f32 %v4887_v18, %v1041_v20  ;;  %v1033_v31 = vadd.f32 %v1032_v23, %v5821_v40  ;;  %v4888_v32 = vpop.f32.mrf.mxu0 }
 0x137   : > { %v4852_v33 = vpop.f32.mrf.mxu1 }
 0x138   : > { %v5979_v35 = vadd.f32 %v1374_v21, %v1033_v31  ;;  %v1044_v36 = vadd.f32 %v4852_v33, %v5826_v43  ;;  %v1377_v44 = vpop.f32.mrf.mxu0 }
 0x139   : > { %v1035_v47 = vpop.f32.mrf.mxu1 }
 0x13a   : > { %v5982_v50 = vadd.f32 %v4888_v32, %v1044_v36  ;;  %v1036_v37 = vadd.f32 %v1035_v47, %v5833_v48  ;;  %v4931_v15 = vpop.f32.mrf.mxu0 }
 0x13b   : > { %v4895_v38 = vpop.f32.mrf.mxu1 }
 0x13c   : > { %v5985_v14 = vadd.f32 %v1377_v44, %v1036_v37  ;;  %v1762_v39 = vadd.f32 %v4895_v38, %v5840_v54  ;;  %v2004_v53 = vpop.f32.mrf.mxu0 }
 0x13d   : > { %v1633_v40 = vpop.f32.mrf.mxu1 }
 0x13e   : > { %v5988_v16 = vadd.f32 %v4931_v15, %v1762_v39  ;;  %v1760_v19 = vadd.f32 %v1633_v40, %v5846_v61  ;;  %v4932_v56 = vpop.f32.mrf.mxu0 }
 0x13f   : > { %v4896_v43 = vpop.f32.mrf.mxu1 }
 0x140   : > { %v5991_v57 = vadd.f32 %v2004_v53, %v1760_v19  ;;  %v1763_v24 = vadd.f32 %v4896_v43, %v5850_v6  ;;  %v2007_v59 = vpop.f32.mrf.mxu0 }
 0x141   : > { %v1636_v48 = vpop.f32.mrf.mxu1 }
 0x142   : > { %v5994_v60 = vadd.f32 %v4932_v56, %v1763_v24  ;;  %v1761_v62 = vadd.f32 %v1636_v48, %v5856_v5  ;;  %v4935_v0 = vpop.f32.mrf.mxu0 }
 0x143   : > { %v4899_v54 = vpop.f32.mrf.mxu1 }
 0x144   : > { %v5997_v25 = vadd.f32 %v2007_v59, %v1761_v62  ;;  %v1766_v3 = vadd.f32 %v4899_v54, %v5860_v10  ;;  %v2020_v2 = vpop.f32.mrf.mxu0 }
 0x145   : > { %v1649_v61 = vpop.f32.mrf.mxu1 }
 0x146   : > { %v6000_v26 = vadd.f32 %v4935_v0, %v1766_v3  ;;  %v1764_v18 = vadd.f32 %v1649_v61, %v5866_v42  ;;  %v4936_v4 = vpop.f32.mrf.mxu0 }
 0x147   : > { %v4900_v6 = vpop.f32.mrf.mxu1 }
 0x148   : > { %v6003_v20 = vadd.f32 %v2020_v2, %v1764_v18  ;;  %v1767_v21 = vadd.f32 %v4900_v6, %v5870_v49  ;;  %v2023_v23 = vpop.f32.mrf.mxu0 }
 0x149   : > { %v1652_v5 = vpop.f32.mrf.mxu1 }
 0x14a   : > { %v6006_v31 = vadd.f32 %v4936_v4, %v1767_v21  ;;  %v1765_v32 = vadd.f32 %v1652_v5, %v5876_v17  ;;  %v4939_v33 = vpop.f32.mrf.mxu0 }
 0x14b   : > { %v4903_v10 = vpop.f32.mrf.mxu1 }
 0x14c   : > { %v6009_v36 = vadd.f32 %v2023_v23, %v1765_v32  ;;  %v1770_v44 = vadd.f32 %v4903_v10, %v5880_v22  ;;  %v2036_v47 = vpop.f32.mrf.mxu0 }
 0x14d   : > { %v1665_v42 = vpop.f32.mrf.mxu1 }
 0x14e   : > { %v6012_v37 = vadd.f32 %v4939_v33, %v1770_v44  ;;  %v1768_v15 = vadd.f32 %v1665_v42, %v5886_v63  ;;  %v4940_v38 = vpop.f32.mrf.mxu0 }
 0x14f   : > { %v4904_v49 = vpop.f32.mrf.mxu1 }
 0x150   : > { %v6015_v39 = vadd.f32 %v2036_v47, %v1768_v15  ;;  %v1771_v53 = vadd.f32 %v4904_v49, %v5890_v9  ;;  %v2039_v40 = vpop.f32.mrf.mxu0 }
 0x151   : > { %v1668_v17 = vpop.f32.mrf.mxu1 }
 0x152   : > { %v6018_v19 = vadd.f32 %v4940_v38, %v1771_v53  ;;  %v1769_v56 = vadd.f32 %v1668_v17, %v5896_v29  ;;  %v4943_v43 = vpop.f32.mrf.mxu0 }
 0x153   : > { %v4907_v22 = vpop.f32.mrf.mxu1 }
 0x154   : > { %v6021_v24 = vadd.f32 %v2039_v40, %v1769_v56  ;;  %v1774_v59 = vadd.f32 %v4907_v22, %v5900_v34  ;;  %v2052_v48 = vpop.f32.mrf.mxu0 }
 0x155   : > { %v1681_v63 = vpop.f32.mrf.mxu1 }
 0x156   : > { %v6024_v62 = vadd.f32 %v4943_v43, %v1774_v59  ;;  %v1772_v0 = vadd.f32 %v1681_v63, %v5906_v45  ;;  %v4944_v54 = vpop.f32.mrf.mxu0 }
 0x157   : > { %v4908_v9 = vpop.f32.mrf.mxu1 }
 0x158   : > { %v6027_v3 = vadd.f32 %v2052_v48, %v1772_v0  ;;  %v1775_v2 = vadd.f32 %v4908_v9, %v5910_v51  ;;  %v2055_v61 = vpop.f32.mrf.mxu0 }
 0x159   : > { %v1684_v29 = vpop.f32.mrf.mxu1 }
 0x15a   : > { %v6030_v18 = vadd.f32 %v4944_v54, %v1775_v2  ;;  %v1773_v4 = vadd.f32 %v1684_v29, %v5916_v41  ;;  %v4947_v6 = vpop.f32.mrf.mxu0 }
 0x15b   : > { %v4911_v34 = vpop.f32.mrf.mxu1 }
 0x15c   : > { %v6033_v21 = vadd.f32 %v2055_v61, %v1773_v4  ;;  %v1778_v23 = vadd.f32 %v4911_v34, %v5920_v46  ;;  %v2068_v5 = vpop.f32.mrf.mxu0 }
 0x15d   : > { %v1697_v45 = vpop.f32.mrf.mxu1 }
 0x15e   : > { %v6036_v32 = vadd.f32 %v4947_v6, %v1778_v23  ;;  %v1776_v33 = vadd.f32 %v1697_v45, %v5926_v1  ;;  %v4948_v10 = vpop.f32.mrf.mxu0 }
 0x15f   : > { %v4912_v51 = vpop.f32.mrf.mxu1 }
 0x160   : > { %v6039_v44 = vadd.f32 %v2068_v5, %v1776_v33  ;;  %v1779_v47 = vadd.f32 %v4912_v51, %v5930_v11  ;;  %v2071_v42 = vpop.f32.mrf.mxu0 }
 0x161   : > { %v1700_v41 = vpop.f32.mrf.mxu1 }
 0x162   : > { %v6042_v15 = vadd.f32 %v4948_v10, %v1779_v47  ;;  %v1777_v38 = vadd.f32 %v1700_v41, %v5936_v7  ;;  %v4951_v49 = vpop.f32.mrf.mxu0 }
 0x163   : > { %v4915_v46 = vpop.f32.mrf.mxu1 }
 0x164   : > { %v6045_v53 = vadd.f32 %v2071_v42, %v1777_v38  ;;  %v1782_v40 = vadd.f32 %v4915_v46, %v5940_v12  ;;  %v2084_v17 = vpop.f32.mrf.mxu0 }
 0x165   : > { %v1713_v1 = vpop.f32.mrf.mxu1 }
 0x166   : > { %6431 = vst [vmem:[#allocation2_spill] sm:$0xff] %v6045_v53  ;;  %v6048_v56 = vadd.f32 %v4951_v49, %v1782_v40  ;;  %v1780_v43 = vadd.f32 %v1713_v1, %v5946_v13  ;;  %v4952_v22 = vpop.f32.mrf.mxu0 }
 0x167   : > { %v4916_v11 = vpop.f32.mrf.mxu1 }
 0x168   : > { %6432 = vst [vmem:[#allocation3_spill] sm:$0xff] %v6048_v56  ;;  %v6051_v59 = vadd.f32 %v2084_v17, %v1780_v43  ;;  %v1783_v48 = vadd.f32 %v4916_v11, %v5950_v52  ;;  %v2087_v63 = vpop.f32.mrf.mxu0 }
 0x169   : > { %v1716_v7 = vpop.f32.mrf.mxu1 }
 0x16a   : > { %6433 = vst [vmem:[#allocation4_spill] sm:$0xff] %v6051_v59  ;;  %v6054_v0 = vadd.f32 %v4952_v22, %v1783_v48  ;;  %v1781_v54 = vadd.f32 %v1716_v7, %v5956_v55  ;;  %v4955_v9 = vpop.f32.mrf.mxu0 }
 0x16b   : > { %v4919_v12 = vpop.f32.mrf.mxu1 }
 0x16c   : > { %6434 = vst [vmem:[#allocation5_spill] sm:$0xff] %v6054_v0  ;;  %v6057_v2 = vadd.f32 %v2087_v63, %v1781_v54  ;;  %v1786_v61 = vadd.f32 %v4919_v12, %v5960_v58  ;;  %v2100_v29 = vpop.f32.mrf.mxu0 }
 0x16d   : > { %v1729_v13 = vpop.f32.mrf.mxu1 }
 0x16e   : > { %6435 = vst [vmem:[#allocation6_spill] sm:$0xff] %v6057_v2  ;;  %v6060_v4 = vadd.f32 %v4955_v9, %v1786_v61  ;;  %v1784_v6 = vadd.f32 %v1729_v13, %v5965_v8  ;;  %v4956_v34 = vpop.f32.mrf.mxu0 }
 0x16f   : > { %v4920_v52 = vpop.f32.mrf.mxu1 }
 0x170   : > { %6436 = vst [vmem:[#allocation7_spill] sm:$0xff] %v6060_v4  ;;  %v6063_v23 = vadd.f32 %v2100_v29, %v1784_v6  ;;  %v1787_v5 = vadd.f32 %v4920_v52, %v5968_v27  ;;  %v2103_v45 = vpop.f32.mrf.mxu0 }
 0x171   : > { %v1732_v55 = vpop.f32.mrf.mxu1 }
 0x172   : > { %6437 = vst [vmem:[#allocation8_spill] sm:$0xff] %v6063_v23  ;;  %v6066_v33 = vadd.f32 %v4956_v34, %v1787_v5  ;;  %v1785_v10 = vadd.f32 %v1732_v55, %v5973_v28  ;;  %v4959_v51 = vpop.f32.mrf.mxu0 }
 0x173   : > { %v4923_v58 = vpop.f32.mrf.mxu1 }
 0x174   : > { %6438 = vst [vmem:[#allocation9_spill] sm:$0xff] %v6066_v33  ;;  %v6069_v47 = vadd.f32 %v2103_v45, %v1785_v10  ;;  %v1790_v42 = vadd.f32 %v4923_v58, %v5976_v30  ;;  %v2116_v41 = vpop.f32.mrf.mxu0 }
 0x175   : > { %v1745_v8 = vpop.f32.mrf.mxu1 }
 0x176   : > { %6439 = vst [vmem:[#allocation10_spill] sm:$0xff] %v6069_v47  ;;  %v6072_v38 = vadd.f32 %v4959_v51, %v1790_v42  ;;  %v1788_v49 = vadd.f32 %v1745_v8, %v5979_v35  ;;  %v4960_v46 = vpop.f32.mrf.mxu0 }
 0x177   : > { %v4924_v27 = vpop.f32.mrf.mxu1 }
 0x178   : > { %6440 = vst [vmem:[#allocation11_spill] sm:$0xff] %v6072_v38  ;;  %v6075_v40 = vadd.f32 %v2116_v41, %v1788_v49  ;;  %v1791_v17 = vadd.f32 %v4924_v27, %v5982_v50  ;;  %v2119_v1 = vpop.f32.mrf.mxu0 }
 0x179   : > { %v1748_v28 = vpop.f32.mrf.mxu1 }
 0x17a   : > { %6441 = vst [vmem:[#allocation12_spill] sm:$0xff] %v6075_v40  ;;  %v6078_v43 = vadd.f32 %v4960_v46, %v1791_v17  ;;  %v1789_v22 = vadd.f32 %v1748_v28, %v5985_v14  ;;  %v6081_v11 = vpop.f32.mrf.mxu0 }
 0x17b   : > { %v4967_v30 = vpop.f32.mrf.mxu1 }
 0x17c   : > { %6442 = vst [vmem:[#allocation13_spill] sm:$0xff] %v6078_v43  ;;  %v6083_v48 = vadd.f32 %v2119_v1, %v1789_v22  ;;  %v6085_v63 = vpop.f32.mrf.mxu0 }
 0x17d   : > { %v2375_v35 = vpop.f32.mrf.mxu1 }
 0x17e   : > { %6443 = vst [vmem:[#allocation14_spill] sm:$0xff] %v6083_v48  ;;  %v6087_v7 = vpop.f32.mrf.mxu0 }
 0x17f   : > { %v6089_v54 = vpop.f32.mrf.mxu1 }
 0x180   : > { %v6091_v9 = vpop.f32.mrf.mxu0 }
 0x181   : > { %v6093_v50 = vpop.f32.mrf.mxu1 }
 0x182   : > { %v6095_v12 = vpop.f32.mrf.mxu0 }
 0x183   : > { %v6097_v61 = vpop.f32.mrf.mxu1 }
 0x184   : > { %v6099_v14 = vpop.f32.mrf.mxu0 }
 0x185   : > { %v6101_v29 = vpop.f32.mrf.mxu1 }
 0x186   : > { %v6103_v13 = vpop.f32.mrf.mxu0 }
 0x187   : > { %v6105_v6 = vpop.f32.mrf.mxu1 }
 0x188   : > { %v6107_v34 = vpop.f32.mrf.mxu0 }
 0x189   : > { %v6109_v52 = vpop.f32.mrf.mxu1 }
 0x18a   : > { %v6111_v5 = vpop.f32.mrf.mxu0 }
 0x18b   : > { %v6113_v45 = vpop.f32.mrf.mxu1 }
 0x18c   : > { %v6115_v55 = vpop.f32.mrf.mxu0 }
 0x18d   : > { %v6117_v10 = vpop.f32.mrf.mxu1 }
 0x18e   : > { %v6119_v51 = vpop.f32.mrf.mxu0 }
 0x18f   : > { %v6121_v58 = vpop.f32.mrf.mxu1 }
 0x190   : > { %v6123_v42 = vpop.f32.mrf.mxu0 }
 0x191   : > { %v6125_v41 = vpop.f32.mrf.mxu1 }
 0x192   : > { %v6127_v8 = vpop.f32.mrf.mxu0 }
 0x193   : > { %v6129_v49 = vpop.f32.mrf.mxu1 }
 0x194   : > { %v6131_v46 = vpop.f32.mrf.mxu0 }
 0x195   : > { %v6133_v27 = vpop.f32.mrf.mxu1 }
 0x196   : > { %v6135_v17 = vpop.f32.mrf.mxu0 }
 0x197   : > { %v6137_v1 = vpop.f32.mrf.mxu1 }
 0x198   : > { %v6139_v28 = vpop.f32.mrf.mxu0 }
 0x199   : > { %v6141_v22 = vpop.f32.mrf.mxu1 }
 0x19a   : > { %v6143_v48 = vpop.f32.mrf.mxu0 }
 0x19b   : > { %v6145_v43 = vpop.f32.mrf.mxu1 }
 0x19c   : > { %v6147_v40 = vpop.f32.mrf.mxu0 }
 0x19d   : > { %6444 = vst [vmem:[#allocation15_spill] sm:$0xff] %v6147_v40  ;;  %v6149_v38 = vpop.f32.mrf.mxu1 }
 0x19e   : > { %v6151_v47 = vpop.f32.mrf.mxu0 }
 0x19f   : > { %6445 = vst [vmem:[#allocation16_spill] sm:$0xff] %v6151_v47  ;;  %v6153_v33 = vpop.f32.mrf.mxu1 }
 0x1a0   : > { %6446 = vst [vmem:[#allocation17_spill] sm:$0xff] %v6153_v33  ;;  %v6155_v23 = vpop.f32.mrf.mxu0 }
 0x1a1   : > { %6447 = vst [vmem:[#allocation18_spill] sm:$0xff] %v6155_v23  ;;  %v6157_v4 = vpop.f32.mrf.mxu1 }
 0x1a2   : > { %6448 = vst [vmem:[#allocation19_spill] sm:$0xff] %v6157_v4  ;;  %v6159_v2 = vpop.f32.mrf.mxu0 }
 0x1a3   : > { %6449 = vst [vmem:[#allocation20_spill] sm:$0xff] %v6159_v2  ;;  %v6161_v0 = vpop.f32.mrf.mxu1 }
 0x1a4   : > { %6450 = vst [vmem:[#allocation21_spill] sm:$0xff] %v6161_v0  ;;  %v6163_v59 = vpop.f32.mrf.mxu0 }
 0x1a5   : > { %6451 = vst [vmem:[#allocation22_spill] sm:$0xff] %v6163_v59  ;;  %v6165_v56 = vpop.f32.mrf.mxu1 }
 0x1a6   : > { %6452 = vst [vmem:[#allocation23_spill] sm:$0xff] %v6165_v56  ;;  %v6167_v53 = vpop.f32.mrf.mxu0 }
 0x1a7   : > { %6453 = vst [vmem:[#allocation24_spill] sm:$0xff] %v6167_v53  ;;  %v6169_v40 = vpop.f32.mrf.mxu1 }
 0x1a8   : > { %6454 = vst [vmem:[#allocation25_spill] sm:$0xff] %v6169_v40  ;;  %v6171_v47 = vpop.f32.mrf.mxu0 }
 0x1a9   : > { %6455 = vst [vmem:[#allocation26_spill] sm:$0xff] %v6171_v47  ;;  %v6173_v33 = vpop.f32.mrf.mxu1 }
 0x1aa   : > { %6456 = vst [vmem:[#allocation27_spill] sm:$0xff] %v6173_v33  ;;  %v6175_v23 = vpop.f32.mrf.mxu0 }
 0x1ab   : > { %6457 = vst [vmem:[#allocation28_spill] sm:$0xff] %v6175_v23  ;;  %v6177_v4 = vpop.f32.mrf.mxu1 }
 0x1ac   : > { %6458 = vst [vmem:[#allocation29_spill] sm:$0xff] %v6177_v4  ;;  %v6179_v2 = vpop.f32.mrf.mxu0 }
 0x1ad   : > { %6459 = vst [vmem:[#allocation30_spill] sm:$0xff] %v6179_v2  ;;  %v6181_v0 = vpop.f32.mrf.mxu1 }
 0x1ae   : > { %6460 = vst [vmem:[#allocation31_spill] sm:$0xff] %v6181_v0  ;;  %v6183_v59 = vpop.f32.mrf.mxu0  ;;  %v2504_v0 = vadd.f32 %v4967_v30, %v5988_v16  ;;  %v2503_v30 = vadd.f32 %v6093_v50, %v5997_v25  ;;  %v2506_v25 = vadd.f32 %v6101_v29, %v6003_v20 }
 0x1af   : > { %6461 = vst [vmem:[#allocation32_spill] sm:$0xff] %v6183_v59  ;;  %v6185_v56 = vpop.f32.mrf.mxu1 }
 0x1b0   : > { %6462 = vst [vmem:[#allocation33_spill] sm:$0xff] %v6185_v56  ;;  %v6187_v53 = vpop.f32.mrf.mxu0 }
 0x1b1   : > { %6463 = vst [vmem:[#allocation34_spill] sm:$0xff] %v6187_v53  ;;  %v6190_v40 = vpop.f32.mrf.mxu1  ;;  %v2502_v53 = vadd.f32 %v2375_v35, %v5991_v57 }
 0x1b2   : > { %6464 = vst [vmem:[#allocation35_spill] sm:$0xff] %v6190_v40  ;;  %v6192_v47 = vpop.f32.mrf.mxu0 }
 0x1b3   : > { %6465 = vst [vmem:[#allocation36_spill] sm:$0xff] %v6192_v47  ;;  %v6194_v33 = vpop.f32.mrf.mxu1  ;;  %v2873_v16 = vadd.f32 %v6085_v63, %v2502_v53 }
 0x1b4   : > { %6466 = vst [vmem:[#allocation37_spill] sm:$0xff] %v6194_v33  ;;  %v6196_v23 = vpop.f32.mrf.mxu0  ;;  %v2875_v33 = vadd.f32 %v6081_v11, %v2504_v0  ;;  %v6223_v0 = vld [vmem:[%s6429_s4] ss:$0 sm:$0xff] }
 0x1b5   : > { %6467 = vst [vmem:[#allocation38_spill] sm:$0xff] %v6196_v23  ;;  %v6199_v2 = vpop.f32.mrf.mxu1  ;;  %v2505_v23 = vadd.f32 %v6089_v54, %v5994_v60 }
 0x1b6   : > { %6468 = vst [vmem:[#allocation39_spill] sm:$0xff] %v6199_v2  ;;  %v6202_v59 = vpop.f32.mrf.mxu0 }
 0x1b7   : > { %6469 = vst [vmem:[#allocation40_spill] sm:$0xff] %v6202_v59  ;;  %v6204_v4 = vpop.f32.mrf.mxu1  ;;  %v2876_v60 = vadd.f32 %v6087_v7, %v2505_v23  ;;  %v2509_v23 = vadd.f32 %v6105_v6, %v6006_v31  ;;  %v2507_v31 = vadd.f32 %v6109_v52, %v6009_v36 }
 0x1b8   : > { %v6207_v56 = vpop.f32.mrf.mxu0 }
 0x1b9   : > { %6470 = vst [vmem:[#allocation41_spill] sm:$0xff] %v6207_v56  ;;  %v6210_v47 = vpop.f32.mrf.mxu1  ;;  %v2508_v56 = vadd.f32 %v6097_v61, %v6000_v26 }
 0x1ba   : > { %6471 = vst [vmem:[#allocation42_spill] sm:$0xff] %v6210_v47  ;;  %v5075_v2 = vpop.f32.mrf.mxu0 }
 0x1bb   : > { %v5039_v40 = vpop.f32.mrf.mxu1  ;;  %v2879_v47 = vadd.f32 %v6095_v12, %v2508_v56  ;;  %v2877_v56 = vadd.f32 %v6099_v14, %v2506_v25 }
 0x1bc   : > { %v3246_v57 = vadd.f32 %v5039_v40, %v2875_v33  ;;  %v3488_v35 = vpop.f32.mrf.mxu0  ;;  %v2874_v40 = vadd.f32 %v6091_v9, %v2503_v30 }
 0x1bd   : > { %v3117_v11 = vpop.f32.mrf.mxu1 }
 0x1be   : > { %v3617_v54 = vadd.f32 %v5075_v2, %v3246_v57  ;;  %v3244_v59 = vadd.f32 %v3117_v11, %v2873_v16  ;;  %v5076_v53 = vpop.f32.mrf.mxu0  ;;  %v2880_v11 = vadd.f32 %v6103_v13, %v2509_v23 }
 0x1bf   : > { %v5040_v33 = vpop.f32.mrf.mxu1 }
 0x1c0   : > { %v3656_v26 = vadd.f32 %v6223_v0, %v3617_v54  ;;  %v3615_v63 = vadd.f32 %v3488_v35, %v3244_v59  ;;  %v3247_v50 = vadd.f32 %v5040_v33, %v2876_v60  ;;  %v3491_v61 = vpop.f32.mrf.mxu0  ;;  %v2512_v60 = vadd.f32 %v6113_v45, %v6012_v37 }
 0x1c1   : > { %v3120_v20 = vpop.f32.mrf.mxu1  ;;  %v2878_v33 = vadd.f32 %v6107_v34, %v2507_v31 }
 0x1c2   : > { %v4589_v2 = vpack.c.bf16 %v3656_v26, %v3656_v26  ;;  %v3654_v7 = vadd.f32 %v6223_v0, %v3615_v63  ;;  %v3618_v59 = vadd.f32 %v5076_v53, %v3247_v50  ;;  %v3245_v9 = vadd.f32 %v3120_v20, %v2874_v40  ;;  %v5079_v29 = vpop.f32.mrf.mxu0 }
 0x1c3   : > { %v5043_v12 = vpop.f32.mrf.mxu1  ;;  %v2883_v50 = vadd.f32 %v6111_v5, %v2512_v60 }
 0x1c4   : > { %3817 = vst.msk [vmem:[%s6236_s9 + $0x8] sm:$0xf] %vm3814_vm2, %v4589_v2  ;;  %v4587_v6 = vpack.c.bf16 %v3654_v7, %v3654_v7  ;;  %v3657_v16 = vadd.f32 %v6223_v0, %v3618_v59  ;;  %v3616_v30 = vadd.f32 %v3491_v61, %v3245_v9  ;;  %v3250_v57 = vadd.f32 %v5043_v12, %v2879_v47  ;;  %v3504_v35 = vpop.f32.mrf.mxu0 }
 0x1c5   : > { %v3133_v54 = vpop.f32.mrf.mxu1  ;;  %v2510_v47 = vadd.f32 %v6117_v10, %v6015_v39  ;;  %v2513_v61 = vadd.f32 %v6121_v58, %v6018_v19  ;;  %v2511_v59 = vadd.f32 %v6125_v41, %v6021_v24  ;;  %v2516_v12 = vadd.f32 %v6129_v49, %v6024_v62 }
 0x1c6   : > { %3815 = vst.msk [vmem:[%s6236_s9] sm:$0xf] %vm3814_vm2, %v4587_v6  ;;  %v4590_v14 = vpack.c.bf16 %v3657_v16, %v3657_v16  ;;  %v3655_v36 = vadd.f32 %v6223_v0, %v3616_v30  ;;  %v3621_v52 = vadd.f32 %v5079_v29, %v3250_v57  ;;  %v3248_v53 = vadd.f32 %v3133_v54, %v2877_v56  ;;  %v5080_v25 = vpop.f32.mrf.mxu0 }
 0x1c7   : > { %v5044_v40 = vpop.f32.mrf.mxu1  ;;  %v2881_v7 = vadd.f32 %v6115_v55, %v2510_v47  ;;  %v2884_v31 = vadd.f32 %v6119_v51, %v2513_v61  ;;  %v2882_v57 = vadd.f32 %v6123_v42, %v2511_v59  ;;  %v2515_v47 = vadd.f32 %v6141_v22, %v6033_v21 }
 0x1c8   : > { %3818 = vst.msk [vmem:[%s6236_s9 + $0xc] sm:$0xf] %vm3814_vm2, %v4590_v14  ;;  %v4588_v13 = vpack.c.bf16 %v3655_v36, %v3655_v36  ;;  %v3660_v37 = vadd.f32 %v6223_v0, %v3621_v52  ;;  %v3619_v45 = vadd.f32 %v3504_v35, %v3248_v53  ;;  %v3251_v26 = vadd.f32 %v5044_v40, %v2880_v11  ;;  %v3507_v63 = vpop.f32.mrf.mxu0 }
 0x1c9   : > { %v3136_v23 = vpop.f32.mrf.mxu1  ;;  %v2514_v35 = vadd.f32 %v6133_v27, %v6027_v3  ;;  %v2887_v14 = vadd.f32 %v6127_v8, %v2516_v12  ;;  %v2517_v36 = vadd.f32 %v6137_v1, %v6030_v18 }
 0x1ca   : > { %3816 = vst.msk [vmem:[%s6236_s9 + $0x4] sm:$0xf] %vm3814_vm2, %v4588_v13  ;;  %v4593_v34 = vpack.c.bf16 %v3660_v37, %v3660_v37  ;;  %v3658_v39 = vadd.f32 %v6223_v0, %v3619_v45  ;;  %v3622_v10 = vadd.f32 %v5080_v25, %v3251_v26  ;;  %v3249_v20 = vadd.f32 %v3136_v23, %v2878_v33  ;;  %v5083_v2 = vpop.f32.mrf.mxu0 }
 0x1cb   : > { %v5047_v9 = vpop.f32.mrf.mxu1  ;;  %v2885_v33 = vadd.f32 %v6131_v46, %v2514_v35  ;;  %v2888_v45 = vadd.f32 %v6135_v17, %v2517_v36  ;;  %v2520_v26 = vadd.f32 %v6145_v43, %v6036_v32  ;;  %v2886_v23 = vadd.f32 %v6139_v28, %v2515_v47  ;;  %v6478_v35 = vld [vmem:[#allocation21_spill] sm:$0xff]  ;;  %v6479_v36 = vld [vmem:[#allocation18_spill] sm:$0xff] }
 0x1cc   : > { %3821 = vst.msk [vmem:[%s6236_s9 + $0x18] sm:$0xf] %vm3814_vm2, %v4593_v34  ;;  %v4591_v5 = vpack.c.bf16 %v3658_v39, %v3658_v39  ;;  %v3661_v19 = vadd.f32 %v6223_v0, %v3622_v10  ;;  %v3620_v58 = vadd.f32 %v3507_v63, %v3249_v20  ;;  %v3254_v29 = vadd.f32 %v5047_v9, %v2883_v50  ;;  %v3520_v56 = vpop.f32.mrf.mxu0 }
 0x1cd   : > { %v3149_v6 = vpop.f32.mrf.mxu1  ;;  %v2518_v34 = vadd.f32 %v6149_v38, %v6039_v44 }
 0x1ce   : > { %3819 = vst.msk [vmem:[%s6236_s9 + $0x10] sm:$0xf] %vm3814_vm2, %v4591_v5  ;;  %v4594_v55 = vpack.c.bf16 %v3661_v19, %v3661_v19  ;;  %v3659_v24 = vadd.f32 %v6223_v0, %v3620_v58  ;;  %v3625_v41 = vadd.f32 %v5083_v2, %v3254_v29  ;;  %v3252_v16 = vadd.f32 %v3149_v6, %v2881_v7  ;;  %v5084_v30 = vpop.f32.mrf.mxu0  ;;  %v6472_v7 = vld [vmem:[#allocation17_spill] sm:$0xff]  ;;  %v6473_v58 = vld [vmem:[#allocation15_spill] sm:$0xff] }
 0x1cf   : > { %v5048_v11 = vpop.f32.mrf.mxu1  ;;  %v2891_v2 = vadd.f32 %v6143_v48, %v2520_v26  ;;  %v2521_v59 = vadd.f32 %v6472_v7, %v6042_v15  ;;  %v2889_v29 = vadd.f32 %v6473_v58, %v2518_v34  ;;  %v6486_v34 = vld [vmem:[#allocation6_spill] sm:$0xff] }
 0x1d0   : > { %3822 = vst.msk [vmem:[%s6236_s9 + $0x1c] sm:$0xf] %vm3814_vm2, %v4594_v55  ;;  %v4592_v51 = vpack.c.bf16 %v3659_v24, %v3659_v24  ;;  %v3664_v62 = vadd.f32 %v6223_v0, %v3625_v41  ;;  %v3623_v49 = vadd.f32 %v3520_v56, %v3252_v16  ;;  %v3255_v60 = vadd.f32 %v5048_v11, %v2884_v31  ;;  %v3523_v54 = vpop.f32.mrf.mxu0  ;;  %v6474_v56 = vld [vmem:[#allocation2_spill] sm:$0xff]  ;;  %v6475_v31 = vld [vmem:[#allocation19_spill] sm:$0xff]  ;;  %v6476_v16 = vld [vmem:[#allocation16_spill] sm:$0xff] }
 0x1d1   : > { %v3152_v52 = vpop.f32.mrf.mxu1  ;;  %v2519_v12 = vadd.f32 %v6475_v31, %v6474_v56 }
 0x1d2   : > { %3820 = vst.msk [vmem:[%s6236_s9 + $0x14] sm:$0xf] %vm3814_vm2, %v4592_v51  ;;  %v4597_v42 = vpack.c.bf16 %v3664_v62, %v3664_v62  ;;  %v3662_v3 = vadd.f32 %v6223_v0, %v3623_v49  ;;  %v3626_v27 = vadd.f32 %v5084_v30, %v3255_v60  ;;  %v3253_v53 = vadd.f32 %v3152_v52, %v2882_v57  ;;  %v5087_v25 = vpop.f32.mrf.mxu0  ;;  %v6477_v57 = vld [vmem:[#allocation3_spill] sm:$0xff] }
 0x1d3   : > { %v5051_v40 = vpop.f32.mrf.mxu1  ;;  %v2892_v30 = vadd.f32 %v6476_v16, %v2521_v59  ;;  %v2524_v11 = vadd.f32 %v6478_v35, %v6477_v57  ;;  %v2890_v52 = vadd.f32 %v6479_v36, %v2519_v12  ;;  %v6488_v59 = vld [vmem:[#allocation24_spill] sm:$0xff]  ;;  %v6491_v12 = vld [vmem:[#allocation26_spill] sm:$0xff] }
 0x1d4   : > { %3825 = vst.msk [vmem:[%s6236_s9 + $0x28] sm:$0xf] %vm3814_vm2, %v4597_v42  ;;  %v4595_v8 = vpack.c.bf16 %v3662_v3, %v3662_v3  ;;  %v3665_v18 = vadd.f32 %v6223_v0, %v3626_v27  ;;  %v3624_v1 = vadd.f32 %v3523_v54, %v3253_v53  ;;  %v3258_v13 = vadd.f32 %v5051_v40, %v2887_v14  ;;  %v3536_v37 = vpop.f32.mrf.mxu0  ;;  %v6480_v42 = vld [vmem:[#allocation4_spill] sm:$0xff]  ;;  %v6481_v3 = vld [vmem:[#allocation23_spill] sm:$0xff] }
 0x1d5   : > { %v3165_v63 = vpop.f32.mrf.mxu1  ;;  %v2522_v27 = vadd.f32 %v6481_v3, %v6480_v42 }
 0x1d6   : > { %3823 = vst.msk [vmem:[%s6236_s9 + $0x20] sm:$0xf] %vm3814_vm2, %v4595_v8  ;;  %v4598_v46 = vpack.c.bf16 %v3665_v18, %v3665_v18  ;;  %v3663_v21 = vadd.f32 %v6223_v0, %v3624_v1  ;;  %v3629_v22 = vadd.f32 %v5087_v25, %v3258_v13  ;;  %v3256_v50 = vadd.f32 %v3165_v63, %v2885_v33  ;;  %v5088_v61 = vpop.f32.mrf.mxu0  ;;  %v6482_v18 = vld [vmem:[#allocation20_spill] sm:$0xff]  ;;  %v6483_v13 = vld [vmem:[#allocation5_spill] sm:$0xff] }
 0x1d7   : > { %v5052_v39 = vpop.f32.mrf.mxu1  ;;  %v2895_v1 = vadd.f32 %v6482_v18, %v2524_v11  ;;  %v6494_v11 = vld [vmem:[#allocation28_spill] sm:$0xff] }
 0x1d8   : > { %3826 = vst.msk [vmem:[%s6236_s9 + $0x2c] sm:$0xf] %vm3814_vm2, %v4598_v46  ;;  %v4596_v17 = vpack.c.bf16 %v3663_v21, %v3663_v21  ;;  %v3668_v32 = vadd.f32 %v6223_v0, %v3629_v22  ;;  %v3627_v43 = vadd.f32 %v3536_v37, %v3256_v50  ;;  %v3259_v10 = vadd.f32 %v5052_v39, %v2888_v45  ;;  %v3539_v20 = vpop.f32.mrf.mxu0  ;;  %v6484_v37 = vld [vmem:[#allocation25_spill] sm:$0xff]  ;;  %v6487_v39 = vld [vmem:[#allocation27_spill] sm:$0xff] }
 0x1d9   : > { %v3168_v9 = vpop.f32.mrf.mxu1  ;;  %v2525_v45 = vadd.f32 %v6484_v37, %v6483_v13 }
 0x1da   : > { %3824 = vst.msk [vmem:[%s6236_s9 + $0x24] sm:$0xf] %vm3814_vm2, %v4596_v17  ;;  %v4601_v28 = vpack.c.bf16 %v3668_v32, %v3668_v32  ;;  %v3666_v44 = vadd.f32 %v6223_v0, %v3627_v43  ;;  %v3630_v38 = vadd.f32 %v5088_v61, %v3259_v10  ;;  %v3257_v5 = vadd.f32 %v3168_v9, %v2886_v23  ;;  %v5091_v19 = vpop.f32.mrf.mxu0  ;;  %v6485_v61 = vld [vmem:[#allocation22_spill] sm:$0xff] }
 0x1db   : > { %v5055_v6 = vpop.f32.mrf.mxu1  ;;  %v2893_v23 = vadd.f32 %v6485_v61, %v2522_v27  ;;  %v2523_v17 = vadd.f32 %v6487_v39, %v6486_v34  ;;  %v2896_v9 = vadd.f32 %v6488_v59, %v2525_v45  ;;  %v6497_v27 = vld [vmem:[#allocation30_spill] sm:$0xff]  ;;  %v6500_v45 = vld [vmem:[#allocation32_spill] sm:$0xff] }
 0x1dc   : > { %3829 = vst.msk [vmem:[%s6236_s9 + $0x38] sm:$0xf] %vm3814_vm2, %v4601_v28  ;;  %v4599_v48 = vpack.c.bf16 %v3666_v44, %v3666_v44  ;;  %v3669_v15 = vadd.f32 %v6223_v0, %v3630_v38  ;;  %v3628_v55 = vadd.f32 %v3539_v20, %v3257_v5  ;;  %v3262_v24 = vadd.f32 %v5055_v6, %v2891_v2  ;;  %v3552_v41 = vpop.f32.mrf.mxu0  ;;  %v6489_v28 = vld [vmem:[#allocation7_spill] sm:$0xff]  ;;  %v6490_v44 = vld [vmem:[#allocation29_spill] sm:$0xff] }
 0x1dd   : > { %v3181_v51 = vpop.f32.mrf.mxu1  ;;  %v2528_v38 = vadd.f32 %v6490_v44, %v6489_v28  ;;  %v2894_v6 = vadd.f32 %v6491_v12, %v2523_v17  ;;  %v6503_v17 = vld [vmem:[#allocation34_spill] sm:$0xff] }
 0x1de   : > { %3827 = vst.msk [vmem:[%s6236_s9 + $0x30] sm:$0xf] %vm3814_vm2, %v4599_v48  ;;  %v4602_v62 = vpack.c.bf16 %v3669_v15, %v3669_v15  ;;  %v3667_v49 = vadd.f32 %v6223_v0, %v3628_v55  ;;  %v3633_v60 = vadd.f32 %v5091_v19, %v3262_v24  ;;  %v3260_v54 = vadd.f32 %v3181_v51, %v2889_v29  ;;  %v5092_v14 = vpop.f32.mrf.mxu0  ;;  %v6492_v48 = vld [vmem:[#allocation8_spill] sm:$0xff]  ;;  %v6493_v15 = vld [vmem:[#allocation31_spill] sm:$0xff] }
 0x1df   : > { %v5056_v53 = vpop.f32.mrf.mxu1  ;;  %v2526_v55 = vadd.f32 %v6493_v15, %v6492_v48  ;;  %v2899_v51 = vadd.f32 %v6494_v11, %v2528_v38  ;;  %v6506_v38 = vld [vmem:[#allocation36_spill] sm:$0xff]  ;;  %v6508_v15 = vld [vmem:[#allocation38_spill] sm:$0xff] }
 0x1e0   : > { %3830 = vst.msk [vmem:[%s6236_s9 + $0x3c] sm:$0xf] %vm3814_vm2, %v4602_v62  ;;  %v4600_v25 = vpack.c.bf16 %v3667_v49, %v3667_v49  ;;  %v3672_v33 = vadd.f32 %v6223_v0, %v3633_v60  ;;  %v3631_v47 = vadd.f32 %v3552_v41, %v3260_v54  ;;  %v3263_v40 = vadd.f32 %v5056_v53, %v2892_v30  ;;  %v3555_v8 = vpop.f32.mrf.mxu0  ;;  %v6495_v62 = vld [vmem:[#allocation9_spill] sm:$0xff] }
 0x1e1   : > { %v3184_v26 = vpop.f32.mrf.mxu1  ;;  %v6496_v49 = vld [vmem:[#allocation33_spill] sm:$0xff]  ;;  %v2897_v53 = vadd.f32 %v6497_v27, %v2526_v55 }
 0x1e2   : > { %3828 = vst.msk [vmem:[%s6236_s9 + $0x34] sm:$0xf] %vm3814_vm2, %v4600_v25  ;;  %v4605_v63 = vpack.c.bf16 %v3672_v33, %v3672_v33  ;;  %v3670_v46 = vadd.f32 %v6223_v0, %v3631_v47  ;;  %v3634_v21 = vadd.f32 %v5092_v14, %v3263_v40  ;;  %v3261_v22 = vadd.f32 %v3184_v26, %v2890_v52  ;;  %v5095_v50 = vpop.f32.mrf.mxu0  ;;  %v6498_v25 = vld [vmem:[#allocation10_spill] sm:$0xff]  ;;  %v6499_v33 = vld [vmem:[#allocation35_spill] sm:$0xff] }
 0x1e3   : > { %v5059_v32 = vpop.f32.mrf.mxu1  ;;  %v2529_v60 = vadd.f32 %v6496_v49, %v6495_v62  ;;  %v2527_v47 = vadd.f32 %v6499_v33, %v6498_v25  ;;  %v6511_v62 = vld [vmem:[#allocation40_spill] sm:$0xff] }
 0x1e4   : > { %3833 = vst.msk [vmem:[%s6236_s9 + $0x48] sm:$0xf] %vm3814_vm2, %v4605_v63  ;;  %v4603_v43 = vpack.c.bf16 %v3670_v46, %v3670_v46  ;;  %v3673_v10 = vadd.f32 %v6223_v0, %v3634_v21  ;;  %v3632_v20 = vadd.f32 %v3555_v8, %v3261_v22  ;;  %v3266_v2 = vadd.f32 %v5059_v32, %v2895_v1  ;;  %v3568_v7 = vpop.f32.mrf.mxu0  ;;  %v6501_v63 = vld [vmem:[#allocation11_spill] sm:$0xff]  ;;  %v6502_v46 = vld [vmem:[#allocation37_spill] sm:$0xff] }
 0x1e5   : > { %v3197_v5 = vpop.f32.mrf.mxu1  ;;  %v2900_v26 = vadd.f32 %v6500_v45, %v2529_v60  ;;  %v2532_v21 = vadd.f32 %v6502_v46, %v6501_v63  ;;  %v2898_v32 = vadd.f32 %v6503_v17, %v2527_v47 }
 0x1e6   : > { %3831 = vst.msk [vmem:[%s6236_s9 + $0x40] sm:$0xf] %vm3814_vm2, %v4603_v43  ;;  %v4606_v19 = vpack.c.bf16 %v3673_v10, %v3673_v10  ;;  %v3671_v58 = vadd.f32 %v6223_v0, %v3632_v20  ;;  %v3637_v29 = vadd.f32 %v5095_v50, %v3266_v2  ;;  %v3264_v56 = vadd.f32 %v3197_v5, %v2893_v23  ;;  %v5096_v31 = vpop.f32.mrf.mxu0  ;;  %v6504_v43 = vld [vmem:[#allocation12_spill] sm:$0xff]  ;;  %v6505_v10 = vld [vmem:[#allocation39_spill] sm:$0xff] }
 0x1e7   : > { %v5060_v24 = vpop.f32.mrf.mxu1  ;;  %v2530_v20 = vadd.f32 %v6505_v10, %v6504_v43  ;;  %v2903_v5 = vadd.f32 %v6506_v38, %v2532_v21 }
 0x1e8   : > { %3834 = vst.msk [vmem:[%s6236_s9 + $0x4c] sm:$0xf] %vm3814_vm2, %v4606_v19  ;;  %v4604_v41 = vpack.c.bf16 %v3671_v58, %v3671_v58  ;;  %v3676_v16 = vadd.f32 %v6223_v0, %v3637_v29  ;;  %v3635_v30 = vadd.f32 %v3568_v7, %v3264_v56  ;;  %v3267_v57 = vadd.f32 %v5060_v24, %v2896_v9  ;;  %v3571_v35 = vpop.f32.mrf.mxu0  ;;  %v6507_v19 = vld [vmem:[#allocation13_spill] sm:$0xff]  ;;  %v6509_v24 = vld [vmem:[#allocation14_spill] sm:$0xff] }
 0x1e9   : > { %v3200_v54 = vpop.f32.mrf.mxu1  ;;  %v2533_v58 = vadd.f32 %v6204_v4, %v6507_v19  ;;  %v2901_v55 = vadd.f32 %v6508_v15, %v2530_v20 }
 0x1ea   : > { %3832 = vst.msk [vmem:[%s6236_s9 + $0x44] sm:$0xf] %vm3814_vm2, %v4604_v41  ;;  %v4609_v14 = vpack.c.bf16 %v3676_v16, %v3676_v16  ;;  %v3674_v36 = vadd.f32 %v6223_v0, %v3635_v30  ;;  %v3638_v52 = vadd.f32 %v5096_v31, %v3267_v57  ;;  %v3265_v42 = vadd.f32 %v3200_v54, %v2894_v6  ;;  %v5099_v3 = vpop.f32.mrf.mxu0  ;;  %v6510_v41 = vld [vmem:[#allocation42_spill] sm:$0xff] }
 0x1eb   : > { %v5063_v40 = vpop.f32.mrf.mxu1  ;;  %v2531_v16 = vadd.f32 %v6510_v41, %v6509_v24  ;;  %v2904_v49 = vadd.f32 %v6511_v62, %v2533_v58 }
 0x1ec   : > { %3837 = vst.msk [vmem:[%s6236_s9 + $0x58] sm:$0xf] %vm3814_vm2, %v4609_v14  ;;  %v4607_v8 = vpack.c.bf16 %v3674_v36, %v3674_v36  ;;  %v3677_v18 = vadd.f32 %v6223_v0, %v3638_v52  ;;  %v3636_v1 = vadd.f32 %v3571_v35, %v3265_v42  ;;  %v3270_v13 = vadd.f32 %v5063_v40, %v2899_v51  ;;  %v3584_v37 = vpop.f32.mrf.mxu0  ;;  %v6512_v42 = vld [vmem:[#allocation41_spill] sm:$0xff] }
 0x1ed   : > { %v3213_v22 = vpop.f32.mrf.mxu1 }
 0x1ee   : > { %3835 = vst.msk [vmem:[%s6236_s9 + $0x50] sm:$0xf] %vm3814_vm2, %v4607_v8  ;;  %v4610_v50 = vpack.c.bf16 %v3677_v18, %v3677_v18  ;;  %v3675_v61 = vadd.f32 %v6223_v0, %v3636_v1  ;;  %v3641_v23 = vadd.f32 %v5099_v3, %v3270_v13  ;;  %v3268_v34 = vadd.f32 %v3213_v22, %v2897_v53  ;;  %v5100_v39 = vpop.f32.mrf.mxu0 }
 0x1ef   : > { %v5064_v2 = vpop.f32.mrf.mxu1  ;;  %v2902_v3 = vadd.f32 %v6512_v42, %v2531_v16 }
 0x1f0   : > { %3838 = vst.msk [vmem:[%s6236_s9 + $0x5c] sm:$0xf] %vm3814_vm2, %v4610_v50  ;;  %v4608_v7 = vpack.c.bf16 %v3675_v61, %v3675_v61  ;;  %v3680_v59 = vadd.f32 %v6223_v0, %v3641_v23  ;;  %v3639_v9 = vadd.f32 %v3584_v37, %v3268_v34  ;;  %v3271_v28 = vadd.f32 %v5064_v2, %v2900_v26  ;;  %v3587_v44 = vpop.f32.mrf.mxu0 }
 0x1f1   : > { %v3216_v29 = vpop.f32.mrf.mxu1 }
 0x1f2   : > { %3836 = vst.msk [vmem:[%s6236_s9 + $0x54] sm:$0xf] %vm3814_vm2, %v4608_v7  ;;  %v4613_v56 = vpack.c.bf16 %v3680_v59, %v3680_v59  ;;  %v3678_v31 = vadd.f32 %v6223_v0, %v3639_v9  ;;  %v3642_v12 = vadd.f32 %v5100_v39, %v3271_v28  ;;  %v3269_v6 = vadd.f32 %v3216_v29, %v2898_v32  ;;  %v5103_v48 = vpop.f32.mrf.mxu0 }
 0x1f3   : > { %v5067_v30 = vpop.f32.mrf.mxu1 }
 0x1f4   : > { %3841 = vst.msk [vmem:[%s6236_s9 + $0x68] sm:$0xf] %vm3814_vm2, %v4613_v56  ;;  %v4611_v4 = vpack.c.bf16 %v3678_v31, %v3678_v31  ;;  %v3681_v57 = vadd.f32 %v6223_v0, %v3642_v12  ;;  %v3640_v35 = vadd.f32 %v3587_v44, %v3269_v6  ;;  %v3274_v11 = vadd.f32 %v5067_v30, %v2903_v5  ;;  %v3600_v51 = vpop.f32.mrf.mxu0 }
 0x1f5   : > { %v3229_v60 = vpop.f32.mrf.mxu1 }
 0x1f6   : > { %3839 = vst.msk [vmem:[%s6236_s9 + $0x60] sm:$0xf] %vm3814_vm2, %v4611_v4  ;;  %v4614_v54 = vpack.c.bf16 %v3681_v57, %v3681_v57  ;;  %v3679_v14 = vadd.f32 %v6223_v0, %v3640_v35  ;;  %v3645_v36 = vadd.f32 %v5103_v48, %v3274_v11  ;;  %v3272_v52 = vadd.f32 %v3229_v60, %v2901_v55  ;;  %v5104_v53 = vpop.f32.mrf.mxu0 }
 0x1f7   : > { %v5068_v27 = vpop.f32.mrf.mxu1 }
 0x1f8   : > { %3842 = vst.msk [vmem:[%s6236_s9 + $0x6c] sm:$0xf] %vm3814_vm2, %v4614_v54  ;;  %v4612_v25 = vpack.c.bf16 %v3679_v14, %v3679_v14  ;;  %v3684_v33 = vadd.f32 %v6223_v0, %v3645_v36  ;;  %v3643_v47 = vadd.f32 %v3600_v51, %v3272_v52  ;;  %v3275_v40 = vadd.f32 %v5068_v27, %v2904_v49  ;;  %v3603_v45 = vpop.f32.mrf.mxu0 }
 0x1f9   : > { %v3232_v8 = vpop.f32.mrf.mxu1 }
 0x1fa   : > { %3840 = vst.msk [vmem:[%s6236_s9 + $0x64] sm:$0xf] %vm3814_vm2, %v4612_v25  ;;  %v4617_v18 = vpack.c.bf16 %v3684_v33, %v3684_v33  ;;  %v3682_v1 = vadd.f32 %v6223_v0, %v3643_v47  ;;  %v3646_v13 = vadd.f32 %v5104_v53, %v3275_v40  ;;  %v3273_v37 = vadd.f32 %v3232_v8, %v2902_v3 }
 0x1fc   : > { %3845 = vst.msk [vmem:[%s6236_s9 + $0x78] sm:$0xf] %vm3814_vm2, %v4617_v18  ;;  %v4615_v26 = vpack.c.bf16 %v3682_v1, %v3682_v1  ;;  %v3685_v63 = vadd.f32 %v6223_v0, %v3646_v13  ;;  %v3644_v46 = vadd.f32 %v3603_v45, %v3273_v37 }
 0x1fe   : > { %3843 = vst.msk [vmem:[%s6236_s9 + $0x70] sm:$0xf] %vm3814_vm2, %v4615_v26  ;;  %v4618_v21 = vpack.c.bf16 %v3685_v63, %v3685_v63  ;;  %v3683_v22 = vadd.f32 %v6223_v0, %v3644_v46 }
 0x200   : > { %3846 = vst.msk [vmem:[%s6236_s9 + $0x7c] sm:$0xf] %vm3814_vm2, %v4618_v21  ;;  %v4616_v50 = vpack.c.bf16 %v3683_v22, %v3683_v22 }
 0x202   : > { %3844 = vst.msk [vmem:[%s6236_s9 + $0x74] sm:$0xf] %vm3814_vm2, %v4616_v50 }
 0x203 PF: > { %s15_s22 = sadd.s32 1, %s5363_s22   ;;  %s6513_s18 = smov %s5355_s20 }
 0x204   : > { %p12_p10 = scmp.ge.s32.totalorder %s15_s22, 34   ;;  %s6514_s19 = smov %s5359_s21 }
 0x205   : > { %s6515_s20 = smov %s6518_s23  ;;  %s6516_s21 = smov %s6522_s24 }
 0x206   :  { %14 = sbr.rel (!%p12_p10) target bundleno = 3 (0x3), region = 93 }

</bundles_post_ra>
